<compile_context>
chip_gen: v5e
topology: v5e:2x2
jax: 0.10.0
libtpu: 0.0.40
codegen_flags: <defaults>
</compile_context>

<pallas_src>
import jax
import jax.numpy as jnp
from jax import lax
from jax.experimental import pallas as pl
from jax.experimental.pallas import tpu as pltpu

INPUT_DIMS = 7
TIME_STEPS = 20
LSTM_UNITS = 64
CONV_CH = 64


def attention_model_kernel(x_ref, wc_ref, bc_ref,
                           wih_f_ref, whh_f_ref, bf_ref,
                           wih_b_ref, whh_b_ref, bb_ref,
                           wa_ref, ba_ref,
                           wd_ref, bd_ref,
                           out_ref,
                           h_scr, gxf_scr, gxb_scr):
    T, Bt, C = x_ref.shape
    H = LSTM_UNITS
    TWO_H = 2 * H

    # --- 1. Conv1d(kernel_size=1) + ReLU, hoisted out of the recurrences -------------
    x2 = x_ref[...].reshape(T * Bt, C)
    conv = jnp.maximum(
        jnp.dot(x2, wc_ref[...], preferred_element_type=jnp.float32) + bc_ref[...],
        0.0)                                                         # (T*Bt, 64)

    # --- 2. Precompute input->hidden gate terms for both directions ------------------
    gxf_scr[...] = (jnp.dot(conv, wih_f_ref[...], preferred_element_type=jnp.float32)
                    + bf_ref[...]).reshape(T, Bt, 4 * H)
    gxb_scr[...] = (jnp.dot(conv, wih_b_ref[...], preferred_element_type=jnp.float32)
                    + bb_ref[...]).reshape(T, Bt, 4 * H)

    whh_f = whh_f_ref[...]
    whh_b = whh_b_ref[...]

    def gate_block(gates, c_prev):
        # gate layout [i, f, o, g] (reordered from torch's i,f,g,o at packing time)
        s = jax.nn.sigmoid(gates[:, :3 * H])
        g = jnp.tanh(gates[:, 3 * H:])
        i_g, f_g, o_g = s[:, :H], s[:, H:2 * H], s[:, 2 * H:]
        c_new = f_g * c_prev + i_g * g
        h_new = o_g * jnp.tanh(c_new)
        return h_new, c_new

    # --- 3. Fused forward/backward recurrence (only h @ W_hh remains per step) -------
    def step(t, carry):
        hf, cf, hb, cb = carry
        tb = T - 1 - t
        gates_f = gxf_scr[t] + jnp.dot(hf, whh_f, preferred_element_type=jnp.float32)
        gates_b = gxb_scr[tb] + jnp.dot(hb, whh_b, preferred_element_type=jnp.float32)
        hf, cf = gate_block(gates_f, cf)
        hb, cb = gate_block(gates_b, cb)
        h_scr[t, :, :H] = hf
        h_scr[tb, :, H:] = hb
        return hf, cf, hb, cb

    zeros = jnp.zeros((Bt, H), jnp.float32)
    lax.fori_loop(0, T, step, (zeros, zeros, zeros, zeros), unroll=True)

    # --- 4. AttentionBlock: a = softmax(x @ Wa + ba, axis=-1); out = x * a -----------
    lo2 = h_scr[...].reshape(T * Bt, TWO_H)
    logits = jnp.dot(lo2, wa_ref[...], preferred_element_type=jnp.float32) + ba_ref[...]
    logits = logits - jnp.max(logits, axis=-1, keepdims=True)
    expv = jnp.exp(logits)
    attn = expv * pl.reciprocal(jnp.sum(expv, axis=-1, keepdims=True), approx=True)
    att = (lo2 * attn).reshape(T, Bt, TWO_H)

    # --- 5. Flatten(B, T*2H) + Linear(T*2H -> 1) as a weighted reduction, sigmoid ----
    contrib = att * wd_ref[...]                                      # (T, Bt, 2H)
    s = jnp.sum(jnp.sum(contrib, axis=0), axis=-1, keepdims=True)    # (Bt, 1)
    out_ref[...] = jax.nn.sigmoid(s + bd_ref[...])


# ----------------------------------------------------------------------------------
# Parameter handling: PyTorch-layout params -> packed kernel params
# ----------------------------------------------------------------------------------
def init_torch_params(key):
    """Random parameters in the PyTorch module's native layout."""
    ks = jax.random.split(key, 14)

    def rnd(k, shape, scale=0.1):
        return jax.random.normal(k, shape, jnp.float32) * scale

    H = LSTM_UNITS
    return dict(
        conv_w=rnd(ks[0], (CONV_CH, INPUT_DIMS, 1)),   # Conv1d weight
        conv_b=rnd(ks[1], (CONV_CH,)),
        w_ih_f=rnd(ks[2], (4 * H, CONV_CH)),           # LSTM fwd (gate order i,f,g,o)
        w_hh_f=rnd(ks[3], (4 * H, H)),
        b_ih_f=rnd(ks[4], (4 * H,)),
        b_hh_f=rnd(ks[5], (4 * H,)),
        w_ih_b=rnd(ks[6], (4 * H, CONV_CH)),           # LSTM bwd
        w_hh_b=rnd(ks[7], (4 * H, H)),
        b_ih_b=rnd(ks[8], (4 * H,)),
        b_hh_b=rnd(ks[9], (4 * H,)),
        attn_w=rnd(ks[10], (2 * H, 2 * H)),            # attention dense
        attn_b=rnd(ks[11], (2 * H,)),
        dense_w=rnd(ks[12], (1, TIME_STEPS * 2 * H)),  # final dense
        dense_b=rnd(ks[13], (1,)),
    )


def pack_params(pt):
    """Transpose / combine biases / reorder gates (i,f,g,o)->(i,f,o,g) for the kernel."""
    H = LSTM_UNITS
    perm = jnp.concatenate([jnp.arange(0, 2 * H),          # i, f
                            jnp.arange(3 * H, 4 * H),      # o
                            jnp.arange(2 * H, 3 * H)])     # g

    def pack_dir(w_ih, w_hh, b_ih, b_hh):
        return w_ih[perm].T, w_hh[perm].T, (b_ih + b_hh)[perm][None, :]

    wih_f, whh_f, b_f = pack_dir(pt['w_ih_f'], pt['w_hh_f'], pt['b_ih_f'], pt['b_hh_f'])
    wih_b, whh_b, b_b = pack_dir(pt['w_ih_b'], pt['w_hh_b'], pt['b_ih_b'], pt['b_hh_b'])
    return dict(
        wc=pt['conv_w'][:, :, 0].T,                       # (INPUT_DIMS, 64)
        bc=pt['conv_b'][None, :],                         # (1, 64)
        wih_f=wih_f, whh_f=whh_f, b_f=b_f,
        wih_b=wih_b, whh_b=whh_b, b_b=b_b,
        wa=pt['attn_w'].T, ba=pt['attn_b'][None, :],
        wd=pt['dense_w'].reshape(TIME_STEPS, 1, 2 * H),   # (T, 1, 2H)
        bd=pt['dense_b'].reshape(1, 1),
    )


# ----------------------------------------------------------------------------------
# Wrapper
# ----------------------------------------------------------------------------------
@jax.jit
def attention_model_forward(x, params):
    B, T, C = x.shape
    H = LSTM_UNITS
    # Batch tile: multiple of 8 (sublanes), capped at 128 rows (MXU-friendly).
    Btile = min(128, ((B + 7) // 8) * 8)
    Bp = ((B + Btile - 1) // Btile) * Btile
    xp = x if Bp == B else jnp.pad(x, ((0, Bp - B), (0, 0), (0, 0)))
    x_tm = jnp.transpose(xp, (1, 0, 2)).astype(jnp.float32)          # (T, Bp, C)

    args = (x_tm,
            params['wc'], params['bc'],
            params['wih_f'], params['whh_f'], params['b_f'],
            params['wih_b'], params['whh_b'], params['b_b'],
            params['wa'], params['ba'],
            params['wd'], params['bd'])

    # Weights: full-array blocks, same tile every grid step.
    weight_specs = [pl.BlockSpec(a.shape, lambda i, nd=a.ndim: (0,) * nd)
                    for a in args[1:]]

    out = pl.pallas_call(
        attention_model_kernel,
        out_shape=jax.ShapeDtypeStruct((Bp, 1), jnp.float32),
        grid=(Bp // Btile,),
        in_specs=[pl.BlockSpec((T, Btile, C), lambda i: (0, i, 0))] + weight_specs,
        out_specs=pl.BlockSpec((Btile, 1), lambda i: (i, 0)),
        scratch_shapes=[
            pltpu.VMEM((T, Btile, 2 * H), jnp.float32),   # bidirectional hidden states
            pltpu.VMEM((T, Btile, 4 * H), jnp.float32),   # precomputed x-gates, fwd
            pltpu.VMEM((T, Btile, 4 * H), jnp.float32),   # precomputed x-gates, bwd
        ],
        compiler_params=pltpu.CompilerParams(
            dimension_semantics=("parallel",)),
    )(*args)
    return out[:B]


# ----------------------------------------------------------------------------------
# Pure-JAX reference (directly mirrors the PyTorch forward) for verification
# ----------------------------------------------------------------------------------
def reference_forward(x, pt):
    B, T, C = x.shape
    H = LSTM_UNITS
    conv = jnp.maximum(
        jnp.einsum('btc,oc->bto', x, pt['conv_w'][:, :, 0]) + pt['conv_b'], 0.0)

    def run_dir(w_ih, w_hh, b_ih, b_hh, xs):
        def step(carry, xt):
            h, c = carry
            g = xt @ w_ih.T + h @ w_hh.T + b_ih + b_hh        # torch order i,f,g,o
            i = jax.nn.sigmoid(g[:, :H])
            f = jax.nn.sigmoid(g[:, H:2 * H])
            gg = jnp.tanh(g[:, 2 * H:3 * H])
            o = jax.nn.sigmoid(g[:, 3 * H:])
            c = f * c + i * gg
            h = o * jnp.tanh(c)
            return (h, c), h
        _, hs = lax.scan(step, (jnp.zeros((B, H)), jnp.zeros((B, H))), xs)
        return hs                                             # (T, B, H)

    xs = jnp.transpose(conv, (1, 0, 2))
    hf = run_dir(pt['w_ih_f'], pt['w_hh_f'], pt['b_ih_f'], pt['b_hh_f'], xs)
    hb = run_dir(pt['w_ih_b'], pt['w_hh_b'], pt['b_ih_b'], pt['b_hh_b'], xs[::-1])[::-1]
    lstm_out = jnp.transpose(jnp.concatenate([hf, hb], axis=-1), (1, 0, 2))  # (B,T,2H)
    a = jax.nn.softmax(jnp.einsum('btd,ed->bte', lstm_out, pt['attn_w'])
                       + pt['attn_b'], axis=-1)
    att = lstm_out * a
    flat = att.reshape(B, T * 2 * H)
    return jax.nn.sigmoid(flat @ pt['dense_w'].T + pt['dense_b'])


if __name__ == "__main__":
    key = jax.random.PRNGKey(0)
    k_x, k_p = jax.random.split(key)

    B = 2
    x = jax.random.normal(k_x, (B, TIME_STEPS, INPUT_DIMS), jnp.float32)
    torch_params = init_torch_params(k_p)
    params = pack_params(torch_params)

    y = attention_model_forward(x, params)
    y = jax.block_until_ready(y)

    assert y.shape == (B, 1), y.shape
    assert bool(jnp.all(jnp.isfinite(y)))
    assert bool(jnp.all((y > 0.0) & (y < 1.0)))  # sigmoid output range

    y_ref = reference_forward(x, torch_params)
    err = float(jnp.max(jnp.abs(y - y_ref)))
    assert err < 5e-3, f"mismatch vs reference: max abs err {err}"

    print("KERNEL_OK")
</pallas_src>

<mosaic_0001>
module attributes {stable_mosaic.version = 11 : i64} {
  func.func @attention_model_kernel(%arg0: i32, %arg1: memref<20x8x7xf32, #tpu.memory_space<vmem>>, %arg2: memref<7x64xf32, #tpu.memory_space<vmem>>, %arg3: memref<1x64xf32, #tpu.memory_space<vmem>>, %arg4: memref<64x256xf32, #tpu.memory_space<vmem>>, %arg5: memref<64x256xf32, #tpu.memory_space<vmem>>, %arg6: memref<1x256xf32, #tpu.memory_space<vmem>>, %arg7: memref<64x256xf32, #tpu.memory_space<vmem>>, %arg8: memref<64x256xf32, #tpu.memory_space<vmem>>, %arg9: memref<1x256xf32, #tpu.memory_space<vmem>>, %arg10: memref<128x128xf32, #tpu.memory_space<vmem>>, %arg11: memref<1x128xf32, #tpu.memory_space<vmem>>, %arg12: memref<20x1x128xf32, #tpu.memory_space<vmem>>, %arg13: memref<1x1xf32, #tpu.memory_space<vmem>>, %arg14: memref<8x1xf32, #tpu.memory_space<vmem>>, %arg15: memref<20x8x128xf32, #tpu.memory_space<vmem>>, %arg16: memref<20x8x256xf32, #tpu.memory_space<vmem>>, %arg17: memref<20x8x256xf32, #tpu.memory_space<vmem>>) attributes {dimension_semantics = [#tpu.dimension_semantics<parallel>], iteration_bounds = array<i64: 1>, scalar_prefetch = 0 : i64, scratch_operands = 3 : i64, tpu.core_type = #tpu.core_type<tc>, window_params = [{transform_indices = @transform_0, window_bounds = array<i64: 20, 8, 7>}, {pipeline_mode = #tpu.pipeline_mode<synchronous>, transform_indices = @transform_1, window_bounds = array<i64: 7, 64>}, {pipeline_mode = #tpu.pipeline_mode<synchronous>, transform_indices = @transform_2, window_bounds = array<i64: 1, 64>}, {pipeline_mode = #tpu.pipeline_mode<synchronous>, transform_indices = @transform_3, window_bounds = array<i64: 64, 256>}, {pipeline_mode = #tpu.pipeline_mode<synchronous>, transform_indices = @transform_4, window_bounds = array<i64: 64, 256>}, {pipeline_mode = #tpu.pipeline_mode<synchronous>, transform_indices = @transform_5, window_bounds = array<i64: 1, 256>}, {pipeline_mode = #tpu.pipeline_mode<synchronous>, transform_indices = @transform_6, window_bounds = array<i64: 64, 256>}, {pipeline_mode = #tpu.pipeline_mode<synchronous>, transform_indices = @transform_7, window_bounds = array<i64: 64, 256>}, {pipeline_mode = #tpu.pipeline_mode<synchronous>, transform_indices = @transform_8, window_bounds = array<i64: 1, 256>}, {pipeline_mode = #tpu.pipeline_mode<synchronous>, transform_indices = @transform_9, window_bounds = array<i64: 128, 128>}, {pipeline_mode = #tpu.pipeline_mode<synchronous>, transform_indices = @transform_10, window_bounds = array<i64: 1, 128>}, {pipeline_mode = #tpu.pipeline_mode<synchronous>, transform_indices = @transform_11, window_bounds = array<i64: 20, 1, 128>}, {pipeline_mode = #tpu.pipeline_mode<synchronous>, transform_indices = @transform_12, window_bounds = array<i64: 1, 1>}, {transform_indices = @transform_13, window_bounds = array<i64: 8, 1>}]} {
    %c0 = arith.constant 0 : index
    %c0_0 = arith.constant 0 : index
    %c0_1 = arith.constant 0 : index
    %0 = vector.load %arg1[%c0, %c0_0, %c0_1] : memref<20x8x7xf32, #tpu.memory_space<vmem>>, vector<20x8x7xf32>
    %1 = vector.shape_cast %0 : vector<20x8x7xf32> to vector<160x7xf32>
    %c0_2 = arith.constant 0 : index
    %c0_3 = arith.constant 0 : index
    %2 = vector.load %arg2[%c0_2, %c0_3] : memref<7x64xf32, #tpu.memory_space<vmem>>, vector<7x64xf32>
    %cst = arith.constant dense<0.000000e+00> : vector<160x64xf32>
    %3 = tpu.matmul %1, %2, %cst {dimension_numbers = #tpu.dot_dimension_numbers<[1], [0], [0], [1], [0, 0, 1, 1], [], []>} : vector<160x7xf32>, vector<7x64xf32>, vector<160x64xf32> -> vector<160x64xf32>
    %c0_4 = arith.constant 0 : index
    %c0_5 = arith.constant 0 : index
    %4 = vector.load %arg3[%c0_4, %c0_5] : memref<1x64xf32, #tpu.memory_space<vmem>>, vector<1x64xf32>
    %5 = vector.broadcast %4 : vector<1x64xf32> to vector<160x64xf32>
    %6 = arith.addf %3, %5 : vector<160x64xf32>
    %cst_6 = arith.constant 0.000000e+00 : f32
    %7 = vector.broadcast %cst_6 : f32 to vector<160x64xf32>
    %8 = arith.maximumf %6, %7 : vector<160x64xf32>
    %c0_7 = arith.constant 0 : index
    %c0_8 = arith.constant 0 : index
    %9 = vector.load %arg4[%c0_7, %c0_8] : memref<64x256xf32, #tpu.memory_space<vmem>>, vector<64x256xf32>
    %cst_9 = arith.constant dense<0.000000e+00> : vector<160x256xf32>
    %10 = tpu.matmul %8, %9, %cst_9 {dimension_numbers = #tpu.dot_dimension_numbers<[1], [0], [0], [1], [0, 0, 1, 1], [], []>} : vector<160x64xf32>, vector<64x256xf32>, vector<160x256xf32> -> vector<160x256xf32>
    %c0_10 = arith.constant 0 : index
    %c0_11 = arith.constant 0 : index
    %11 = vector.load %arg6[%c0_10, %c0_11] : memref<1x256xf32, #tpu.memory_space<vmem>>, vector<1x256xf32>
    %12 = vector.broadcast %11 : vector<1x256xf32> to vector<160x256xf32>
    %13 = arith.addf %10, %12 : vector<160x256xf32>
    %14 = vector.shape_cast %13 : vector<160x256xf32> to vector<20x8x256xf32>
    %c0_12 = arith.constant 0 : index
    %c0_13 = arith.constant 0 : index
    %c0_14 = arith.constant 0 : index
    %15 = vector.load %arg16[%c0_12, %c0_13, %c0_14] : memref<20x8x256xf32, #tpu.memory_space<vmem>>, vector<20x8x256xf32>
    tpu.vector_store %arg16[%c0_12, %c0_13, %c0_14], %14 {strides = array<i32>} : memref<20x8x256xf32, #tpu.memory_space<vmem>>, vector<20x8x256xf32>,
    %c0_15 = arith.constant 0 : index
    %c0_16 = arith.constant 0 : index
    %16 = vector.load %arg7[%c0_15, %c0_16] : memref<64x256xf32, #tpu.memory_space<vmem>>, vector<64x256xf32>
    %cst_17 = arith.constant dense<0.000000e+00> : vector<160x256xf32>
    %17 = tpu.matmul %8, %16, %cst_17 {dimension_numbers = #tpu.dot_dimension_numbers<[1], [0], [0], [1], [0, 0, 1, 1], [], []>} : vector<160x64xf32>, vector<64x256xf32>, vector<160x256xf32> -> vector<160x256xf32>
    %c0_18 = arith.constant 0 : index
    %c0_19 = arith.constant 0 : index
    %18 = vector.load %arg9[%c0_18, %c0_19] : memref<1x256xf32, #tpu.memory_space<vmem>>, vector<1x256xf32>
    %19 = vector.broadcast %18 : vector<1x256xf32> to vector<160x256xf32>
    %20 = arith.addf %17, %19 : vector<160x256xf32>
    %21 = vector.shape_cast %20 : vector<160x256xf32> to vector<20x8x256xf32>
    %c0_20 = arith.constant 0 : index
    %c0_21 = arith.constant 0 : index
    %c0_22 = arith.constant 0 : index
    %22 = vector.load %arg17[%c0_20, %c0_21, %c0_22] : memref<20x8x256xf32, #tpu.memory_space<vmem>>, vector<20x8x256xf32>
    tpu.vector_store %arg17[%c0_20, %c0_21, %c0_22], %21 {strides = array<i32>} : memref<20x8x256xf32, #tpu.memory_space<vmem>>, vector<20x8x256xf32>,
    %c0_23 = arith.constant 0 : index
    %c0_24 = arith.constant 0 : index
    %23 = vector.load %arg5[%c0_23, %c0_24] : memref<64x256xf32, #tpu.memory_space<vmem>>, vector<64x256xf32>
    %c0_25 = arith.constant 0 : index
    %c0_26 = arith.constant 0 : index
    %24 = vector.load %arg8[%c0_25, %c0_26] : memref<64x256xf32, #tpu.memory_space<vmem>>, vector<64x256xf32>
    %cst_27 = arith.constant 0.000000e+00 : f32
    %25 = vector.broadcast %cst_27 : f32 to vector<8x64xf32>
    %c0_i32 = arith.constant 0 : i32
    %c19_i32 = arith.constant 19 : i32
    %26 = arith.subi %c19_i32, %c0_i32 : i32
    %27 = arith.index_cast %c0_i32 : i32 to index
    %c0_28 = arith.constant 0 : index
    %c0_29 = arith.constant 0 : index
    %28 = vector.load %arg16[%27, %c0_28, %c0_29] : memref<20x8x256xf32, #tpu.memory_space<vmem>>, vector<1x8x256xf32>
    %29 = vector.shape_cast %28 : vector<1x8x256xf32> to vector<8x256xf32>
    %cst_30 = arith.constant dense<0.000000e+00> : vector<8x256xf32>
    %30 = tpu.matmul %25, %23, %cst_30 {dimension_numbers = #tpu.dot_dimension_numbers<[1], [0], [0], [1], [0, 0, 1, 1], [], []>} : vector<8x64xf32>, vector<64x256xf32>, vector<8x256xf32> -> vector<8x256xf32>
    %31 = arith.addf %29, %30 : vector<8x256xf32>
    %32 = arith.index_cast %26 : i32 to index
    %c0_31 = arith.constant 0 : index
    %c0_32 = arith.constant 0 : index
    %33 = vector.load %arg17[%32, %c0_31, %c0_32] : memref<20x8x256xf32, #tpu.memory_space<vmem>>, vector<1x8x256xf32>
    %34 = vector.shape_cast %33 : vector<1x8x256xf32> to vector<8x256xf32>
    %cst_33 = arith.constant dense<0.000000e+00> : vector<8x256xf32>
    %35 = tpu.matmul %25, %24, %cst_33 {dimension_numbers = #tpu.dot_dimension_numbers<[1], [0], [0], [1], [0, 0, 1, 1], [], []>} : vector<8x64xf32>, vector<64x256xf32>, vector<8x256xf32> -> vector<8x256xf32>
    %36 = arith.addf %34, %35 : vector<8x256xf32>
    %37 = vector.extract_strided_slice %31 {offsets = [0, 0], sizes = [8, 192], strides = [1, 1]} : vector<8x256xf32> to vector<8x192xf32>
    %38 = arith.negf %37 : vector<8x192xf32>
    %39 = math.exp %38 : vector<8x192xf32>
    %cst_34 = arith.constant 1.000000e+00 : f32
    %40 = vector.broadcast %cst_34 : f32 to vector<8x192xf32>
    %41 = arith.addf %40, %39 : vector<8x192xf32>
    %42 = arith.divf %40, %41 : vector<8x192xf32>
    %43 = vector.extract_strided_slice %31 {offsets = [0, 192], sizes = [8, 64], strides = [1, 1]} : vector<8x256xf32> to vector<8x64xf32>
    %44 = math.tanh %43 : vector<8x64xf32>
    %45 = vector.extract_strided_slice %42 {offsets = [0, 0], sizes = [8, 64], strides = [1, 1]} : vector<8x192xf32> to vector<8x64xf32>
    %46 = vector.extract_strided_slice %42 {offsets = [0, 64], sizes = [8, 64], strides = [1, 1]} : vector<8x192xf32> to vector<8x64xf32>
    %47 = vector.extract_strided_slice %42 {offsets = [0, 128], sizes = [8, 64], strides = [1, 1]} : vector<8x192xf32> to vector<8x64xf32>
    %48 = arith.mulf %46, %25 : vector<8x64xf32>
    %49 = arith.mulf %45, %44 : vector<8x64xf32>
    %50 = arith.addf %48, %49 : vector<8x64xf32>
    %51 = math.tanh %50 : vector<8x64xf32>
    %52 = arith.mulf %47, %51 : vector<8x64xf32>
    %53 = vector.extract_strided_slice %36 {offsets = [0, 0], sizes = [8, 192], strides = [1, 1]} : vector<8x256xf32> to vector<8x192xf32>
    %54 = arith.negf %53 : vector<8x192xf32>
    %55 = math.exp %54 : vector<8x192xf32>
    %cst_35 = arith.constant 1.000000e+00 : f32
    %56 = vector.broadcast %cst_35 : f32 to vector<8x192xf32>
    %57 = arith.addf %56, %55 : vector<8x192xf32>
    %58 = arith.divf %56, %57 : vector<8x192xf32>
    %59 = vector.extract_strided_slice %36 {offsets = [0, 192], sizes = [8, 64], strides = [1, 1]} : vector<8x256xf32> to vector<8x64xf32>
    %60 = math.tanh %59 : vector<8x64xf32>
    %61 = vector.extract_strided_slice %58 {offsets = [0, 0], sizes = [8, 64], strides = [1, 1]} : vector<8x192xf32> to vector<8x64xf32>
    %62 = vector.extract_strided_slice %58 {offsets = [0, 64], sizes = [8, 64], strides = [1, 1]} : vector<8x192xf32> to vector<8x64xf32>
    %63 = vector.extract_strided_slice %58 {offsets = [0, 128], sizes = [8, 64], strides = [1, 1]} : vector<8x192xf32> to vector<8x64xf32>
    %64 = arith.mulf %62, %25 : vector<8x64xf32>
    %65 = arith.mulf %61, %60 : vector<8x64xf32>
    %66 = arith.addf %64, %65 : vector<8x64xf32>
    %67 = math.tanh %66 : vector<8x64xf32>
    %68 = arith.mulf %63, %67 : vector<8x64xf32>
    %69 = arith.index_cast %c0_i32 : i32 to index
    %c0_36 = arith.constant 0 : index
    %c0_37 = arith.constant 0 : index
    %70 = vector.load %arg15[%69, %c0_36, %c0_37] : memref<20x8x128xf32, #tpu.memory_space<vmem>>, vector<1x8x64xf32>
    %71 = vector.shape_cast %70 : vector<1x8x64xf32> to vector<8x64xf32>
    %72 = vector.shape_cast %52 : vector<8x64xf32> to vector<1x8x64xf32>
    tpu.vector_store %arg15[%69, %c0_36, %c0_37], %72 {strides = array<i32>} : memref<20x8x128xf32, #tpu.memory_space<vmem>>, vector<1x8x64xf32>,
    %73 = arith.index_cast %26 : i32 to index
    %c0_38 = arith.constant 0 : index
    %c64 = arith.constant 64 : index
    %74 = vector.load %arg15[%73, %c0_38, %c64] : memref<20x8x128xf32, #tpu.memory_space<vmem>>, vector<1x8x64xf32>
    %75 = vector.shape_cast %74 : vector<1x8x64xf32> to vector<8x64xf32>
    %76 = vector.shape_cast %68 : vector<8x64xf32> to vector<1x8x64xf32>
    tpu.vector_store %arg15[%73, %c0_38, %c64], %76 {strides = array<i32>} : memref<20x8x128xf32, #tpu.memory_space<vmem>>, vector<1x8x64xf32>,
    %c1_i32 = arith.constant 1 : i32
    %c19_i32_39 = arith.constant 19 : i32
    %77 = arith.subi %c19_i32_39, %c1_i32 : i32
    %78 = arith.index_cast %c1_i32 : i32 to index
    %c0_40 = arith.constant 0 : index
    %c0_41 = arith.constant 0 : index
    %79 = vector.load %arg16[%78, %c0_40, %c0_41] : memref<20x8x256xf32, #tpu.memory_space<vmem>>, vector<1x8x256xf32>
    %80 = vector.shape_cast %79 : vector<1x8x256xf32> to vector<8x256xf32>
    %cst_42 = arith.constant dense<0.000000e+00> : vector<8x256xf32>
    %81 = tpu.matmul %52, %23, %cst_42 {dimension_numbers = #tpu.dot_dimension_numbers<[1], [0], [0], [1], [0, 0, 1, 1], [], []>} : vector<8x64xf32>, vector<64x256xf32>, vector<8x256xf32> -> vector<8x256xf32>
    %82 = arith.addf %80, %81 : vector<8x256xf32>
    %83 = arith.index_cast %77 : i32 to index
    %c0_43 = arith.constant 0 : index
    %c0_44 = arith.constant 0 : index
    %84 = vector.load %arg17[%83, %c0_43, %c0_44] : memref<20x8x256xf32, #tpu.memory_space<vmem>>, vector<1x8x256xf32>
    %85 = vector.shape_cast %84 : vector<1x8x256xf32> to vector<8x256xf32>
    %cst_45 = arith.constant dense<0.000000e+00> : vector<8x256xf32>
    %86 = tpu.matmul %68, %24, %cst_45 {dimension_numbers = #tpu.dot_dimension_numbers<[1], [0], [0], [1], [0, 0, 1, 1], [], []>} : vector<8x64xf32>, vector<64x256xf32>, vector<8x256xf32> -> vector<8x256xf32>
    %87 = arith.addf %85, %86 : vector<8x256xf32>
    %88 = vector.extract_strided_slice %82 {offsets = [0, 0], sizes = [8, 192], strides = [1, 1]} : vector<8x256xf32> to vector<8x192xf32>
    %89 = arith.negf %88 : vector<8x192xf32>
    %90 = math.exp %89 : vector<8x192xf32>
    %cst_46 = arith.constant 1.000000e+00 : f32
    %91 = vector.broadcast %cst_46 : f32 to vector<8x192xf32>
    %92 = arith.addf %91, %90 : vector<8x192xf32>
    %93 = arith.divf %91, %92 : vector<8x192xf32>
    %94 = vector.extract_strided_slice %82 {offsets = [0, 192], sizes = [8, 64], strides = [1, 1]} : vector<8x256xf32> to vector<8x64xf32>
    %95 = math.tanh %94 : vector<8x64xf32>
    %96 = vector.extract_strided_slice %93 {offsets = [0, 0], sizes = [8, 64], strides = [1, 1]} : vector<8x192xf32> to vector<8x64xf32>
    %97 = vector.extract_strided_slice %93 {offsets = [0, 64], sizes = [8, 64], strides = [1, 1]} : vector<8x192xf32> to vector<8x64xf32>
    %98 = vector.extract_strided_slice %93 {offsets = [0, 128], sizes = [8, 64], strides = [1, 1]} : vector<8x192xf32> to vector<8x64xf32>
    %99 = arith.mulf %97, %50 : vector<8x64xf32>
    %100 = arith.mulf %96, %95 : vector<8x64xf32>
    %101 = arith.addf %99, %100 : vector<8x64xf32>
    %102 = math.tanh %101 : vector<8x64xf32>
    %103 = arith.mulf %98, %102 : vector<8x64xf32>
    %104 = vector.extract_strided_slice %87 {offsets = [0, 0], sizes = [8, 192], strides = [1, 1]} : vector<8x256xf32> to vector<8x192xf32>
    %105 = arith.negf %104 : vector<8x192xf32>
    %106 = math.exp %105 : vector<8x192xf32>
    %cst_47 = arith.constant 1.000000e+00 : f32
    %107 = vector.broadcast %cst_47 : f32 to vector<8x192xf32>
    %108 = arith.addf %107, %106 : vector<8x192xf32>
    %109 = arith.divf %107, %108 : vector<8x192xf32>
    %110 = vector.extract_strided_slice %87 {offsets = [0, 192], sizes = [8, 64], strides = [1, 1]} : vector<8x256xf32> to vector<8x64xf32>
    %111 = math.tanh %110 : vector<8x64xf32>
    %112 = vector.extract_strided_slice %109 {offsets = [0, 0], sizes = [8, 64], strides = [1, 1]} : vector<8x192xf32> to vector<8x64xf32>
    %113 = vector.extract_strided_slice %109 {offsets = [0, 64], sizes = [8, 64], strides = [1, 1]} : vector<8x192xf32> to vector<8x64xf32>
    %114 = vector.extract_strided_slice %109 {offsets = [0, 128], sizes = [8, 64], strides = [1, 1]} : vector<8x192xf32> to vector<8x64xf32>
    %115 = arith.mulf %113, %66 : vector<8x64xf32>
    %116 = arith.mulf %112, %111 : vector<8x64xf32>
    %117 = arith.addf %115, %116 : vector<8x64xf32>
    %118 = math.tanh %117 : vector<8x64xf32>
    %119 = arith.mulf %114, %118 : vector<8x64xf32>
    %120 = arith.index_cast %c1_i32 : i32 to index
    %c0_48 = arith.constant 0 : index
    %c0_49 = arith.constant 0 : index
    %121 = vector.load %arg15[%120, %c0_48, %c0_49] : memref<20x8x128xf32, #tpu.memory_space<vmem>>, vector<1x8x64xf32>
    %122 = vector.shape_cast %121 : vector<1x8x64xf32> to vector<8x64xf32>
    %123 = vector.shape_cast %103 : vector<8x64xf32> to vector<1x8x64xf32>
    tpu.vector_store %arg15[%120, %c0_48, %c0_49], %123 {strides = array<i32>} : memref<20x8x128xf32, #tpu.memory_space<vmem>>, vector<1x8x64xf32>,
    %124 = arith.index_cast %77 : i32 to index
    %c0_50 = arith.constant 0 : index
    %c64_51 = arith.constant 64 : index
    %125 = vector.load %arg15[%124, %c0_50, %c64_51] : memref<20x8x128xf32, #tpu.memory_space<vmem>>, vector<1x8x64xf32>
    %126 = vector.shape_cast %125 : vector<1x8x64xf32> to vector<8x64xf32>
    %127 = vector.shape_cast %119 : vector<8x64xf32> to vector<1x8x64xf32>
    tpu.vector_store %arg15[%124, %c0_50, %c64_51], %127 {strides = array<i32>} : memref<20x8x128xf32, #tpu.memory_space<vmem>>, vector<1x8x64xf32>,
    %c2_i32 = arith.constant 2 : i32
    %c19_i32_52 = arith.constant 19 : i32
    %128 = arith.subi %c19_i32_52, %c2_i32 : i32
    %129 = arith.index_cast %c2_i32 : i32 to index
    %c0_53 = arith.constant 0 : index
    %c0_54 = arith.constant 0 : index
    %130 = vector.load %arg16[%129, %c0_53, %c0_54] : memref<20x8x256xf32, #tpu.memory_space<vmem>>, vector<1x8x256xf32>
    %131 = vector.shape_cast %130 : vector<1x8x256xf32> to vector<8x256xf32>
    %cst_55 = arith.constant dense<0.000000e+00> : vector<8x256xf32>
    %132 = tpu.matmul %103, %23, %cst_55 {dimension_numbers = #tpu.dot_dimension_numbers<[1], [0], [0], [1], [0, 0, 1, 1], [], []>} : vector<8x64xf32>, vector<64x256xf32>, vector<8x256xf32> -> vector<8x256xf32>
    %133 = arith.addf %131, %132 : vector<8x256xf32>
    %134 = arith.index_cast %128 : i32 to index
    %c0_56 = arith.constant 0 : index
    %c0_57 = arith.constant 0 : index
    %135 = vector.load %arg17[%134, %c0_56, %c0_57] : memref<20x8x256xf32, #tpu.memory_space<vmem>>, vector<1x8x256xf32>
    %136 = vector.shape_cast %135 : vector<1x8x256xf32> to vector<8x256xf32>
    %cst_58 = arith.constant dense<0.000000e+00> : vector<8x256xf32>
    %137 = tpu.matmul %119, %24, %cst_58 {dimension_numbers = #tpu.dot_dimension_numbers<[1], [0], [0], [1], [0, 0, 1, 1], [], []>} : vector<8x64xf32>, vector<64x256xf32>, vector<8x256xf32> -> vector<8x256xf32>
    %138 = arith.addf %136, %137 : vector<8x256xf32>
    %139 = vector.extract_strided_slice %133 {offsets = [0, 0], sizes = [8, 192], strides = [1, 1]} : vector<8x256xf32> to vector<8x192xf32>
    %140 = arith.negf %139 : vector<8x192xf32>
    %141 = math.exp %140 : vector<8x192xf32>
    %cst_59 = arith.constant 1.000000e+00 : f32
    %142 = vector.broadcast %cst_59 : f32 to vector<8x192xf32>
    %143 = arith.addf %142, %141 : vector<8x192xf32>
    %144 = arith.divf %142, %143 : vector<8x192xf32>
    %145 = vector.extract_strided_slice %133 {offsets = [0, 192], sizes = [8, 64], strides = [1, 1]} : vector<8x256xf32> to vector<8x64xf32>
    %146 = math.tanh %145 : vector<8x64xf32>
    %147 = vector.extract_strided_slice %144 {offsets = [0, 0], sizes = [8, 64], strides = [1, 1]} : vector<8x192xf32> to vector<8x64xf32>
    %148 = vector.extract_strided_slice %144 {offsets = [0, 64], sizes = [8, 64], strides = [1, 1]} : vector<8x192xf32> to vector<8x64xf32>
    %149 = vector.extract_strided_slice %144 {offsets = [0, 128], sizes = [8, 64], strides = [1, 1]} : vector<8x192xf32> to vector<8x64xf32>
    %150 = arith.mulf %148, %101 : vector<8x64xf32>
    %151 = arith.mulf %147, %146 : vector<8x64xf32>
    %152 = arith.addf %150, %151 : vector<8x64xf32>
    %153 = math.tanh %152 : vector<8x64xf32>
    %154 = arith.mulf %149, %153 : vector<8x64xf32>
    %155 = vector.extract_strided_slice %138 {offsets = [0, 0], sizes = [8, 192], strides = [1, 1]} : vector<8x256xf32> to vector<8x192xf32>
    %156 = arith.negf %155 : vector<8x192xf32>
    %157 = math.exp %156 : vector<8x192xf32>
    %cst_60 = arith.constant 1.000000e+00 : f32
    %158 = vector.broadcast %cst_60 : f32 to vector<8x192xf32>
    %159 = arith.addf %158, %157 : vector<8x192xf32>
    %160 = arith.divf %158, %159 : vector<8x192xf32>
    %161 = vector.extract_strided_slice %138 {offsets = [0, 192], sizes = [8, 64], strides = [1, 1]} : vector<8x256xf32> to vector<8x64xf32>
    %162 = math.tanh %161 : vector<8x64xf32>
    %163 = vector.extract_strided_slice %160 {offsets = [0, 0], sizes = [8, 64], strides = [1, 1]} : vector<8x192xf32> to vector<8x64xf32>
    %164 = vector.extract_strided_slice %160 {offsets = [0, 64], sizes = [8, 64], strides = [1, 1]} : vector<8x192xf32> to vector<8x64xf32>
    %165 = vector.extract_strided_slice %160 {offsets = [0, 128], sizes = [8, 64], strides = [1, 1]} : vector<8x192xf32> to vector<8x64xf32>
    %166 = arith.mulf %164, %117 : vector<8x64xf32>
    %167 = arith.mulf %163, %162 : vector<8x64xf32>
    %168 = arith.addf %166, %167 : vector<8x64xf32>
    %169 = math.tanh %168 : vector<8x64xf32>
    %170 = arith.mulf %165, %169 : vector<8x64xf32>
    %171 = arith.index_cast %c2_i32 : i32 to index
    %c0_61 = arith.constant 0 : index
    %c0_62 = arith.constant 0 : index
    %172 = vector.load %arg15[%171, %c0_61, %c0_62] : memref<20x8x128xf32, #tpu.memory_space<vmem>>, vector<1x8x64xf32>
    %173 = vector.shape_cast %172 : vector<1x8x64xf32> to vector<8x64xf32>
    %174 = vector.shape_cast %154 : vector<8x64xf32> to vector<1x8x64xf32>
    tpu.vector_store %arg15[%171, %c0_61, %c0_62], %174 {strides = array<i32>} : memref<20x8x128xf32, #tpu.memory_space<vmem>>, vector<1x8x64xf32>,
    %175 = arith.index_cast %128 : i32 to index
    %c0_63 = arith.constant 0 : index
    %c64_64 = arith.constant 64 : index
    %176 = vector.load %arg15[%175, %c0_63, %c64_64] : memref<20x8x128xf32, #tpu.memory_space<vmem>>, vector<1x8x64xf32>
    %177 = vector.shape_cast %176 : vector<1x8x64xf32> to vector<8x64xf32>
    %178 = vector.shape_cast %170 : vector<8x64xf32> to vector<1x8x64xf32>
    tpu.vector_store %arg15[%175, %c0_63, %c64_64], %178 {strides = array<i32>} : memref<20x8x128xf32, #tpu.memory_space<vmem>>, vector<1x8x64xf32>,
    %c3_i32 = arith.constant 3 : i32
    %c19_i32_65 = arith.constant 19 : i32
    %179 = arith.subi %c19_i32_65, %c3_i32 : i32
    %180 = arith.index_cast %c3_i32 : i32 to index
    %c0_66 = arith.constant 0 : index
    %c0_67 = arith.constant 0 : index
    %181 = vector.load %arg16[%180, %c0_66, %c0_67] : memref<20x8x256xf32, #tpu.memory_space<vmem>>, vector<1x8x256xf32>
    %182 = vector.shape_cast %181 : vector<1x8x256xf32> to vector<8x256xf32>
    %cst_68 = arith.constant dense<0.000000e+00> : vector<8x256xf32>
    %183 = tpu.matmul %154, %23, %cst_68 {dimension_numbers = #tpu.dot_dimension_numbers<[1], [0], [0], [1], [0, 0, 1, 1], [], []>} : vector<8x64xf32>, vector<64x256xf32>, vector<8x256xf32> -> vector<8x256xf32>
    %184 = arith.addf %182, %183 : vector<8x256xf32>
    %185 = arith.index_cast %179 : i32 to index
    %c0_69 = arith.constant 0 : index
    %c0_70 = arith.constant 0 : index
    %186 = vector.load %arg17[%185, %c0_69, %c0_70] : memref<20x8x256xf32, #tpu.memory_space<vmem>>, vector<1x8x256xf32>
    %187 = vector.shape_cast %186 : vector<1x8x256xf32> to vector<8x256xf32>
    %cst_71 = arith.constant dense<0.000000e+00> : vector<8x256xf32>
    %188 = tpu.matmul %170, %24, %cst_71 {dimension_numbers = #tpu.dot_dimension_numbers<[1], [0], [0], [1], [0, 0, 1, 1], [], []>} : vector<8x64xf32>, vector<64x256xf32>, vector<8x256xf32> -> vector<8x256xf32>
    %189 = arith.addf %187, %188 : vector<8x256xf32>
    %190 = vector.extract_strided_slice %184 {offsets = [0, 0], sizes = [8, 192], strides = [1, 1]} : vector<8x256xf32> to vector<8x192xf32>
    %191 = arith.negf %190 : vector<8x192xf32>
    %192 = math.exp %191 : vector<8x192xf32>
    %cst_72 = arith.constant 1.000000e+00 : f32
    %193 = vector.broadcast %cst_72 : f32 to vector<8x192xf32>
    %194 = arith.addf %193, %192 : vector<8x192xf32>
    %195 = arith.divf %193, %194 : vector<8x192xf32>
    %196 = vector.extract_strided_slice %184 {offsets = [0, 192], sizes = [8, 64], strides = [1, 1]} : vector<8x256xf32> to vector<8x64xf32>
    %197 = math.tanh %196 : vector<8x64xf32>
    %198 = vector.extract_strided_slice %195 {offsets = [0, 0], sizes = [8, 64], strides = [1, 1]} : vector<8x192xf32> to vector<8x64xf32>
    %199 = vector.extract_strided_slice %195 {offsets = [0, 64], sizes = [8, 64], strides = [1, 1]} : vector<8x192xf32> to vector<8x64xf32>
    %200 = vector.extract_strided_slice %195 {offsets = [0, 128], sizes = [8, 64], strides = [1, 1]} : vector<8x192xf32> to vector<8x64xf32>
    %201 = arith.mulf %199, %152 : vector<8x64xf32>
    %202 = arith.mulf %198, %197 : vector<8x64xf32>
    %203 = arith.addf %201, %202 : vector<8x64xf32>
    %204 = math.tanh %203 : vector<8x64xf32>
    %205 = arith.mulf %200, %204 : vector<8x64xf32>
    %206 = vector.extract_strided_slice %189 {offsets = [0, 0], sizes = [8, 192], strides = [1, 1]} : vector<8x256xf32> to vector<8x192xf32>
    %207 = arith.negf %206 : vector<8x192xf32>
    %208 = math.exp %207 : vector<8x192xf32>
    %cst_73 = arith.constant 1.000000e+00 : f32
    %209 = vector.broadcast %cst_73 : f32 to vector<8x192xf32>
    %210 = arith.addf %209, %208 : vector<8x192xf32>
    %211 = arith.divf %209, %210 : vector<8x192xf32>
    %212 = vector.extract_strided_slice %189 {offsets = [0, 192], sizes = [8, 64], strides = [1, 1]} : vector<8x256xf32> to vector<8x64xf32>
    %213 = math.tanh %212 : vector<8x64xf32>
    %214 = vector.extract_strided_slice %211 {offsets = [0, 0], sizes = [8, 64], strides = [1, 1]} : vector<8x192xf32> to vector<8x64xf32>
    %215 = vector.extract_strided_slice %211 {offsets = [0, 64], sizes = [8, 64], strides = [1, 1]} : vector<8x192xf32> to vector<8x64xf32>
    %216 = vector.extract_strided_slice %211 {offsets = [0, 128], sizes = [8, 64], strides = [1, 1]} : vector<8x192xf32> to vector<8x64xf32>
    %217 = arith.mulf %215, %168 : vector<8x64xf32>
    %218 = arith.mulf %214, %213 : vector<8x64xf32>
    %219 = arith.addf %217, %218 : vector<8x64xf32>
    %220 = math.tanh %219 : vector<8x64xf32>
    %221 = arith.mulf %216, %220 : vector<8x64xf32>
    %222 = arith.index_cast %c3_i32 : i32 to index
    %c0_74 = arith.constant 0 : index
    %c0_75 = arith.constant 0 : index
    %223 = vector.load %arg15[%222, %c0_74, %c0_75] : memref<20x8x128xf32, #tpu.memory_space<vmem>>, vector<1x8x64xf32>
    %224 = vector.shape_cast %223 : vector<1x8x64xf32> to vector<8x64xf32>
    %225 = vector.shape_cast %205 : vector<8x64xf32> to vector<1x8x64xf32>
    tpu.vector_store %arg15[%222, %c0_74, %c0_75], %225 {strides = array<i32>} : memref<20x8x128xf32, #tpu.memory_space<vmem>>, vector<1x8x64xf32>,
    %226 = arith.index_cast %179 : i32 to index
    %c0_76 = arith.constant 0 : index
    %c64_77 = arith.constant 64 : index
    %227 = vector.load %arg15[%226, %c0_76, %c64_77] : memref<20x8x128xf32, #tpu.memory_space<vmem>>, vector<1x8x64xf32>
    %228 = vector.shape_cast %227 : vector<1x8x64xf32> to vector<8x64xf32>
    %229 = vector.shape_cast %221 : vector<8x64xf32> to vector<1x8x64xf32>
    tpu.vector_store %arg15[%226, %c0_76, %c64_77], %229 {strides = array<i32>} : memref<20x8x128xf32, #tpu.memory_space<vmem>>, vector<1x8x64xf32>,
    %c4_i32 = arith.constant 4 : i32
    %c19_i32_78 = arith.constant 19 : i32
    %230 = arith.subi %c19_i32_78, %c4_i32 : i32
    %231 = arith.index_cast %c4_i32 : i32 to index
    %c0_79 = arith.constant 0 : index
    %c0_80 = arith.constant 0 : index
    %232 = vector.load %arg16[%231, %c0_79, %c0_80] : memref<20x8x256xf32, #tpu.memory_space<vmem>>, vector<1x8x256xf32>
    %233 = vector.shape_cast %232 : vector<1x8x256xf32> to vector<8x256xf32>
    %cst_81 = arith.constant dense<0.000000e+00> : vector<8x256xf32>
    %234 = tpu.matmul %205, %23, %cst_81 {dimension_numbers = #tpu.dot_dimension_numbers<[1], [0], [0], [1], [0, 0, 1, 1], [], []>} : vector<8x64xf32>, vector<64x256xf32>, vector<8x256xf32> -> vector<8x256xf32>
    %235 = arith.addf %233, %234 : vector<8x256xf32>
    %236 = arith.index_cast %230 : i32 to index
    %c0_82 = arith.constant 0 : index
    %c0_83 = arith.constant 0 : index
    %237 = vector.load %arg17[%236, %c0_82, %c0_83] : memref<20x8x256xf32, #tpu.memory_space<vmem>>, vector<1x8x256xf32>
    %238 = vector.shape_cast %237 : vector<1x8x256xf32> to vector<8x256xf32>
    %cst_84 = arith.constant dense<0.000000e+00> : vector<8x256xf32>
    %239 = tpu.matmul %221, %24, %cst_84 {dimension_numbers = #tpu.dot_dimension_numbers<[1], [0], [0], [1], [0, 0, 1, 1], [], []>} : vector<8x64xf32>, vector<64x256xf32>, vector<8x256xf32> -> vector<8x256xf32>
    %240 = arith.addf %238, %239 : vector<8x256xf32>
    %241 = vector.extract_strided_slice %235 {offsets = [0, 0], sizes = [8, 192], strides = [1, 1]} : vector<8x256xf32> to vector<8x192xf32>
    %242 = arith.negf %241 : vector<8x192xf32>
    %243 = math.exp %242 : vector<8x192xf32>
    %cst_85 = arith.constant 1.000000e+00 : f32
    %244 = vector.broadcast %cst_85 : f32 to vector<8x192xf32>
    %245 = arith.addf %244, %243 : vector<8x192xf32>
    %246 = arith.divf %244, %245 : vector<8x192xf32>
    %247 = vector.extract_strided_slice %235 {offsets = [0, 192], sizes = [8, 64], strides = [1, 1]} : vector<8x256xf32> to vector<8x64xf32>
    %248 = math.tanh %247 : vector<8x64xf32>
    %249 = vector.extract_strided_slice %246 {offsets = [0, 0], sizes = [8, 64], strides = [1, 1]} : vector<8x192xf32> to vector<8x64xf32>
    %250 = vector.extract_strided_slice %246 {offsets = [0, 64], sizes = [8, 64], strides = [1, 1]} : vector<8x192xf32> to vector<8x64xf32>
    %251 = vector.extract_strided_slice %246 {offsets = [0, 128], sizes = [8, 64], strides = [1, 1]} : vector<8x192xf32> to vector<8x64xf32>
    %252 = arith.mulf %250, %203 : vector<8x64xf32>
    %253 = arith.mulf %249, %248 : vector<8x64xf32>
    %254 = arith.addf %252, %253 : vector<8x64xf32>
    %255 = math.tanh %254 : vector<8x64xf32>
    %256 = arith.mulf %251, %255 : vector<8x64xf32>
    %257 = vector.extract_strided_slice %240 {offsets = [0, 0], sizes = [8, 192], strides = [1, 1]} : vector<8x256xf32> to vector<8x192xf32>
    %258 = arith.negf %257 : vector<8x192xf32>
    %259 = math.exp %258 : vector<8x192xf32>
    %cst_86 = arith.constant 1.000000e+00 : f32
    %260 = vector.broadcast %cst_86 : f32 to vector<8x192xf32>
    %261 = arith.addf %260, %259 : vector<8x192xf32>
    %262 = arith.divf %260, %261 : vector<8x192xf32>
    %263 = vector.extract_strided_slice %240 {offsets = [0, 192], sizes = [8, 64], strides = [1, 1]} : vector<8x256xf32> to vector<8x64xf32>
    %264 = math.tanh %263 : vector<8x64xf32>
    %265 = vector.extract_strided_slice %262 {offsets = [0, 0], sizes = [8, 64], strides = [1, 1]} : vector<8x192xf32> to vector<8x64xf32>
    %266 = vector.extract_strided_slice %262 {offsets = [0, 64], sizes = [8, 64], strides = [1, 1]} : vector<8x192xf32> to vector<8x64xf32>
    %267 = vector.extract_strided_slice %262 {offsets = [0, 128], sizes = [8, 64], strides = [1, 1]} : vector<8x192xf32> to vector<8x64xf32>
    %268 = arith.mulf %266, %219 : vector<8x64xf32>
    %269 = arith.mulf %265, %264 : vector<8x64xf32>
    %270 = arith.addf %268, %269 : vector<8x64xf32>
    %271 = math.tanh %270 : vector<8x64xf32>
    %272 = arith.mulf %267, %271 : vector<8x64xf32>
    %273 = arith.index_cast %c4_i32 : i32 to index
    %c0_87 = arith.constant 0 : index
    %c0_88 = arith.constant 0 : index
    %274 = vector.load %arg15[%273, %c0_87, %c0_88] : memref<20x8x128xf32, #tpu.memory_space<vmem>>, vector<1x8x64xf32>
    %275 = vector.shape_cast %274 : vector<1x8x64xf32> to vector<8x64xf32>
    %276 = vector.shape_cast %256 : vector<8x64xf32> to vector<1x8x64xf32>
    tpu.vector_store %arg15[%273, %c0_87, %c0_88], %276 {strides = array<i32>} : memref<20x8x128xf32, #tpu.memory_space<vmem>>, vector<1x8x64xf32>,
    %277 = arith.index_cast %230 : i32 to index
    %c0_89 = arith.constant 0 : index
    %c64_90 = arith.constant 64 : index
    %278 = vector.load %arg15[%277, %c0_89, %c64_90] : memref<20x8x128xf32, #tpu.memory_space<vmem>>, vector<1x8x64xf32>
    %279 = vector.shape_cast %278 : vector<1x8x64xf32> to vector<8x64xf32>
    %280 = vector.shape_cast %272 : vector<8x64xf32> to vector<1x8x64xf32>
    tpu.vector_store %arg15[%277, %c0_89, %c64_90], %280 {strides = array<i32>} : memref<20x8x128xf32, #tpu.memory_space<vmem>>, vector<1x8x64xf32>,
    %c5_i32 = arith.constant 5 : i32
    %c19_i32_91 = arith.constant 19 : i32
    %281 = arith.subi %c19_i32_91, %c5_i32 : i32
    %282 = arith.index_cast %c5_i32 : i32 to index
    %c0_92 = arith.constant 0 : index
    %c0_93 = arith.constant 0 : index
    %283 = vector.load %arg16[%282, %c0_92, %c0_93] : memref<20x8x256xf32, #tpu.memory_space<vmem>>, vector<1x8x256xf32>
    %284 = vector.shape_cast %283 : vector<1x8x256xf32> to vector<8x256xf32>
    %cst_94 = arith.constant dense<0.000000e+00> : vector<8x256xf32>
    %285 = tpu.matmul %256, %23, %cst_94 {dimension_numbers = #tpu.dot_dimension_numbers<[1], [0], [0], [1], [0, 0, 1, 1], [], []>} : vector<8x64xf32>, vector<64x256xf32>, vector<8x256xf32> -> vector<8x256xf32>
    %286 = arith.addf %284, %285 : vector<8x256xf32>
    %287 = arith.index_cast %281 : i32 to index
    %c0_95 = arith.constant 0 : index
    %c0_96 = arith.constant 0 : index
    %288 = vector.load %arg17[%287, %c0_95, %c0_96] : memref<20x8x256xf32, #tpu.memory_space<vmem>>, vector<1x8x256xf32>
    %289 = vector.shape_cast %288 : vector<1x8x256xf32> to vector<8x256xf32>
    %cst_97 = arith.constant dense<0.000000e+00> : vector<8x256xf32>
    %290 = tpu.matmul %272, %24, %cst_97 {dimension_numbers = #tpu.dot_dimension_numbers<[1], [0], [0], [1], [0, 0, 1, 1], [], []>} : vector<8x64xf32>, vector<64x256xf32>, vector<8x256xf32> -> vector<8x256xf32>
    %291 = arith.addf %289, %290 : vector<8x256xf32>
    %292 = vector.extract_strided_slice %286 {offsets = [0, 0], sizes = [8, 192], strides = [1, 1]} : vector<8x256xf32> to vector<8x192xf32>
    %293 = arith.negf %292 : vector<8x192xf32>
    %294 = math.exp %293 : vector<8x192xf32>
    %cst_98 = arith.constant 1.000000e+00 : f32
    %295 = vector.broadcast %cst_98 : f32 to vector<8x192xf32>
    %296 = arith.addf %295, %294 : vector<8x192xf32>
    %297 = arith.divf %295, %296 : vector<8x192xf32>
    %298 = vector.extract_strided_slice %286 {offsets = [0, 192], sizes = [8, 64], strides = [1, 1]} : vector<8x256xf32> to vector<8x64xf32>
    %299 = math.tanh %298 : vector<8x64xf32>
    %300 = vector.extract_strided_slice %297 {offsets = [0, 0], sizes = [8, 64], strides = [1, 1]} : vector<8x192xf32> to vector<8x64xf32>
    %301 = vector.extract_strided_slice %297 {offsets = [0, 64], sizes = [8, 64], strides = [1, 1]} : vector<8x192xf32> to vector<8x64xf32>
    %302 = vector.extract_strided_slice %297 {offsets = [0, 128], sizes = [8, 64], strides = [1, 1]} : vector<8x192xf32> to vector<8x64xf32>
    %303 = arith.mulf %301, %254 : vector<8x64xf32>
    %304 = arith.mulf %300, %299 : vector<8x64xf32>
    %305 = arith.addf %303, %304 : vector<8x64xf32>
    %306 = math.tanh %305 : vector<8x64xf32>
    %307 = arith.mulf %302, %306 : vector<8x64xf32>
    %308 = vector.extract_strided_slice %291 {offsets = [0, 0], sizes = [8, 192], strides = [1, 1]} : vector<8x256xf32> to vector<8x192xf32>
    %309 = arith.negf %308 : vector<8x192xf32>
    %310 = math.exp %309 : vector<8x192xf32>
    %cst_99 = arith.constant 1.000000e+00 : f32
    %311 = vector.broadcast %cst_99 : f32 to vector<8x192xf32>
    %312 = arith.addf %311, %310 : vector<8x192xf32>
    %313 = arith.divf %311, %312 : vector<8x192xf32>
    %314 = vector.extract_strided_slice %291 {offsets = [0, 192], sizes = [8, 64], strides = [1, 1]} : vector<8x256xf32> to vector<8x64xf32>
    %315 = math.tanh %314 : vector<8x64xf32>
    %316 = vector.extract_strided_slice %313 {offsets = [0, 0], sizes = [8, 64], strides = [1, 1]} : vector<8x192xf32> to vector<8x64xf32>
    %317 = vector.extract_strided_slice %313 {offsets = [0, 64], sizes = [8, 64], strides = [1, 1]} : vector<8x192xf32> to vector<8x64xf32>
    %318 = vector.extract_strided_slice %313 {offsets = [0, 128], sizes = [8, 64], strides = [1, 1]} : vector<8x192xf32> to vector<8x64xf32>
    %319 = arith.mulf %317, %270 : vector<8x64xf32>
    %320 = arith.mulf %316, %315 : vector<8x64xf32>
    %321 = arith.addf %319, %320 : vector<8x64xf32>
    %322 = math.tanh %321 : vector<8x64xf32>
    %323 = arith.mulf %318, %322 : vector<8x64xf32>
    %324 = arith.index_cast %c5_i32 : i32 to index
    %c0_100 = arith.constant 0 : index
    %c0_101 = arith.constant 0 : index
    %325 = vector.load %arg15[%324, %c0_100, %c0_101] : memref<20x8x128xf32, #tpu.memory_space<vmem>>, vector<1x8x64xf32>
    %326 = vector.shape_cast %325 : vector<1x8x64xf32> to vector<8x64xf32>
    %327 = vector.shape_cast %307 : vector<8x64xf32> to vector<1x8x64xf32>
    tpu.vector_store %arg15[%324, %c0_100, %c0_101], %327 {strides = array<i32>} : memref<20x8x128xf32, #tpu.memory_space<vmem>>, vector<1x8x64xf32>,
    %328 = arith.index_cast %281 : i32 to index
    %c0_102 = arith.constant 0 : index
    %c64_103 = arith.constant 64 : index
    %329 = vector.load %arg15[%328, %c0_102, %c64_103] : memref<20x8x128xf32, #tpu.memory_space<vmem>>, vector<1x8x64xf32>
    %330 = vector.shape_cast %329 : vector<1x8x64xf32> to vector<8x64xf32>
    %331 = vector.shape_cast %323 : vector<8x64xf32> to vector<1x8x64xf32>
    tpu.vector_store %arg15[%328, %c0_102, %c64_103], %331 {strides = array<i32>} : memref<20x8x128xf32, #tpu.memory_space<vmem>>, vector<1x8x64xf32>,
    %c6_i32 = arith.constant 6 : i32
    %c19_i32_104 = arith.constant 19 : i32
    %332 = arith.subi %c19_i32_104, %c6_i32 : i32
    %333 = arith.index_cast %c6_i32 : i32 to index
    %c0_105 = arith.constant 0 : index
    %c0_106 = arith.constant 0 : index
    %334 = vector.load %arg16[%333, %c0_105, %c0_106] : memref<20x8x256xf32, #tpu.memory_space<vmem>>, vector<1x8x256xf32>
    %335 = vector.shape_cast %334 : vector<1x8x256xf32> to vector<8x256xf32>
    %cst_107 = arith.constant dense<0.000000e+00> : vector<8x256xf32>
    %336 = tpu.matmul %307, %23, %cst_107 {dimension_numbers = #tpu.dot_dimension_numbers<[1], [0], [0], [1], [0, 0, 1, 1], [], []>} : vector<8x64xf32>, vector<64x256xf32>, vector<8x256xf32> -> vector<8x256xf32>
    %337 = arith.addf %335, %336 : vector<8x256xf32>
    %338 = arith.index_cast %332 : i32 to index
    %c0_108 = arith.constant 0 : index
    %c0_109 = arith.constant 0 : index
    %339 = vector.load %arg17[%338, %c0_108, %c0_109] : memref<20x8x256xf32, #tpu.memory_space<vmem>>, vector<1x8x256xf32>
    %340 = vector.shape_cast %339 : vector<1x8x256xf32> to vector<8x256xf32>
    %cst_110 = arith.constant dense<0.000000e+00> : vector<8x256xf32>
    %341 = tpu.matmul %323, %24, %cst_110 {dimension_numbers = #tpu.dot_dimension_numbers<[1], [0], [0], [1], [0, 0, 1, 1], [], []>} : vector<8x64xf32>, vector<64x256xf32>, vector<8x256xf32> -> vector<8x256xf32>
    %342 = arith.addf %340, %341 : vector<8x256xf32>
    %343 = vector.extract_strided_slice %337 {offsets = [0, 0], sizes = [8, 192], strides = [1, 1]} : vector<8x256xf32> to vector<8x192xf32>
    %344 = arith.negf %343 : vector<8x192xf32>
    %345 = math.exp %344 : vector<8x192xf32>
    %cst_111 = arith.constant 1.000000e+00 : f32
    %346 = vector.broadcast %cst_111 : f32 to vector<8x192xf32>
    %347 = arith.addf %346, %345 : vector<8x192xf32>
    %348 = arith.divf %346, %347 : vector<8x192xf32>
    %349 = vector.extract_strided_slice %337 {offsets = [0, 192], sizes = [8, 64], strides = [1, 1]} : vector<8x256xf32> to vector<8x64xf32>
    %350 = math.tanh %349 : vector<8x64xf32>
    %351 = vector.extract_strided_slice %348 {offsets = [0, 0], sizes = [8, 64], strides = [1, 1]} : vector<8x192xf32> to vector<8x64xf32>
    %352 = vector.extract_strided_slice %348 {offsets = [0, 64], sizes = [8, 64], strides = [1, 1]} : vector<8x192xf32> to vector<8x64xf32>
    %353 = vector.extract_strided_slice %348 {offsets = [0, 128], sizes = [8, 64], strides = [1, 1]} : vector<8x192xf32> to vector<8x64xf32>
    %354 = arith.mulf %352, %305 : vector<8x64xf32>
    %355 = arith.mulf %351, %350 : vector<8x64xf32>
    %356 = arith.addf %354, %355 : vector<8x64xf32>
    %357 = math.tanh %356 : vector<8x64xf32>
    %358 = arith.mulf %353, %357 : vector<8x64xf32>
    %359 = vector.extract_strided_slice %342 {offsets = [0, 0], sizes = [8, 192], strides = [1, 1]} : vector<8x256xf32> to vector<8x192xf32>
    %360 = arith.negf %359 : vector<8x192xf32>
    %361 = math.exp %360 : vector<8x192xf32>
    %cst_112 = arith.constant 1.000000e+00 : f32
    %362 = vector.broadcast %cst_112 : f32 to vector<8x192xf32>
    %363 = arith.addf %362, %361 : vector<8x192xf32>
    %364 = arith.divf %362, %363 : vector<8x192xf32>
    %365 = vector.extract_strided_slice %342 {offsets = [0, 192], sizes = [8, 64], strides = [1, 1]} : vector<8x256xf32> to vector<8x64xf32>
    %366 = math.tanh %365 : vector<8x64xf32>
    %367 = vector.extract_strided_slice %364 {offsets = [0, 0], sizes = [8, 64], strides = [1, 1]} : vector<8x192xf32> to vector<8x64xf32>
    %368 = vector.extract_strided_slice %364 {offsets = [0, 64], sizes = [8, 64], strides = [1, 1]} : vector<8x192xf32> to vector<8x64xf32>
    %369 = vector.extract_strided_slice %364 {offsets = [0, 128], sizes = [8, 64], strides = [1, 1]} : vector<8x192xf32> to vector<8x64xf32>
    %370 = arith.mulf %368, %321 : vector<8x64xf32>
    %371 = arith.mulf %367, %366 : vector<8x64xf32>
    %372 = arith.addf %370, %371 : vector<8x64xf32>
    %373 = math.tanh %372 : vector<8x64xf32>
    %374 = arith.mulf %369, %373 : vector<8x64xf32>
    %375 = arith.index_cast %c6_i32 : i32 to index
    %c0_113 = arith.constant 0 : index
    %c0_114 = arith.constant 0 : index
    %376 = vector.load %arg15[%375, %c0_113, %c0_114] : memref<20x8x128xf32, #tpu.memory_space<vmem>>, vector<1x8x64xf32>
    %377 = vector.shape_cast %376 : vector<1x8x64xf32> to vector<8x64xf32>
    %378 = vector.shape_cast %358 : vector<8x64xf32> to vector<1x8x64xf32>
    tpu.vector_store %arg15[%375, %c0_113, %c0_114], %378 {strides = array<i32>} : memref<20x8x128xf32, #tpu.memory_space<vmem>>, vector<1x8x64xf32>,
    %379 = arith.index_cast %332 : i32 to index
    %c0_115 = arith.constant 0 : index
    %c64_116 = arith.constant 64 : index
    %380 = vector.load %arg15[%379, %c0_115, %c64_116] : memref<20x8x128xf32, #tpu.memory_space<vmem>>, vector<1x8x64xf32>
    %381 = vector.shape_cast %380 : vector<1x8x64xf32> to vector<8x64xf32>
    %382 = vector.shape_cast %374 : vector<8x64xf32> to vector<1x8x64xf32>
    tpu.vector_store %arg15[%379, %c0_115, %c64_116], %382 {strides = array<i32>} : memref<20x8x128xf32, #tpu.memory_space<vmem>>, vector<1x8x64xf32>,
    %c7_i32 = arith.constant 7 : i32
    %c19_i32_117 = arith.constant 19 : i32
    %383 = arith.subi %c19_i32_117, %c7_i32 : i32
    %384 = arith.index_cast %c7_i32 : i32 to index
    %c0_118 = arith.constant 0 : index
    %c0_119 = arith.constant 0 : index
    %385 = vector.load %arg16[%384, %c0_118, %c0_119] : memref<20x8x256xf32, #tpu.memory_space<vmem>>, vector<1x8x256xf32>
    %386 = vector.shape_cast %385 : vector<1x8x256xf32> to vector<8x256xf32>
    %cst_120 = arith.constant dense<0.000000e+00> : vector<8x256xf32>
    %387 = tpu.matmul %358, %23, %cst_120 {dimension_numbers = #tpu.dot_dimension_numbers<[1], [0], [0], [1], [0, 0, 1, 1], [], []>} : vector<8x64xf32>, vector<64x256xf32>, vector<8x256xf32> -> vector<8x256xf32>
    %388 = arith.addf %386, %387 : vector<8x256xf32>
    %389 = arith.index_cast %383 : i32 to index
    %c0_121 = arith.constant 0 : index
    %c0_122 = arith.constant 0 : index
    %390 = vector.load %arg17[%389, %c0_121, %c0_122] : memref<20x8x256xf32, #tpu.memory_space<vmem>>, vector<1x8x256xf32>
    %391 = vector.shape_cast %390 : vector<1x8x256xf32> to vector<8x256xf32>
    %cst_123 = arith.constant dense<0.000000e+00> : vector<8x256xf32>
    %392 = tpu.matmul %374, %24, %cst_123 {dimension_numbers = #tpu.dot_dimension_numbers<[1], [0], [0], [1], [0, 0, 1, 1], [], []>} : vector<8x64xf32>, vector<64x256xf32>, vector<8x256xf32> -> vector<8x256xf32>
    %393 = arith.addf %391, %392 : vector<8x256xf32>
    %394 = vector.extract_strided_slice %388 {offsets = [0, 0], sizes = [8, 192], strides = [1, 1]} : vector<8x256xf32> to vector<8x192xf32>
    %395 = arith.negf %394 : vector<8x192xf32>
    %396 = math.exp %395 : vector<8x192xf32>
    %cst_124 = arith.constant 1.000000e+00 : f32
    %397 = vector.broadcast %cst_124 : f32 to vector<8x192xf32>
    %398 = arith.addf %397, %396 : vector<8x192xf32>
    %399 = arith.divf %397, %398 : vector<8x192xf32>
    %400 = vector.extract_strided_slice %388 {offsets = [0, 192], sizes = [8, 64], strides = [1, 1]} : vector<8x256xf32> to vector<8x64xf32>
    %401 = math.tanh %400 : vector<8x64xf32>
    %402 = vector.extract_strided_slice %399 {offsets = [0, 0], sizes = [8, 64], strides = [1, 1]} : vector<8x192xf32> to vector<8x64xf32>
    %403 = vector.extract_strided_slice %399 {offsets = [0, 64], sizes = [8, 64], strides = [1, 1]} : vector<8x192xf32> to vector<8x64xf32>
    %404 = vector.extract_strided_slice %399 {offsets = [0, 128], sizes = [8, 64], strides = [1, 1]} : vector<8x192xf32> to vector<8x64xf32>
    %405 = arith.mulf %403, %356 : vector<8x64xf32>
    %406 = arith.mulf %402, %401 : vector<8x64xf32>
    %407 = arith.addf %405, %406 : vector<8x64xf32>
    %408 = math.tanh %407 : vector<8x64xf32>
    %409 = arith.mulf %404, %408 : vector<8x64xf32>
    %410 = vector.extract_strided_slice %393 {offsets = [0, 0], sizes = [8, 192], strides = [1, 1]} : vector<8x256xf32> to vector<8x192xf32>
    %411 = arith.negf %410 : vector<8x192xf32>
    %412 = math.exp %411 : vector<8x192xf32>
    %cst_125 = arith.constant 1.000000e+00 : f32
    %413 = vector.broadcast %cst_125 : f32 to vector<8x192xf32>
    %414 = arith.addf %413, %412 : vector<8x192xf32>
    %415 = arith.divf %413, %414 : vector<8x192xf32>
    %416 = vector.extract_strided_slice %393 {offsets = [0, 192], sizes = [8, 64], strides = [1, 1]} : vector<8x256xf32> to vector<8x64xf32>
    %417 = math.tanh %416 : vector<8x64xf32>
    %418 = vector.extract_strided_slice %415 {offsets = [0, 0], sizes = [8, 64], strides = [1, 1]} : vector<8x192xf32> to vector<8x64xf32>
    %419 = vector.extract_strided_slice %415 {offsets = [0, 64], sizes = [8, 64], strides = [1, 1]} : vector<8x192xf32> to vector<8x64xf32>
    %420 = vector.extract_strided_slice %415 {offsets = [0, 128], sizes = [8, 64], strides = [1, 1]} : vector<8x192xf32> to vector<8x64xf32>
    %421 = arith.mulf %419, %372 : vector<8x64xf32>
    %422 = arith.mulf %418, %417 : vector<8x64xf32>
    %423 = arith.addf %421, %422 : vector<8x64xf32>
    %424 = math.tanh %423 : vector<8x64xf32>
    %425 = arith.mulf %420, %424 : vector<8x64xf32>
    %426 = arith.index_cast %c7_i32 : i32 to index
    %c0_126 = arith.constant 0 : index
    %c0_127 = arith.constant 0 : index
    %427 = vector.load %arg15[%426, %c0_126, %c0_127] : memref<20x8x128xf32, #tpu.memory_space<vmem>>, vector<1x8x64xf32>
    %428 = vector.shape_cast %427 : vector<1x8x64xf32> to vector<8x64xf32>
    %429 = vector.shape_cast %409 : vector<8x64xf32> to vector<1x8x64xf32>
    tpu.vector_store %arg15[%426, %c0_126, %c0_127], %429 {strides = array<i32>} : memref<20x8x128xf32, #tpu.memory_space<vmem>>, vector<1x8x64xf32>,
    %430 = arith.index_cast %383 : i32 to index
    %c0_128 = arith.constant 0 : index
    %c64_129 = arith.constant 64 : index
    %431 = vector.load %arg15[%430, %c0_128, %c64_129] : memref<20x8x128xf32, #tpu.memory_space<vmem>>, vector<1x8x64xf32>
    %432 = vector.shape_cast %431 : vector<1x8x64xf32> to vector<8x64xf32>
    %433 = vector.shape_cast %425 : vector<8x64xf32> to vector<1x8x64xf32>
    tpu.vector_store %arg15[%430, %c0_128, %c64_129], %433 {strides = array<i32>} : memref<20x8x128xf32, #tpu.memory_space<vmem>>, vector<1x8x64xf32>,
    %c8_i32 = arith.constant 8 : i32
    %c19_i32_130 = arith.constant 19 : i32
    %434 = arith.subi %c19_i32_130, %c8_i32 : i32
    %435 = arith.index_cast %c8_i32 : i32 to index
    %c0_131 = arith.constant 0 : index
    %c0_132 = arith.constant 0 : index
    %436 = vector.load %arg16[%435, %c0_131, %c0_132] : memref<20x8x256xf32, #tpu.memory_space<vmem>>, vector<1x8x256xf32>
    %437 = vector.shape_cast %436 : vector<1x8x256xf32> to vector<8x256xf32>
    %cst_133 = arith.constant dense<0.000000e+00> : vector<8x256xf32>
    %438 = tpu.matmul %409, %23, %cst_133 {dimension_numbers = #tpu.dot_dimension_numbers<[1], [0], [0], [1], [0, 0, 1, 1], [], []>} : vector<8x64xf32>, vector<64x256xf32>, vector<8x256xf32> -> vector<8x256xf32>
    %439 = arith.addf %437, %438 : vector<8x256xf32>
    %440 = arith.index_cast %434 : i32 to index
    %c0_134 = arith.constant 0 : index
    %c0_135 = arith.constant 0 : index
    %441 = vector.load %arg17[%440, %c0_134, %c0_135] : memref<20x8x256xf32, #tpu.memory_space<vmem>>, vector<1x8x256xf32>
    %442 = vector.shape_cast %441 : vector<1x8x256xf32> to vector<8x256xf32>
    %cst_136 = arith.constant dense<0.000000e+00> : vector<8x256xf32>
    %443 = tpu.matmul %425, %24, %cst_136 {dimension_numbers = #tpu.dot_dimension_numbers<[1], [0], [0], [1], [0, 0, 1, 1], [], []>} : vector<8x64xf32>, vector<64x256xf32>, vector<8x256xf32> -> vector<8x256xf32>
    %444 = arith.addf %442, %443 : vector<8x256xf32>
    %445 = vector.extract_strided_slice %439 {offsets = [0, 0], sizes = [8, 192], strides = [1, 1]} : vector<8x256xf32> to vector<8x192xf32>
    %446 = arith.negf %445 : vector<8x192xf32>
    %447 = math.exp %446 : vector<8x192xf32>
    %cst_137 = arith.constant 1.000000e+00 : f32
    %448 = vector.broadcast %cst_137 : f32 to vector<8x192xf32>
    %449 = arith.addf %448, %447 : vector<8x192xf32>
    %450 = arith.divf %448, %449 : vector<8x192xf32>
    %451 = vector.extract_strided_slice %439 {offsets = [0, 192], sizes = [8, 64], strides = [1, 1]} : vector<8x256xf32> to vector<8x64xf32>
    %452 = math.tanh %451 : vector<8x64xf32>
    %453 = vector.extract_strided_slice %450 {offsets = [0, 0], sizes = [8, 64], strides = [1, 1]} : vector<8x192xf32> to vector<8x64xf32>
    %454 = vector.extract_strided_slice %450 {offsets = [0, 64], sizes = [8, 64], strides = [1, 1]} : vector<8x192xf32> to vector<8x64xf32>
    %455 = vector.extract_strided_slice %450 {offsets = [0, 128], sizes = [8, 64], strides = [1, 1]} : vector<8x192xf32> to vector<8x64xf32>
    %456 = arith.mulf %454, %407 : vector<8x64xf32>
    %457 = arith.mulf %453, %452 : vector<8x64xf32>
    %458 = arith.addf %456, %457 : vector<8x64xf32>
    %459 = math.tanh %458 : vector<8x64xf32>
    %460 = arith.mulf %455, %459 : vector<8x64xf32>
    %461 = vector.extract_strided_slice %444 {offsets = [0, 0], sizes = [8, 192], strides = [1, 1]} : vector<8x256xf32> to vector<8x192xf32>
    %462 = arith.negf %461 : vector<8x192xf32>
    %463 = math.exp %462 : vector<8x192xf32>
    %cst_138 = arith.constant 1.000000e+00 : f32
    %464 = vector.broadcast %cst_138 : f32 to vector<8x192xf32>
    %465 = arith.addf %464, %463 : vector<8x192xf32>
    %466 = arith.divf %464, %465 : vector<8x192xf32>
    %467 = vector.extract_strided_slice %444 {offsets = [0, 192], sizes = [8, 64], strides = [1, 1]} : vector<8x256xf32> to vector<8x64xf32>
    %468 = math.tanh %467 : vector<8x64xf32>
    %469 = vector.extract_strided_slice %466 {offsets = [0, 0], sizes = [8, 64], strides = [1, 1]} : vector<8x192xf32> to vector<8x64xf32>
    %470 = vector.extract_strided_slice %466 {offsets = [0, 64], sizes = [8, 64], strides = [1, 1]} : vector<8x192xf32> to vector<8x64xf32>
    %471 = vector.extract_strided_slice %466 {offsets = [0, 128], sizes = [8, 64], strides = [1, 1]} : vector<8x192xf32> to vector<8x64xf32>
    %472 = arith.mulf %470, %423 : vector<8x64xf32>
    %473 = arith.mulf %469, %468 : vector<8x64xf32>
    %474 = arith.addf %472, %473 : vector<8x64xf32>
    %475 = math.tanh %474 : vector<8x64xf32>
    %476 = arith.mulf %471, %475 : vector<8x64xf32>
    %477 = arith.index_cast %c8_i32 : i32 to index
    %c0_139 = arith.constant 0 : index
    %c0_140 = arith.constant 0 : index
    %478 = vector.load %arg15[%477, %c0_139, %c0_140] : memref<20x8x128xf32, #tpu.memory_space<vmem>>, vector<1x8x64xf32>
    %479 = vector.shape_cast %478 : vector<1x8x64xf32> to vector<8x64xf32>
    %480 = vector.shape_cast %460 : vector<8x64xf32> to vector<1x8x64xf32>
    tpu.vector_store %arg15[%477, %c0_139, %c0_140], %480 {strides = array<i32>} : memref<20x8x128xf32, #tpu.memory_space<vmem>>, vector<1x8x64xf32>,
    %481 = arith.index_cast %434 : i32 to index
    %c0_141 = arith.constant 0 : index
    %c64_142 = arith.constant 64 : index
    %482 = vector.load %arg15[%481, %c0_141, %c64_142] : memref<20x8x128xf32, #tpu.memory_space<vmem>>, vector<1x8x64xf32>
    %483 = vector.shape_cast %482 : vector<1x8x64xf32> to vector<8x64xf32>
    %484 = vector.shape_cast %476 : vector<8x64xf32> to vector<1x8x64xf32>
    tpu.vector_store %arg15[%481, %c0_141, %c64_142], %484 {strides = array<i32>} : memref<20x8x128xf32, #tpu.memory_space<vmem>>, vector<1x8x64xf32>,
    %c9_i32 = arith.constant 9 : i32
    %c19_i32_143 = arith.constant 19 : i32
    %485 = arith.subi %c19_i32_143, %c9_i32 : i32
    %486 = arith.index_cast %c9_i32 : i32 to index
    %c0_144 = arith.constant 0 : index
    %c0_145 = arith.constant 0 : index
    %487 = vector.load %arg16[%486, %c0_144, %c0_145] : memref<20x8x256xf32, #tpu.memory_space<vmem>>, vector<1x8x256xf32>
    %488 = vector.shape_cast %487 : vector<1x8x256xf32> to vector<8x256xf32>
    %cst_146 = arith.constant dense<0.000000e+00> : vector<8x256xf32>
    %489 = tpu.matmul %460, %23, %cst_146 {dimension_numbers = #tpu.dot_dimension_numbers<[1], [0], [0], [1], [0, 0, 1, 1], [], []>} : vector<8x64xf32>, vector<64x256xf32>, vector<8x256xf32> -> vector<8x256xf32>
    %490 = arith.addf %488, %489 : vector<8x256xf32>
    %491 = arith.index_cast %485 : i32 to index
    %c0_147 = arith.constant 0 : index
    %c0_148 = arith.constant 0 : index
    %492 = vector.load %arg17[%491, %c0_147, %c0_148] : memref<20x8x256xf32, #tpu.memory_space<vmem>>, vector<1x8x256xf32>
    %493 = vector.shape_cast %492 : vector<1x8x256xf32> to vector<8x256xf32>
    %cst_149 = arith.constant dense<0.000000e+00> : vector<8x256xf32>
    %494 = tpu.matmul %476, %24, %cst_149 {dimension_numbers = #tpu.dot_dimension_numbers<[1], [0], [0], [1], [0, 0, 1, 1], [], []>} : vector<8x64xf32>, vector<64x256xf32>, vector<8x256xf32> -> vector<8x256xf32>
    %495 = arith.addf %493, %494 : vector<8x256xf32>
    %496 = vector.extract_strided_slice %490 {offsets = [0, 0], sizes = [8, 192], strides = [1, 1]} : vector<8x256xf32> to vector<8x192xf32>
    %497 = arith.negf %496 : vector<8x192xf32>
    %498 = math.exp %497 : vector<8x192xf32>
    %cst_150 = arith.constant 1.000000e+00 : f32
    %499 = vector.broadcast %cst_150 : f32 to vector<8x192xf32>
    %500 = arith.addf %499, %498 : vector<8x192xf32>
    %501 = arith.divf %499, %500 : vector<8x192xf32>
    %502 = vector.extract_strided_slice %490 {offsets = [0, 192], sizes = [8, 64], strides = [1, 1]} : vector<8x256xf32> to vector<8x64xf32>
    %503 = math.tanh %502 : vector<8x64xf32>
    %504 = vector.extract_strided_slice %501 {offsets = [0, 0], sizes = [8, 64], strides = [1, 1]} : vector<8x192xf32> to vector<8x64xf32>
    %505 = vector.extract_strided_slice %501 {offsets = [0, 64], sizes = [8, 64], strides = [1, 1]} : vector<8x192xf32> to vector<8x64xf32>
    %506 = vector.extract_strided_slice %501 {offsets = [0, 128], sizes = [8, 64], strides = [1, 1]} : vector<8x192xf32> to vector<8x64xf32>
    %507 = arith.mulf %505, %458 : vector<8x64xf32>
    %508 = arith.mulf %504, %503 : vector<8x64xf32>
    %509 = arith.addf %507, %508 : vector<8x64xf32>
    %510 = math.tanh %509 : vector<8x64xf32>
    %511 = arith.mulf %506, %510 : vector<8x64xf32>
    %512 = vector.extract_strided_slice %495 {offsets = [0, 0], sizes = [8, 192], strides = [1, 1]} : vector<8x256xf32> to vector<8x192xf32>
    %513 = arith.negf %512 : vector<8x192xf32>
    %514 = math.exp %513 : vector<8x192xf32>
    %cst_151 = arith.constant 1.000000e+00 : f32
    %515 = vector.broadcast %cst_151 : f32 to vector<8x192xf32>
    %516 = arith.addf %515, %514 : vector<8x192xf32>
    %517 = arith.divf %515, %516 : vector<8x192xf32>
    %518 = vector.extract_strided_slice %495 {offsets = [0, 192], sizes = [8, 64], strides = [1, 1]} : vector<8x256xf32> to vector<8x64xf32>
    %519 = math.tanh %518 : vector<8x64xf32>
    %520 = vector.extract_strided_slice %517 {offsets = [0, 0], sizes = [8, 64], strides = [1, 1]} : vector<8x192xf32> to vector<8x64xf32>
    %521 = vector.extract_strided_slice %517 {offsets = [0, 64], sizes = [8, 64], strides = [1, 1]} : vector<8x192xf32> to vector<8x64xf32>
    %522 = vector.extract_strided_slice %517 {offsets = [0, 128], sizes = [8, 64], strides = [1, 1]} : vector<8x192xf32> to vector<8x64xf32>
    %523 = arith.mulf %521, %474 : vector<8x64xf32>
    %524 = arith.mulf %520, %519 : vector<8x64xf32>
    %525 = arith.addf %523, %524 : vector<8x64xf32>
    %526 = math.tanh %525 : vector<8x64xf32>
    %527 = arith.mulf %522, %526 : vector<8x64xf32>
    %528 = arith.index_cast %c9_i32 : i32 to index
    %c0_152 = arith.constant 0 : index
    %c0_153 = arith.constant 0 : index
    %529 = vector.load %arg15[%528, %c0_152, %c0_153] : memref<20x8x128xf32, #tpu.memory_space<vmem>>, vector<1x8x64xf32>
    %530 = vector.shape_cast %529 : vector<1x8x64xf32> to vector<8x64xf32>
    %531 = vector.shape_cast %511 : vector<8x64xf32> to vector<1x8x64xf32>
    tpu.vector_store %arg15[%528, %c0_152, %c0_153], %531 {strides = array<i32>} : memref<20x8x128xf32, #tpu.memory_space<vmem>>, vector<1x8x64xf32>,
    %532 = arith.index_cast %485 : i32 to index
    %c0_154 = arith.constant 0 : index
    %c64_155 = arith.constant 64 : index
    %533 = vector.load %arg15[%532, %c0_154, %c64_155] : memref<20x8x128xf32, #tpu.memory_space<vmem>>, vector<1x8x64xf32>
    %534 = vector.shape_cast %533 : vector<1x8x64xf32> to vector<8x64xf32>
    %535 = vector.shape_cast %527 : vector<8x64xf32> to vector<1x8x64xf32>
    tpu.vector_store %arg15[%532, %c0_154, %c64_155], %535 {strides = array<i32>} : memref<20x8x128xf32, #tpu.memory_space<vmem>>, vector<1x8x64xf32>,
    %c10_i32 = arith.constant 10 : i32
    %c19_i32_156 = arith.constant 19 : i32
    %536 = arith.subi %c19_i32_156, %c10_i32 : i32
    %537 = arith.index_cast %c10_i32 : i32 to index
    %c0_157 = arith.constant 0 : index
    %c0_158 = arith.constant 0 : index
    %538 = vector.load %arg16[%537, %c0_157, %c0_158] : memref<20x8x256xf32, #tpu.memory_space<vmem>>, vector<1x8x256xf32>
    %539 = vector.shape_cast %538 : vector<1x8x256xf32> to vector<8x256xf32>
    %cst_159 = arith.constant dense<0.000000e+00> : vector<8x256xf32>
    %540 = tpu.matmul %511, %23, %cst_159 {dimension_numbers = #tpu.dot_dimension_numbers<[1], [0], [0], [1], [0, 0, 1, 1], [], []>} : vector<8x64xf32>, vector<64x256xf32>, vector<8x256xf32> -> vector<8x256xf32>
    %541 = arith.addf %539, %540 : vector<8x256xf32>
    %542 = arith.index_cast %536 : i32 to index
    %c0_160 = arith.constant 0 : index
    %c0_161 = arith.constant 0 : index
    %543 = vector.load %arg17[%542, %c0_160, %c0_161] : memref<20x8x256xf32, #tpu.memory_space<vmem>>, vector<1x8x256xf32>
    %544 = vector.shape_cast %543 : vector<1x8x256xf32> to vector<8x256xf32>
    %cst_162 = arith.constant dense<0.000000e+00> : vector<8x256xf32>
    %545 = tpu.matmul %527, %24, %cst_162 {dimension_numbers = #tpu.dot_dimension_numbers<[1], [0], [0], [1], [0, 0, 1, 1], [], []>} : vector<8x64xf32>, vector<64x256xf32>, vector<8x256xf32> -> vector<8x256xf32>
    %546 = arith.addf %544, %545 : vector<8x256xf32>
    %547 = vector.extract_strided_slice %541 {offsets = [0, 0], sizes = [8, 192], strides = [1, 1]} : vector<8x256xf32> to vector<8x192xf32>
    %548 = arith.negf %547 : vector<8x192xf32>
    %549 = math.exp %548 : vector<8x192xf32>
    %cst_163 = arith.constant 1.000000e+00 : f32
    %550 = vector.broadcast %cst_163 : f32 to vector<8x192xf32>
    %551 = arith.addf %550, %549 : vector<8x192xf32>
    %552 = arith.divf %550, %551 : vector<8x192xf32>
    %553 = vector.extract_strided_slice %541 {offsets = [0, 192], sizes = [8, 64], strides = [1, 1]} : vector<8x256xf32> to vector<8x64xf32>
    %554 = math.tanh %553 : vector<8x64xf32>
    %555 = vector.extract_strided_slice %552 {offsets = [0, 0], sizes = [8, 64], strides = [1, 1]} : vector<8x192xf32> to vector<8x64xf32>
    %556 = vector.extract_strided_slice %552 {offsets = [0, 64], sizes = [8, 64], strides = [1, 1]} : vector<8x192xf32> to vector<8x64xf32>
    %557 = vector.extract_strided_slice %552 {offsets = [0, 128], sizes = [8, 64], strides = [1, 1]} : vector<8x192xf32> to vector<8x64xf32>
    %558 = arith.mulf %556, %509 : vector<8x64xf32>
    %559 = arith.mulf %555, %554 : vector<8x64xf32>
    %560 = arith.addf %558, %559 : vector<8x64xf32>
    %561 = math.tanh %560 : vector<8x64xf32>
    %562 = arith.mulf %557, %561 : vector<8x64xf32>
    %563 = vector.extract_strided_slice %546 {offsets = [0, 0], sizes = [8, 192], strides = [1, 1]} : vector<8x256xf32> to vector<8x192xf32>
    %564 = arith.negf %563 : vector<8x192xf32>
    %565 = math.exp %564 : vector<8x192xf32>
    %cst_164 = arith.constant 1.000000e+00 : f32
    %566 = vector.broadcast %cst_164 : f32 to vector<8x192xf32>
    %567 = arith.addf %566, %565 : vector<8x192xf32>
    %568 = arith.divf %566, %567 : vector<8x192xf32>
    %569 = vector.extract_strided_slice %546 {offsets = [0, 192], sizes = [8, 64], strides = [1, 1]} : vector<8x256xf32> to vector<8x64xf32>
    %570 = math.tanh %569 : vector<8x64xf32>
    %571 = vector.extract_strided_slice %568 {offsets = [0, 0], sizes = [8, 64], strides = [1, 1]} : vector<8x192xf32> to vector<8x64xf32>
    %572 = vector.extract_strided_slice %568 {offsets = [0, 64], sizes = [8, 64], strides = [1, 1]} : vector<8x192xf32> to vector<8x64xf32>
    %573 = vector.extract_strided_slice %568 {offsets = [0, 128], sizes = [8, 64], strides = [1, 1]} : vector<8x192xf32> to vector<8x64xf32>
    %574 = arith.mulf %572, %525 : vector<8x64xf32>
    %575 = arith.mulf %571, %570 : vector<8x64xf32>
    %576 = arith.addf %574, %575 : vector<8x64xf32>
    %577 = math.tanh %576 : vector<8x64xf32>
    %578 = arith.mulf %573, %577 : vector<8x64xf32>
    %579 = arith.index_cast %c10_i32 : i32 to index
    %c0_165 = arith.constant 0 : index
    %c0_166 = arith.constant 0 : index
    %580 = vector.load %arg15[%579, %c0_165, %c0_166] : memref<20x8x128xf32, #tpu.memory_space<vmem>>, vector<1x8x64xf32>
    %581 = vector.shape_cast %580 : vector<1x8x64xf32> to vector<8x64xf32>
    %582 = vector.shape_cast %562 : vector<8x64xf32> to vector<1x8x64xf32>
    tpu.vector_store %arg15[%579, %c0_165, %c0_166], %582 {strides = array<i32>} : memref<20x8x128xf32, #tpu.memory_space<vmem>>, vector<1x8x64xf32>,
    %583 = arith.index_cast %536 : i32 to index
    %c0_167 = arith.constant 0 : index
    %c64_168 = arith.constant 64 : index
    %584 = vector.load %arg15[%583, %c0_167, %c64_168] : memref<20x8x128xf32, #tpu.memory_space<vmem>>, vector<1x8x64xf32>
    %585 = vector.shape_cast %584 : vector<1x8x64xf32> to vector<8x64xf32>
    %586 = vector.shape_cast %578 : vector<8x64xf32> to vector<1x8x64xf32>
    tpu.vector_store %arg15[%583, %c0_167, %c64_168], %586 {strides = array<i32>} : memref<20x8x128xf32, #tpu.memory_space<vmem>>, vector<1x8x64xf32>,
    %c11_i32 = arith.constant 11 : i32
    %c19_i32_169 = arith.constant 19 : i32
    %587 = arith.subi %c19_i32_169, %c11_i32 : i32
    %588 = arith.index_cast %c11_i32 : i32 to index
    %c0_170 = arith.constant 0 : index
    %c0_171 = arith.constant 0 : index
    %589 = vector.load %arg16[%588, %c0_170, %c0_171] : memref<20x8x256xf32, #tpu.memory_space<vmem>>, vector<1x8x256xf32>
    %590 = vector.shape_cast %589 : vector<1x8x256xf32> to vector<8x256xf32>
    %cst_172 = arith.constant dense<0.000000e+00> : vector<8x256xf32>
    %591 = tpu.matmul %562, %23, %cst_172 {dimension_numbers = #tpu.dot_dimension_numbers<[1], [0], [0], [1], [0, 0, 1, 1], [], []>} : vector<8x64xf32>, vector<64x256xf32>, vector<8x256xf32> -> vector<8x256xf32>
    %592 = arith.addf %590, %591 : vector<8x256xf32>
    %593 = arith.index_cast %587 : i32 to index
    %c0_173 = arith.constant 0 : index
    %c0_174 = arith.constant 0 : index
    %594 = vector.load %arg17[%593, %c0_173, %c0_174] : memref<20x8x256xf32, #tpu.memory_space<vmem>>, vector<1x8x256xf32>
    %595 = vector.shape_cast %594 : vector<1x8x256xf32> to vector<8x256xf32>
    %cst_175 = arith.constant dense<0.000000e+00> : vector<8x256xf32>
    %596 = tpu.matmul %578, %24, %cst_175 {dimension_numbers = #tpu.dot_dimension_numbers<[1], [0], [0], [1], [0, 0, 1, 1], [], []>} : vector<8x64xf32>, vector<64x256xf32>, vector<8x256xf32> -> vector<8x256xf32>
    %597 = arith.addf %595, %596 : vector<8x256xf32>
    %598 = vector.extract_strided_slice %592 {offsets = [0, 0], sizes = [8, 192], strides = [1, 1]} : vector<8x256xf32> to vector<8x192xf32>
    %599 = arith.negf %598 : vector<8x192xf32>
    %600 = math.exp %599 : vector<8x192xf32>
    %cst_176 = arith.constant 1.000000e+00 : f32
    %601 = vector.broadcast %cst_176 : f32 to vector<8x192xf32>
    %602 = arith.addf %601, %600 : vector<8x192xf32>
    %603 = arith.divf %601, %602 : vector<8x192xf32>
    %604 = vector.extract_strided_slice %592 {offsets = [0, 192], sizes = [8, 64], strides = [1, 1]} : vector<8x256xf32> to vector<8x64xf32>
    %605 = math.tanh %604 : vector<8x64xf32>
    %606 = vector.extract_strided_slice %603 {offsets = [0, 0], sizes = [8, 64], strides = [1, 1]} : vector<8x192xf32> to vector<8x64xf32>
    %607 = vector.extract_strided_slice %603 {offsets = [0, 64], sizes = [8, 64], strides = [1, 1]} : vector<8x192xf32> to vector<8x64xf32>
    %608 = vector.extract_strided_slice %603 {offsets = [0, 128], sizes = [8, 64], strides = [1, 1]} : vector<8x192xf32> to vector<8x64xf32>
    %609 = arith.mulf %607, %560 : vector<8x64xf32>
    %610 = arith.mulf %606, %605 : vector<8x64xf32>
    %611 = arith.addf %609, %610 : vector<8x64xf32>
    %612 = math.tanh %611 : vector<8x64xf32>
    %613 = arith.mulf %608, %612 : vector<8x64xf32>
    %614 = vector.extract_strided_slice %597 {offsets = [0, 0], sizes = [8, 192], strides = [1, 1]} : vector<8x256xf32> to vector<8x192xf32>
    %615 = arith.negf %614 : vector<8x192xf32>
    %616 = math.exp %615 : vector<8x192xf32>
    %cst_177 = arith.constant 1.000000e+00 : f32
    %617 = vector.broadcast %cst_177 : f32 to vector<8x192xf32>
    %618 = arith.addf %617, %616 : vector<8x192xf32>
    %619 = arith.divf %617, %618 : vector<8x192xf32>
    %620 = vector.extract_strided_slice %597 {offsets = [0, 192], sizes = [8, 64], strides = [1, 1]} : vector<8x256xf32> to vector<8x64xf32>
    %621 = math.tanh %620 : vector<8x64xf32>
    %622 = vector.extract_strided_slice %619 {offsets = [0, 0], sizes = [8, 64], strides = [1, 1]} : vector<8x192xf32> to vector<8x64xf32>
    %623 = vector.extract_strided_slice %619 {offsets = [0, 64], sizes = [8, 64], strides = [1, 1]} : vector<8x192xf32> to vector<8x64xf32>
    %624 = vector.extract_strided_slice %619 {offsets = [0, 128], sizes = [8, 64], strides = [1, 1]} : vector<8x192xf32> to vector<8x64xf32>
    %625 = arith.mulf %623, %576 : vector<8x64xf32>
    %626 = arith.mulf %622, %621 : vector<8x64xf32>
    %627 = arith.addf %625, %626 : vector<8x64xf32>
    %628 = math.tanh %627 : vector<8x64xf32>
    %629 = arith.mulf %624, %628 : vector<8x64xf32>
    %630 = arith.index_cast %c11_i32 : i32 to index
    %c0_178 = arith.constant 0 : index
    %c0_179 = arith.constant 0 : index
    %631 = vector.load %arg15[%630, %c0_178, %c0_179] : memref<20x8x128xf32, #tpu.memory_space<vmem>>, vector<1x8x64xf32>
    %632 = vector.shape_cast %631 : vector<1x8x64xf32> to vector<8x64xf32>
    %633 = vector.shape_cast %613 : vector<8x64xf32> to vector<1x8x64xf32>
    tpu.vector_store %arg15[%630, %c0_178, %c0_179], %633 {strides = array<i32>} : memref<20x8x128xf32, #tpu.memory_space<vmem>>, vector<1x8x64xf32>,
    %634 = arith.index_cast %587 : i32 to index
    %c0_180 = arith.constant 0 : index
    %c64_181 = arith.constant 64 : index
    %635 = vector.load %arg15[%634, %c0_180, %c64_181] : memref<20x8x128xf32, #tpu.memory_space<vmem>>, vector<1x8x64xf32>
    %636 = vector.shape_cast %635 : vector<1x8x64xf32> to vector<8x64xf32>
    %637 = vector.shape_cast %629 : vector<8x64xf32> to vector<1x8x64xf32>
    tpu.vector_store %arg15[%634, %c0_180, %c64_181], %637 {strides = array<i32>} : memref<20x8x128xf32, #tpu.memory_space<vmem>>, vector<1x8x64xf32>,
    %c12_i32 = arith.constant 12 : i32
    %c19_i32_182 = arith.constant 19 : i32
    %638 = arith.subi %c19_i32_182, %c12_i32 : i32
    %639 = arith.index_cast %c12_i32 : i32 to index
    %c0_183 = arith.constant 0 : index
    %c0_184 = arith.constant 0 : index
    %640 = vector.load %arg16[%639, %c0_183, %c0_184] : memref<20x8x256xf32, #tpu.memory_space<vmem>>, vector<1x8x256xf32>
    %641 = vector.shape_cast %640 : vector<1x8x256xf32> to vector<8x256xf32>
    %cst_185 = arith.constant dense<0.000000e+00> : vector<8x256xf32>
    %642 = tpu.matmul %613, %23, %cst_185 {dimension_numbers = #tpu.dot_dimension_numbers<[1], [0], [0], [1], [0, 0, 1, 1], [], []>} : vector<8x64xf32>, vector<64x256xf32>, vector<8x256xf32> -> vector<8x256xf32>
    %643 = arith.addf %641, %642 : vector<8x256xf32>
    %644 = arith.index_cast %638 : i32 to index
    %c0_186 = arith.constant 0 : index
    %c0_187 = arith.constant 0 : index
    %645 = vector.load %arg17[%644, %c0_186, %c0_187] : memref<20x8x256xf32, #tpu.memory_space<vmem>>, vector<1x8x256xf32>
    %646 = vector.shape_cast %645 : vector<1x8x256xf32> to vector<8x256xf32>
    %cst_188 = arith.constant dense<0.000000e+00> : vector<8x256xf32>
    %647 = tpu.matmul %629, %24, %cst_188 {dimension_numbers = #tpu.dot_dimension_numbers<[1], [0], [0], [1], [0, 0, 1, 1], [], []>} : vector<8x64xf32>, vector<64x256xf32>, vector<8x256xf32> -> vector<8x256xf32>
    %648 = arith.addf %646, %647 : vector<8x256xf32>
    %649 = vector.extract_strided_slice %643 {offsets = [0, 0], sizes = [8, 192], strides = [1, 1]} : vector<8x256xf32> to vector<8x192xf32>
    %650 = arith.negf %649 : vector<8x192xf32>
    %651 = math.exp %650 : vector<8x192xf32>
    %cst_189 = arith.constant 1.000000e+00 : f32
    %652 = vector.broadcast %cst_189 : f32 to vector<8x192xf32>
    %653 = arith.addf %652, %651 : vector<8x192xf32>
    %654 = arith.divf %652, %653 : vector<8x192xf32>
    %655 = vector.extract_strided_slice %643 {offsets = [0, 192], sizes = [8, 64], strides = [1, 1]} : vector<8x256xf32> to vector<8x64xf32>
    %656 = math.tanh %655 : vector<8x64xf32>
    %657 = vector.extract_strided_slice %654 {offsets = [0, 0], sizes = [8, 64], strides = [1, 1]} : vector<8x192xf32> to vector<8x64xf32>
    %658 = vector.extract_strided_slice %654 {offsets = [0, 64], sizes = [8, 64], strides = [1, 1]} : vector<8x192xf32> to vector<8x64xf32>
    %659 = vector.extract_strided_slice %654 {offsets = [0, 128], sizes = [8, 64], strides = [1, 1]} : vector<8x192xf32> to vector<8x64xf32>
    %660 = arith.mulf %658, %611 : vector<8x64xf32>
    %661 = arith.mulf %657, %656 : vector<8x64xf32>
    %662 = arith.addf %660, %661 : vector<8x64xf32>
    %663 = math.tanh %662 : vector<8x64xf32>
    %664 = arith.mulf %659, %663 : vector<8x64xf32>
    %665 = vector.extract_strided_slice %648 {offsets = [0, 0], sizes = [8, 192], strides = [1, 1]} : vector<8x256xf32> to vector<8x192xf32>
    %666 = arith.negf %665 : vector<8x192xf32>
    %667 = math.exp %666 : vector<8x192xf32>
    %cst_190 = arith.constant 1.000000e+00 : f32
    %668 = vector.broadcast %cst_190 : f32 to vector<8x192xf32>
    %669 = arith.addf %668, %667 : vector<8x192xf32>
    %670 = arith.divf %668, %669 : vector<8x192xf32>
    %671 = vector.extract_strided_slice %648 {offsets = [0, 192], sizes = [8, 64], strides = [1, 1]} : vector<8x256xf32> to vector<8x64xf32>
    %672 = math.tanh %671 : vector<8x64xf32>
    %673 = vector.extract_strided_slice %670 {offsets = [0, 0], sizes = [8, 64], strides = [1, 1]} : vector<8x192xf32> to vector<8x64xf32>
    %674 = vector.extract_strided_slice %670 {offsets = [0, 64], sizes = [8, 64], strides = [1, 1]} : vector<8x192xf32> to vector<8x64xf32>
    %675 = vector.extract_strided_slice %670 {offsets = [0, 128], sizes = [8, 64], strides = [1, 1]} : vector<8x192xf32> to vector<8x64xf32>
    %676 = arith.mulf %674, %627 : vector<8x64xf32>
    %677 = arith.mulf %673, %672 : vector<8x64xf32>
    %678 = arith.addf %676, %677 : vector<8x64xf32>
    %679 = math.tanh %678 : vector<8x64xf32>
    %680 = arith.mulf %675, %679 : vector<8x64xf32>
    %681 = arith.index_cast %c12_i32 : i32 to index
    %c0_191 = arith.constant 0 : index
    %c0_192 = arith.constant 0 : index
    %682 = vector.load %arg15[%681, %c0_191, %c0_192] : memref<20x8x128xf32, #tpu.memory_space<vmem>>, vector<1x8x64xf32>
    %683 = vector.shape_cast %682 : vector<1x8x64xf32> to vector<8x64xf32>
    %684 = vector.shape_cast %664 : vector<8x64xf32> to vector<1x8x64xf32>
    tpu.vector_store %arg15[%681, %c0_191, %c0_192], %684 {strides = array<i32>} : memref<20x8x128xf32, #tpu.memory_space<vmem>>, vector<1x8x64xf32>,
    %685 = arith.index_cast %638 : i32 to index
    %c0_193 = arith.constant 0 : index
    %c64_194 = arith.constant 64 : index
    %686 = vector.load %arg15[%685, %c0_193, %c64_194] : memref<20x8x128xf32, #tpu.memory_space<vmem>>, vector<1x8x64xf32>
    %687 = vector.shape_cast %686 : vector<1x8x64xf32> to vector<8x64xf32>
    %688 = vector.shape_cast %680 : vector<8x64xf32> to vector<1x8x64xf32>
    tpu.vector_store %arg15[%685, %c0_193, %c64_194], %688 {strides = array<i32>} : memref<20x8x128xf32, #tpu.memory_space<vmem>>, vector<1x8x64xf32>,
    %c13_i32 = arith.constant 13 : i32
    %c19_i32_195 = arith.constant 19 : i32
    %689 = arith.subi %c19_i32_195, %c13_i32 : i32
    %690 = arith.index_cast %c13_i32 : i32 to index
    %c0_196 = arith.constant 0 : index
    %c0_197 = arith.constant 0 : index
    %691 = vector.load %arg16[%690, %c0_196, %c0_197] : memref<20x8x256xf32, #tpu.memory_space<vmem>>, vector<1x8x256xf32>
    %692 = vector.shape_cast %691 : vector<1x8x256xf32> to vector<8x256xf32>
    %cst_198 = arith.constant dense<0.000000e+00> : vector<8x256xf32>
    %693 = tpu.matmul %664, %23, %cst_198 {dimension_numbers = #tpu.dot_dimension_numbers<[1], [0], [0], [1], [0, 0, 1, 1], [], []>} : vector<8x64xf32>, vector<64x256xf32>, vector<8x256xf32> -> vector<8x256xf32>
    %694 = arith.addf %692, %693 : vector<8x256xf32>
    %695 = arith.index_cast %689 : i32 to index
    %c0_199 = arith.constant 0 : index
    %c0_200 = arith.constant 0 : index
    %696 = vector.load %arg17[%695, %c0_199, %c0_200] : memref<20x8x256xf32, #tpu.memory_space<vmem>>, vector<1x8x256xf32>
    %697 = vector.shape_cast %696 : vector<1x8x256xf32> to vector<8x256xf32>
    %cst_201 = arith.constant dense<0.000000e+00> : vector<8x256xf32>
    %698 = tpu.matmul %680, %24, %cst_201 {dimension_numbers = #tpu.dot_dimension_numbers<[1], [0], [0], [1], [0, 0, 1, 1], [], []>} : vector<8x64xf32>, vector<64x256xf32>, vector<8x256xf32> -> vector<8x256xf32>
    %699 = arith.addf %697, %698 : vector<8x256xf32>
    %700 = vector.extract_strided_slice %694 {offsets = [0, 0], sizes = [8, 192], strides = [1, 1]} : vector<8x256xf32> to vector<8x192xf32>
    %701 = arith.negf %700 : vector<8x192xf32>
    %702 = math.exp %701 : vector<8x192xf32>
    %cst_202 = arith.constant 1.000000e+00 : f32
    %703 = vector.broadcast %cst_202 : f32 to vector<8x192xf32>
    %704 = arith.addf %703, %702 : vector<8x192xf32>
    %705 = arith.divf %703, %704 : vector<8x192xf32>
    %706 = vector.extract_strided_slice %694 {offsets = [0, 192], sizes = [8, 64], strides = [1, 1]} : vector<8x256xf32> to vector<8x64xf32>
    %707 = math.tanh %706 : vector<8x64xf32>
    %708 = vector.extract_strided_slice %705 {offsets = [0, 0], sizes = [8, 64], strides = [1, 1]} : vector<8x192xf32> to vector<8x64xf32>
    %709 = vector.extract_strided_slice %705 {offsets = [0, 64], sizes = [8, 64], strides = [1, 1]} : vector<8x192xf32> to vector<8x64xf32>
    %710 = vector.extract_strided_slice %705 {offsets = [0, 128], sizes = [8, 64], strides = [1, 1]} : vector<8x192xf32> to vector<8x64xf32>
    %711 = arith.mulf %709, %662 : vector<8x64xf32>
    %712 = arith.mulf %708, %707 : vector<8x64xf32>
    %713 = arith.addf %711, %712 : vector<8x64xf32>
    %714 = math.tanh %713 : vector<8x64xf32>
    %715 = arith.mulf %710, %714 : vector<8x64xf32>
    %716 = vector.extract_strided_slice %699 {offsets = [0, 0], sizes = [8, 192], strides = [1, 1]} : vector<8x256xf32> to vector<8x192xf32>
    %717 = arith.negf %716 : vector<8x192xf32>
    %718 = math.exp %717 : vector<8x192xf32>
    %cst_203 = arith.constant 1.000000e+00 : f32
    %719 = vector.broadcast %cst_203 : f32 to vector<8x192xf32>
    %720 = arith.addf %719, %718 : vector<8x192xf32>
    %721 = arith.divf %719, %720 : vector<8x192xf32>
    %722 = vector.extract_strided_slice %699 {offsets = [0, 192], sizes = [8, 64], strides = [1, 1]} : vector<8x256xf32> to vector<8x64xf32>
    %723 = math.tanh %722 : vector<8x64xf32>
    %724 = vector.extract_strided_slice %721 {offsets = [0, 0], sizes = [8, 64], strides = [1, 1]} : vector<8x192xf32> to vector<8x64xf32>
    %725 = vector.extract_strided_slice %721 {offsets = [0, 64], sizes = [8, 64], strides = [1, 1]} : vector<8x192xf32> to vector<8x64xf32>
    %726 = vector.extract_strided_slice %721 {offsets = [0, 128], sizes = [8, 64], strides = [1, 1]} : vector<8x192xf32> to vector<8x64xf32>
    %727 = arith.mulf %725, %678 : vector<8x64xf32>
    %728 = arith.mulf %724, %723 : vector<8x64xf32>
    %729 = arith.addf %727, %728 : vector<8x64xf32>
    %730 = math.tanh %729 : vector<8x64xf32>
    %731 = arith.mulf %726, %730 : vector<8x64xf32>
    %732 = arith.index_cast %c13_i32 : i32 to index
    %c0_204 = arith.constant 0 : index
    %c0_205 = arith.constant 0 : index
    %733 = vector.load %arg15[%732, %c0_204, %c0_205] : memref<20x8x128xf32, #tpu.memory_space<vmem>>, vector<1x8x64xf32>
    %734 = vector.shape_cast %733 : vector<1x8x64xf32> to vector<8x64xf32>
    %735 = vector.shape_cast %715 : vector<8x64xf32> to vector<1x8x64xf32>
    tpu.vector_store %arg15[%732, %c0_204, %c0_205], %735 {strides = array<i32>} : memref<20x8x128xf32, #tpu.memory_space<vmem>>, vector<1x8x64xf32>,
    %736 = arith.index_cast %689 : i32 to index
    %c0_206 = arith.constant 0 : index
    %c64_207 = arith.constant 64 : index
    %737 = vector.load %arg15[%736, %c0_206, %c64_207] : memref<20x8x128xf32, #tpu.memory_space<vmem>>, vector<1x8x64xf32>
    %738 = vector.shape_cast %737 : vector<1x8x64xf32> to vector<8x64xf32>
    %739 = vector.shape_cast %731 : vector<8x64xf32> to vector<1x8x64xf32>
    tpu.vector_store %arg15[%736, %c0_206, %c64_207], %739 {strides = array<i32>} : memref<20x8x128xf32, #tpu.memory_space<vmem>>, vector<1x8x64xf32>,
    %c14_i32 = arith.constant 14 : i32
    %c19_i32_208 = arith.constant 19 : i32
    %740 = arith.subi %c19_i32_208, %c14_i32 : i32
    %741 = arith.index_cast %c14_i32 : i32 to index
    %c0_209 = arith.constant 0 : index
    %c0_210 = arith.constant 0 : index
    %742 = vector.load %arg16[%741, %c0_209, %c0_210] : memref<20x8x256xf32, #tpu.memory_space<vmem>>, vector<1x8x256xf32>
    %743 = vector.shape_cast %742 : vector<1x8x256xf32> to vector<8x256xf32>
    %cst_211 = arith.constant dense<0.000000e+00> : vector<8x256xf32>
    %744 = tpu.matmul %715, %23, %cst_211 {dimension_numbers = #tpu.dot_dimension_numbers<[1], [0], [0], [1], [0, 0, 1, 1], [], []>} : vector<8x64xf32>, vector<64x256xf32>, vector<8x256xf32> -> vector<8x256xf32>
    %745 = arith.addf %743, %744 : vector<8x256xf32>
    %746 = arith.index_cast %740 : i32 to index
    %c0_212 = arith.constant 0 : index
    %c0_213 = arith.constant 0 : index
    %747 = vector.load %arg17[%746, %c0_212, %c0_213] : memref<20x8x256xf32, #tpu.memory_space<vmem>>, vector<1x8x256xf32>
    %748 = vector.shape_cast %747 : vector<1x8x256xf32> to vector<8x256xf32>
    %cst_214 = arith.constant dense<0.000000e+00> : vector<8x256xf32>
    %749 = tpu.matmul %731, %24, %cst_214 {dimension_numbers = #tpu.dot_dimension_numbers<[1], [0], [0], [1], [0, 0, 1, 1], [], []>} : vector<8x64xf32>, vector<64x256xf32>, vector<8x256xf32> -> vector<8x256xf32>
    %750 = arith.addf %748, %749 : vector<8x256xf32>
    %751 = vector.extract_strided_slice %745 {offsets = [0, 0], sizes = [8, 192], strides = [1, 1]} : vector<8x256xf32> to vector<8x192xf32>
    %752 = arith.negf %751 : vector<8x192xf32>
    %753 = math.exp %752 : vector<8x192xf32>
    %cst_215 = arith.constant 1.000000e+00 : f32
    %754 = vector.broadcast %cst_215 : f32 to vector<8x192xf32>
    %755 = arith.addf %754, %753 : vector<8x192xf32>
    %756 = arith.divf %754, %755 : vector<8x192xf32>
    %757 = vector.extract_strided_slice %745 {offsets = [0, 192], sizes = [8, 64], strides = [1, 1]} : vector<8x256xf32> to vector<8x64xf32>
    %758 = math.tanh %757 : vector<8x64xf32>
    %759 = vector.extract_strided_slice %756 {offsets = [0, 0], sizes = [8, 64], strides = [1, 1]} : vector<8x192xf32> to vector<8x64xf32>
    %760 = vector.extract_strided_slice %756 {offsets = [0, 64], sizes = [8, 64], strides = [1, 1]} : vector<8x192xf32> to vector<8x64xf32>
    %761 = vector.extract_strided_slice %756 {offsets = [0, 128], sizes = [8, 64], strides = [1, 1]} : vector<8x192xf32> to vector<8x64xf32>
    %762 = arith.mulf %760, %713 : vector<8x64xf32>
    %763 = arith.mulf %759, %758 : vector<8x64xf32>
    %764 = arith.addf %762, %763 : vector<8x64xf32>
    %765 = math.tanh %764 : vector<8x64xf32>
    %766 = arith.mulf %761, %765 : vector<8x64xf32>
    %767 = vector.extract_strided_slice %750 {offsets = [0, 0], sizes = [8, 192], strides = [1, 1]} : vector<8x256xf32> to vector<8x192xf32>
    %768 = arith.negf %767 : vector<8x192xf32>
    %769 = math.exp %768 : vector<8x192xf32>
    %cst_216 = arith.constant 1.000000e+00 : f32
    %770 = vector.broadcast %cst_216 : f32 to vector<8x192xf32>
    %771 = arith.addf %770, %769 : vector<8x192xf32>
    %772 = arith.divf %770, %771 : vector<8x192xf32>
    %773 = vector.extract_strided_slice %750 {offsets = [0, 192], sizes = [8, 64], strides = [1, 1]} : vector<8x256xf32> to vector<8x64xf32>
    %774 = math.tanh %773 : vector<8x64xf32>
    %775 = vector.extract_strided_slice %772 {offsets = [0, 0], sizes = [8, 64], strides = [1, 1]} : vector<8x192xf32> to vector<8x64xf32>
    %776 = vector.extract_strided_slice %772 {offsets = [0, 64], sizes = [8, 64], strides = [1, 1]} : vector<8x192xf32> to vector<8x64xf32>
    %777 = vector.extract_strided_slice %772 {offsets = [0, 128], sizes = [8, 64], strides = [1, 1]} : vector<8x192xf32> to vector<8x64xf32>
    %778 = arith.mulf %776, %729 : vector<8x64xf32>
    %779 = arith.mulf %775, %774 : vector<8x64xf32>
    %780 = arith.addf %778, %779 : vector<8x64xf32>
    %781 = math.tanh %780 : vector<8x64xf32>
    %782 = arith.mulf %777, %781 : vector<8x64xf32>
    %783 = arith.index_cast %c14_i32 : i32 to index
    %c0_217 = arith.constant 0 : index
    %c0_218 = arith.constant 0 : index
    %784 = vector.load %arg15[%783, %c0_217, %c0_218] : memref<20x8x128xf32, #tpu.memory_space<vmem>>, vector<1x8x64xf32>
    %785 = vector.shape_cast %784 : vector<1x8x64xf32> to vector<8x64xf32>
    %786 = vector.shape_cast %766 : vector<8x64xf32> to vector<1x8x64xf32>
    tpu.vector_store %arg15[%783, %c0_217, %c0_218], %786 {strides = array<i32>} : memref<20x8x128xf32, #tpu.memory_space<vmem>>, vector<1x8x64xf32>,
    %787 = arith.index_cast %740 : i32 to index
    %c0_219 = arith.constant 0 : index
    %c64_220 = arith.constant 64 : index
    %788 = vector.load %arg15[%787, %c0_219, %c64_220] : memref<20x8x128xf32, #tpu.memory_space<vmem>>, vector<1x8x64xf32>
    %789 = vector.shape_cast %788 : vector<1x8x64xf32> to vector<8x64xf32>
    %790 = vector.shape_cast %782 : vector<8x64xf32> to vector<1x8x64xf32>
    tpu.vector_store %arg15[%787, %c0_219, %c64_220], %790 {strides = array<i32>} : memref<20x8x128xf32, #tpu.memory_space<vmem>>, vector<1x8x64xf32>,
    %c15_i32 = arith.constant 15 : i32
    %c19_i32_221 = arith.constant 19 : i32
    %791 = arith.subi %c19_i32_221, %c15_i32 : i32
    %792 = arith.index_cast %c15_i32 : i32 to index
    %c0_222 = arith.constant 0 : index
    %c0_223 = arith.constant 0 : index
    %793 = vector.load %arg16[%792, %c0_222, %c0_223] : memref<20x8x256xf32, #tpu.memory_space<vmem>>, vector<1x8x256xf32>
    %794 = vector.shape_cast %793 : vector<1x8x256xf32> to vector<8x256xf32>
    %cst_224 = arith.constant dense<0.000000e+00> : vector<8x256xf32>
    %795 = tpu.matmul %766, %23, %cst_224 {dimension_numbers = #tpu.dot_dimension_numbers<[1], [0], [0], [1], [0, 0, 1, 1], [], []>} : vector<8x64xf32>, vector<64x256xf32>, vector<8x256xf32> -> vector<8x256xf32>
    %796 = arith.addf %794, %795 : vector<8x256xf32>
    %797 = arith.index_cast %791 : i32 to index
    %c0_225 = arith.constant 0 : index
    %c0_226 = arith.constant 0 : index
    %798 = vector.load %arg17[%797, %c0_225, %c0_226] : memref<20x8x256xf32, #tpu.memory_space<vmem>>, vector<1x8x256xf32>
    %799 = vector.shape_cast %798 : vector<1x8x256xf32> to vector<8x256xf32>
    %cst_227 = arith.constant dense<0.000000e+00> : vector<8x256xf32>
    %800 = tpu.matmul %782, %24, %cst_227 {dimension_numbers = #tpu.dot_dimension_numbers<[1], [0], [0], [1], [0, 0, 1, 1], [], []>} : vector<8x64xf32>, vector<64x256xf32>, vector<8x256xf32> -> vector<8x256xf32>
    %801 = arith.addf %799, %800 : vector<8x256xf32>
    %802 = vector.extract_strided_slice %796 {offsets = [0, 0], sizes = [8, 192], strides = [1, 1]} : vector<8x256xf32> to vector<8x192xf32>
    %803 = arith.negf %802 : vector<8x192xf32>
    %804 = math.exp %803 : vector<8x192xf32>
    %cst_228 = arith.constant 1.000000e+00 : f32
    %805 = vector.broadcast %cst_228 : f32 to vector<8x192xf32>
    %806 = arith.addf %805, %804 : vector<8x192xf32>
    %807 = arith.divf %805, %806 : vector<8x192xf32>
    %808 = vector.extract_strided_slice %796 {offsets = [0, 192], sizes = [8, 64], strides = [1, 1]} : vector<8x256xf32> to vector<8x64xf32>
    %809 = math.tanh %808 : vector<8x64xf32>
    %810 = vector.extract_strided_slice %807 {offsets = [0, 0], sizes = [8, 64], strides = [1, 1]} : vector<8x192xf32> to vector<8x64xf32>
    %811 = vector.extract_strided_slice %807 {offsets = [0, 64], sizes = [8, 64], strides = [1, 1]} : vector<8x192xf32> to vector<8x64xf32>
    %812 = vector.extract_strided_slice %807 {offsets = [0, 128], sizes = [8, 64], strides = [1, 1]} : vector<8x192xf32> to vector<8x64xf32>
    %813 = arith.mulf %811, %764 : vector<8x64xf32>
    %814 = arith.mulf %810, %809 : vector<8x64xf32>
    %815 = arith.addf %813, %814 : vector<8x64xf32>
    %816 = math.tanh %815 : vector<8x64xf32>
    %817 = arith.mulf %812, %816 : vector<8x64xf32>
    %818 = vector.extract_strided_slice %801 {offsets = [0, 0], sizes = [8, 192], strides = [1, 1]} : vector<8x256xf32> to vector<8x192xf32>
    %819 = arith.negf %818 : vector<8x192xf32>
    %820 = math.exp %819 : vector<8x192xf32>
    %cst_229 = arith.constant 1.000000e+00 : f32
    %821 = vector.broadcast %cst_229 : f32 to vector<8x192xf32>
    %822 = arith.addf %821, %820 : vector<8x192xf32>
    %823 = arith.divf %821, %822 : vector<8x192xf32>
    %824 = vector.extract_strided_slice %801 {offsets = [0, 192], sizes = [8, 64], strides = [1, 1]} : vector<8x256xf32> to vector<8x64xf32>
    %825 = math.tanh %824 : vector<8x64xf32>
    %826 = vector.extract_strided_slice %823 {offsets = [0, 0], sizes = [8, 64], strides = [1, 1]} : vector<8x192xf32> to vector<8x64xf32>
    %827 = vector.extract_strided_slice %823 {offsets = [0, 64], sizes = [8, 64], strides = [1, 1]} : vector<8x192xf32> to vector<8x64xf32>
    %828 = vector.extract_strided_slice %823 {offsets = [0, 128], sizes = [8, 64], strides = [1, 1]} : vector<8x192xf32> to vector<8x64xf32>
    %829 = arith.mulf %827, %780 : vector<8x64xf32>
    %830 = arith.mulf %826, %825 : vector<8x64xf32>
    %831 = arith.addf %829, %830 : vector<8x64xf32>
    %832 = math.tanh %831 : vector<8x64xf32>
    %833 = arith.mulf %828, %832 : vector<8x64xf32>
    %834 = arith.index_cast %c15_i32 : i32 to index
    %c0_230 = arith.constant 0 : index
    %c0_231 = arith.constant 0 : index
    %835 = vector.load %arg15[%834, %c0_230, %c0_231] : memref<20x8x128xf32, #tpu.memory_space<vmem>>, vector<1x8x64xf32>
    %836 = vector.shape_cast %835 : vector<1x8x64xf32> to vector<8x64xf32>
    %837 = vector.shape_cast %817 : vector<8x64xf32> to vector<1x8x64xf32>
    tpu.vector_store %arg15[%834, %c0_230, %c0_231], %837 {strides = array<i32>} : memref<20x8x128xf32, #tpu.memory_space<vmem>>, vector<1x8x64xf32>,
    %838 = arith.index_cast %791 : i32 to index
    %c0_232 = arith.constant 0 : index
    %c64_233 = arith.constant 64 : index
    %839 = vector.load %arg15[%838, %c0_232, %c64_233] : memref<20x8x128xf32, #tpu.memory_space<vmem>>, vector<1x8x64xf32>
    %840 = vector.shape_cast %839 : vector<1x8x64xf32> to vector<8x64xf32>
    %841 = vector.shape_cast %833 : vector<8x64xf32> to vector<1x8x64xf32>
    tpu.vector_store %arg15[%838, %c0_232, %c64_233], %841 {strides = array<i32>} : memref<20x8x128xf32, #tpu.memory_space<vmem>>, vector<1x8x64xf32>,
    %c16_i32 = arith.constant 16 : i32
    %c19_i32_234 = arith.constant 19 : i32
    %842 = arith.subi %c19_i32_234, %c16_i32 : i32
    %843 = arith.index_cast %c16_i32 : i32 to index
    %c0_235 = arith.constant 0 : index
    %c0_236 = arith.constant 0 : index
    %844 = vector.load %arg16[%843, %c0_235, %c0_236] : memref<20x8x256xf32, #tpu.memory_space<vmem>>, vector<1x8x256xf32>
    %845 = vector.shape_cast %844 : vector<1x8x256xf32> to vector<8x256xf32>
    %cst_237 = arith.constant dense<0.000000e+00> : vector<8x256xf32>
    %846 = tpu.matmul %817, %23, %cst_237 {dimension_numbers = #tpu.dot_dimension_numbers<[1], [0], [0], [1], [0, 0, 1, 1], [], []>} : vector<8x64xf32>, vector<64x256xf32>, vector<8x256xf32> -> vector<8x256xf32>
    %847 = arith.addf %845, %846 : vector<8x256xf32>
    %848 = arith.index_cast %842 : i32 to index
    %c0_238 = arith.constant 0 : index
    %c0_239 = arith.constant 0 : index
    %849 = vector.load %arg17[%848, %c0_238, %c0_239] : memref<20x8x256xf32, #tpu.memory_space<vmem>>, vector<1x8x256xf32>
    %850 = vector.shape_cast %849 : vector<1x8x256xf32> to vector<8x256xf32>
    %cst_240 = arith.constant dense<0.000000e+00> : vector<8x256xf32>
    %851 = tpu.matmul %833, %24, %cst_240 {dimension_numbers = #tpu.dot_dimension_numbers<[1], [0], [0], [1], [0, 0, 1, 1], [], []>} : vector<8x64xf32>, vector<64x256xf32>, vector<8x256xf32> -> vector<8x256xf32>
    %852 = arith.addf %850, %851 : vector<8x256xf32>
    %853 = vector.extract_strided_slice %847 {offsets = [0, 0], sizes = [8, 192], strides = [1, 1]} : vector<8x256xf32> to vector<8x192xf32>
    %854 = arith.negf %853 : vector<8x192xf32>
    %855 = math.exp %854 : vector<8x192xf32>
    %cst_241 = arith.constant 1.000000e+00 : f32
    %856 = vector.broadcast %cst_241 : f32 to vector<8x192xf32>
    %857 = arith.addf %856, %855 : vector<8x192xf32>
    %858 = arith.divf %856, %857 : vector<8x192xf32>
    %859 = vector.extract_strided_slice %847 {offsets = [0, 192], sizes = [8, 64], strides = [1, 1]} : vector<8x256xf32> to vector<8x64xf32>
    %860 = math.tanh %859 : vector<8x64xf32>
    %861 = vector.extract_strided_slice %858 {offsets = [0, 0], sizes = [8, 64], strides = [1, 1]} : vector<8x192xf32> to vector<8x64xf32>
    %862 = vector.extract_strided_slice %858 {offsets = [0, 64], sizes = [8, 64], strides = [1, 1]} : vector<8x192xf32> to vector<8x64xf32>
    %863 = vector.extract_strided_slice %858 {offsets = [0, 128], sizes = [8, 64], strides = [1, 1]} : vector<8x192xf32> to vector<8x64xf32>
    %864 = arith.mulf %862, %815 : vector<8x64xf32>
    %865 = arith.mulf %861, %860 : vector<8x64xf32>
    %866 = arith.addf %864, %865 : vector<8x64xf32>
    %867 = math.tanh %866 : vector<8x64xf32>
    %868 = arith.mulf %863, %867 : vector<8x64xf32>
    %869 = vector.extract_strided_slice %852 {offsets = [0, 0], sizes = [8, 192], strides = [1, 1]} : vector<8x256xf32> to vector<8x192xf32>
    %870 = arith.negf %869 : vector<8x192xf32>
    %871 = math.exp %870 : vector<8x192xf32>
    %cst_242 = arith.constant 1.000000e+00 : f32
    %872 = vector.broadcast %cst_242 : f32 to vector<8x192xf32>
    %873 = arith.addf %872, %871 : vector<8x192xf32>
    %874 = arith.divf %872, %873 : vector<8x192xf32>
    %875 = vector.extract_strided_slice %852 {offsets = [0, 192], sizes = [8, 64], strides = [1, 1]} : vector<8x256xf32> to vector<8x64xf32>
    %876 = math.tanh %875 : vector<8x64xf32>
    %877 = vector.extract_strided_slice %874 {offsets = [0, 0], sizes = [8, 64], strides = [1, 1]} : vector<8x192xf32> to vector<8x64xf32>
    %878 = vector.extract_strided_slice %874 {offsets = [0, 64], sizes = [8, 64], strides = [1, 1]} : vector<8x192xf32> to vector<8x64xf32>
    %879 = vector.extract_strided_slice %874 {offsets = [0, 128], sizes = [8, 64], strides = [1, 1]} : vector<8x192xf32> to vector<8x64xf32>
    %880 = arith.mulf %878, %831 : vector<8x64xf32>
    %881 = arith.mulf %877, %876 : vector<8x64xf32>
    %882 = arith.addf %880, %881 : vector<8x64xf32>
    %883 = math.tanh %882 : vector<8x64xf32>
    %884 = arith.mulf %879, %883 : vector<8x64xf32>
    %885 = arith.index_cast %c16_i32 : i32 to index
    %c0_243 = arith.constant 0 : index
    %c0_244 = arith.constant 0 : index
    %886 = vector.load %arg15[%885, %c0_243, %c0_244] : memref<20x8x128xf32, #tpu.memory_space<vmem>>, vector<1x8x64xf32>
    %887 = vector.shape_cast %886 : vector<1x8x64xf32> to vector<8x64xf32>
    %888 = vector.shape_cast %868 : vector<8x64xf32> to vector<1x8x64xf32>
    tpu.vector_store %arg15[%885, %c0_243, %c0_244], %888 {strides = array<i32>} : memref<20x8x128xf32, #tpu.memory_space<vmem>>, vector<1x8x64xf32>,
    %889 = arith.index_cast %842 : i32 to index
    %c0_245 = arith.constant 0 : index
    %c64_246 = arith.constant 64 : index
    %890 = vector.load %arg15[%889, %c0_245, %c64_246] : memref<20x8x128xf32, #tpu.memory_space<vmem>>, vector<1x8x64xf32>
    %891 = vector.shape_cast %890 : vector<1x8x64xf32> to vector<8x64xf32>
    %892 = vector.shape_cast %884 : vector<8x64xf32> to vector<1x8x64xf32>
    tpu.vector_store %arg15[%889, %c0_245, %c64_246], %892 {strides = array<i32>} : memref<20x8x128xf32, #tpu.memory_space<vmem>>, vector<1x8x64xf32>,
    %c17_i32 = arith.constant 17 : i32
    %c19_i32_247 = arith.constant 19 : i32
    %893 = arith.subi %c19_i32_247, %c17_i32 : i32
    %894 = arith.index_cast %c17_i32 : i32 to index
    %c0_248 = arith.constant 0 : index
    %c0_249 = arith.constant 0 : index
    %895 = vector.load %arg16[%894, %c0_248, %c0_249] : memref<20x8x256xf32, #tpu.memory_space<vmem>>, vector<1x8x256xf32>
    %896 = vector.shape_cast %895 : vector<1x8x256xf32> to vector<8x256xf32>
    %cst_250 = arith.constant dense<0.000000e+00> : vector<8x256xf32>
    %897 = tpu.matmul %868, %23, %cst_250 {dimension_numbers = #tpu.dot_dimension_numbers<[1], [0], [0], [1], [0, 0, 1, 1], [], []>} : vector<8x64xf32>, vector<64x256xf32>, vector<8x256xf32> -> vector<8x256xf32>
    %898 = arith.addf %896, %897 : vector<8x256xf32>
    %899 = arith.index_cast %893 : i32 to index
    %c0_251 = arith.constant 0 : index
    %c0_252 = arith.constant 0 : index
    %900 = vector.load %arg17[%899, %c0_251, %c0_252] : memref<20x8x256xf32, #tpu.memory_space<vmem>>, vector<1x8x256xf32>
    %901 = vector.shape_cast %900 : vector<1x8x256xf32> to vector<8x256xf32>
    %cst_253 = arith.constant dense<0.000000e+00> : vector<8x256xf32>
    %902 = tpu.matmul %884, %24, %cst_253 {dimension_numbers = #tpu.dot_dimension_numbers<[1], [0], [0], [1], [0, 0, 1, 1], [], []>} : vector<8x64xf32>, vector<64x256xf32>, vector<8x256xf32> -> vector<8x256xf32>
    %903 = arith.addf %901, %902 : vector<8x256xf32>
    %904 = vector.extract_strided_slice %898 {offsets = [0, 0], sizes = [8, 192], strides = [1, 1]} : vector<8x256xf32> to vector<8x192xf32>
    %905 = arith.negf %904 : vector<8x192xf32>
    %906 = math.exp %905 : vector<8x192xf32>
    %cst_254 = arith.constant 1.000000e+00 : f32
    %907 = vector.broadcast %cst_254 : f32 to vector<8x192xf32>
    %908 = arith.addf %907, %906 : vector<8x192xf32>
    %909 = arith.divf %907, %908 : vector<8x192xf32>
    %910 = vector.extract_strided_slice %898 {offsets = [0, 192], sizes = [8, 64], strides = [1, 1]} : vector<8x256xf32> to vector<8x64xf32>
    %911 = math.tanh %910 : vector<8x64xf32>
    %912 = vector.extract_strided_slice %909 {offsets = [0, 0], sizes = [8, 64], strides = [1, 1]} : vector<8x192xf32> to vector<8x64xf32>
    %913 = vector.extract_strided_slice %909 {offsets = [0, 64], sizes = [8, 64], strides = [1, 1]} : vector<8x192xf32> to vector<8x64xf32>
    %914 = vector.extract_strided_slice %909 {offsets = [0, 128], sizes = [8, 64], strides = [1, 1]} : vector<8x192xf32> to vector<8x64xf32>
    %915 = arith.mulf %913, %866 : vector<8x64xf32>
    %916 = arith.mulf %912, %911 : vector<8x64xf32>
    %917 = arith.addf %915, %916 : vector<8x64xf32>
    %918 = math.tanh %917 : vector<8x64xf32>
    %919 = arith.mulf %914, %918 : vector<8x64xf32>
    %920 = vector.extract_strided_slice %903 {offsets = [0, 0], sizes = [8, 192], strides = [1, 1]} : vector<8x256xf32> to vector<8x192xf32>
    %921 = arith.negf %920 : vector<8x192xf32>
    %922 = math.exp %921 : vector<8x192xf32>
    %cst_255 = arith.constant 1.000000e+00 : f32
    %923 = vector.broadcast %cst_255 : f32 to vector<8x192xf32>
    %924 = arith.addf %923, %922 : vector<8x192xf32>
    %925 = arith.divf %923, %924 : vector<8x192xf32>
    %926 = vector.extract_strided_slice %903 {offsets = [0, 192], sizes = [8, 64], strides = [1, 1]} : vector<8x256xf32> to vector<8x64xf32>
    %927 = math.tanh %926 : vector<8x64xf32>
    %928 = vector.extract_strided_slice %925 {offsets = [0, 0], sizes = [8, 64], strides = [1, 1]} : vector<8x192xf32> to vector<8x64xf32>
    %929 = vector.extract_strided_slice %925 {offsets = [0, 64], sizes = [8, 64], strides = [1, 1]} : vector<8x192xf32> to vector<8x64xf32>
    %930 = vector.extract_strided_slice %925 {offsets = [0, 128], sizes = [8, 64], strides = [1, 1]} : vector<8x192xf32> to vector<8x64xf32>
    %931 = arith.mulf %929, %882 : vector<8x64xf32>
    %932 = arith.mulf %928, %927 : vector<8x64xf32>
    %933 = arith.addf %931, %932 : vector<8x64xf32>
    %934 = math.tanh %933 : vector<8x64xf32>
    %935 = arith.mulf %930, %934 : vector<8x64xf32>
    %936 = arith.index_cast %c17_i32 : i32 to index
    %c0_256 = arith.constant 0 : index
    %c0_257 = arith.constant 0 : index
    %937 = vector.load %arg15[%936, %c0_256, %c0_257] : memref<20x8x128xf32, #tpu.memory_space<vmem>>, vector<1x8x64xf32>
    %938 = vector.shape_cast %937 : vector<1x8x64xf32> to vector<8x64xf32>
    %939 = vector.shape_cast %919 : vector<8x64xf32> to vector<1x8x64xf32>
    tpu.vector_store %arg15[%936, %c0_256, %c0_257], %939 {strides = array<i32>} : memref<20x8x128xf32, #tpu.memory_space<vmem>>, vector<1x8x64xf32>,
    %940 = arith.index_cast %893 : i32 to index
    %c0_258 = arith.constant 0 : index
    %c64_259 = arith.constant 64 : index
    %941 = vector.load %arg15[%940, %c0_258, %c64_259] : memref<20x8x128xf32, #tpu.memory_space<vmem>>, vector<1x8x64xf32>
    %942 = vector.shape_cast %941 : vector<1x8x64xf32> to vector<8x64xf32>
    %943 = vector.shape_cast %935 : vector<8x64xf32> to vector<1x8x64xf32>
    tpu.vector_store %arg15[%940, %c0_258, %c64_259], %943 {strides = array<i32>} : memref<20x8x128xf32, #tpu.memory_space<vmem>>, vector<1x8x64xf32>,
    %c18_i32 = arith.constant 18 : i32
    %c19_i32_260 = arith.constant 19 : i32
    %944 = arith.subi %c19_i32_260, %c18_i32 : i32
    %945 = arith.index_cast %c18_i32 : i32 to index
    %c0_261 = arith.constant 0 : index
    %c0_262 = arith.constant 0 : index
    %946 = vector.load %arg16[%945, %c0_261, %c0_262] : memref<20x8x256xf32, #tpu.memory_space<vmem>>, vector<1x8x256xf32>
    %947 = vector.shape_cast %946 : vector<1x8x256xf32> to vector<8x256xf32>
    %cst_263 = arith.constant dense<0.000000e+00> : vector<8x256xf32>
    %948 = tpu.matmul %919, %23, %cst_263 {dimension_numbers = #tpu.dot_dimension_numbers<[1], [0], [0], [1], [0, 0, 1, 1], [], []>} : vector<8x64xf32>, vector<64x256xf32>, vector<8x256xf32> -> vector<8x256xf32>
    %949 = arith.addf %947, %948 : vector<8x256xf32>
    %950 = arith.index_cast %944 : i32 to index
    %c0_264 = arith.constant 0 : index
    %c0_265 = arith.constant 0 : index
    %951 = vector.load %arg17[%950, %c0_264, %c0_265] : memref<20x8x256xf32, #tpu.memory_space<vmem>>, vector<1x8x256xf32>
    %952 = vector.shape_cast %951 : vector<1x8x256xf32> to vector<8x256xf32>
    %cst_266 = arith.constant dense<0.000000e+00> : vector<8x256xf32>
    %953 = tpu.matmul %935, %24, %cst_266 {dimension_numbers = #tpu.dot_dimension_numbers<[1], [0], [0], [1], [0, 0, 1, 1], [], []>} : vector<8x64xf32>, vector<64x256xf32>, vector<8x256xf32> -> vector<8x256xf32>
    %954 = arith.addf %952, %953 : vector<8x256xf32>
    %955 = vector.extract_strided_slice %949 {offsets = [0, 0], sizes = [8, 192], strides = [1, 1]} : vector<8x256xf32> to vector<8x192xf32>
    %956 = arith.negf %955 : vector<8x192xf32>
    %957 = math.exp %956 : vector<8x192xf32>
    %cst_267 = arith.constant 1.000000e+00 : f32
    %958 = vector.broadcast %cst_267 : f32 to vector<8x192xf32>
    %959 = arith.addf %958, %957 : vector<8x192xf32>
    %960 = arith.divf %958, %959 : vector<8x192xf32>
    %961 = vector.extract_strided_slice %949 {offsets = [0, 192], sizes = [8, 64], strides = [1, 1]} : vector<8x256xf32> to vector<8x64xf32>
    %962 = math.tanh %961 : vector<8x64xf32>
    %963 = vector.extract_strided_slice %960 {offsets = [0, 0], sizes = [8, 64], strides = [1, 1]} : vector<8x192xf32> to vector<8x64xf32>
    %964 = vector.extract_strided_slice %960 {offsets = [0, 64], sizes = [8, 64], strides = [1, 1]} : vector<8x192xf32> to vector<8x64xf32>
    %965 = vector.extract_strided_slice %960 {offsets = [0, 128], sizes = [8, 64], strides = [1, 1]} : vector<8x192xf32> to vector<8x64xf32>
    %966 = arith.mulf %964, %917 : vector<8x64xf32>
    %967 = arith.mulf %963, %962 : vector<8x64xf32>
    %968 = arith.addf %966, %967 : vector<8x64xf32>
    %969 = math.tanh %968 : vector<8x64xf32>
    %970 = arith.mulf %965, %969 : vector<8x64xf32>
    %971 = vector.extract_strided_slice %954 {offsets = [0, 0], sizes = [8, 192], strides = [1, 1]} : vector<8x256xf32> to vector<8x192xf32>
    %972 = arith.negf %971 : vector<8x192xf32>
    %973 = math.exp %972 : vector<8x192xf32>
    %cst_268 = arith.constant 1.000000e+00 : f32
    %974 = vector.broadcast %cst_268 : f32 to vector<8x192xf32>
    %975 = arith.addf %974, %973 : vector<8x192xf32>
    %976 = arith.divf %974, %975 : vector<8x192xf32>
    %977 = vector.extract_strided_slice %954 {offsets = [0, 192], sizes = [8, 64], strides = [1, 1]} : vector<8x256xf32> to vector<8x64xf32>
    %978 = math.tanh %977 : vector<8x64xf32>
    %979 = vector.extract_strided_slice %976 {offsets = [0, 0], sizes = [8, 64], strides = [1, 1]} : vector<8x192xf32> to vector<8x64xf32>
    %980 = vector.extract_strided_slice %976 {offsets = [0, 64], sizes = [8, 64], strides = [1, 1]} : vector<8x192xf32> to vector<8x64xf32>
    %981 = vector.extract_strided_slice %976 {offsets = [0, 128], sizes = [8, 64], strides = [1, 1]} : vector<8x192xf32> to vector<8x64xf32>
    %982 = arith.mulf %980, %933 : vector<8x64xf32>
    %983 = arith.mulf %979, %978 : vector<8x64xf32>
    %984 = arith.addf %982, %983 : vector<8x64xf32>
    %985 = math.tanh %984 : vector<8x64xf32>
    %986 = arith.mulf %981, %985 : vector<8x64xf32>
    %987 = arith.index_cast %c18_i32 : i32 to index
    %c0_269 = arith.constant 0 : index
    %c0_270 = arith.constant 0 : index
    %988 = vector.load %arg15[%987, %c0_269, %c0_270] : memref<20x8x128xf32, #tpu.memory_space<vmem>>, vector<1x8x64xf32>
    %989 = vector.shape_cast %988 : vector<1x8x64xf32> to vector<8x64xf32>
    %990 = vector.shape_cast %970 : vector<8x64xf32> to vector<1x8x64xf32>
    tpu.vector_store %arg15[%987, %c0_269, %c0_270], %990 {strides = array<i32>} : memref<20x8x128xf32, #tpu.memory_space<vmem>>, vector<1x8x64xf32>,
    %991 = arith.index_cast %944 : i32 to index
    %c0_271 = arith.constant 0 : index
    %c64_272 = arith.constant 64 : index
    %992 = vector.load %arg15[%991, %c0_271, %c64_272] : memref<20x8x128xf32, #tpu.memory_space<vmem>>, vector<1x8x64xf32>
    %993 = vector.shape_cast %992 : vector<1x8x64xf32> to vector<8x64xf32>
    %994 = vector.shape_cast %986 : vector<8x64xf32> to vector<1x8x64xf32>
    tpu.vector_store %arg15[%991, %c0_271, %c64_272], %994 {strides = array<i32>} : memref<20x8x128xf32, #tpu.memory_space<vmem>>, vector<1x8x64xf32>,
    %c19_i32_273 = arith.constant 19 : i32
    %c19_i32_274 = arith.constant 19 : i32
    %995 = arith.subi %c19_i32_274, %c19_i32_273 : i32
    %996 = arith.index_cast %c19_i32_273 : i32 to index
    %c0_275 = arith.constant 0 : index
    %c0_276 = arith.constant 0 : index
    %997 = vector.load %arg16[%996, %c0_275, %c0_276] : memref<20x8x256xf32, #tpu.memory_space<vmem>>, vector<1x8x256xf32>
    %998 = vector.shape_cast %997 : vector<1x8x256xf32> to vector<8x256xf32>
    %cst_277 = arith.constant dense<0.000000e+00> : vector<8x256xf32>
    %999 = tpu.matmul %970, %23, %cst_277 {dimension_numbers = #tpu.dot_dimension_numbers<[1], [0], [0], [1], [0, 0, 1, 1], [], []>} : vector<8x64xf32>, vector<64x256xf32>, vector<8x256xf32> -> vector<8x256xf32>
    %1000 = arith.addf %998, %999 : vector<8x256xf32>
    %1001 = arith.index_cast %995 : i32 to index
    %c0_278 = arith.constant 0 : index
    %c0_279 = arith.constant 0 : index
    %1002 = vector.load %arg17[%1001, %c0_278, %c0_279] : memref<20x8x256xf32, #tpu.memory_space<vmem>>, vector<1x8x256xf32>
    %1003 = vector.shape_cast %1002 : vector<1x8x256xf32> to vector<8x256xf32>
    %cst_280 = arith.constant dense<0.000000e+00> : vector<8x256xf32>
    %1004 = tpu.matmul %986, %24, %cst_280 {dimension_numbers = #tpu.dot_dimension_numbers<[1], [0], [0], [1], [0, 0, 1, 1], [], []>} : vector<8x64xf32>, vector<64x256xf32>, vector<8x256xf32> -> vector<8x256xf32>
    %1005 = arith.addf %1003, %1004 : vector<8x256xf32>
    %1006 = vector.extract_strided_slice %1000 {offsets = [0, 0], sizes = [8, 192], strides = [1, 1]} : vector<8x256xf32> to vector<8x192xf32>
    %1007 = arith.negf %1006 : vector<8x192xf32>
    %1008 = math.exp %1007 : vector<8x192xf32>
    %cst_281 = arith.constant 1.000000e+00 : f32
    %1009 = vector.broadcast %cst_281 : f32 to vector<8x192xf32>
    %1010 = arith.addf %1009, %1008 : vector<8x192xf32>
    %1011 = arith.divf %1009, %1010 : vector<8x192xf32>
    %1012 = vector.extract_strided_slice %1000 {offsets = [0, 192], sizes = [8, 64], strides = [1, 1]} : vector<8x256xf32> to vector<8x64xf32>
    %1013 = math.tanh %1012 : vector<8x64xf32>
    %1014 = vector.extract_strided_slice %1011 {offsets = [0, 0], sizes = [8, 64], strides = [1, 1]} : vector<8x192xf32> to vector<8x64xf32>
    %1015 = vector.extract_strided_slice %1011 {offsets = [0, 64], sizes = [8, 64], strides = [1, 1]} : vector<8x192xf32> to vector<8x64xf32>
    %1016 = vector.extract_strided_slice %1011 {offsets = [0, 128], sizes = [8, 64], strides = [1, 1]} : vector<8x192xf32> to vector<8x64xf32>
    %1017 = arith.mulf %1015, %968 : vector<8x64xf32>
    %1018 = arith.mulf %1014, %1013 : vector<8x64xf32>
    %1019 = arith.addf %1017, %1018 : vector<8x64xf32>
    %1020 = math.tanh %1019 : vector<8x64xf32>
    %1021 = arith.mulf %1016, %1020 : vector<8x64xf32>
    %1022 = vector.extract_strided_slice %1005 {offsets = [0, 0], sizes = [8, 192], strides = [1, 1]} : vector<8x256xf32> to vector<8x192xf32>
    %1023 = arith.negf %1022 : vector<8x192xf32>
    %1024 = math.exp %1023 : vector<8x192xf32>
    %cst_282 = arith.constant 1.000000e+00 : f32
    %1025 = vector.broadcast %cst_282 : f32 to vector<8x192xf32>
    %1026 = arith.addf %1025, %1024 : vector<8x192xf32>
    %1027 = arith.divf %1025, %1026 : vector<8x192xf32>
    %1028 = vector.extract_strided_slice %1005 {offsets = [0, 192], sizes = [8, 64], strides = [1, 1]} : vector<8x256xf32> to vector<8x64xf32>
    %1029 = math.tanh %1028 : vector<8x64xf32>
    %1030 = vector.extract_strided_slice %1027 {offsets = [0, 0], sizes = [8, 64], strides = [1, 1]} : vector<8x192xf32> to vector<8x64xf32>
    %1031 = vector.extract_strided_slice %1027 {offsets = [0, 64], sizes = [8, 64], strides = [1, 1]} : vector<8x192xf32> to vector<8x64xf32>
    %1032 = vector.extract_strided_slice %1027 {offsets = [0, 128], sizes = [8, 64], strides = [1, 1]} : vector<8x192xf32> to vector<8x64xf32>
    %1033 = arith.mulf %1031, %984 : vector<8x64xf32>
    %1034 = arith.mulf %1030, %1029 : vector<8x64xf32>
    %1035 = arith.addf %1033, %1034 : vector<8x64xf32>
    %1036 = math.tanh %1035 : vector<8x64xf32>
    %1037 = arith.mulf %1032, %1036 : vector<8x64xf32>
    %1038 = arith.index_cast %c19_i32_273 : i32 to index
    %c0_283 = arith.constant 0 : index
    %c0_284 = arith.constant 0 : index
    %1039 = vector.load %arg15[%1038, %c0_283, %c0_284] : memref<20x8x128xf32, #tpu.memory_space<vmem>>, vector<1x8x64xf32>
    %1040 = vector.shape_cast %1039 : vector<1x8x64xf32> to vector<8x64xf32>
    %1041 = vector.shape_cast %1021 : vector<8x64xf32> to vector<1x8x64xf32>
    tpu.vector_store %arg15[%1038, %c0_283, %c0_284], %1041 {strides = array<i32>} : memref<20x8x128xf32, #tpu.memory_space<vmem>>, vector<1x8x64xf32>,
    %1042 = arith.index_cast %995 : i32 to index
    %c0_285 = arith.constant 0 : index
    %c64_286 = arith.constant 64 : index
    %1043 = vector.load %arg15[%1042, %c0_285, %c64_286] : memref<20x8x128xf32, #tpu.memory_space<vmem>>, vector<1x8x64xf32>
    %1044 = vector.shape_cast %1043 : vector<1x8x64xf32> to vector<8x64xf32>
    %1045 = vector.shape_cast %1037 : vector<8x64xf32> to vector<1x8x64xf32>
    tpu.vector_store %arg15[%1042, %c0_285, %c64_286], %1045 {strides = array<i32>} : memref<20x8x128xf32, #tpu.memory_space<vmem>>, vector<1x8x64xf32>,
    %c20_i32 = arith.constant 20 : i32
    %c0_287 = arith.constant 0 : index
    %c0_288 = arith.constant 0 : index
    %c0_289 = arith.constant 0 : index
    %1046 = vector.load %arg15[%c0_287, %c0_288, %c0_289] : memref<20x8x128xf32, #tpu.memory_space<vmem>>, vector<20x8x128xf32>
    %1047 = vector.shape_cast %1046 : vector<20x8x128xf32> to vector<160x128xf32>
    %c0_290 = arith.constant 0 : index
    %c0_291 = arith.constant 0 : index
    %1048 = vector.load %arg10[%c0_290, %c0_291] : memref<128x128xf32, #tpu.memory_space<vmem>>, vector<128x128xf32>
    %cst_292 = arith.constant dense<0.000000e+00> : vector<160x128xf32>
    %1049 = tpu.matmul %1047, %1048, %cst_292 {dimension_numbers = #tpu.dot_dimension_numbers<[1], [0], [0], [1], [0, 0, 1, 1], [], []>} : vector<160x128xf32>, vector<128x128xf32>, vector<160x128xf32> -> vector<160x128xf32>
    %c0_293 = arith.constant 0 : index
    %c0_294 = arith.constant 0 : index
    %1050 = vector.load %arg11[%c0_293, %c0_294] : memref<1x128xf32, #tpu.memory_space<vmem>>, vector<1x128xf32>
    %1051 = vector.broadcast %1050 : vector<1x128xf32> to vector<160x128xf32>
    %1052 = arith.addf %1049, %1051 : vector<160x128xf32>
    %cst_295 = arith.constant dense<0xFF800000> : vector<160xf32>
    %1053 = vector.multi_reduction <maximumf>, %1052, %cst_295 [1] : vector<160x128xf32> to vector<160xf32>
    %1054 = vector.shape_cast %1053 : vector<160xf32> to vector<160x1xf32>
    %1055 = vector.broadcast %1054 : vector<160x1xf32> to vector<160x128xf32>
    %1056 = arith.subf %1052, %1055 : vector<160x128xf32>
    %1057 = math.exp %1056 : vector<160x128xf32>
    %cst_296 = arith.constant dense<0.000000e+00> : vector<160xf32>
    %1058 = vector.multi_reduction <add>, %1057, %cst_296 [1] : vector<160x128xf32> to vector<160xf32>
    %1059 = vector.shape_cast %1058 : vector<160xf32> to vector<160x1xf32>
    %1060 = tpu.reciprocal %1059 {approx = true} : vector<160x1xf32> -> vector<160x1xf32>
    %1061 = vector.broadcast %1060 : vector<160x1xf32> to vector<160x128xf32>
    %1062 = arith.mulf %1057, %1061 : vector<160x128xf32>
    %1063 = arith.mulf %1047, %1062 : vector<160x128xf32>
    %1064 = vector.shape_cast %1063 : vector<160x128xf32> to vector<20x8x128xf32>
    %c0_297 = arith.constant 0 : index
    %c0_298 = arith.constant 0 : index
    %c0_299 = arith.constant 0 : index
    %1065 = vector.load %arg12[%c0_297, %c0_298, %c0_299] : memref<20x1x128xf32, #tpu.memory_space<vmem>>, vector<20x1x128xf32>
    %1066 = vector.broadcast %1065 : vector<20x1x128xf32> to vector<20x8x128xf32>
    %1067 = arith.mulf %1064, %1066 : vector<20x8x128xf32>
    %cst_300 = arith.constant dense<0.000000e+00> : vector<8x128xf32>
    %1068 = vector.multi_reduction <add>, %1067, %cst_300 [0] : vector<20x8x128xf32> to vector<8x128xf32>
    %cst_301 = arith.constant dense<0.000000e+00> : vector<8xf32>
    %1069 = vector.multi_reduction <add>, %1068, %cst_301 [1] : vector<8x128xf32> to vector<8xf32>
    %1070 = vector.shape_cast %1069 : vector<8xf32> to vector<8x1xf32>
    %c0_302 = arith.constant 0 : index
    %c0_303 = arith.constant 0 : index
    %1071 = vector.load %arg13[%c0_302, %c0_303] : memref<1x1xf32, #tpu.memory_space<vmem>>, vector<1x1xf32>
    %1072 = vector.broadcast %1071 : vector<1x1xf32> to vector<8x1xf32>
    %1073 = arith.addf %1070, %1072 : vector<8x1xf32>
    %1074 = arith.negf %1073 : vector<8x1xf32>
    %1075 = math.exp %1074 : vector<8x1xf32>
    %cst_304 = arith.constant 1.000000e+00 : f32
    %1076 = vector.broadcast %cst_304 : f32 to vector<8x1xf32>
    %1077 = arith.addf %1076, %1075 : vector<8x1xf32>
    %1078 = arith.divf %1076, %1077 : vector<8x1xf32>
    %c0_305 = arith.constant 0 : index
    %c0_306 = arith.constant 0 : index
    %1079 = vector.load %arg14[%c0_305, %c0_306] : memref<8x1xf32, #tpu.memory_space<vmem>>, vector<8x1xf32>
    tpu.vector_store %arg14[%c0_305, %c0_306], %1078 {strides = array<i32>} : memref<8x1xf32, #tpu.memory_space<vmem>>, vector<8x1xf32>,
    return
  }
  func.func @transform_0(%arg0: i32) -> (i32, i32, i32) {
    %c0_i32 = arith.constant 0 : i32
    %c0_i32_0 = arith.constant 0 : i32
    %c0_i32_1 = arith.constant 0 : i32
    return %c0_i32, %arg0, %c0_i32_0 : i32, i32, i32
  }
  func.func @transform_1(%arg0: i32) -> (i32, i32) {
    %c0_i32 = arith.constant 0 : i32
    %c0_i32_0 = arith.constant 0 : i32
    %c0_i32_1 = arith.constant 0 : i32
    return %c0_i32, %c0_i32_0 : i32, i32
  }
  func.func @transform_2(%arg0: i32) -> (i32, i32) {
    %c0_i32 = arith.constant 0 : i32
    %c0_i32_0 = arith.constant 0 : i32
    %c0_i32_1 = arith.constant 0 : i32
    return %c0_i32, %c0_i32_0 : i32, i32
  }
  func.func @transform_3(%arg0: i32) -> (i32, i32) {
    %c0_i32 = arith.constant 0 : i32
    %c0_i32_0 = arith.constant 0 : i32
    %c0_i32_1 = arith.constant 0 : i32
    return %c0_i32, %c0_i32_0 : i32, i32
  }
  func.func @transform_4(%arg0: i32) -> (i32, i32) {
    %c0_i32 = arith.constant 0 : i32
    %c0_i32_0 = arith.constant 0 : i32
    %c0_i32_1 = arith.constant 0 : i32
    return %c0_i32, %c0_i32_0 : i32, i32
  }
  func.func @transform_5(%arg0: i32) -> (i32, i32) {
    %c0_i32 = arith.constant 0 : i32
    %c0_i32_0 = arith.constant 0 : i32
    %c0_i32_1 = arith.constant 0 : i32
    return %c0_i32, %c0_i32_0 : i32, i32
  }
  func.func @transform_6(%arg0: i32) -> (i32, i32) {
    %c0_i32 = arith.constant 0 : i32
    %c0_i32_0 = arith.constant 0 : i32
    %c0_i32_1 = arith.constant 0 : i32
    return %c0_i32, %c0_i32_0 : i32, i32
  }
  func.func @transform_7(%arg0: i32) -> (i32, i32) {
    %c0_i32 = arith.constant 0 : i32
    %c0_i32_0 = arith.constant 0 : i32
    %c0_i32_1 = arith.constant 0 : i32
    return %c0_i32, %c0_i32_0 : i32, i32
  }
  func.func @transform_8(%arg0: i32) -> (i32, i32) {
    %c0_i32 = arith.constant 0 : i32
    %c0_i32_0 = arith.constant 0 : i32
    %c0_i32_1 = arith.constant 0 : i32
    return %c0_i32, %c0_i32_0 : i32, i32
  }
  func.func @transform_9(%arg0: i32) -> (i32, i32) {
    %c0_i32 = arith.constant 0 : i32
    %c0_i32_0 = arith.constant 0 : i32
    %c0_i32_1 = arith.constant 0 : i32
    return %c0_i32, %c0_i32_0 : i32, i32
  }
  func.func @transform_10(%arg0: i32) -> (i32, i32) {
    %c0_i32 = arith.constant 0 : i32
    %c0_i32_0 = arith.constant 0 : i32
    %c0_i32_1 = arith.constant 0 : i32
    return %c0_i32, %c0_i32_0 : i32, i32
  }
  func.func @transform_11(%arg0: i32) -> (i32, i32, i32) {
    %c0_i32 = arith.constant 0 : i32
    %c0_i32_0 = arith.constant 0 : i32
    %c0_i32_1 = arith.constant 0 : i32
    %c0_i32_2 = arith.constant 0 : i32
    return %c0_i32, %c0_i32_0, %c0_i32_1 : i32, i32, i32
  }
  func.func @transform_12(%arg0: i32) -> (i32, i32) {
    %c0_i32 = arith.constant 0 : i32
    %c0_i32_0 = arith.constant 0 : i32
    %c0_i32_1 = arith.constant 0 : i32
    return %c0_i32, %c0_i32_0 : i32, i32
  }
  func.func @transform_13(%arg0: i32) -> (i32, i32) {
    %c0_i32 = arith.constant 0 : i32
    %c0_i32_0 = arith.constant 0 : i32
    return %arg0, %c0_i32 : i32, i32
  }
}

</mosaic_0001>

<bundles_post_ra>
// kernel: attention_model_forward.1
= control target key start
LH: loop header
LB: loop body
LE: loop exit
PB: predicated region body
PF: predicated region fallthrough
CT: control target
= control target key end

     0   :  { %s9736_s0 = inlined_call_operand.vmem [shape: f32[20,8,7], index: 0, kind: input, shape index: {}]   ;;  %s9737_s1 = inlined_call_operand.hbm [shape: f32[7,64], index: 1, kind: input, shape index: {}]   ;;  %s9738_s2 = inlined_call_operand.vmem [shape: f32[1,64], index: 2, kind: input, shape index: {}]   ;;  %s9739_s3 = inlined_call_operand.vmem [shape: f32[64,256], index: 3, kind: input, shape index: {}]   ;;  %s9740_s4 = inlined_call_operand.vmem [shape: f32[64,256], index: 4, kind: input, shape index: {}]   ;;  %s9741_s5 = inlined_call_operand.vmem [shape: f32[1,256], index: 5, kind: input, shape index: {}]   ;;  %s9742_s6 = inlined_call_operand.hbm [shape: f32[64,256], index: 6, kind: input, shape index: {}]   ;;  %s9743_s7 = inlined_call_operand.hbm [shape: f32[64,256], index: 7, kind: input, shape index: {}]   ;;  %s9744_s8 = inlined_call_operand.vmem [shape: f32[1,256], index: 8, kind: input, shape index: {}]   ;;  %s9745_s9 = inlined_call_operand.hbm [shape: f32[128,128], index: 9, kind: input, shape index: {}]   ;;  %s9746_s10 = inlined_call_operand.hbm [shape: f32[1,128], index: 10, kind: input, shape index: {}]   ;;  %s9747_s11 = inlined_call_operand.hbm [shape: f32[20,1,128], index: 11, kind: input, shape index: {}]   ;;  %s9748_s12 = inlined_call_operand.<no memory space> [shape: f32[1,1], index: 12, kind: input, shape index: {}]   ;;  %s9749_s13 = inlined_call_operand.vmem [shape: f32[8,1], index: 13, kind: output, shape index: {}]  }
   0x1   :  { %v18_v0 = vstv %s9748_s12 }
   0x2   :  { %19 = vst [vmem:[#allocation5] sm:$0x1] %v18_v0 }
   0x3   :  { %20 = vsyncpa [#allocation7], 0 }
   0x4   :  { %21 = vsyncpa [#allocation9], 0 }
   0x5   :  { %22 = vsyncpa [#allocation12], 0  ;;  %s49_s29 = sshll.u32 %s9742_s6, 4  ;;  %s50_s29 = int_to_ptr.hbm [resolvable:$true] %s49_s29 }
   0x6   :  { %23 = vsyncpa [#allocation15], 0  ;;  %s6759_s30 = smov [#allocation8]   ;;  %s77_s17 = sshll.u32 %s9745_s9, 4  ;;  %s78_s17 = int_to_ptr.hbm [resolvable:$true] %s77_s17 }
   0x7   :  { %s51_s14 = sshll.u32 %s6759_s30, 4  ;;  %s6760_s18 = smov 256   ;;  %s52_s14 = int_to_ptr.vmem [resolvable:$true] %s51_s14 }
   0x8   :  { %s6761_s19 = smov 16   ;;  %s6762_s12 = smov [#allocation11]  }
   0x9   :  { %57 = dma.hbm_to_vmem [thread:$0]  %s50_s29, 2048, %s52_s14, [#allocation9], %s6760_s18, %s6760_s18, %s6761_s19  }
   0xa   :  { %s79_s20 = sshll.u32 %s6762_s12, 4  ;;  %s6763_s21 = smov 128   ;;  %s80_s20 = int_to_ptr.vmem [resolvable:$true] %s79_s20 }
   0xb   :  { %s6764_s22 = smov 8   ;;  %s31_s24 = sshll.u32 %s9737_s1, 4  ;;  %s32_s24 = int_to_ptr.hbm [resolvable:$true] %s31_s24 }
   0xc   :  { %85 = dma.hbm_to_vmem [thread:$0]  %s78_s17, 2048, %s80_s20, [#allocation12], %s6763_s21, %s6763_s21, %s6764_s22  }
   0xd   :  { %s6765_s25 = smov [#allocation6]   ;;  %s62_s28 = sshll.u32 %s9743_s7, 4  ;;  %s63_s28 = int_to_ptr.hbm [resolvable:$true] %s62_s28 }
   0xe   :  { %s33_s26 = sshll.u32 %s6765_s25, 4  ;;  %s6766_s29 = smov [#allocation10]   ;;  %s34_s26 = int_to_ptr.vmem [resolvable:$true] %s33_s26 }
   0xf   :  { %36 = dma.hbm_to_vmem [thread:$0]  %s32_s24, 128, %s34_s26, [#allocation7]  }
  0x10   :  { %s64_s30 = sshll.u32 %s6766_s29, 4  ;;  %s91_s16 = sshll.u32 %s9746_s10, 4  ;;  %s65_s30 = int_to_ptr.vmem [resolvable:$true] %s64_s30  ;;  %s92_s16 = int_to_ptr.hbm [resolvable:$true] %s91_s16 }
  0x11   :  { %70 = dma.hbm_to_vmem [thread:$0]  %s63_s28, 2048, %s65_s30, [#allocation9], %s6760_s18, %s6760_s18, %s6761_s19  }
  0x12   :  { %s101_s12 = sshll.u32 %s9747_s11, 4  ;;  %s6767_s20 = smov [#allocation13]   ;;  %s102_s12 = int_to_ptr.hbm [resolvable:$true] %s101_s12 }
  0x13   :  { %s93_s21 = sshll.u32 %s6767_s20, 4  ;;  %s6768_s7 = smov [#allocation14]   ;;  %s94_s21 = int_to_ptr.vmem [resolvable:$true] %s93_s21 }
  0x14   :  { %96 = dma.hbm_to_vmem [thread:$0]  %s92_s16, 16, %s94_s21, [#allocation12]  }
  0x15   :  { %s103_s22 = sshll.u32 %s6768_s7, 4  ;;  %s6769_s6 = smov 1   ;;  %s104_s22 = int_to_ptr.vmem [resolvable:$true] %s103_s22 }
  0x16   :  { %109 = dma.hbm_to_vmem [thread:$0]  %s102_s12, 320, %s104_s22, [#allocation15], %s6761_s19, %s6761_s19, %s6769_s6  }
  0x17   :  { %6751 = dma.done.wait [#allocation7], 128  }
  0x18   :  { %6752 = vsyncadd [#allocation7], 4294967168 }
  0x19   :  { %6753 = dma.done.wait [#allocation9], 4096  }
  0x1a   :  { %6754 = vsyncadd [#allocation9], 4294963200 }
  0x1b   :  { %6755 = dma.done.wait [#allocation12], 2064  }
  0x1c   :  { %6756 = vsyncadd [#allocation12], 4294965232 }
  0x1d   :  { %6757 = dma.done.wait [#allocation15], 320  }
  0x1e   :  { %6758 = vsyncadd [#allocation15], 4294966976  ;;  %vm222_vm0 = vcmask 1046528   ;;  %vm161_vm1 = vcmask 56320   ;;  %v156_v1 = vld [vmem:[#allocation6] sm:$0x7f] }
  0x1f   :  { %v136_v2 = vld [vmem:[%s9736_s0] sm:$0xff]  ;;  %v6873_v3 = vld [vmem:[%s9739_s3 + $0x78] sm:$0xff]  ;;  %5596 = vmatpush.msk.msra.mxu0 %vm222_vm0, %v156_v1  ;;  %5854 = vmatpush.msk.msra.mxu1 %vm222_vm0, %v156_v1  ;;  %v6879_v4 = vld [vmem:[%s9739_s3 + $0x68] sm:$0xff]  ;;  %vm345_vm2 = vcmask 523264  }
  0x20   :  { %5597 = vmatmul.msk.f32.vlgmr.msra.gmra.mxu0 %vm161_vm1, %v136_v2  ;;  %5856 = vmatpush.msra.mxu2 %v6873_v3  ;;  %v6886_v5 = vld [vmem:[%s9739_s3 + $0x58] sm:$0xff]  ;;  %v137_v6 = vld [vmem:[%s9736_s0 + $0x8] sm:$0xff]  ;;  %v138_v7 = vld [vmem:[%s9736_s0 + $0x10] sm:$0xff] }
  0x21   :  { %491 = vmatpush.msrb.mxu0 %v6873_v3  ;;  %5857 = vmatpush.msra.mxu3 %v6873_v3  ;;  %v6906_v8 = vld [vmem:[%s9739_s3 + $0x48] sm:$0xff]  ;;  %v139_v9 = vld [vmem:[%s9736_s0 + $0x18] sm:$0xff]  ;;  %v140_v10 = vld [vmem:[%s9736_s0 + $0x20] sm:$0xff] }
  0x22   :  { %5859 = vmatpush.msra.mxu2 %v6879_v4  ;;  %v330_v11 = vld [vmem:[%s9739_s3 + $0x38] sm:$0xff]  ;;  %v141_v12 = vld [vmem:[%s9736_s0 + $0x28] sm:$0xff]  ;;  %v142_v13 = vld [vmem:[%s9736_s0 + $0x30] sm:$0xff] }
  0x23   :  { %492 = vmatpush.msrb.mxu0 %v6879_v4  ;;  %5860 = vmatpush.msra.mxu3 %v6879_v4  ;;  %v328_v14 = vld [vmem:[%s9739_s3 + $0x28] sm:$0xff]  ;;  %v143_v15 = vld [vmem:[%s9736_s0 + $0x38] sm:$0xff]  ;;  %v144_v16 = vld [vmem:[%s9736_s0 + $0x40] sm:$0xff] }
  0x24   :  { %5862 = vmatpush.msra.mxu2 %v6886_v5  ;;  %v326_v17 = vld [vmem:[%s9739_s3 + $0x18] sm:$0xff]  ;;  %v145_v18 = vld [vmem:[%s9736_s0 + $0x48] sm:$0xff]  ;;  %v146_v20 = vld [vmem:[%s9736_s0 + $0x50] sm:$0xff] }
  0x25   :  { %493 = vmatpush.msrb.mxu0 %v6886_v5  ;;  %5863 = vmatpush.msra.mxu3 %v6886_v5  ;;  %v153_v19 = vld [vmem:[%s9736_s0 + $0x88] sm:$0xff]  ;;  %v154_v21 = vld [vmem:[%s9736_s0 + $0x90] sm:$0xff]  ;;  %v335_v23 = vld [vmem:[%s9739_s3 + $0x60] sm:$0xff] }
  0x26   :  { %5865 = vmatpush.msra.mxu2 %v6906_v8  ;;  %5614 = vmatmul.msk.f32.vlgmr.msra.gmra.mxu1 %vm161_vm1, %v153_v19  ;;  %v337_v22 = vld [vmem:[%s9739_s3 + $0x70] sm:$0xff]  ;;  %v324_v24 = vld [vmem:[%s9739_s3 + $0x8] sm:$0xff]  ;;  %v147_v26 = vld [vmem:[%s9736_s0 + $0x58] sm:$0xff] }
  0x27   :  { %494 = vmatpush.msrb.mxu0 %v6906_v8  ;;  %5866 = vmatpush.msra.mxu3 %v6906_v8  ;;  %v333_v25 = vld [vmem:[%s9739_s3 + $0x50] sm:$0xff]  ;;  %v331_v27 = vld [vmem:[%s9739_s3 + $0x40] sm:$0xff]  ;;  %v155_v28 = vld [vmem:[%s9736_s0 + $0x98] sm:$0xff] }
  0x28   :  { %5598 = vmatmul.msk.f32.gmra.mxu0 %vm161_vm1, %v137_v6  ;;  %5868 = vmatpush.msra.mxu2 %v330_v11  ;;  %v329_v29 = vld [vmem:[%s9739_s3 + $0x30] sm:$0xff]  ;;  %v327_v30 = vld [vmem:[%s9739_s3 + $0x20] sm:$0xff]  ;;  %v149_v34 = vld [vmem:[%s9736_s0 + $0x68] sm:$0xff] }
  0x29   :  { %495 = vmatpush.msrb.mxu0 %v330_v11  ;;  %5869 = vmatpush.msra.mxu3 %v330_v11  ;;  %v148_v31 = vld [vmem:[%s9736_s0 + $0x60] sm:$0xff]  ;;  %v325_v32 = vld [vmem:[%s9739_s3 + $0x10] sm:$0xff]  ;;  %v151_v38 = vld [vmem:[%s9736_s0 + $0x78] sm:$0xff] }
  0x2a   :  { %5871 = vmatpush.msra.mxu2 %v328_v14  ;;  %414 = vmatpush.msrb.mxu1 %v337_v22  ;;  %v323_v33 = vld [vmem:[%s9739_s3] sm:$0xff]  ;;  %v150_v36 = vld [vmem:[%s9736_s0 + $0x70] sm:$0xff] }
  0x2b   :  { %496 = vmatpush.msrb.mxu0 %v328_v14  ;;  %5872 = vmatpush.msra.mxu3 %v328_v14  ;;  %v615_v35 = vld [vmem:[#allocation8 + $0x78] sm:$0xff]  ;;  %v613_v37 = vld [vmem:[#allocation8 + $0x68] sm:$0xff]  ;;  %v7018_v39 = vld [vmem:[%s9738_s2] ss:$0 sm:$0xff] }
  0x2c   :  { %5874 = vmatpush.msra.mxu2 %v326_v17  ;;  %415 = vmatpush.msrb.mxu1 %v335_v23  ;;  %v611_v40 = vld [vmem:[#allocation8 + $0x58] sm:$0xff]  ;;  %v609_v45 = vld [vmem:[#allocation8 + $0x48] sm:$0xff] }
  0x2d   :  { %497 = vmatpush.msrb.mxu0 %v326_v17  ;;  %5875 = vmatpush.msra.mxu3 %v326_v17  ;;  %v152_v42 = vld [vmem:[%s9736_s0 + $0x80] sm:$0xff]  ;;  %v605_v56 = vld [vmem:[#allocation8 + $0x28] sm:$0xff] }
  0x2e   :  { %5615 = vmatmul.msk.f32.gmra.mxu1 %vm161_vm1, %v154_v21  ;;  %5877 = vmatpush.msra.mxu2 %v324_v24  ;;  %v607_v49 = vld [vmem:[#allocation8 + $0x38] sm:$0xff]  ;;  %v601_v0 = vld [vmem:[#allocation8 + $0x8] sm:$0xff]  ;;  %v614_v21 = vld [vmem:[#allocation8 + $0x70] sm:$0xff] }
  0x2f   :  { %498 = vmatpush.msrb.mxu0 %v324_v24  ;;  %5878 = vmatpush.msra.mxu3 %v324_v24  ;;  %v603_v60 = vld [vmem:[#allocation8 + $0x18] sm:$0xff] }
  0x30   :  { %5599 = vmatmul.msk.f32.gmra.mxu0 %vm161_vm1, %v138_v7  ;;  %416 = vmatpush.msrb.mxu1 %v333_v25  ;;  %v7081_v7 = vld [vmem:[%s9740_s4 + $0x78] sm:$0xff]  ;;  %v612_v25 = vld [vmem:[#allocation8 + $0x60] sm:$0xff] }
  0x31   :  { %707 = vmatpush.msra.mxu0 %v615_v35  ;;  %881 = vmatpush.msrb.mxu2 %v7081_v7 }
  0x32   :  { %417 = vmatpush.msrb.mxu1 %v331_v27  ;;  %630 = vmatpush.msrb.mxu3 %v614_v21 }
  0x33   :  { %708 = vmatpush.msra.mxu0 %v613_v37  ;;  %v606_v37 = vld [vmem:[#allocation8 + $0x30] sm:$0xff] }
  0x34   :  { %418 = vmatpush.msrb.mxu1 %v329_v29  ;;  %631 = vmatpush.msrb.mxu3 %v612_v25  ;;  %v610_v29 = vld [vmem:[#allocation8 + $0x50] sm:$0xff] }
  0x35   :  { %709 = vmatpush.msra.mxu0 %v611_v40  ;;  %v9750_v40 = vmov 0.0  }
  0x36   :  { %5616 = vmatmul.msk.f32.gmra.mxu1 %vm161_vm1, %v155_v28  ;;  %632 = vmatpush.msrb.mxu3 %v610_v29 }
  0x37   :  { %419 = vmatpush.msrb.mxu1 %v327_v30  ;;  %710 = vmatpush.msra.mxu0 %v609_v45  ;;  %v604_v45 = vld [vmem:[#allocation8 + $0x20] sm:$0xff] }
  0x38   :  { %5600 = vmatmul.msk.f32.gmra.mxu0 %vm161_vm1, %v139_v9 }
  0x39   :  { %420 = vmatpush.msrb.mxu1 %v325_v32  ;;  %711 = vmatpush.msra.mxu0 %v607_v49 }
  0x3b   :  { %421 = vmatpush.msrb.mxu1 %v323_v33  ;;  %712 = vmatpush.msra.mxu0 %v605_v56  ;;  %v608_v33 = vld [vmem:[#allocation8 + $0x40] sm:$0xff] }
  0x3c   :  { %633 = vmatpush.msrb.mxu3 %v608_v33  ;;  %v7295_v33 = vld [vmem:[#allocation10 + $0x60] sm:$0xff] }
  0x3d   :  { %5855 = vmatpush.msra.mxu1 %v6873_v3  ;;  %713 = vmatpush.msra.mxu0 %v603_v60 }
  0x3e   :  { %634 = vmatpush.msrb.mxu3 %v606_v37 }
  0x3f   :  { %5858 = vmatpush.msra.mxu1 %v6879_v4  ;;  %714 = vmatpush.msra.mxu0 %v601_v0  ;;  %v7210_v0 = vld [vmem:[%s9740_s4 + $0x70] sm:$0xff] }
  0x40   :  { %5601 = vmatmul.msk.f32.gmra.mxu0 %vm161_vm1, %v140_v10  ;;  %635 = vmatpush.msrb.mxu3 %v604_v45  ;;  %v7348_v45 = vld [vmem:[#allocation10 + $0x78] sm:$0xff] }
  0x41   :  { %5861 = vmatpush.msra.mxu1 %v6886_v5 }
  0x43   :  { %5864 = vmatpush.msra.mxu1 %v6906_v8  ;;  %v7087_v8 = vld [vmem:[%s9740_s4 + $0x68] sm:$0xff] }
  0x44   :  { %882 = vmatpush.msrb.mxu2 %v7087_v8 }
  0x45   :  { %5867 = vmatpush.msra.mxu1 %v330_v11  ;;  %v7094_v11 = vld [vmem:[%s9740_s4 + $0x58] sm:$0xff] }
  0x46   :  { %883 = vmatpush.msrb.mxu2 %v7094_v11 }
  0x47   :  { %5870 = vmatpush.msra.mxu1 %v328_v14  ;;  %v7112_v14 = vld [vmem:[%s9740_s4 + $0x38] sm:$0xff] }
  0x48   :  { %5602 = vmatmul.msk.f32.gmra.mxu0 %vm161_vm1, %v141_v12 }
  0x49   :  { %5873 = vmatpush.msra.mxu1 %v326_v17 }
  0x4b   :  { %5876 = vmatpush.msra.mxu1 %v324_v24 }
  0x50   :  { %5603 = vmatmul.msk.f32.gmra.mxu0 %vm161_vm1, %v142_v13  ;;  %v7104_v13 = vld [vmem:[%s9740_s4 + $0x48] sm:$0xff] }
  0x51   :  { %884 = vmatpush.msrb.mxu2 %v7104_v13 }
  0x53   :  { %885 = vmatpush.msrb.mxu2 %v7112_v14 }
  0x58   :  { %5604 = vmatmul.msk.f32.gmra.mxu0 %vm161_vm1, %v143_v15  ;;  %v7118_v15 = vld [vmem:[%s9740_s4 + $0x28] sm:$0xff] }
  0x59   :  { %886 = vmatpush.msrb.mxu2 %v7118_v15 }
  0x60   :  { %5605 = vmatmul.msk.f32.gmra.mxu0 %vm161_vm1, %v144_v16 }
  0x68   :  { %5606 = vmatmul.msk.f32.gmra.mxu0 %vm161_vm1, %v145_v18  ;;  %v7125_v18 = vld [vmem:[%s9740_s4 + $0x18] sm:$0xff] }
  0x69   :  { %887 = vmatpush.msrb.mxu2 %v7125_v18 }
  0x70   :  { %5607 = vmatmul.msk.f32.gmra.mxu0 %vm161_vm1, %v146_v20  ;;  %v7135_v20 = vld [vmem:[%s9740_s4 + $0x8] sm:$0xff] }
  0x71   :  { %888 = vmatpush.msrb.mxu2 %v7135_v20 }
  0x78   :  { %5608 = vmatmul.msk.f32.gmra.mxu0 %vm161_vm1, %v147_v26 }
  0x80   :  { %5609 = vmatmul.msk.f32.gmra.mxu0 %vm161_vm1, %v148_v31 }
  0x88   :  { %5610 = vmatmul.msk.f32.gmra.mxu0 %vm161_vm1, %v149_v34 }
  0x90   :  { %5611 = vmatmul.msk.f32.gmra.mxu0 %vm161_vm1, %v150_v36 }
  0x98   :  { %5612 = vmatmul.msk.f32.gmra.mxu0 %vm161_vm1, %v151_v38 }
  0x9d   :  { %v243_v41 = vpop.f32.mrf.mxu0 }
  0x9e   :  { %v244_v43 = vadd.f32 %v7018_v39, %v243_v41 }
  0xa0   :  { %v7024_v44 = vmax.f32 %v244_v43, 0.0  ;;  %5613 = vmatmul.msk.f32.gmra.mxu0 %vm161_vm1, %v152_v42 }
  0xa2   :  { %5617 = vmatmul.msk.f32.vlgmr.msrb.gmra.mxu1 %vm345_vm2, %v7024_v44 }
  0xa3   :  { %v294_v34 = vpop.f32.mrf.mxu1  ;;  %861 = vmatpush.msrb.mxu1 %v7210_v0 }
  0xa5   :  { %v246_v46 = vpop.f32.mrf.mxu0 }
  0xa6   :  { %v247_v47 = vadd.f32 %v7018_v39, %v246_v46 }
  0xa8   :  { %v7030_v48 = vmax.f32 %v247_v47, 0.0  ;;  %5637 = vmatmul.msk.f32.vlgmr.msrb.gmra.mxu0 %vm345_vm2, %v7024_v44  ;;  %v602_v47 = vld [vmem:[#allocation8 + $0x10] sm:$0xff] }
  0xa9   :  { %636 = vmatpush.msrb.mxu3 %v602_v47 }
  0xaa   :  { %5618 = vmatmul.msk.f32.gmra.mxu1 %vm345_vm2, %v7030_v48 }
  0xab   :  { %v297_v41 = vpop.f32.mrf.mxu1 }
  0xad   :  { %v249_v50 = vpop.f32.mrf.mxu0 }
  0xae   :  { %v250_v51 = vadd.f32 %v7018_v39, %v249_v50 }
  0xb0   :  { %v7037_v52 = vmax.f32 %v250_v51, 0.0  ;;  %5638 = vmatmul.msk.f32.gmra.mxu0 %vm345_vm2, %v7030_v48 }
  0xb2   :  { %5619 = vmatmul.msk.f32.gmra.mxu1 %vm345_vm2, %v7037_v52 }
  0xb3   :  { %v300_v50 = vpop.f32.mrf.mxu1 }
  0xb4   :  { %v301_v29 = vadd.f32 %v7018_v39, %v300_v50 }
  0xb5   :  { %v252_v53 = vpop.f32.mrf.mxu0 }
  0xb6   :  { %v253_v54 = vadd.f32 %v7018_v39, %v252_v53 }
  0xb8   :  { %v7044_v55 = vmax.f32 %v253_v54, 0.0  ;;  %5639 = vmatmul.msk.f32.gmra.mxu0 %vm345_vm2, %v7037_v52  ;;  %v600_v54 = vld [vmem:[#allocation8] sm:$0xff] }
  0xb9   :  { %637 = vmatpush.msrb.mxu3 %v600_v54  ;;  %v7375_v54 = vld [vmem:[#allocation10 + $0x38] sm:$0xff] }
  0xba   :  { %5620 = vmatmul.msk.f32.gmra.mxu1 %vm345_vm2, %v7044_v55 }
  0xbd   :  { %v255_v57 = vpop.f32.mrf.mxu0 }
  0xbe   :  { %v256_v58 = vadd.f32 %v7018_v39, %v255_v57 }
  0xc0   :  { %v7051_v59 = vmax.f32 %v256_v58, 0.0  ;;  %5640 = vmatmul.msk.f32.gmra.mxu0 %vm345_vm2, %v7044_v55 }
  0xc2   :  { %5621 = vmatmul.msk.f32.gmra.mxu1 %vm345_vm2, %v7051_v59 }
  0xc5   :  { %v258_v61 = vpop.f32.mrf.mxu0 }
  0xc6   :  { %v259_v62 = vadd.f32 %v7018_v39, %v258_v61  ;;  %v295_v61 = vadd.f32 %v7018_v39, %v294_v34 }
  0xc8   :  { %v7058_v63 = vmax.f32 %v259_v62, 0.0  ;;  %5641 = vmatmul.msk.f32.gmra.mxu0 %vm345_vm2, %v7051_v59  ;;  %v7205_v62 = vld [vmem:[#allocation10 + $0x70] sm:$0xff] }
  0xc9   :  { %2411 = vmatpush.msrb.mxu0 %v7205_v62 }
  0xca   :  { %5622 = vmatmul.msk.f32.gmra.mxu1 %vm345_vm2, %v7058_v63 }
  0xcb   :  { %2412 = vmatpush.msrb.mxu0 %v7295_v33 }
  0xcd   :  { %v261_v1 = vpop.f32.mrf.mxu0 }
  0xce   :  { %v262_v2 = vadd.f32 %v7018_v39, %v261_v1 }
  0xd0   :  { %v7065_v3 = vmax.f32 %v262_v2, 0.0  ;;  %5642 = vmatmul.msk.f32.gmra.mxu0 %vm345_vm2, %v7058_v63  ;;  %v7221_v2 = vld [vmem:[%s9740_s4 + $0x60] sm:$0xff] }
  0xd1   :  { %862 = vmatpush.msrb.mxu1 %v7221_v2 }
  0xd2   :  { %5623 = vmatmul.msk.f32.gmra.mxu1 %vm345_vm2, %v7065_v3 }
  0xd5   :  { %v264_v4 = vpop.f32.mrf.mxu0 }
  0xd6   :  { %v265_v5 = vadd.f32 %v7018_v39, %v264_v4  ;;  %v7223_v4 = vmax.f32 %v295_v61, 0.0 }
  0xd8   :  { %v7072_v6 = vmax.f32 %v265_v5, 0.0  ;;  %5643 = vmatmul.msk.f32.gmra.mxu0 %vm345_vm2, %v7065_v3 }
  0xda   :  { %5624 = vmatmul.msk.f32.gmra.mxu1 %vm345_vm2, %v7072_v6 }
  0xdd   :  { %v267_v9 = vpop.f32.mrf.mxu0 }
  0xde   :  { %v268_v10 = vadd.f32 %v7018_v39, %v267_v9  ;;  %v7232_v9 = vld [vmem:[%s9740_s4 + $0x50] sm:$0xff] }
  0xdf   :  { %863 = vmatpush.msrb.mxu1 %v7232_v9 }
  0xe0   :  { %v7097_v12 = vmax.f32 %v268_v10, 0.0  ;;  %5644 = vmatmul.msk.f32.gmra.mxu0 %vm345_vm2, %v7072_v6  ;;  %v7240_v10 = vld [vmem:[%s9740_s4 + $0x40] sm:$0xff] }
  0xe1   :  { %864 = vmatpush.msrb.mxu1 %v7240_v10 }
  0xe2   :  { %5625 = vmatmul.msk.f32.gmra.mxu1 %vm345_vm2, %v7097_v12 }
  0xe5   :  { %v270_v16 = vpop.f32.mrf.mxu0 }
  0xe6   :  { %v271_v17 = vadd.f32 %v7018_v39, %v270_v16  ;;  %v298_v16 = vadd.f32 %v7018_v39, %v297_v41  ;;  %v7327_v41 = vld [vmem:[#allocation10 + $0x50] sm:$0xff] }
  0xe7   :  { %2413 = vmatpush.msrb.mxu0 %v7327_v41 }
  0xe8   :  { %v7128_v19 = vmax.f32 %v271_v17, 0.0  ;;  %5645 = vmatmul.msk.f32.gmra.mxu0 %vm345_vm2, %v7097_v12  ;;  %v7251_v17 = vld [vmem:[%s9740_s4 + $0x30] sm:$0xff] }
  0xe9   :  { %865 = vmatpush.msrb.mxu1 %v7251_v17 }
  0xea   :  { %5626 = vmatmul.msk.f32.gmra.mxu1 %vm345_vm2, %v7128_v19 }
  0xed   :  { %v273_v22 = vpop.f32.mrf.mxu0 }
  0xee   :  { %v274_v23 = vadd.f32 %v7018_v39, %v273_v22  ;;  %v7261_v22 = vld [vmem:[%s9740_s4 + $0x20] sm:$0xff] }
  0xef   :  { %866 = vmatpush.msrb.mxu1 %v7261_v22 }
  0xf0   :  { %v7141_v24 = vmax.f32 %v274_v23, 0.0  ;;  %5677 = vmatmul.msk.f32.vlgmr.msra.gmra.mxu0 %vm345_vm2, %v7024_v44  ;;  %v7264_v23 = vmax.f32 %v298_v16, 0.0  ;;  %v7387_v16 = vld [vmem:[#allocation10 + $0x18] sm:$0xff] }
  0xf2   :  { %5627 = vmatmul.msk.f32.gmra.mxu1 %vm345_vm2, %v7141_v24 }
  0xf5   :  { %v276_v26 = vpop.f32.mrf.mxu0 }
  0xf6   :  { %v277_v27 = vadd.f32 %v7018_v39, %v276_v26  ;;  %v7272_v26 = vld [vmem:[%s9740_s4 + $0x10] sm:$0xff] }
  0xf7   :  { %867 = vmatpush.msrb.mxu1 %v7272_v26 }
  0xf8   :  { %v7148_v28 = vmax.f32 %v277_v27, 0.0  ;;  %5678 = vmatmul.msk.f32.gmra.mxu0 %vm345_vm2, %v7030_v48  ;;  %v7280_v27 = vld [vmem:[%s9740_s4] sm:$0xff] }
  0xf9   :  { %868 = vmatpush.msrb.mxu1 %v7280_v27 }
  0xfa   :  { %5628 = vmatmul.msk.f32.gmra.mxu1 %vm345_vm2, %v7148_v28  ;;  %5648 = vmatmul.msk.f32.vlgmr.msra.gmra.mxu2 %vm345_vm2, %v7148_v28 }
  0xfb   :  { %1074 = vmatpush.msra.mxu2 %v7210_v0 }
  0xfd   :  { %v279_v30 = vpop.f32.mrf.mxu0  ;;  %1075 = vmatpush.msra.mxu2 %v7221_v2 }
  0xfe   :  { %v280_v31 = vadd.f32 %v7018_v39, %v279_v30 }
  0xff   :  { %1076 = vmatpush.msra.mxu2 %v7232_v9 }
 0x100   :  { %v7157_v32 = vmax.f32 %v280_v31, 0.0  ;;  %5679 = vmatmul.msk.f32.gmra.mxu0 %vm345_vm2, %v7037_v52  ;;  %v7293_v31 = vmax.f32 %v301_v29, 0.0 }
 0x101   :  { %1077 = vmatpush.msra.mxu2 %v7240_v10 }
 0x102   :  { %5629 = vmatmul.msk.f32.gmra.mxu1 %vm345_vm2, %v7157_v32  ;;  %5649 = vmatmul.msk.f32.gmra.mxu2 %vm345_vm2, %v7157_v32 }
 0x103   :  { %1078 = vmatpush.msra.mxu2 %v7251_v17 }
 0x105   :  { %v282_v35 = vpop.f32.mrf.mxu0  ;;  %1079 = vmatpush.msra.mxu2 %v7261_v22 }
 0x106   :  { %v283_v36 = vadd.f32 %v7018_v39, %v282_v35 }
 0x107   :  { %1080 = vmatpush.msra.mxu2 %v7272_v26 }
 0x108   :  { %v7166_v38 = vmax.f32 %v283_v36, 0.0  ;;  %5680 = vmatmul.msk.f32.gmra.mxu0 %vm345_vm2, %v7044_v55 }
 0x109   :  { %1081 = vmatpush.msra.mxu2 %v7280_v27 }
 0x10a   :  { %5630 = vmatmul.msk.f32.gmra.mxu1 %vm345_vm2, %v7166_v38  ;;  %5650 = vmatmul.msk.f32.vlgmr.msra.gmra.mxu3 %vm345_vm2, %v7166_v38 }
 0x10b   :  { %889 = vmatmul.f32.vlgmr.msrb.gmra.mxu2 %v9750_v40  ;;  %906 = vmatpush.msra.mxu3 %v7205_v62 }
 0x10c   :  { %1141 = vmatpush.msrb.mxu2 %v7348_v45 }
 0x10d   :  { %v285_v42 = vpop.f32.mrf.mxu0  ;;  %907 = vmatpush.msra.mxu3 %v7295_v33 }
 0x10e   :  { %v286_v43 = vadd.f32 %v7018_v39, %v285_v42 }
 0x10f   :  { %908 = vmatpush.msra.mxu3 %v7327_v41 }
 0x110   :  { %v7176_v46 = vmax.f32 %v286_v43, 0.0  ;;  %5681 = vmatmul.msk.f32.gmra.mxu0 %vm345_vm2, %v7051_v59 }
 0x112   :  { %5631 = vmatmul.msk.f32.gmra.mxu1 %vm345_vm2, %v7176_v46  ;;  %5651 = vmatmul.msk.f32.gmra.mxu3 %vm345_vm2, %v7176_v46 }
 0x115   :  { %v288_v49 = vpop.f32.mrf.mxu0 }
 0x116   :  { %v289_v51 = vadd.f32 %v7018_v39, %v288_v49  ;;  %v7357_v49 = vld [vmem:[#allocation10 + $0x40] sm:$0xff] }
 0x117   :  { %909 = vmatpush.msra.mxu3 %v7357_v49  ;;  %2414 = vmatpush.msrb.mxu0 %v7357_v49 }
 0x118   :  { %v7185_v53 = vmax.f32 %v289_v51, 0.0  ;;  %5682 = vmatmul.msk.f32.gmra.mxu0 %vm345_vm2, %v7058_v63  ;;  %v7369_v51 = vld [vmem:[#allocation10 + $0x48] sm:$0xff] }
 0x11a   :  { %5632 = vmatmul.msk.f32.gmra.mxu1 %vm345_vm2, %v7185_v53  ;;  %5652 = vmatmul.msk.f32.gmra.mxu3 %vm345_vm2, %v7185_v53 }
 0x11d   :  { %v291_v56 = vpop.f32.mrf.mxu0 }
 0x11e   :  { %v292_v57 = vadd.f32 %v7018_v39, %v291_v56 }
 0x11f   :  { %v7194_v58 = vpop.f32.mrf.mxu1 }
 0x120   :  { %v7196_v60 = vmax.f32 %v292_v57, 0.0  ;;  %5683 = vmatmul.msk.f32.gmra.mxu0 %vm345_vm2, %v7065_v3  ;;  %v7381_v57 = vld [vmem:[#allocation10 + $0x28] sm:$0xff] }
 0x122   :  { %5633 = vmatmul.msk.f32.gmra.mxu1 %vm345_vm2, %v7196_v60  ;;  %5653 = vmatmul.msk.f32.gmra.mxu3 %vm345_vm2, %v7196_v60 }
 0x125   :  { %v7216_v1 = vpop.f32.mrf.mxu0 }
 0x127   :  { %v7227_v5 = vpop.f32.mrf.mxu1 }
 0x128   :  { %5684 = vmatmul.msk.f32.gmra.mxu0 %vm345_vm2, %v7072_v6 }
 0x12a   :  { %5634 = vmatmul.msk.f32.gmra.mxu1 %vm345_vm2, %v7223_v4  ;;  %5654 = vmatmul.msk.f32.gmra.mxu3 %vm345_vm2, %v7223_v4 }
 0x12d   :  { %v7255_v21 = vpop.f32.mrf.mxu0 }
 0x12f   :  { %v7266_v25 = vpop.f32.mrf.mxu1 }
 0x130   :  { %5685 = vmatmul.msk.f32.gmra.mxu0 %vm345_vm2, %v7097_v12 }
 0x132   :  { %5635 = vmatmul.msk.f32.gmra.mxu1 %vm345_vm2, %v7264_v23  ;;  %5655 = vmatmul.msk.f32.gmra.mxu3 %vm345_vm2, %v7264_v23 }
 0x135   :  { %v7291_v30 = vpop.f32.mrf.mxu0 }
 0x137   :  { %v7297_v34 = vpop.f32.mrf.mxu1 }
 0x138   :  { %9767 = vst [vmem:[#allocation20_spill] sm:$0xff] %v7297_v34  ;;  %5686 = vmatmul.msk.f32.gmra.mxu0 %vm345_vm2, %v7128_v19 }
 0x13a   :  { %5636 = vmatmul.msk.f32.gmra.mxu1 %vm345_vm2, %v7293_v31  ;;  %5656 = vmatmul.msk.f32.gmra.mxu3 %vm345_vm2, %v7293_v31 }
 0x13d   :  { %v7307_v39 = vpop.f32.mrf.mxu0 }
 0x13e   :  { %9768 = vst [vmem:[#allocation21_spill] sm:$0xff] %v7307_v39 }
 0x13f   :  { %v7309_v35 = vpop.f32.mrf.mxu1 }
 0x140   :  { %9769 = vst [vmem:[#allocation22_spill] sm:$0xff] %v7309_v35  ;;  %5687 = vmatmul.msk.f32.gmra.mxu0 %vm345_vm2, %v7141_v24 }
 0x142   :  { %5646 = vmatmul.msk.f32.vlgmr.msra.gmra.mxu1 %vm345_vm2, %v7128_v19  ;;  %5657 = vmatmul.msk.f32.vlgmr.msrb.gmra.mxu3 %vm345_vm2, %v7024_v44 }
 0x143   :  { %926 = vmatpush.msra.mxu1 %v7348_v45 }
 0x145   :  { %v7317_v36 = vpop.f32.mrf.mxu0 }
 0x146   :  { %9770 = vst [vmem:[#allocation23_spill] sm:$0xff] %v7317_v36 }
 0x147   :  { %v7319_v37 = vpop.f32.mrf.mxu1 }
 0x148   :  { %9771 = vst [vmem:[#allocation24_spill] sm:$0xff] %v7319_v37  ;;  %5688 = vmatmul.msk.f32.gmra.mxu0 %vm345_vm2, %v7148_v28 }
 0x14a   :  { %5647 = vmatmul.msk.f32.gmra.mxu1 %vm345_vm2, %v7141_v24  ;;  %5658 = vmatmul.msk.f32.gmra.mxu3 %vm345_vm2, %v7030_v48 }
 0x14d   :  { %v7331_v44 = vpop.f32.mrf.mxu0 }
 0x14e   :  { %9772 = vst [vmem:[#allocation25_spill] sm:$0xff] %v7331_v44 }
 0x14f   :  { %v7333_v42 = vpop.f32.mrf.mxu1 }
 0x150   :  { %9773 = vst [vmem:[#allocation26_spill] sm:$0xff] %v7333_v42  ;;  %5689 = vmatmul.msk.f32.gmra.mxu0 %vm345_vm2, %v7157_v32 }
 0x152   :  { %5659 = vmatmul.msk.f32.gmra.mxu3 %vm345_vm2, %v7037_v52  ;;  %869 = vmatmul.f32.vlgmr.msrb.gmra.mxu1 %v9750_v40  ;;  %v7354_v52 = vld [vmem:[#allocation10 + $0x68] sm:$0xff] }
 0x153   :  { %927 = vmatpush.msra.mxu1 %v7354_v52  ;;  %1142 = vmatpush.msrb.mxu2 %v7354_v52 }
 0x155   :  { %v7340_v43 = vpop.f32.mrf.mxu0 }
 0x156   :  { %9774 = vst [vmem:[#allocation27_spill] sm:$0xff] %v7340_v43 }
 0x157   :  { %v7342_v48 = vpop.f32.mrf.mxu1 }
 0x158   :  { %9775 = vst [vmem:[#allocation28_spill] sm:$0xff] %v7342_v48  ;;  %5690 = vmatmul.msk.f32.gmra.mxu0 %vm345_vm2, %v7166_v38 }
 0x15a   :  { %5660 = vmatmul.msk.f32.gmra.mxu3 %vm345_vm2, %v7044_v55  ;;  %v7363_v55 = vld [vmem:[#allocation10 + $0x58] sm:$0xff] }
 0x15b   :  { %928 = vmatpush.msra.mxu1 %v7363_v55  ;;  %1143 = vmatpush.msrb.mxu2 %v7363_v55 }
 0x15d   :  { %v7352_v47 = vpop.f32.mrf.mxu0  ;;  %929 = vmatpush.msra.mxu1 %v7369_v51  ;;  %1144 = vmatpush.msrb.mxu2 %v7369_v51 }
 0x15e   :  { %9776 = vst [vmem:[#allocation29_spill] sm:$0xff] %v7352_v47 }
 0x15f   :  { %v7360_v50 = vpop.f32.mrf.mxu1  ;;  %930 = vmatpush.msra.mxu1 %v7375_v54  ;;  %1145 = vmatpush.msrb.mxu2 %v7375_v54 }
 0x160   :  { %9777 = vst [vmem:[#allocation30_spill] sm:$0xff] %v7360_v50  ;;  %5691 = vmatmul.msk.f32.gmra.mxu0 %vm345_vm2, %v7176_v46 }
 0x161   :  { %931 = vmatpush.msra.mxu1 %v7381_v57  ;;  %1146 = vmatpush.msrb.mxu2 %v7381_v57 }
 0x162   :  { %5661 = vmatmul.msk.f32.gmra.mxu3 %vm345_vm2, %v7051_v59  ;;  %v7393_v59 = vld [vmem:[#allocation10 + $0x8] sm:$0xff] }
 0x163   :  { %932 = vmatpush.msra.mxu1 %v7387_v16  ;;  %1147 = vmatpush.msrb.mxu2 %v7387_v16 }
 0x165   :  { %v7379_v56 = vpop.f32.mrf.mxu0  ;;  %933 = vmatpush.msra.mxu1 %v7393_v59  ;;  %1148 = vmatpush.msrb.mxu2 %v7393_v59 }
 0x166   :  { %9778 = vst [vmem:[#allocation31_spill] sm:$0xff] %v7379_v56  ;;  %934 = vmatmul.f32.vlgmr.msra.gmra.mxu1 %v9750_v40 }
 0x167   :  { %v7385_v61 = vpop.f32.mrf.mxu1  ;;  %1121 = vmatpush.msrb.mxu1 %v7205_v62 }
 0x168   :  { %9779 = vst [vmem:[#allocation32_spill] sm:$0xff] %v7385_v61  ;;  %5692 = vmatmul.msk.f32.gmra.mxu0 %vm345_vm2, %v7185_v53 }
 0x169   :  { %1122 = vmatpush.msrb.mxu1 %v7295_v33 }
 0x16a   :  { %5662 = vmatmul.msk.f32.gmra.mxu3 %vm345_vm2, %v7058_v63 }
 0x16b   :  { %1123 = vmatpush.msrb.mxu1 %v7327_v41 }
 0x16d   :  { %v7402_v29 = vpop.f32.mrf.mxu0  ;;  %1124 = vmatpush.msrb.mxu1 %v7357_v49 }
 0x16e   :  { %9780 = vst [vmem:[#allocation33_spill] sm:$0xff] %v7402_v29  ;;  %v7421_v29 = vld [vmem:[#allocation10 + $0x30] sm:$0xff] }
 0x16f   :  { %v7405_v61 = vpop.f32.mrf.mxu1  ;;  %910 = vmatpush.msra.mxu3 %v7421_v29  ;;  %1125 = vmatpush.msrb.mxu1 %v7421_v29 }
 0x170   :  { %9781 = vst [vmem:[#allocation34_spill] sm:$0xff] %v7405_v61  ;;  %5693 = vmatmul.msk.f32.gmra.mxu0 %vm345_vm2, %v7196_v60 }
 0x171   :  { %2415 = vmatpush.msrb.mxu0 %v7421_v29 }
 0x172   :  { %5663 = vmatmul.msk.f32.gmra.mxu3 %vm345_vm2, %v7065_v3 }
 0x175   :  { %v7413_v63 = vpop.f32.mrf.mxu0 }
 0x176   :  { %9782 = vst [vmem:[#allocation35_spill] sm:$0xff] %v7413_v63 }
 0x177   :  { %v7415_v40 = vpop.f32.mrf.mxu1 }
 0x178   :  { %9783 = vst [vmem:[#allocation36_spill] sm:$0xff] %v7415_v40  ;;  %5694 = vmatmul.msk.f32.gmra.mxu0 %vm345_vm2, %v7223_v4  ;;  %v7440_v40 = vld [vmem:[#allocation10 + $0x20] sm:$0xff] }
 0x179   :  { %911 = vmatpush.msra.mxu3 %v7440_v40  ;;  %1126 = vmatpush.msrb.mxu1 %v7440_v40 }
 0x17a   :  { %5664 = vmatmul.msk.f32.gmra.mxu3 %vm345_vm2, %v7072_v6  ;;  %2416 = vmatpush.msrb.mxu0 %v7440_v40 }
 0x17d   :  { %v7423_v61 = vpop.f32.mrf.mxu2  ;;  %v7425_v50 = vpop.f32.mrf.mxu0 }
 0x17e   :  { %9784 = vst [vmem:[#allocation37_spill] sm:$0xff] %v7423_v61 }
 0x17f   :  { %9785 = vst [vmem:[#allocation38_spill] sm:$0xff] %v7425_v50  ;;  %v7430_v3 = vpop.f32.mrf.mxu1 }
 0x180   :  { %9786 = vst [vmem:[#allocation39_spill] sm:$0xff] %v7430_v3  ;;  %5695 = vmatmul.msk.f32.gmra.mxu0 %vm345_vm2, %v7264_v23  ;;  %v7449_v3 = vld [vmem:[%s9741_s5] sm:$0x3]  ;;  %s6771_s5 = smov 64  }
 0x182   :  { %5665 = vmatmul.msk.f32.gmra.mxu3 %vm345_vm2, %v7097_v12  ;;  %v7454_v12 = vperm.slane %v7449_v3, 1 }
 0x185   :  { %v7436_v6 = vpop.f32.mrf.mxu2  ;;  %v7438_v63 = vpop.f32.mrf.mxu0 }
 0x186   :  { %9787 = vst [vmem:[#allocation40_spill] sm:$0xff] %v7436_v6 }
 0x187   :  { %9788 = vst [vmem:[#allocation41_spill] sm:$0xff] %v7438_v63  ;;  %v7442_v50 = vpop.f32.mrf.mxu1  ;;  %v501_v63 = vadd.f32 %v7216_v1, %v7454_v12 }
 0x188   :  { %9789 = vst [vmem:[#allocation42_spill] sm:$0xff] %v7442_v50  ;;  %5696 = vmatmul.msk.f32.gmra.mxu0 %vm345_vm2, %v7293_v31 }
 0x18a   :  { %5666 = vmatmul.msk.f32.gmra.mxu3 %vm345_vm2, %v7128_v19 }
 0x18d   :  { %v7461_v50 = vpop.f32.mrf.mxu3  ;;  %v7463_v6 = vpop.f32.mrf.mxu0 }
 0x18e   :  { %9790 = vst [vmem:[#allocation43_spill] sm:$0xff] %v7461_v50  ;;  %v890_v61 = vpop.f32.mrf.mxu2 }
 0x18f   :  { %9791 = vst [vmem:[#allocation44_spill] sm:$0xff] %v7463_v6  ;;  %v7465_v56 = vadd.f32 %v890_v61, %v501_v63  ;;  %v7467_v48 = vpop.f32.mrf.mxu1  ;;  %v7481_v61 = vld [vmem:[#allocation10 + $0x10] sm:$0xff] }
 0x190   :  { %9792 = vst [vmem:[#allocation45_spill] sm:$0xff] %v7467_v48  ;;  %912 = vmatpush.msra.mxu3 %v7481_v61  ;;  %1127 = vmatpush.msrb.mxu1 %v7481_v61 }
 0x191   :  { %5915 = vtanh.f32 %v7465_v56  ;;  %2417 = vmatpush.msrb.mxu0 %v7481_v61 }
 0x192   :  { %5667 = vmatmul.msk.f32.gmra.mxu3 %vm345_vm2, %v7141_v24 }
 0x195   :  { %v7472_v47 = vpop.f32.mrf.mxu3  ;;  %v7474_v19 = vpop.f32.mrf.mxu0 }
 0x196   :  { %9793 = vst [vmem:[#allocation46_spill] sm:$0xff] %v7472_v47 }
 0x197   :  { %9794 = vst [vmem:[#allocation47_spill] sm:$0xff] %v7474_v19  ;;  %v5916_v42 = vpop.eup %5915  ;;  %v7476_v1 = vpop.f32.mrf.mxu1 }
 0x198   :  { %9795 = vst [vmem:[#allocation48_spill] sm:$0xff] %v7476_v1  ;;  %981 = vrot.lane.b32.xlu0 %v5916_v42, %s6771_s5 }
 0x19a   :  { %5668 = vmatmul.msk.f32.gmra.mxu3 %vm345_vm2, %v7148_v28 }
 0x19d   :  { %v7486_v24 = vpop.f32.mrf.mxu3  ;;  %v7488_v63 = vpop.f32.mrf.mxu0 }
 0x19e   :  { %9796 = vst [vmem:[#allocation49_spill] sm:$0xff] %v7486_v24  ;;  %v7506_v24 = vld [vmem:[#allocation10] sm:$0xff] }
 0x19f   :  { %9797 = vst [vmem:[#allocation50_spill] sm:$0xff] %v7488_v63  ;;  %v7490_v6 = vpop.f32.mrf.mxu1  ;;  %913 = vmatpush.msra.mxu3 %v7506_v24  ;;  %1128 = vmatpush.msrb.mxu1 %v7506_v24 }
 0x1a0   :  { %9798 = vst [vmem:[#allocation51_spill] sm:$0xff] %v7490_v6  ;;  %2418 = vmatpush.msrb.mxu0 %v7506_v24 }
 0x1a1   :  { %1094 = vmatpush.msrb.mxu3 %v7081_v7  ;;  %1309 = vmatpush.msra.mxu1 %v7081_v7 }
 0x1a2   :  { %5669 = vmatmul.msk.f32.gmra.mxu3 %vm345_vm2, %v7157_v32  ;;  %2626 = vmatpush.msra.mxu0 %v7205_v62 }
 0x1a3   :  { %1310 = vmatpush.msra.mxu1 %v7087_v8  ;;  %1095 = vmatpush.msrb.mxu3 %v7087_v8 }
 0x1a4   :  { %2627 = vmatpush.msra.mxu0 %v7295_v33 }
 0x1a5   :  { %v7494_v42 = vpop.f32.mrf.mxu3  ;;  %v7496_v28 = vpop.f32.mrf.mxu0  ;;  %1311 = vmatpush.msra.mxu1 %v7094_v11  ;;  %1096 = vmatpush.msrb.mxu3 %v7094_v11 }
 0x1a6   :  { %9799 = vst [vmem:[#allocation52_spill] sm:$0xff] %v7494_v42  ;;  %2628 = vmatpush.msra.mxu0 %v7327_v41  ;;  %v7570_v42 = vperm.slane %v7449_v3, 0 }
 0x1a7   :  { %9800 = vst [vmem:[#allocation53_spill] sm:$0xff] %v7496_v28  ;;  %v7498_v1 = vpop.f32.mrf.mxu1  ;;  %1312 = vmatpush.msra.mxu1 %v7104_v13  ;;  %1097 = vmatpush.msrb.mxu3 %v7104_v13 }
 0x1a8   :  { %9801 = vst [vmem:[#allocation54_spill] sm:$0xff] %v7498_v1  ;;  %2629 = vmatpush.msra.mxu0 %v7357_v49 }
 0x1a9   :  { %1313 = vmatpush.msra.mxu1 %v7112_v14  ;;  %1098 = vmatpush.msrb.mxu3 %v7112_v14 }
 0x1aa   :  { %5670 = vmatmul.msk.f32.gmra.mxu3 %vm345_vm2, %v7166_v38  ;;  %2630 = vmatpush.msra.mxu0 %v7421_v29 }
 0x1ab   :  { %1314 = vmatpush.msra.mxu1 %v7118_v15  ;;  %1099 = vmatpush.msrb.mxu3 %v7118_v15 }
 0x1ac   :  { %2631 = vmatpush.msra.mxu0 %v7440_v40 }
 0x1ad   :  { %v7502_v48 = vpop.f32.mrf.mxu3  ;;  %v7504_v47 = vpop.f32.mrf.mxu0  ;;  %1315 = vmatpush.msra.mxu1 %v7125_v18  ;;  %1100 = vmatpush.msrb.mxu3 %v7125_v18 }
 0x1ae   :  { %9802 = vst [vmem:[#allocation55_spill] sm:$0xff] %v7502_v48  ;;  %2632 = vmatpush.msra.mxu0 %v7481_v61 }
 0x1af   :  { %9803 = vst [vmem:[#allocation56_spill] sm:$0xff] %v7504_v47  ;;  %v7508_v19 = vpop.f32.mrf.mxu1  ;;  %1316 = vmatpush.msra.mxu1 %v7135_v20  ;;  %1101 = vmatpush.msrb.mxu3 %v7135_v20 }
 0x1b0   :  { %9804 = vst [vmem:[#allocation57_spill] sm:$0xff] %v7508_v19  ;;  %2633 = vmatpush.msra.mxu0 %v7506_v24 }
 0x1b2   :  { %5671 = vmatmul.msk.f32.gmra.mxu3 %vm345_vm2, %v7176_v46 }
 0x1b5   :  { %v7521_v32 = vpop.f32.mrf.mxu3  ;;  %v7523_v38 = vpop.f32.mrf.mxu0 }
 0x1b6   :  { %9805 = vst [vmem:[#allocation58_spill] sm:$0xff] %v7521_v32 }
 0x1b7   :  { %9806 = vst [vmem:[#allocation59_spill] sm:$0xff] %v7523_v38  ;;  %v7530_v46 = vpop.f32.mrf.mxu1  ;;  %v616_v38 = vld [vmem:[%s9744_s8] sm:$0x3] }
 0x1b8   :  { %9807 = vst [vmem:[#allocation60_spill] sm:$0xff] %v7530_v46 }
 0x1ba   :  { %5672 = vmatmul.msk.f32.gmra.mxu3 %vm345_vm2, %v7185_v53 }
 0x1bd   :  { %v7541_v19 = vpop.f32.mrf.mxu3  ;;  %v7543_v46 = vpop.f32.mrf.mxu0 }
 0x1be   :  { %9808 = vst [vmem:[#allocation61_spill] sm:$0xff] %v7541_v19 }
 0x1bf   :  { %9809 = vst [vmem:[#allocation62_spill] sm:$0xff] %v7543_v46  ;;  %v7551_v53 = vpop.f32.mrf.mxu1  ;;  %v7612_v46 = vperm.slane %v616_v38, 1 }
 0x1c0   :  { %9810 = vst [vmem:[#allocation63_spill] sm:$0xff] %v7551_v53 }
 0x1c2   :  { %5673 = vmatmul.msk.f32.gmra.mxu3 %vm345_vm2, %v7196_v60 }
 0x1c5   :  { %v7555_v19 = vpop.f32.mrf.mxu3  ;;  %v7557_v32 = vpop.f32.mrf.mxu0 }
 0x1c6   :  { %9811 = vst [vmem:[#allocation64_spill] sm:$0xff] %v7555_v19 }
 0x1c7   :  { %9812 = vst [vmem:[#allocation65_spill] sm:$0xff] %v7557_v32  ;;  %v7561_v1 = vpop.f32.mrf.mxu1 }
 0x1c8   :  { %9813 = vst [vmem:[#allocation66_spill] sm:$0xff] %v7561_v1 }
 0x1ca   :  { %5674 = vmatmul.msk.f32.gmra.mxu3 %vm345_vm2, %v7223_v4  ;;  %v424_v4 = vadd.f32 %v7194_v58, %v7570_v42 }
 0x1cd   :  { %v7563_v48 = vpop.f32.mrf.mxu3  ;;  %v7565_v6 = vpop.f32.mrf.mxu0 }
 0x1ce   :  { %9814 = vst [vmem:[#allocation67_spill] sm:$0xff] %v7563_v48 }
 0x1cf   :  { %9815 = vst [vmem:[#allocation68_spill] sm:$0xff] %v7565_v6  ;;  %v870_v50 = vpop.f32.mrf.mxu1 }
 0x1d0   :  { %v893_v63 = vadd.f32 %v870_v50, %v424_v4 }
 0x1d2   :  { %5675 = vmatmul.msk.f32.gmra.mxu3 %vm345_vm2, %v7264_v23  ;;  %v5697_v48 = vmul.f32 -1.442695, %v893_v63  ;;  %v9820_v23 = vmov 0.0  }
 0x1d4   :  { %5917 = vpow2.f32 %v5697_v48 }
 0x1d5   :  { %v7572_v60 = vpop.f32.mrf.mxu3  ;;  %v7574_v19 = vpop.f32.mrf.mxu0 }
 0x1d6   :  { %9816 = vst [vmem:[#allocation69_spill] sm:$0xff] %v7572_v60 }
 0x1d7   :  { %9817 = vst [vmem:[#allocation70_spill] sm:$0xff] %v7574_v19 }
 0x1da   :  { %5676 = vmatmul.msk.f32.gmra.mxu3 %vm345_vm2, %v7293_v31  ;;  %v5918_v58 = vpop.eup %5917 }
 0x1db   :  { %v946_v31 = vadd.f32 1.0, %v5918_v58 }
 0x1dd   :  { %v7580_v28 = vpop.f32.mrf.mxu3  ;;  %v7582_v47 = vpop.f32.mrf.mxu0  ;;  %5919 = vrcp.f32 %v946_v31  ;;  %v959_v6 = vand.u32 2147483648, %v946_v31  ;;  %vm953_vm4 = vweird.f32 %v946_v31 }
 0x1de   :  { %9818 = vst [vmem:[#allocation71_spill] sm:$0xff] %v7580_v28 }
 0x1df   :  { %9819 = vst [vmem:[#allocation72_spill] sm:$0xff] %v7582_v47  ;;  %v960_v47 = vor.u32 1.1754944e-38, %v959_v6 }
 0x1e2   :  { %914 = vmatmul.f32.vlgmr.msra.gmra.mxu3 %v9820_v23 }
 0x1e3   :  { %1289 = vmatpush.msra.mxu3 %v7210_v0  ;;  %v5920_v63 = vpop.eup %5919  ;;  %v935_v32 = vpop.f32.mrf.mxu1 }
 0x1e4   :  { %v949_v28 = vmul.f32 %v5920_v63, %v946_v31  ;;  %vm954_vm3 = vweird.f32 %v5920_v63 }
 0x1e5   :  { %v7586_v3 = vpop.f32.mrf.mxu3  ;;  %v7588_v60 = vpop.f32.mrf.mxu0  ;;  %1290 = vmatpush.msra.mxu3 %v7221_v2  ;;  %vm955_vm5 = vmor %vm953_vm4, %vm954_vm3 }
 0x1e6   :  { %9821 = vst [vmem:[#allocation73_spill] sm:$0xff] %v7586_v3  ;;  %v950_v58 = vsub.f32 1.0, %v949_v28  ;;  %v957_v28 = vand.u32 2147483647, %v946_v31 }
 0x1e7   :  { %9822 = vst [vmem:[#allocation74_spill] sm:$0xff] %v7588_v60  ;;  %1291 = vmatpush.msra.mxu3 %v7232_v9 }
 0x1e8   :  { %vm958_vm6 = vcmp.eq.f32.partialorder %v957_v28, 8.507059e+37 }
 0x1e9   :  { %1292 = vmatpush.msra.mxu3 %v7240_v10 }
 0x1eb   :  { %1293 = vmatpush.msra.mxu3 %v7251_v17 }
 0x1ed   :  { %v7594_v50 = vpop.f32.mrf.mxu3  ;;  %v7596_v48 = vpop.f32.mrf.mxu0  ;;  %1294 = vmatpush.msra.mxu3 %v7261_v22 }
 0x1ee   :  { %9823 = vst [vmem:[#allocation75_spill] sm:$0xff] %v7594_v50  ;;  %v951_v50 = vmul.f32 %v5920_v63, %v950_v58 }
 0x1ef   :  { %9824 = vst [vmem:[#allocation76_spill] sm:$0xff] %v7596_v48  ;;  %1295 = vmatpush.msra.mxu3 %v7272_v26 }
 0x1f0   :  { %v952_v53 = vadd.f32 %v5920_v63, %v951_v50 }
 0x1f1   :  { %1296 = vmatpush.msra.mxu3 %v7280_v27 }
 0x1f2   :  { %v956_v19 = vsel %vm955_vm5, %v5920_v63, %v952_v53 }
 0x1f3   :  { %v961_v37 = vsel %vm958_vm6, %v960_v47, %v956_v19 }
 0x1f4   :  { %v979_v36 = vmul.f32 0.0, %v961_v37 }
 0x1f5   :  { %v7601_v4 = vpop.f32.mrf.mxu3  ;;  %v7603_v23 = vpop.f32.mrf.mxu0 }
 0x1f6   :  { %9825 = vst [vmem:[#allocation77_spill] sm:$0xff] %v7601_v4 }
 0x1fd   :  { %v7605_v3 = vpop.f32.mrf.mxu3  ;;  %v7607_v1 = vpop.f32.mrf.mxu0 }
 0x1fe   :  { %9826 = vst [vmem:[#allocation78_spill] sm:$0xff] %v7605_v3 }
 0x205   :  { %v7614_v4 = vpop.f32.mrf.mxu3  ;;  %v773_v43 = vpop.f32.mrf.mxu0 }
 0x206   :  { %9827 = vst [vmem:[#allocation79_spill] sm:$0xff] %v7614_v4  ;;  %v774_v3 = vadd.f32 %v773_v43, %v7612_v46 }
 0x208   :  { %v7617_v58 = vadd.f32 %v935_v32, %v774_v3 }
 0x20a   :  { %5921 = vtanh.f32 %v7617_v58  ;;  %v982_v50 = vpop.permute.xlu0 %981 }
 0x20b   :  { %v984_v44 = vmul.f32 %v982_v50, %v961_v37 }
 0x20d   :  { %986 = vrot.lane.b32.xlu1 %v984_v44, %s6771_s5  ;;  %v7621_v60 = vpop.f32.mrf.mxu3 }
 0x20e   :  { %9828 = vst [vmem:[#allocation80_spill] sm:$0xff] %v7621_v60 }
 0x210   :  { %v5922_v4 = vpop.eup %5921 }
 0x211   :  { %1037 = vrot.lane.b32.xlu0 %v5922_v4, %s6771_s5  ;;  %v7642_v4 = vperm.slane %v616_v38, 0 }
 0x215   :  { %v7624_v31 = vpop.f32.mrf.mxu3 }
 0x216   :  { %9829 = vst [vmem:[#allocation81_spill] sm:$0xff] %v7624_v31 }
 0x21d   :  { %v7626_v43 = vpop.f32.mrf.mxu3 }
 0x21e   :  { %9830 = vst [vmem:[#allocation82_spill] sm:$0xff] %v7626_v43 }
 0x225   :  { %v7628_v32 = vpop.f32.mrf.mxu3 }
 0x226   :  { %9831 = vst [vmem:[#allocation83_spill] sm:$0xff] %v7628_v32 }
 0x22d   :  { %v7630_v6 = vpop.f32.mrf.mxu3 }
 0x22e   :  { %9832 = vst [vmem:[#allocation84_spill] sm:$0xff] %v7630_v6 }
 0x235   :  { %v7632_v53 = vpop.f32.mrf.mxu3 }
 0x236   :  { %9833 = vst [vmem:[#allocation85_spill] sm:$0xff] %v7632_v53 }
 0x23d   :  { %v7634_v3 = vpop.f32.mrf.mxu3 }
 0x23e   :  { %9834 = vst [vmem:[#allocation86_spill] sm:$0xff] %v7634_v3 }
 0x245   :  { %v7636_v47 = vpop.f32.mrf.mxu3 }
 0x246   :  { %9835 = vst [vmem:[#allocation87_spill] sm:$0xff] %v7636_v47 }
 0x24d   :  { %v7638_v44 = vpop.f32.mrf.mxu3 }
 0x255   :  { %v7640_v19 = vpop.f32.mrf.mxu3 }
 0x25d   :  { %v696_v63 = vpop.f32.mrf.mxu3 }
 0x25e   :  { %v697_v28 = vadd.f32 %v696_v63, %v7642_v4 }
 0x265   :  { %v915_v50 = vpop.f32.mrf.mxu3 }
 0x266   :  { %v938_v60 = vadd.f32 %v915_v50, %v697_v28 }
 0x268   :  { %v5699_v31 = vmul.f32 -1.442695, %v938_v60 }
 0x26a   :  { %5923 = vpow2.f32 %v5699_v31 }
 0x270   :  { %v5924_v43 = vpop.eup %5923 }
 0x271   :  { %v1002_v32 = vadd.f32 1.0, %v5924_v43 }
 0x273   :  { %5925 = vrcp.f32 %v1002_v32  ;;  %v1015_v35 = vand.u32 2147483648, %v1002_v32  ;;  %v1013_v48 = vand.u32 2147483647, %v1002_v32  ;;  %vm1009_vm8 = vweird.f32 %v1002_v32 }
 0x275   :  { %v1016_v63 = vor.u32 1.1754944e-38, %v1015_v35  ;;  %vm1014_vm10 = vcmp.eq.f32.partialorder %v1013_v48, 8.507059e+37 }
 0x279   :  { %v5926_v6 = vpop.eup %5925 }
 0x27a   :  { %v1005_v53 = vmul.f32 %v5926_v6, %v1002_v32  ;;  %vm1010_vm7 = vweird.f32 %v5926_v6 }
 0x27b   :  { %vm1011_vm9 = vmor %vm1009_vm8, %vm1010_vm7 }
 0x27c   :  { %v1006_v3 = vsub.f32 1.0, %v1005_v53  ;;  %v5698_v53 = vmul.f32 -1.442695, %v7465_v56 }
 0x27e   :  { %v1007_v47 = vmul.f32 %v5926_v6, %v1006_v3 }
 0x27f   :  { %v987_v34 = vpop.permute.xlu1 %986 }
 0x280   :  { %v7645_v38 = vadd.f32 %v987_v34, %v979_v36  ;;  %v1008_v39 = vadd.f32 %v5926_v6, %v1007_v47 }
 0x282   :  { %5927 = vtanh.f32 %v7645_v38  ;;  %v1012_v60 = vsel %vm1011_vm9, %v5926_v6, %v1008_v39 }
 0x283   :  { %v1017_v31 = vsel %vm1014_vm10, %v1016_v63, %v1012_v60  ;;  %v1038_v43 = vpop.permute.xlu0 %1037  ;;  %5929 = vpow2.f32 %v5698_v53 }
 0x284   :  { %v1040_v28 = vmul.f32 %v1038_v43, %v1017_v31 }
 0x286   :  { %1042 = vrot.lane.b32.xlu1 %v1040_v28, %s6771_s5  ;;  %v1035_v28 = vmul.f32 0.0, %v1017_v31 }
 0x288   :  { %v5928_v37 = vpop.eup %5927 }
 0x289   :  { %992 = vrot.lane.b32.xlu2 %v5928_v37, %s6771_s5  ;;  %v5930_v34 = vpop.eup %5929 }
 0x28a   :  { %v947_v36 = vadd.f32 1.0, %v5930_v34 }
 0x28c   :  { %5931 = vrcp.f32 %v947_v36  ;;  %v974_v48 = vand.u32 2147483648, %v947_v36  ;;  %vm968_vm12 = vweird.f32 %v947_v36  ;;  %v972_v6 = vand.u32 2147483647, %v947_v36 }
 0x28e   :  { %v975_v63 = vor.u32 1.1754944e-38, %v974_v48  ;;  %vm973_vm14 = vcmp.eq.f32.partialorder %v972_v6, 8.507059e+37 }
 0x292   :  { %v5932_v32 = vpop.eup %5931 }
 0x293   :  { %v964_v35 = vmul.f32 %v5932_v32, %v947_v36  ;;  %vm969_vm11 = vweird.f32 %v5932_v32  ;;  %v5700_v36 = vmul.f32 -1.442695, %v7617_v58 }
 0x294   :  { %vm970_vm13 = vmor %vm968_vm12, %vm969_vm11 }
 0x295   :  { %v965_v3 = vsub.f32 1.0, %v964_v35 }
 0x297   :  { %v966_v47 = vmul.f32 %v5932_v32, %v965_v3 }
 0x299   :  { %v967_v39 = vadd.f32 %v5932_v32, %v966_v47 }
 0x29b   :  { %v971_v50 = vsel %vm970_vm13, %v5932_v32, %v967_v39 }
 0x29c   :  { %v976_v60 = vsel %vm973_vm14, %v975_v63, %v971_v50 }
 0x2e3   :  { %v993_v43 = vpop.permute.xlu2 %992 }
 0x2e4   :  { %v995_v56 = vmul.f32 %v993_v43, %v976_v60 }
 0x2e6   :  { %1052 = vst.msk [vmem:[#allocation2] sm:$0xff] %vm345_vm2, %v995_v56  ;;  %5701 = vmatmul.msk.f32.vlgmr.msra.gmra.mxu2 %vm345_vm2, %v995_v56  ;;  %5702 = vmatmul.msk.f32.vlgmr.msrb.gmra.mxu3 %vm345_vm2, %v995_v56 }
 0x2e7   :  { %1336 = vmatpush.msra.mxu2 %v7205_v62  ;;  %1356 = vmatpush.msrb.mxu3 %v7348_v45 }
 0x2e9   :  { %1337 = vmatpush.msra.mxu2 %v7295_v33  ;;  %1357 = vmatpush.msrb.mxu3 %v7354_v52 }
 0x2eb   :  { %1338 = vmatpush.msra.mxu2 %v7327_v41  ;;  %1358 = vmatpush.msrb.mxu3 %v7363_v55 }
 0x2ed   :  { %1339 = vmatpush.msra.mxu2 %v7357_v49  ;;  %1359 = vmatpush.msrb.mxu3 %v7369_v51 }
 0x2ef   :  { %1340 = vmatpush.msra.mxu2 %v7421_v29  ;;  %1360 = vmatpush.msrb.mxu3 %v7375_v54 }
 0x2f1   :  { %1341 = vmatpush.msra.mxu2 %v7440_v40  ;;  %1361 = vmatpush.msrb.mxu3 %v7381_v57 }
 0x2f3   :  { %1342 = vmatpush.msra.mxu2 %v7481_v61  ;;  %1362 = vmatpush.msrb.mxu3 %v7387_v16 }
 0x2f5   :  { %1343 = vmatpush.msra.mxu2 %v7506_v24  ;;  %1363 = vmatpush.msrb.mxu3 %v7393_v59 }
 0x2f8   :  { %v1043_v37 = vpop.permute.xlu1 %1042 }
 0x2f9   :  { %v7670_v53 = vadd.f32 %v1043_v37, %v1035_v28  ;;  %v504_v28 = vadd.f32 %v7255_v21, %v7454_v12 }
 0x2fb   :  { %5933 = vtanh.f32 %v7670_v53 }
 0x2fc   :  { %5935 = vpow2.f32 %v5700_v36 }
 0x301   :  { %v5934_v34 = vpop.eup %5933 }
 0x302   :  { %1048 = vrot.lane.b32.xlu2 %v5934_v34, %s6771_s5  ;;  %v5936_v32 = vpop.eup %5935 }
 0x303   :  { %v1003_v35 = vadd.f32 1.0, %v5936_v32 }
 0x305   :  { %5937 = vrcp.f32 %v1003_v35  ;;  %v1030_v31 = vand.u32 2147483648, %v1003_v35  ;;  %vm1024_vm0 = vweird.f32 %v1003_v35  ;;  %v1028_v50 = vand.u32 2147483647, %v1003_v35 }
 0x307   :  { %v1031_v60 = vor.u32 1.1754944e-38, %v1030_v31  ;;  %vm1029_vm3 = vcmp.eq.f32.partialorder %v1028_v50, 8.507059e+37 }
 0x30b   :  { %v5938_v3 = vpop.eup %5937 }
 0x30c   :  { %v1020_v47 = vmul.f32 %v5938_v3, %v1003_v35  ;;  %vm1025_vm15 = vweird.f32 %v5938_v3 }
 0x30d   :  { %vm1026_vm1 = vmor %vm1024_vm0, %vm1025_vm15 }
 0x30e   :  { %v1021_v39 = vsub.f32 1.0, %v1020_v47 }
 0x310   :  { %v1022_v48 = vmul.f32 %v5938_v3, %v1021_v39 }
 0x312   :  { %v1023_v6 = vadd.f32 %v5938_v3, %v1022_v48 }
 0x314   :  { %v1027_v63 = vsel %vm1026_vm1, %v5938_v3, %v1023_v6 }
 0x315   :  { %v1032_v43 = vsel %vm1029_vm3, %v1031_v60, %v1027_v63 }
 0x35c   :  { %v1049_v56 = vpop.permute.xlu2 %1048 }
 0x35d   :  { %v7675_v58 = vmul.f32 %v1049_v56, %v1032_v43 }
 0x35f   :  { %9836 = vst [vmem:[#allocation88_spill] sm:$0xff] %v7675_v58  ;;  %5703 = vmatmul.msk.f32.vlgmr.msrb.gmra.mxu1 %vm345_vm2, %v7675_v58  ;;  %5704 = vmatmul.msk.f32.vlgmr.msrb.gmra.mxu2 %vm345_vm2, %v7675_v58 }
 0x360   :  { %1504 = vmatpush.msrb.mxu1 %v7210_v0  ;;  %1524 = vmatpush.msrb.mxu2 %v7081_v7 }
 0x362   :  { %1505 = vmatpush.msrb.mxu1 %v7221_v2  ;;  %1525 = vmatpush.msrb.mxu2 %v7087_v8 }
 0x364   :  { %1506 = vmatpush.msrb.mxu1 %v7232_v9  ;;  %1526 = vmatpush.msrb.mxu2 %v7094_v11 }
 0x366   :  { %1507 = vmatpush.msrb.mxu1 %v7240_v10  ;;  %1527 = vmatpush.msrb.mxu2 %v7104_v13  ;;  %v427_v13 = vadd.f32 %v7227_v5, %v7570_v42 }
 0x368   :  { %1508 = vmatpush.msrb.mxu1 %v7251_v17  ;;  %1528 = vmatpush.msrb.mxu2 %v7112_v14 }
 0x369   :  { %v1103_v7 = vpop.f32.mrf.mxu3  ;;  %v1083_v11 = vpop.f32.mrf.mxu2 }
 0x36a   :  { %v7693_v0 = vadd.f32 %v1103_v7, %v504_v28  ;;  %1509 = vmatpush.msrb.mxu1 %v7261_v22  ;;  %1529 = vmatpush.msrb.mxu2 %v7118_v15  ;;  %v1106_v14 = vadd.f32 %v1083_v11, %v427_v13 }
 0x36c   :  { %5939 = vtanh.f32 %v7693_v0  ;;  %1510 = vmatpush.msrb.mxu1 %v7272_v26  ;;  %1530 = vmatpush.msrb.mxu2 %v7125_v18  ;;  %v5705_v2 = vmul.f32 -1.442695, %v1106_v14 }
 0x36e   :  { %1511 = vmatpush.msrb.mxu1 %v7280_v27  ;;  %1531 = vmatpush.msrb.mxu2 %v7135_v20  ;;  %5941 = vpow2.f32 %v5705_v2  ;;  %v771_v27 = vadd.f32 %v7607_v1, %v7612_v46  ;;  %v694_v1 = vadd.f32 %v7640_v19, %v7642_v4 }
 0x372   :  { %v5940_v8 = vpop.eup %5939 }
 0x373   :  { %1196 = vrot.lane.b32.xlu0 %v5940_v8, %s6771_s5 }
 0x374   :  { %v5942_v15 = vpop.eup %5941 }
 0x375   :  { %v1161_v9 = vadd.f32 1.0, %v5942_v15 }
 0x377   :  { %5943 = vrcp.f32 %v1161_v9  ;;  %v1174_v20 = vand.u32 2147483648, %v1161_v9  ;;  %vm1168_vm5 = vweird.f32 %v1161_v9  ;;  %v1172_v26 = vand.u32 2147483647, %v1161_v9 }
 0x379   :  { %v1175_v36 = vor.u32 1.1754944e-38, %v1174_v20  ;;  %vm1173_vm7 = vcmp.eq.f32.partialorder %v1172_v26, 8.507059e+37 }
 0x37d   :  { %v5944_v10 = vpop.eup %5943 }
 0x37e   :  { %v1164_v17 = vmul.f32 %v5944_v10, %v1161_v9  ;;  %vm1169_vm4 = vweird.f32 %v5944_v10 }
 0x37f   :  { %vm1170_vm6 = vmor %vm1168_vm5, %vm1169_vm4 }
 0x380   :  { %v1165_v18 = vsub.f32 1.0, %v1164_v17  ;;  %v5706_v17 = vmul.f32 -1.442695, %v7693_v0 }
 0x382   :  { %v1166_v21 = vmul.f32 %v5944_v10, %v1165_v18 }
 0x384   :  { %v1167_v22 = vadd.f32 %v5944_v10, %v1166_v21 }
 0x386   :  { %v1171_v37 = vsel %vm1170_vm6, %v5944_v10, %v1167_v22 }
 0x387   :  { %v1176_v35 = vsel %vm1173_vm7, %v1175_v36, %v1171_v37 }
 0x388   :  { %v1194_v63 = vmul.f32 %v1176_v35, %v7645_v38 }
 0x3dc   :  { %v1130_v39 = vpop.f32.mrf.mxu1 }
 0x3dd   :  { %v1153_v48 = vadd.f32 %v1130_v39, %v694_v1 }
 0x3df   :  { %v5707_v6 = vmul.f32 -1.442695, %v1153_v48 }
 0x3e2   :  { %v1150_v5 = vpop.f32.mrf.mxu2 }
 0x3e3   :  { %v7707_v34 = vadd.f32 %v1150_v5, %v771_v27 }
 0x3e5   :  { %5945 = vtanh.f32 %v7707_v34  ;;  %v1197_v32 = vpop.permute.xlu0 %1196 }
 0x3e6   :  { %v1199_v3 = vmul.f32 %v1197_v32, %v1176_v35  ;;  %5947 = vpow2.f32 %v5707_v6  ;;  %v7755_v6 = vld [vmem:[%s9740_s4 + $0x70] sm:$0xff] }
 0x3e8   :  { %1201 = vrot.lane.b32.xlu2 %v1199_v3, %s6771_s5 }
 0x3eb   :  { %v5946_v47 = vpop.eup %5945 }
 0x3ec   :  { %1252 = vrot.lane.b32.xlu1 %v5946_v47, %s6771_s5  ;;  %v5948_v31 = vpop.eup %5947 }
 0x3ed   :  { %v1217_v50 = vadd.f32 1.0, %v5948_v31  ;;  %v7761_v31 = vld [vmem:[%s9740_s4 + $0x78] sm:$0xff] }
 0x3ef   :  { %5949 = vrcp.f32 %v1217_v50  ;;  %v1230_v13 = vand.u32 2147483648, %v1217_v50  ;;  %vm1224_vm9 = vweird.f32 %v1217_v50  ;;  %v1228_v14 = vand.u32 2147483647, %v1217_v50 }
 0x3f1   :  { %v1231_v2 = vor.u32 1.1754944e-38, %v1230_v13  ;;  %vm1229_vm11 = vcmp.eq.f32.partialorder %v1228_v14, 8.507059e+37  ;;  %v7814_v13 = vld [vmem:[%s9740_s4 + $0x38] sm:$0xff]  ;;  %v7820_v14 = vld [vmem:[%s9740_s4 + $0x20] sm:$0xff] }
 0x3f5   :  { %v5950_v56 = vpop.eup %5949 }
 0x3f6   :  { %v1220_v7 = vmul.f32 %v5950_v56, %v1217_v50  ;;  %vm1225_vm8 = vweird.f32 %v5950_v56  ;;  %v507_v50 = vadd.f32 %v7291_v30, %v7454_v12  ;;  %v7783_v30 = vld [vmem:[%s9740_s4 + $0x50] sm:$0xff] }
 0x3f7   :  { %vm1226_vm10 = vmor %vm1224_vm9, %vm1225_vm8 }
 0x3f8   :  { %v1221_v8 = vsub.f32 1.0, %v1220_v7  ;;  %v7789_v7 = vld [vmem:[%s9740_s4 + $0x58] sm:$0xff] }
 0x3fa   :  { %v1222_v19 = vmul.f32 %v5950_v56, %v1221_v8  ;;  %v7796_v8 = vld [vmem:[%s9740_s4 + $0x40] sm:$0xff] }
 0x3fc   :  { %v1223_v11 = vadd.f32 %v5950_v56, %v1222_v19  ;;  %v7802_v19 = vld [vmem:[%s9740_s4 + $0x48] sm:$0xff] }
 0x3fe   :  { %v1227_v38 = vsel %vm1226_vm10, %v5950_v56, %v1223_v11  ;;  %v7808_v11 = vld [vmem:[%s9740_s4 + $0x30] sm:$0xff] }
 0x3ff   :  { %v1232_v9 = vsel %vm1229_vm11, %v1231_v2, %v1227_v38  ;;  %v7826_v38 = vld [vmem:[%s9740_s4 + $0x28] sm:$0xff] }
 0x442   :  { %v1202_v60 = vpop.permute.xlu2 %1201 }
 0x443   :  { %v7715_v43 = vadd.f32 %v1202_v60, %v1194_v63  ;;  %v7769_v63 = vld [vmem:[%s9740_s4 + $0x60] sm:$0xff]  ;;  %v7775_v60 = vld [vmem:[%s9740_s4 + $0x68] sm:$0xff] }
 0x445   :  { %5951 = vtanh.f32 %v7715_v43 }
 0x446   :  { %5953 = vpow2.f32 %v5706_v17  ;;  %v7851_v17 = vld [vmem:[%s9740_s4 + $0x8] sm:$0xff] }
 0x44b   :  { %v5952_v28 = vpop.eup %5951 }
 0x44c   :  { %1207 = vrot.lane.b32.xlu1 %v5952_v28, %s6771_s5  ;;  %v5954_v18 = vpop.eup %5953 }
 0x44d   :  { %v1162_v21 = vadd.f32 1.0, %v5954_v18 }
 0x44f   :  { %5955 = vrcp.f32 %v1162_v21  ;;  %v1189_v37 = vand.u32 2147483648, %v1162_v21  ;;  %vm1183_vm13 = vweird.f32 %v1162_v21  ;;  %v1187_v36 = vand.u32 2147483647, %v1162_v21 }
 0x451   :  { %v1190_v35 = vor.u32 1.1754944e-38, %v1189_v37  ;;  %vm1188_vm15 = vcmp.eq.f32.partialorder %v1187_v36, 8.507059e+37 }
 0x455   :  { %v5956_v22 = vpop.eup %5955 }
 0x456   :  { %v1179_v20 = vmul.f32 %v5956_v22, %v1162_v21  ;;  %vm1184_vm12 = vweird.f32 %v5956_v22  ;;  %v430_v21 = vadd.f32 %v7266_v25, %v7570_v42 }
 0x457   :  { %vm1185_vm14 = vmor %vm1183_vm13, %vm1184_vm12 }
 0x458   :  { %v1180_v26 = vsub.f32 1.0, %v1179_v20 }
 0x45a   :  { %v1181_v27 = vmul.f32 %v5956_v22, %v1180_v26 }
 0x45c   :  { %v1182_v5 = vadd.f32 %v5956_v22, %v1181_v27 }
 0x45e   :  { %v1253_v15 = vpop.permute.xlu1 %1252  ;;  %v1186_v32 = vsel %vm1185_vm14, %v5956_v22, %v1182_v5 }
 0x45f   :  { %v1255_v10 = vmul.f32 %v1253_v15, %v1232_v9  ;;  %v1191_v3 = vsel %vm1188_vm15, %v1190_v35, %v1186_v32  ;;  %v7832_v15 = vld [vmem:[%s9740_s4 + $0x10] sm:$0xff] }
 0x461   :  { %1257 = vrot.lane.b32.xlu0 %v1255_v10, %s6771_s5  ;;  %v7845_v10 = vld [vmem:[%s9740_s4] sm:$0xff] }
 0x4be   :  { %v1208_v47 = vpop.permute.xlu1 %1207 }
 0x4bf   :  { %v1210_v0 = vmul.f32 %v1208_v47, %v1191_v3 }
 0x4c1   :  { %1268 = vst.msk [vmem:[#allocation2 + $0x8] sm:$0xff] %vm345_vm2, %v1210_v0  ;;  %5709 = vmatmul.msk.f32.vlgmr.msra.gmra.mxu3 %vm345_vm2, %v1210_v0  ;;  %5710 = vmatmul.msk.f32.vlgmr.msra.gmra.mxu1 %vm345_vm2, %v1210_v0 }
 0x4c2   :  { %1551 = vmatpush.msra.mxu3 %v7205_v62  ;;  %1571 = vmatpush.msra.mxu1 %v7348_v45  ;;  %v1250_v62 = vmul.f32 %v1232_v9, %v7670_v53  ;;  %v7838_v9 = vld [vmem:[%s9740_s4 + $0x18] sm:$0xff] }
 0x4c4   :  { %1552 = vmatpush.msra.mxu3 %v7295_v33  ;;  %1572 = vmatpush.msra.mxu1 %v7354_v52 }
 0x4c6   :  { %1553 = vmatpush.msra.mxu3 %v7327_v41  ;;  %1573 = vmatpush.msra.mxu1 %v7363_v55 }
 0x4c8   :  { %1554 = vmatpush.msra.mxu3 %v7357_v49  ;;  %1574 = vmatpush.msra.mxu1 %v7369_v51 }
 0x4ca   :  { %1555 = vmatpush.msra.mxu3 %v7421_v29  ;;  %1575 = vmatpush.msra.mxu1 %v7375_v54 }
 0x4cc   :  { %1556 = vmatpush.msra.mxu3 %v7440_v40  ;;  %1576 = vmatpush.msra.mxu1 %v7381_v57  ;;  %v5708_v40 = vmul.f32 -1.442695, %v7707_v34 }
 0x4ce   :  { %1557 = vmatpush.msra.mxu3 %v7481_v61  ;;  %1577 = vmatpush.msra.mxu1 %v7387_v16 }
 0x4d0   :  { %1558 = vmatpush.msra.mxu3 %v7506_v24  ;;  %1578 = vmatpush.msra.mxu1 %v7393_v59 }
 0x4d3   :  { %v1258_v33 = vpop.permute.xlu0 %1257 }
 0x4d4   :  { %v7741_v41 = vadd.f32 %v1258_v33, %v1250_v62 }
 0x4d6   :  { %5957 = vtanh.f32 %v7741_v41 }
 0x4d7   :  { %5959 = vpow2.f32 %v5708_v40  ;;  %v768_v40 = vadd.f32 %v7603_v23, %v7612_v46 }
 0x4dc   :  { %v5958_v45 = vpop.eup %5957 }
 0x4dd   :  { %1263 = vrot.lane.b32.xlu2 %v5958_v45, %s6771_s5  ;;  %v5960_v52 = vpop.eup %5959 }
 0x4de   :  { %v1218_v49 = vadd.f32 1.0, %v5960_v52 }
 0x4e0   :  { %5961 = vrcp.f32 %v1218_v49  ;;  %v1245_v59 = vand.u32 2147483648, %v1218_v49  ;;  %vm1239_vm1 = vweird.f32 %v1218_v49  ;;  %v1243_v29 = vand.u32 2147483647, %v1218_v49 }
 0x4e2   :  { %v1246_v39 = vor.u32 1.1754944e-38, %v1245_v59  ;;  %vm1244_vm4 = vcmp.eq.f32.partialorder %v1243_v29, 8.507059e+37 }
 0x4e6   :  { %v5962_v55 = vpop.eup %5961 }
 0x4e7   :  { %v1235_v51 = vmul.f32 %v5962_v55, %v1218_v49  ;;  %vm1240_vm0 = vweird.f32 %v5962_v55 }
 0x4e8   :  { %vm1241_vm3 = vmor %vm1239_vm1, %vm1240_vm0 }
 0x4e9   :  { %v1236_v54 = vsub.f32 1.0, %v1235_v51 }
 0x4eb   :  { %v1237_v57 = vmul.f32 %v5962_v55, %v1236_v54  ;;  %v691_v54 = vadd.f32 %v7638_v44, %v7642_v4 }
 0x4ed   :  { %v1238_v16 = vadd.f32 %v5962_v55, %v1237_v57 }
 0x4ef   :  { %v1242_v53 = vsel %vm1241_vm3, %v5962_v55, %v1238_v16 }
 0x4f0   :  { %v1247_v1 = vsel %vm1244_vm4, %v1246_v39, %v1242_v53 }
 0x537   :  { %v1264_v48 = vpop.permute.xlu2 %1263 }
 0x538   :  { %v7746_v34 = vmul.f32 %v1264_v48, %v1247_v1 }
 0x53a   :  { %9837 = vst [vmem:[#allocation89_spill] sm:$0xff] %v7746_v34  ;;  %5711 = vmatmul.msk.f32.vlgmr.msra.gmra.mxu2 %vm345_vm2, %v7746_v34  ;;  %5712 = vmatmul.msk.f32.vlgmr.msrb.gmra.mxu3 %vm345_vm2, %v7746_v34 }
 0x53b   :  { %1719 = vmatpush.msra.mxu2 %v7755_v6  ;;  %1739 = vmatpush.msrb.mxu3 %v7761_v31 }
 0x53d   :  { %1720 = vmatpush.msra.mxu2 %v7769_v63  ;;  %1740 = vmatpush.msrb.mxu3 %v7775_v60 }
 0x53e   :  { %v1318_v56 = vpop.f32.mrf.mxu1 }
 0x53f   :  { %v7778_v28 = vadd.f32 %v1318_v56, %v507_v50  ;;  %1721 = vmatpush.msra.mxu2 %v7783_v30  ;;  %1741 = vmatpush.msrb.mxu3 %v7789_v7 }
 0x541   :  { %5963 = vtanh.f32 %v7778_v28  ;;  %1722 = vmatpush.msra.mxu2 %v7796_v8  ;;  %1742 = vmatpush.msrb.mxu3 %v7802_v19 }
 0x543   :  { %1723 = vmatpush.msra.mxu2 %v7808_v11  ;;  %1743 = vmatpush.msrb.mxu3 %v7814_v13 }
 0x544   :  { %v1298_v18 = vpop.f32.mrf.mxu3 }
 0x545   :  { %1724 = vmatpush.msra.mxu2 %v7820_v14  ;;  %1744 = vmatpush.msrb.mxu3 %v7826_v38  ;;  %v1321_v22 = vadd.f32 %v1298_v18, %v430_v21 }
 0x547   :  { %v5964_v2 = vpop.eup %5963  ;;  %1725 = vmatpush.msra.mxu2 %v7832_v15  ;;  %1745 = vmatpush.msrb.mxu3 %v7838_v9  ;;  %v5713_v20 = vmul.f32 -1.442695, %v1321_v22 }
 0x548   :  { %1411 = vrot.lane.b32.xlu0 %v5964_v2, %s6771_s5 }
 0x549   :  { %1726 = vmatpush.msra.mxu2 %v7845_v10  ;;  %1746 = vmatpush.msrb.mxu3 %v7851_v17  ;;  %5965 = vpow2.f32 %v5713_v20 }
 0x54f   :  { %v5966_v26 = vpop.eup %5965 }
 0x550   :  { %v1376_v27 = vadd.f32 1.0, %v5966_v26 }
 0x552   :  { %5967 = vrcp.f32 %v1376_v27  ;;  %v1389_v3 = vand.u32 2147483648, %v1376_v27  ;;  %vm1383_vm6 = vweird.f32 %v1376_v27  ;;  %v1387_v47 = vand.u32 2147483647, %v1376_v27 }
 0x554   :  { %v1390_v62 = vor.u32 1.1754944e-38, %v1389_v3  ;;  %vm1388_vm8 = vcmp.eq.f32.partialorder %v1387_v47, 8.507059e+37 }
 0x558   :  { %v5968_v5 = vpop.eup %5967 }
 0x559   :  { %v1379_v37 = vmul.f32 %v5968_v5, %v1376_v27  ;;  %vm1384_vm5 = vweird.f32 %v5968_v5 }
 0x55a   :  { %vm1385_vm7 = vmor %vm1383_vm6, %vm1384_vm5 }
 0x55b   :  { %v1380_v36 = vsub.f32 1.0, %v1379_v37 }
 0x55d   :  { %v1381_v32 = vmul.f32 %v5968_v5, %v1380_v36 }
 0x55f   :  { %v1382_v35 = vadd.f32 %v5968_v5, %v1381_v32 }
 0x561   :  { %v1386_v0 = vsel %vm1385_vm7, %v5968_v5, %v1382_v35  ;;  %v5714_v5 = vmul.f32 -1.442695, %v7778_v28 }
 0x562   :  { %v1391_v33 = vsel %vm1388_vm8, %v1390_v62, %v1386_v0 }
 0x563   :  { %v1409_v23 = vmul.f32 %v1391_v33, %v7715_v43 }
 0x5ba   :  { %v1412_v25 = vpop.permute.xlu0 %1411 }
 0x5bb   :  { %v1414_v45 = vmul.f32 %v1412_v25, %v1391_v33 }
 0x5bd   :  { %1416 = vrot.lane.b32.xlu2 %v1414_v45, %s6771_s5  ;;  %v1365_v52 = vpop.f32.mrf.mxu3  ;;  %v1345_v51 = vpop.f32.mrf.mxu2 }
 0x5be   :  { %v7859_v49 = vadd.f32 %v1365_v52, %v768_v40  ;;  %v1368_v57 = vadd.f32 %v1345_v51, %v691_v54  ;;  %v7878_v51 = vld [vmem:[#allocation10 + $0x78] sm:$0xff]  ;;  %v7881_v54 = vld [vmem:[#allocation10 + $0x60] sm:$0xff] }
 0x5c0   :  { %5969 = vtanh.f32 %v7859_v49  ;;  %v5715_v16 = vmul.f32 -1.442695, %v1368_v57  ;;  %v7884_v57 = vld [vmem:[#allocation10 + $0x68] sm:$0xff] }
 0x5c2   :  { %5971 = vpow2.f32 %v5715_v16  ;;  %v7887_v16 = vld [vmem:[#allocation10 + $0x50] sm:$0xff] }
 0x5c6   :  { %v5970_v55 = vpop.eup %5969 }
 0x5c7   :  { %1467 = vrot.lane.b32.xlu1 %v5970_v55, %s6771_s5  ;;  %v7875_v55 = vld [vmem:[#allocation10 + $0x70] sm:$0xff] }
 0x5c8   :  { %v5972_v59 = vpop.eup %5971 }
 0x5c9   :  { %v1432_v39 = vadd.f32 1.0, %v5972_v59  ;;  %v7890_v59 = vld [vmem:[#allocation10 + $0x58] sm:$0xff] }
 0x5cb   :  { %v1445_v18 = vand.u32 2147483648, %v1432_v39  ;;  %vm1439_vm10 = vweird.f32 %v1432_v39  ;;  %v1443_v21 = vand.u32 2147483647, %v1432_v39 }
 0x5cd   :  { %v1446_v22 = vor.u32 1.1754944e-38, %v1445_v18  ;;  %vm1444_vm12 = vcmp.eq.f32.partialorder %v1443_v21, 8.507059e+37 }
 0x617   :  { %v1417_v29 = vpop.permute.xlu2 %1416 }
 0x618   :  { %v7866_v53 = vadd.f32 %v1417_v29, %v1409_v23  ;;  %v7893_v23 = vld [vmem:[#allocation10 + $0x40] sm:$0xff]  ;;  %v7896_v29 = vld [vmem:[#allocation10 + $0x48] sm:$0xff] }
 0x61a   :  { %5973 = vtanh.f32 %v7866_v53 }
 0x61b   :  { %5975 = vrcp.f32 %v1432_v39 }
 0x61c   :  { %5977 = vpow2.f32 %v5714_v5 }
 0x620   :  { %v5974_v1 = vpop.eup %5973 }
 0x621   :  { %1422 = vrot.lane.b32.xlu1 %v5974_v1, %s6771_s5  ;;  %v5976_v48 = vpop.eup %5975  ;;  %v7902_v1 = vld [vmem:[#allocation10 + $0x38] sm:$0xff] }
 0x622   :  { %v1435_v50 = vmul.f32 %v5976_v48, %v1432_v39  ;;  %vm1440_vm9 = vweird.f32 %v5976_v48  ;;  %v5978_v37 = vpop.eup %5977  ;;  %v7899_v39 = vld [vmem:[#allocation10 + $0x30] sm:$0xff] }
 0x623   :  { %vm1441_vm11 = vmor %vm1439_vm10, %vm1440_vm9  ;;  %v1377_v36 = vadd.f32 1.0, %v5978_v37 }
 0x624   :  { %v1436_v56 = vsub.f32 1.0, %v1435_v50  ;;  %v7908_v50 = vld [vmem:[#allocation10 + $0x28] sm:$0xff] }
 0x625   :  { %5979 = vrcp.f32 %v1377_v36  ;;  %v1404_v62 = vand.u32 2147483648, %v1377_v36  ;;  %vm1398_vm14 = vweird.f32 %v1377_v36  ;;  %v1402_v25 = vand.u32 2147483647, %v1377_v36 }
 0x626   :  { %v1437_v44 = vmul.f32 %v5976_v48, %v1436_v56  ;;  %v7912_v56 = vld [vmem:[#allocation10 + $0x18] sm:$0xff] }
 0x627   :  { %v1405_v45 = vor.u32 1.1754944e-38, %v1404_v62  ;;  %vm1403_vm0 = vcmp.eq.f32.partialorder %v1402_v25, 8.507059e+37 }
 0x628   :  { %v1438_v2 = vadd.f32 %v5976_v48, %v1437_v44  ;;  %v7916_v44 = vld [vmem:[#allocation10 + $0x8] sm:$0xff] }
 0x62a   :  { %v1442_v43 = vsel %vm1441_vm11, %v5976_v48, %v1438_v2  ;;  %v7905_v48 = vld [vmem:[#allocation10 + $0x20] sm:$0xff] }
 0x62b   :  { %v1447_v26 = vsel %vm1444_vm12, %v1446_v22, %v1442_v43  ;;  %v5980_v32 = vpop.eup %5979 }
 0x62c   :  { %v1394_v35 = vmul.f32 %v5980_v32, %v1377_v36  ;;  %vm1399_vm13 = vweird.f32 %v5980_v32  ;;  %v1465_v2 = vmul.f32 %v1447_v26, %v7741_v41 }
 0x62d   :  { %vm1400_vm15 = vmor %vm1398_vm14, %vm1399_vm13 }
 0x62e   :  { %v1395_v3 = vsub.f32 1.0, %v1394_v35 }
 0x630   :  { %v1396_v47 = vmul.f32 %v5980_v32, %v1395_v3 }
 0x632   :  { %v1397_v0 = vadd.f32 %v5980_v32, %v1396_v47 }
 0x634   :  { %v1401_v33 = vsel %vm1400_vm15, %v5980_v32, %v1397_v0  ;;  %v9838_v0 = vld [vmem:[#allocation21_spill] sm:$0xff] }
 0x635   :  { %v1406_v40 = vsel %vm1403_vm0, %v1405_v45, %v1401_v33  ;;  %v510_v62 = vadd.f32 %v9838_v0, %v7454_v12 }
 0x639   :  { %v1468_v20 = vpop.permute.xlu1 %1467 }
 0x63a   :  { %v1470_v27 = vmul.f32 %v1468_v20, %v1447_v26 }
 0x63c   :  { %1472 = vrot.lane.b32.xlu0 %v1470_v27, %s6771_s5 }
 0x693   :  { %v1423_v52 = vpop.permute.xlu1 %1422 }
 0x694   :  { %v1425_v28 = vmul.f32 %v1423_v52, %v1406_v40  ;;  %v9839_v52 = vld [vmem:[#allocation20_spill] sm:$0xff] }
 0x696   :  { %1483 = vst.msk [vmem:[#allocation2 + $0x10] sm:$0xff] %vm345_vm2, %v1425_v28  ;;  %5717 = vmatmul.msk.f32.vlgmr.msrb.gmra.mxu1 %vm345_vm2, %v1425_v28  ;;  %5718 = vmatmul.msk.f32.vlgmr.msrb.gmra.mxu2 %vm345_vm2, %v1425_v28  ;;  %v433_v28 = vadd.f32 %v9839_v52, %v7570_v42  ;;  %v9841_v52 = vld [vmem:[#allocation87_spill] sm:$0xff] }
 0x697   :  { %1766 = vmatpush.msrb.mxu1 %v7875_v55  ;;  %1786 = vmatpush.msrb.mxu2 %v7878_v51 }
 0x699   :  { %1767 = vmatpush.msrb.mxu1 %v7881_v54  ;;  %1787 = vmatpush.msrb.mxu2 %v7884_v57 }
 0x69b   :  { %1768 = vmatpush.msrb.mxu1 %v7887_v16  ;;  %1788 = vmatpush.msrb.mxu2 %v7890_v59 }
 0x69d   :  { %1769 = vmatpush.msrb.mxu1 %v7893_v23  ;;  %1789 = vmatpush.msrb.mxu2 %v7896_v29 }
 0x69f   :  { %1770 = vmatpush.msrb.mxu1 %v7899_v39  ;;  %1790 = vmatpush.msrb.mxu2 %v7902_v1 }
 0x6a1   :  { %1771 = vmatpush.msrb.mxu1 %v7905_v48  ;;  %1791 = vmatpush.msrb.mxu2 %v7908_v50 }
 0x6a3   :  { %1772 = vmatpush.msrb.mxu1 %v7481_v61  ;;  %1792 = vmatpush.msrb.mxu2 %v7912_v56  ;;  %v5716_v61 = vmul.f32 -1.442695, %v7859_v49 }
 0x6a5   :  { %1773 = vmatpush.msrb.mxu1 %v7506_v24  ;;  %1793 = vmatpush.msrb.mxu2 %v7916_v44 }
 0x6ae   :  { %v1473_v18 = vpop.permute.xlu0 %1472 }
 0x6af   :  { %v7920_v21 = vadd.f32 %v1473_v18, %v1465_v2 }
 0x6b1   :  { %5981 = vtanh.f32 %v7920_v21 }
 0x6b2   :  { %5983 = vpow2.f32 %v5716_v61 }
 0x6b7   :  { %v5982_v43 = vpop.eup %5981 }
 0x6b8   :  { %1478 = vrot.lane.b32.xlu2 %v5982_v43, %s6771_s5  ;;  %v5984_v22 = vpop.eup %5983 }
 0x6b9   :  { %v1433_v20 = vadd.f32 1.0, %v5984_v22 }
 0x6bb   :  { %5985 = vrcp.f32 %v1433_v20  ;;  %v1460_v41 = vand.u32 2147483648, %v1433_v20  ;;  %vm1454_vm3 = vweird.f32 %v1433_v20  ;;  %v1458_v26 = vand.u32 2147483647, %v1433_v20 }
 0x6bd   :  { %v1461_v35 = vor.u32 1.1754944e-38, %v1460_v41  ;;  %vm1459_vm5 = vcmp.eq.f32.partialorder %v1458_v26, 8.507059e+37  ;;  %v9840_v41 = vld [vmem:[#allocation76_spill] sm:$0xff] }
 0x6be   :  { %v765_v26 = vadd.f32 %v9840_v41, %v7612_v46 }
 0x6c1   :  { %v5986_v24 = vpop.eup %5985 }
 0x6c2   :  { %v1450_v27 = vmul.f32 %v5986_v24, %v1433_v20  ;;  %vm1455_vm1 = vweird.f32 %v5986_v24 }
 0x6c3   :  { %vm1456_vm4 = vmor %vm1454_vm3, %vm1455_vm1 }
 0x6c4   :  { %v1451_v5 = vsub.f32 1.0, %v1450_v27 }
 0x6c6   :  { %v1452_v37 = vmul.f32 %v5986_v24, %v1451_v5 }
 0x6c8   :  { %v1453_v36 = vadd.f32 %v5986_v24, %v1452_v37 }
 0x6ca   :  { %v1457_v32 = vsel %vm1456_vm4, %v5986_v24, %v1453_v36 }
 0x6cb   :  { %v1462_v3 = vsel %vm1459_vm5, %v1461_v35, %v1457_v32 }
 0x712   :  { %v1479_v47 = vpop.permute.xlu2 %1478 }
 0x713   :  { %v7925_v49 = vmul.f32 %v1479_v47, %v1462_v3  ;;  %v1513_v40 = vpop.f32.mrf.mxu1 }
 0x714   :  { %v1536_v2 = vadd.f32 %v1513_v40, %v433_v28  ;;  %v688_v28 = vadd.f32 %v9841_v52, %v7642_v4 }
 0x715   :  { %5719 = vmatmul.msk.f32.vlgmr.msra.gmra.mxu3 %vm345_vm2, %v7925_v49  ;;  %5720 = vmatmul.msk.f32.vlgmr.msra.gmra.mxu1 %vm345_vm2, %v7925_v49 }
 0x716   :  { %1934 = vmatpush.msra.mxu3 %v7755_v6  ;;  %1954 = vmatpush.msra.mxu1 %v7761_v31  ;;  %v5721_v18 = vmul.f32 -1.442695, %v1536_v2 }
 0x718   :  { %1935 = vmatpush.msra.mxu3 %v7769_v63  ;;  %1955 = vmatpush.msra.mxu1 %v7775_v60 }
 0x719   :  { %v1533_v25 = vpop.f32.mrf.mxu2 }
 0x71a   :  { %v7937_v33 = vadd.f32 %v1533_v25, %v510_v62  ;;  %1936 = vmatpush.msra.mxu3 %v7783_v30  ;;  %1956 = vmatpush.msra.mxu1 %v7789_v7 }
 0x71c   :  { %5987 = vtanh.f32 %v7937_v33  ;;  %1937 = vmatpush.msra.mxu3 %v7796_v8  ;;  %1957 = vmatpush.msra.mxu1 %v7802_v19 }
 0x71d   :  { %5989 = vpow2.f32 %v5721_v18 }
 0x71e   :  { %1938 = vmatpush.msra.mxu3 %v7808_v11  ;;  %1958 = vmatpush.msra.mxu1 %v7814_v13 }
 0x720   :  { %1939 = vmatpush.msra.mxu3 %v7820_v14  ;;  %1959 = vmatpush.msra.mxu1 %v7826_v38 }
 0x722   :  { %v5988_v45 = vpop.eup %5987  ;;  %1940 = vmatpush.msra.mxu3 %v7832_v15  ;;  %1960 = vmatpush.msra.mxu1 %v7838_v9 }
 0x723   :  { %1626 = vrot.lane.b32.xlu0 %v5988_v45, %s6771_s5  ;;  %v5990_v43 = vpop.eup %5989 }
 0x724   :  { %1941 = vmatpush.msra.mxu3 %v7845_v10  ;;  %1961 = vmatpush.msra.mxu1 %v7851_v17  ;;  %v1591_v61 = vadd.f32 1.0, %v5990_v43 }
 0x726   :  { %5991 = vrcp.f32 %v1591_v61  ;;  %v1604_v37 = vand.u32 2147483648, %v1591_v61  ;;  %vm1598_vm7 = vweird.f32 %v1591_v61  ;;  %v1602_v36 = vand.u32 2147483647, %v1591_v61 }
 0x728   :  { %v1605_v47 = vor.u32 1.1754944e-38, %v1604_v37  ;;  %vm1603_vm9 = vcmp.eq.f32.partialorder %v1602_v36, 8.507059e+37 }
 0x72c   :  { %v5992_v22 = vpop.eup %5991 }
 0x72d   :  { %v1594_v20 = vmul.f32 %v5992_v22, %v1591_v61  ;;  %vm1599_vm6 = vweird.f32 %v5992_v22 }
 0x72e   :  { %vm1600_vm8 = vmor %vm1598_vm7, %vm1599_vm6 }
 0x72f   :  { %v1595_v24 = vsub.f32 1.0, %v1594_v20 }
 0x731   :  { %v1596_v27 = vmul.f32 %v5992_v22, %v1595_v24 }
 0x733   :  { %v1597_v5 = vadd.f32 %v5992_v22, %v1596_v27 }
 0x735   :  { %v1601_v35 = vsel %vm1600_vm8, %v5992_v22, %v1597_v5 }
 0x736   :  { %v1606_v62 = vsel %vm1603_vm9, %v1605_v47, %v1601_v35 }
 0x737   :  { %v1624_v22 = vmul.f32 %v1606_v62, %v7866_v53 }
 0x792   :  { %v1580_v32 = vpop.f32.mrf.mxu1 }
 0x793   :  { %v7957_v3 = vadd.f32 %v1580_v32, %v765_v26 }
 0x795   :  { %5993 = vtanh.f32 %v7957_v3  ;;  %v1627_v0 = vpop.permute.xlu0 %1626 }
 0x796   :  { %v1629_v25 = vmul.f32 %v1627_v0, %v1606_v62 }
 0x798   :  { %1631 = vrot.lane.b32.xlu2 %v1629_v25, %s6771_s5  ;;  %v1560_v40 = vpop.f32.mrf.mxu3 }
 0x799   :  { %v1583_v2 = vadd.f32 %v1560_v40, %v688_v28 }
 0x79b   :  { %v5994_v45 = vpop.eup %5993  ;;  %v5723_v18 = vmul.f32 -1.442695, %v1583_v2 }
 0x79c   :  { %1682 = vrot.lane.b32.xlu1 %v5994_v45, %s6771_s5  ;;  %v5722_v45 = vmul.f32 -1.442695, %v7937_v33 }
 0x79d   :  { %5995 = vpow2.f32 %v5723_v18 }
 0x7a3   :  { %v5996_v43 = vpop.eup %5995 }
 0x7a4   :  { %v1647_v61 = vadd.f32 1.0, %v5996_v43 }
 0x7a6   :  { %5997 = vrcp.f32 %v1647_v61  ;;  %v1660_v32 = vand.u32 2147483648, %v1647_v61  ;;  %vm1654_vm11 = vweird.f32 %v1647_v61  ;;  %v1658_v35 = vand.u32 2147483647, %v1647_v61 }
 0x7a8   :  { %v1661_v47 = vor.u32 1.1754944e-38, %v1660_v32  ;;  %vm1659_vm13 = vcmp.eq.f32.partialorder %v1658_v35, 8.507059e+37 }
 0x7ac   :  { %v5998_v27 = vpop.eup %5997 }
 0x7ad   :  { %v1650_v37 = vmul.f32 %v5998_v27, %v1647_v61  ;;  %vm1655_vm10 = vweird.f32 %v5998_v27 }
 0x7ae   :  { %vm1656_vm12 = vmor %vm1654_vm11, %vm1655_vm10 }
 0x7af   :  { %v1651_v36 = vsub.f32 1.0, %v1650_v37 }
 0x7b1   :  { %v1652_v41 = vmul.f32 %v5998_v27, %v1651_v36 }
 0x7b3   :  { %v1653_v26 = vadd.f32 %v5998_v27, %v1652_v41  ;;  %v7986_v41 = vld [vmem:[#allocation10 + $0x10] sm:$0xff] }
 0x7b5   :  { %v1657_v53 = vsel %vm1656_vm12, %v5998_v27, %v1653_v26  ;;  %v7990_v26 = vld [vmem:[#allocation10] sm:$0xff] }
 0x7b6   :  { %v1662_v62 = vsel %vm1659_vm13, %v1661_v47, %v1657_v53 }
 0x7b7   :  { %v1680_v32 = vmul.f32 %v1662_v62, %v7920_v21 }
 0x7f2   :  { %v1632_v20 = vpop.permute.xlu2 %1631 }
 0x7f3   :  { %v7965_v24 = vadd.f32 %v1632_v20, %v1624_v22 }
 0x7f5   :  { %5999 = vtanh.f32 %v7965_v24 }
 0x7f6   :  { %6001 = vpow2.f32 %v5722_v45 }
 0x7fb   :  { %v6000_v5 = vpop.eup %5999 }
 0x7fc   :  { %1637 = vrot.lane.b32.xlu1 %v6000_v5, %s6771_s5  ;;  %v6002_v40 = vpop.eup %6001 }
 0x7fd   :  { %v1592_v52 = vadd.f32 1.0, %v6002_v40 }
 0x7ff   :  { %6003 = vrcp.f32 %v1592_v52  ;;  %v1619_v22 = vand.u32 2147483648, %v1592_v52  ;;  %vm1613_vm15 = vweird.f32 %v1592_v52  ;;  %v1617_v20 = vand.u32 2147483647, %v1592_v52 }
 0x801   :  { %v1620_v5 = vor.u32 1.1754944e-38, %v1619_v22  ;;  %vm1618_vm1 = vcmp.eq.f32.partialorder %v1617_v20, 8.507059e+37 }
 0x805   :  { %v6004_v28 = vpop.eup %6003 }
 0x806   :  { %v1609_v2 = vmul.f32 %v6004_v28, %v1592_v52  ;;  %vm1614_vm14 = vweird.f32 %v6004_v28 }
 0x807   :  { %vm1615_vm0 = vmor %vm1613_vm15, %vm1614_vm14 }
 0x808   :  { %v1610_v18 = vsub.f32 1.0, %v1609_v2 }
 0x80a   :  { %v1611_v43 = vmul.f32 %v6004_v28, %v1610_v18 }
 0x80c   :  { %v1612_v61 = vadd.f32 %v6004_v28, %v1611_v43 }
 0x80e   :  { %v1683_v0 = vpop.permute.xlu1 %1682  ;;  %v1616_v27 = vsel %vm1615_vm0, %v6004_v28, %v1612_v61 }
 0x80f   :  { %v1685_v25 = vmul.f32 %v1683_v0, %v1662_v62  ;;  %v1621_v37 = vsel %vm1618_vm1, %v1620_v5, %v1616_v27  ;;  %v5724_v0 = vmul.f32 -1.442695, %v7957_v3  ;;  %v9843_v27 = vld [vmem:[#allocation23_spill] sm:$0xff] }
 0x810   :  { %v513_v5 = vadd.f32 %v9843_v27, %v7454_v12 }
 0x811   :  { %1687 = vrot.lane.b32.xlu0 %v1685_v25, %s6771_s5 }
 0x86e   :  { %v1638_v36 = vpop.permute.xlu1 %1637 }
 0x86f   :  { %v1640_v33 = vmul.f32 %v1638_v36, %v1621_v37 }
 0x871   :  { %1698 = vst.msk [vmem:[#allocation2 + $0x18] sm:$0xff] %vm345_vm2, %v1640_v33  ;;  %5725 = vmatmul.msk.f32.vlgmr.msra.gmra.mxu2 %vm345_vm2, %v1640_v33  ;;  %5726 = vmatmul.msk.f32.vlgmr.msrb.gmra.mxu3 %vm345_vm2, %v1640_v33 }
 0x872   :  { %1981 = vmatpush.msra.mxu2 %v7875_v55  ;;  %2001 = vmatpush.msrb.mxu3 %v7878_v51 }
 0x874   :  { %1982 = vmatpush.msra.mxu2 %v7881_v54  ;;  %2002 = vmatpush.msrb.mxu3 %v7884_v57 }
 0x876   :  { %1983 = vmatpush.msra.mxu2 %v7887_v16  ;;  %2003 = vmatpush.msrb.mxu3 %v7890_v59 }
 0x878   :  { %1984 = vmatpush.msra.mxu2 %v7893_v23  ;;  %2004 = vmatpush.msrb.mxu3 %v7896_v29 }
 0x87a   :  { %1985 = vmatpush.msra.mxu2 %v7899_v39  ;;  %2005 = vmatpush.msrb.mxu3 %v7902_v1 }
 0x87c   :  { %1986 = vmatpush.msra.mxu2 %v7905_v48  ;;  %2006 = vmatpush.msrb.mxu3 %v7908_v50 }
 0x87e   :  { %1987 = vmatpush.msra.mxu2 %v7986_v41  ;;  %2007 = vmatpush.msrb.mxu3 %v7912_v56 }
 0x880   :  { %1988 = vmatpush.msra.mxu2 %v7990_v26  ;;  %2008 = vmatpush.msrb.mxu3 %v7916_v44 }
 0x883   :  { %v1688_v35 = vpop.permute.xlu0 %1687 }
 0x884   :  { %v7995_v53 = vadd.f32 %v1688_v35, %v1680_v32  ;;  %v9844_v35 = vld [vmem:[#allocation22_spill] sm:$0xff] }
 0x886   :  { %6005 = vtanh.f32 %v7995_v53 }
 0x887   :  { %6007 = vpow2.f32 %v5724_v0 }
 0x88c   :  { %v6006_v47 = vpop.eup %6005 }
 0x88d   :  { %1693 = vrot.lane.b32.xlu2 %v6006_v47, %s6771_s5  ;;  %v6008_v25 = vpop.eup %6007  ;;  %v436_v47 = vadd.f32 %v9844_v35, %v7570_v42 }
 0x88e   :  { %v1648_v45 = vadd.f32 1.0, %v6008_v25 }
 0x890   :  { %6009 = vrcp.f32 %v1648_v45  ;;  %v1675_v21 = vand.u32 2147483648, %v1648_v45  ;;  %vm1669_vm4 = vweird.f32 %v1648_v45  ;;  %v1673_v62 = vand.u32 2147483647, %v1648_v45 }
 0x892   :  { %v1676_v61 = vor.u32 1.1754944e-38, %v1675_v21  ;;  %vm1674_vm6 = vcmp.eq.f32.partialorder %v1673_v62, 8.507059e+37 }
 0x896   :  { %v6010_v40 = vpop.eup %6009 }
 0x897   :  { %v1665_v52 = vmul.f32 %v6010_v40, %v1648_v45  ;;  %vm1670_vm3 = vweird.f32 %v6010_v40 }
 0x898   :  { %vm1671_vm5 = vmor %vm1669_vm4, %vm1670_vm3 }
 0x899   :  { %v1666_v28 = vsub.f32 1.0, %v1665_v52 }
 0x89b   :  { %v1667_v2 = vmul.f32 %v6010_v40, %v1666_v28 }
 0x89d   :  { %v1668_v18 = vadd.f32 %v6010_v40, %v1667_v2 }
 0x89f   :  { %v1672_v43 = vsel %vm1671_vm5, %v6010_v40, %v1668_v18 }
 0x8a0   :  { %v1677_v22 = vsel %vm1674_vm6, %v1676_v61, %v1672_v43  ;;  %v9845_v61 = vld [vmem:[#allocation74_spill] sm:$0xff] }
 0x8e7   :  { %v1694_v20 = vpop.permute.xlu2 %1693 }
 0x8e8   :  { %v8000_v3 = vmul.f32 %v1694_v20, %v1677_v22  ;;  %v762_v22 = vadd.f32 %v9845_v61, %v7612_v46 }
 0x8ea   :  { %9842 = vst [vmem:[#allocation21_spill] sm:$0xff] %v8000_v3  ;;  %5727 = vmatmul.msk.f32.vlgmr.msrb.gmra.mxu1 %vm345_vm2, %v8000_v3  ;;  %5728 = vmatmul.msk.f32.vlgmr.msrb.gmra.mxu2 %vm345_vm2, %v8000_v3 }
 0x8eb   :  { %2149 = vmatpush.msrb.mxu1 %v7755_v6  ;;  %2169 = vmatpush.msrb.mxu2 %v7761_v31 }
 0x8ed   :  { %2150 = vmatpush.msrb.mxu1 %v7769_v63  ;;  %2170 = vmatpush.msrb.mxu2 %v7775_v60 }
 0x8ef   :  { %2151 = vmatpush.msrb.mxu1 %v7783_v30  ;;  %2171 = vmatpush.msrb.mxu2 %v7789_v7 }
 0x8f1   :  { %2152 = vmatpush.msrb.mxu1 %v7796_v8  ;;  %2172 = vmatpush.msrb.mxu2 %v7802_v19 }
 0x8f3   :  { %2153 = vmatpush.msrb.mxu1 %v7808_v11  ;;  %2173 = vmatpush.msrb.mxu2 %v7814_v13 }
 0x8f4   :  { %v1748_v37 = vpop.f32.mrf.mxu3  ;;  %v1728_v32 = vpop.f32.mrf.mxu2 }
 0x8f5   :  { %v8018_v36 = vadd.f32 %v1748_v37, %v513_v5  ;;  %2154 = vmatpush.msrb.mxu1 %v7820_v14  ;;  %2174 = vmatpush.msrb.mxu2 %v7826_v38  ;;  %v1751_v0 = vadd.f32 %v1728_v32, %v436_v47 }
 0x8f7   :  { %6011 = vtanh.f32 %v8018_v36  ;;  %2155 = vmatpush.msrb.mxu1 %v7832_v15  ;;  %2175 = vmatpush.msrb.mxu2 %v7838_v9  ;;  %v5729_v25 = vmul.f32 -1.442695, %v1751_v0 }
 0x8f9   :  { %2156 = vmatpush.msrb.mxu1 %v7845_v10  ;;  %2176 = vmatpush.msrb.mxu2 %v7851_v17  ;;  %6013 = vpow2.f32 %v5729_v25  ;;  %v9846_v25 = vld [vmem:[#allocation86_spill] sm:$0xff] }
 0x8fd   :  { %v6012_v33 = vpop.eup %6011 }
 0x8fe   :  { %1841 = vrot.lane.b32.xlu0 %v6012_v33, %s6771_s5 }
 0x8ff   :  { %v6014_v45 = vpop.eup %6013 }
 0x900   :  { %v1806_v40 = vadd.f32 1.0, %v6014_v45  ;;  %v685_v45 = vadd.f32 %v9846_v25, %v7642_v4 }
 0x902   :  { %6015 = vrcp.f32 %v1806_v40  ;;  %v1819_v62 = vand.u32 2147483648, %v1806_v40  ;;  %vm1813_vm8 = vweird.f32 %v1806_v40  ;;  %v1817_v43 = vand.u32 2147483647, %v1806_v40 }
 0x904   :  { %v1820_v37 = vor.u32 1.1754944e-38, %v1819_v62  ;;  %vm1818_vm10 = vcmp.eq.f32.partialorder %v1817_v43, 8.507059e+37 }
 0x908   :  { %v6016_v52 = vpop.eup %6015 }
 0x909   :  { %v1809_v28 = vmul.f32 %v6016_v52, %v1806_v40  ;;  %vm1814_vm7 = vweird.f32 %v6016_v52 }
 0x90a   :  { %vm1815_vm9 = vmor %vm1813_vm8, %vm1814_vm7 }
 0x90b   :  { %v1810_v2 = vsub.f32 1.0, %v1809_v28 }
 0x90d   :  { %v1811_v18 = vmul.f32 %v6016_v52, %v1810_v2 }
 0x90f   :  { %v1812_v21 = vadd.f32 %v6016_v52, %v1811_v18 }
 0x911   :  { %v1816_v27 = vsel %vm1815_vm9, %v6016_v52, %v1812_v21 }
 0x912   :  { %v1821_v32 = vsel %vm1818_vm10, %v1820_v37, %v1816_v27 }
 0x913   :  { %v1839_v18 = vmul.f32 %v1821_v32, %v7965_v24 }
 0x967   :  { %v1775_v0 = vpop.f32.mrf.mxu1 }
 0x968   :  { %v1798_v40 = vadd.f32 %v1775_v0, %v685_v45  ;;  %v5730_v45 = vmul.f32 -1.442695, %v8018_v36 }
 0x96a   :  { %v5731_v52 = vmul.f32 -1.442695, %v1798_v40 }
 0x96d   :  { %v1795_v20 = vpop.f32.mrf.mxu2 }
 0x96e   :  { %v8032_v5 = vadd.f32 %v1795_v20, %v762_v22 }
 0x970   :  { %6017 = vtanh.f32 %v8032_v5  ;;  %v1842_v33 = vpop.permute.xlu0 %1841 }
 0x971   :  { %v1844_v35 = vmul.f32 %v1842_v33, %v1821_v32  ;;  %6019 = vpow2.f32 %v5731_v52 }
 0x973   :  { %1846 = vrot.lane.b32.xlu2 %v1844_v35, %s6771_s5 }
 0x976   :  { %v6018_v47 = vpop.eup %6017 }
 0x977   :  { %1897 = vrot.lane.b32.xlu1 %v6018_v47, %s6771_s5  ;;  %v6020_v28 = vpop.eup %6019 }
 0x978   :  { %v1862_v2 = vadd.f32 1.0, %v6020_v28 }
 0x97a   :  { %6021 = vrcp.f32 %v1862_v2  ;;  %v1875_v33 = vand.u32 2147483648, %v1862_v2  ;;  %vm1869_vm12 = vweird.f32 %v1862_v2  ;;  %v1873_v35 = vand.u32 2147483647, %v1862_v2 }
 0x97c   :  { %v1876_v32 = vor.u32 1.1754944e-38, %v1875_v33  ;;  %vm1874_vm14 = vcmp.eq.f32.partialorder %v1873_v35, 8.507059e+37 }
 0x980   :  { %v6022_v43 = vpop.eup %6021 }
 0x981   :  { %v1865_v22 = vmul.f32 %v6022_v43, %v1862_v2  ;;  %vm1870_vm11 = vweird.f32 %v6022_v43 }
 0x982   :  { %vm1871_vm13 = vmor %vm1869_vm12, %vm1870_vm11 }
 0x983   :  { %v1866_v20 = vsub.f32 1.0, %v1865_v22 }
 0x985   :  { %v1867_v27 = vmul.f32 %v6022_v43, %v1866_v20 }
 0x987   :  { %v1868_v37 = vadd.f32 %v6022_v43, %v1867_v27 }
 0x989   :  { %v1872_v24 = vsel %vm1871_vm13, %v6022_v43, %v1868_v37 }
 0x98a   :  { %v1877_v0 = vsel %vm1874_vm14, %v1876_v32, %v1872_v24 }
 0x9cd   :  { %v1847_v21 = vpop.permute.xlu2 %1846 }
 0x9ce   :  { %v8040_v62 = vadd.f32 %v1847_v21, %v1839_v18 }
 0x9d0   :  { %6023 = vtanh.f32 %v8040_v62 }
 0x9d1   :  { %6025 = vpow2.f32 %v5730_v45 }
 0x9d6   :  { %v6024_v61 = vpop.eup %6023 }
 0x9d7   :  { %1852 = vrot.lane.b32.xlu1 %v6024_v61, %s6771_s5  ;;  %v6026_v40 = vpop.eup %6025 }
 0x9d8   :  { %v1807_v52 = vadd.f32 1.0, %v6026_v40 }
 0x9da   :  { %6027 = vrcp.f32 %v1807_v52  ;;  %v1834_v43 = vand.u32 2147483648, %v1807_v52  ;;  %vm1828_vm0 = vweird.f32 %v1807_v52  ;;  %v1832_v22 = vand.u32 2147483647, %v1807_v52 }
 0x9dc   :  { %v1835_v27 = vor.u32 1.1754944e-38, %v1834_v43  ;;  %vm1833_vm3 = vcmp.eq.f32.partialorder %v1832_v22, 8.507059e+37 }
 0x9e0   :  { %v6028_v28 = vpop.eup %6027 }
 0x9e1   :  { %v1824_v18 = vmul.f32 %v6028_v28, %v1807_v52  ;;  %vm1829_vm15 = vweird.f32 %v6028_v28 }
 0x9e2   :  { %vm1830_vm1 = vmor %vm1828_vm0, %vm1829_vm15 }
 0x9e3   :  { %v1825_v21 = vsub.f32 1.0, %v1824_v18 }
 0x9e5   :  { %v1826_v61 = vmul.f32 %v6028_v28, %v1825_v21  ;;  %v9848_v21 = vld [vmem:[#allocation25_spill] sm:$0xff] }
 0x9e7   :  { %v1827_v2 = vadd.f32 %v6028_v28, %v1826_v61  ;;  %v516_v61 = vadd.f32 %v9848_v21, %v7454_v12 }
 0x9e9   :  { %v1898_v47 = vpop.permute.xlu1 %1897  ;;  %v1831_v20 = vsel %vm1830_vm1, %v6028_v28, %v1827_v2 }
 0x9ea   :  { %v1900_v25 = vmul.f32 %v1898_v47, %v1877_v0  ;;  %v1836_v37 = vsel %vm1833_vm3, %v1835_v27, %v1831_v20 }
 0x9ec   :  { %1902 = vrot.lane.b32.xlu0 %v1900_v25, %s6771_s5 }
 0xa49   :  { %v1853_v33 = vpop.permute.xlu1 %1852 }
 0xa4a   :  { %v1855_v36 = vmul.f32 %v1853_v33, %v1836_v37  ;;  %v9850_v33 = vld [vmem:[#allocation72_spill] sm:$0xff] }
 0xa4c   :  { %1913 = vst.msk [vmem:[#allocation2 + $0x20] sm:$0xff] %vm345_vm2, %v1855_v36  ;;  %5733 = vmatmul.msk.f32.vlgmr.msra.gmra.mxu3 %vm345_vm2, %v1855_v36  ;;  %5734 = vmatmul.msk.f32.vlgmr.msra.gmra.mxu1 %vm345_vm2, %v1855_v36  ;;  %v759_v36 = vadd.f32 %v9850_v33, %v7612_v46  ;;  %v8131_v33 = vld [vmem:[%s9740_s4 + $0x60] sm:$0xff] }
 0xa4d   :  { %2196 = vmatpush.msra.mxu3 %v7875_v55  ;;  %2216 = vmatpush.msra.mxu1 %v7878_v51  ;;  %v1895_v55 = vmul.f32 %v1877_v0, %v7995_v53 }
 0xa4f   :  { %2197 = vmatpush.msra.mxu3 %v7881_v54  ;;  %2217 = vmatpush.msra.mxu1 %v7884_v57 }
 0xa51   :  { %2198 = vmatpush.msra.mxu3 %v7887_v16  ;;  %2218 = vmatpush.msra.mxu1 %v7890_v59 }
 0xa53   :  { %2199 = vmatpush.msra.mxu3 %v7893_v23  ;;  %2219 = vmatpush.msra.mxu1 %v7896_v29 }
 0xa55   :  { %2200 = vmatpush.msra.mxu3 %v7899_v39  ;;  %2220 = vmatpush.msra.mxu1 %v7902_v1  ;;  %v5732_v39 = vmul.f32 -1.442695, %v8032_v5 }
 0xa57   :  { %2201 = vmatpush.msra.mxu3 %v7905_v48  ;;  %2221 = vmatpush.msra.mxu1 %v7908_v50 }
 0xa59   :  { %2202 = vmatpush.msra.mxu3 %v7986_v41  ;;  %2222 = vmatpush.msra.mxu1 %v7912_v56 }
 0xa5b   :  { %2203 = vmatpush.msra.mxu3 %v7990_v26  ;;  %2223 = vmatpush.msra.mxu1 %v7916_v44 }
 0xa5e   :  { %v1903_v54 = vpop.permute.xlu0 %1902 }
 0xa5f   :  { %v8066_v16 = vadd.f32 %v1903_v54, %v1895_v55 }
 0xa61   :  { %6029 = vtanh.f32 %v8066_v16 }
 0xa62   :  { %6031 = vpow2.f32 %v5732_v39 }
 0xa67   :  { %v6030_v23 = vpop.eup %6029 }
 0xa68   :  { %1908 = vrot.lane.b32.xlu2 %v6030_v23, %s6771_s5  ;;  %v6032_v48 = vpop.eup %6031 }
 0xa69   :  { %v1863_v35 = vadd.f32 1.0, %v6032_v48  ;;  %v9851_v48 = vld [vmem:[#allocation85_spill] sm:$0xff] }
 0xa6b   :  { %6033 = vrcp.f32 %v1863_v35  ;;  %v1890_v53 = vand.u32 2147483648, %v1863_v35  ;;  %vm1884_vm5 = vweird.f32 %v1863_v35  ;;  %v1888_v0 = vand.u32 2147483647, %v1863_v35 }
 0xa6d   :  { %v1891_v52 = vor.u32 1.1754944e-38, %v1890_v53  ;;  %vm1889_vm7 = vcmp.eq.f32.partialorder %v1888_v0, 8.507059e+37 }
 0xa71   :  { %v6034_v24 = vpop.eup %6033 }
 0xa72   :  { %v1880_v32 = vmul.f32 %v6034_v24, %v1863_v35  ;;  %vm1885_vm4 = vweird.f32 %v6034_v24  ;;  %v682_v35 = vadd.f32 %v9851_v48, %v7642_v4  ;;  %v8166_v48 = vld [vmem:[%s9740_s4 + $0x10] sm:$0xff] }
 0xa73   :  { %vm1886_vm6 = vmor %vm1884_vm5, %vm1885_vm4 }
 0xa74   :  { %v1881_v47 = vsub.f32 1.0, %v1880_v32 }
 0xa76   :  { %v1882_v25 = vmul.f32 %v6034_v24, %v1881_v47 }
 0xa78   :  { %v1883_v45 = vadd.f32 %v6034_v24, %v1882_v25 }
 0xa7a   :  { %v1887_v40 = vsel %vm1886_vm6, %v6034_v24, %v1883_v45 }
 0xa7b   :  { %v1892_v28 = vsel %vm1889_vm7, %v1891_v52, %v1887_v40 }
 0xac2   :  { %v1909_v18 = vpop.permute.xlu2 %1908 }
 0xac3   :  { %v8071_v5 = vmul.f32 %v1909_v18, %v1892_v28 }
 0xac5   :  { %9847 = vst [vmem:[#allocation20_spill] sm:$0xff] %v8071_v5  ;;  %5735 = vmatmul.msk.f32.vlgmr.msra.gmra.mxu2 %vm345_vm2, %v8071_v5  ;;  %5736 = vmatmul.msk.f32.vlgmr.msrb.gmra.mxu3 %vm345_vm2, %v8071_v5 }
 0xac6   :  { %2364 = vmatpush.msra.mxu2 %v7755_v6  ;;  %2384 = vmatpush.msrb.mxu3 %v7761_v31 }
 0xac8   :  { %2365 = vmatpush.msra.mxu2 %v7769_v63  ;;  %2385 = vmatpush.msrb.mxu3 %v7775_v60  ;;  %v9849_v63 = vld [vmem:[#allocation24_spill] sm:$0xff] }
 0xac9   :  { %v1963_v2 = vpop.f32.mrf.mxu1  ;;  %v439_v60 = vadd.f32 %v9849_v63, %v7570_v42 }
 0xaca   :  { %v8083_v43 = vadd.f32 %v1963_v2, %v516_v61  ;;  %2366 = vmatpush.msra.mxu2 %v7783_v30  ;;  %2386 = vmatpush.msrb.mxu3 %v7789_v7 }
 0xacc   :  { %6035 = vtanh.f32 %v8083_v43  ;;  %2367 = vmatpush.msra.mxu2 %v7796_v8  ;;  %2387 = vmatpush.msrb.mxu3 %v7802_v19 }
 0xace   :  { %2368 = vmatpush.msra.mxu2 %v7808_v11  ;;  %2388 = vmatpush.msrb.mxu3 %v7814_v13 }
 0xacf   :  { %v1943_v31 = vpop.f32.mrf.mxu3 }
 0xad0   :  { %2369 = vmatpush.msra.mxu2 %v7820_v14  ;;  %2389 = vmatpush.msrb.mxu3 %v7826_v38  ;;  %v1966_v30 = vadd.f32 %v1943_v31, %v439_v60 }
 0xad2   :  { %v6036_v6 = vpop.eup %6035  ;;  %2370 = vmatpush.msra.mxu2 %v7832_v15  ;;  %2390 = vmatpush.msrb.mxu3 %v7838_v9  ;;  %v5737_v7 = vmul.f32 -1.442695, %v1966_v30 }
 0xad3   :  { %2056 = vrot.lane.b32.xlu0 %v6036_v6, %s6771_s5 }
 0xad4   :  { %2371 = vmatpush.msra.mxu2 %v7845_v10  ;;  %2391 = vmatpush.msrb.mxu3 %v7851_v17  ;;  %6037 = vpow2.f32 %v5737_v7  ;;  %v5738_v7 = vmul.f32 -1.442695, %v8083_v43 }
 0xada   :  { %v6038_v8 = vpop.eup %6037 }
 0xadb   :  { %v2021_v19 = vadd.f32 1.0, %v6038_v8 }
 0xadd   :  { %6039 = vrcp.f32 %v2021_v19  ;;  %v2034_v9 = vand.u32 2147483648, %v2021_v19  ;;  %vm2028_vm9 = vweird.f32 %v2021_v19  ;;  %v2032_v10 = vand.u32 2147483647, %v2021_v19 }
 0xadf   :  { %v2035_v22 = vor.u32 1.1754944e-38, %v2034_v9  ;;  %vm2033_vm11 = vcmp.eq.f32.partialorder %v2032_v10, 8.507059e+37 }
 0xae3   :  { %v6040_v11 = vpop.eup %6039 }
 0xae4   :  { %v2024_v13 = vmul.f32 %v6040_v11, %v2021_v19  ;;  %vm2029_vm8 = vweird.f32 %v6040_v11 }
 0xae5   :  { %vm2030_vm10 = vmor %vm2028_vm9, %vm2029_vm8 }
 0xae6   :  { %v2025_v14 = vsub.f32 1.0, %v2024_v13 }
 0xae8   :  { %v2026_v38 = vmul.f32 %v6040_v11, %v2025_v14 }
 0xaea   :  { %v2027_v15 = vadd.f32 %v6040_v11, %v2026_v38 }
 0xaec   :  { %v2031_v17 = vsel %vm2030_vm10, %v6040_v11, %v2027_v15 }
 0xaed   :  { %v2036_v27 = vsel %vm2033_vm11, %v2035_v22, %v2031_v17 }
 0xaee   :  { %v2054_v25 = vmul.f32 %v2036_v27, %v8040_v62 }
 0xb45   :  { %v2057_v20 = vpop.permute.xlu0 %2056 }
 0xb46   :  { %v2059_v37 = vmul.f32 %v2057_v20, %v2036_v27 }
 0xb48   :  { %2061 = vrot.lane.b32.xlu2 %v2059_v37, %s6771_s5  ;;  %v2010_v55 = vpop.f32.mrf.mxu3  ;;  %v1990_v39 = vpop.f32.mrf.mxu2  ;;  %v8124_v37 = vld [vmem:[%s9740_s4 + $0x70] sm:$0xff] }
 0xb49   :  { %v8104_v54 = vadd.f32 %v2010_v55, %v759_v36  ;;  %v2013_v24 = vadd.f32 %v1990_v39, %v682_v35  ;;  %v8138_v36 = vld [vmem:[%s9740_s4 + $0x50] sm:$0xff]  ;;  %v8145_v55 = vld [vmem:[%s9740_s4 + $0x40] sm:$0xff] }
 0xb4a   :  { %v8159_v39 = vld [vmem:[%s9740_s4 + $0x20] sm:$0xff] }
 0xb4b   :  { %6041 = vtanh.f32 %v8104_v54  ;;  %v5739_v32 = vmul.f32 -1.442695, %v2013_v24  ;;  %v8173_v35 = vld [vmem:[%s9740_s4] sm:$0xff] }
 0xb4d   :  { %6043 = vpow2.f32 %v5739_v32 }
 0xb51   :  { %v6042_v23 = vpop.eup %6041 }
 0xb52   :  { %2112 = vrot.lane.b32.xlu1 %v6042_v23, %s6771_s5  ;;  %v8152_v23 = vld [vmem:[%s9740_s4 + $0x30] sm:$0xff] }
 0xb53   :  { %v6044_v47 = vpop.eup %6043 }
 0xb54   :  { %v2077_v0 = vadd.f32 1.0, %v6044_v47 }
 0xb56   :  { %v2090_v2 = vand.u32 2147483648, %v2077_v0  ;;  %vm2084_vm13 = vweird.f32 %v2077_v0  ;;  %v2088_v6 = vand.u32 2147483647, %v2077_v0 }
 0xb58   :  { %v2091_v31 = vor.u32 1.1754944e-38, %v2090_v2  ;;  %vm2089_vm15 = vcmp.eq.f32.partialorder %v2088_v6, 8.507059e+37 }
 0xba2   :  { %v2062_v45 = vpop.permute.xlu2 %2061 }
 0xba3   :  { %v8111_v53 = vadd.f32 %v2062_v45, %v2054_v25  ;;  %v5740_v45 = vmul.f32 -1.442695, %v8104_v54 }
 0xba5   :  { %6045 = vtanh.f32 %v8111_v53 }
 0xba6   :  { %6047 = vrcp.f32 %v2077_v0 }
 0xba7   :  { %6049 = vpow2.f32 %v5738_v7 }
 0xbab   :  { %v6046_v40 = vpop.eup %6045 }
 0xbac   :  { %2067 = vrot.lane.b32.xlu1 %v6046_v40, %s6771_s5  ;;  %v6048_v52 = vpop.eup %6047 }
 0xbad   :  { %v2080_v28 = vmul.f32 %v6048_v52, %v2077_v0  ;;  %vm2085_vm12 = vweird.f32 %v6048_v52  ;;  %v6050_v8 = vpop.eup %6049 }
 0xbae   :  { %vm2086_vm14 = vmor %vm2084_vm13, %vm2085_vm12  ;;  %v2022_v19 = vadd.f32 1.0, %v6050_v8  ;;  %v9852_v8 = vld [vmem:[#allocation70_spill] sm:$0xff] }
 0xbaf   :  { %v2081_v18 = vsub.f32 1.0, %v2080_v28 }
 0xbb0   :  { %6051 = vrcp.f32 %v2022_v19  ;;  %v2049_v9 = vand.u32 2147483648, %v2022_v19  ;;  %vm2043_vm1 = vweird.f32 %v2022_v19  ;;  %v2047_v10 = vand.u32 2147483647, %v2022_v19 }
 0xbb1   :  { %v2082_v21 = vmul.f32 %v6048_v52, %v2081_v18 }
 0xbb2   :  { %v2050_v22 = vor.u32 1.1754944e-38, %v2049_v9  ;;  %vm2048_vm4 = vcmp.eq.f32.partialorder %v2047_v10, 8.507059e+37 }
 0xbb3   :  { %v2083_v61 = vadd.f32 %v6048_v52, %v2082_v21 }
 0xbb5   :  { %v2087_v62 = vsel %vm2086_vm14, %v6048_v52, %v2083_v61 }
 0xbb6   :  { %v2092_v60 = vsel %vm2089_vm15, %v2091_v31, %v2087_v62  ;;  %v6052_v11 = vpop.eup %6051 }
 0xbb7   :  { %v2039_v13 = vmul.f32 %v6052_v11, %v2022_v19  ;;  %vm2044_vm0 = vweird.f32 %v6052_v11  ;;  %v2110_v24 = vmul.f32 %v2092_v60, %v8066_v16 }
 0xbb8   :  { %vm2045_vm3 = vmor %vm2043_vm1, %vm2044_vm0 }
 0xbb9   :  { %v2040_v14 = vsub.f32 1.0, %v2039_v13 }
 0xbbb   :  { %v2041_v38 = vmul.f32 %v6052_v11, %v2040_v14  ;;  %v9853_v14 = vld [vmem:[#allocation27_spill] sm:$0xff] }
 0xbbd   :  { %v2042_v15 = vadd.f32 %v6052_v11, %v2041_v38 }
 0xbbf   :  { %v2046_v17 = vsel %vm2045_vm3, %v6052_v11, %v2042_v15 }
 0xbc0   :  { %v2051_v20 = vsel %vm2048_vm4, %v2050_v22, %v2046_v17  ;;  %v9854_v17 = vld [vmem:[#allocation84_spill] sm:$0xff] }
 0xbc1   :  { %v679_v22 = vadd.f32 %v9854_v17, %v7642_v4 }
 0xbc4   :  { %v2113_v63 = vpop.permute.xlu1 %2112 }
 0xbc5   :  { %v2115_v30 = vmul.f32 %v2113_v63, %v2092_v60  ;;  %v8192_v60 = vld [vmem:[%s9740_s4 + $0x78] sm:$0xff] }
 0xbc7   :  { %2117 = vrot.lane.b32.xlu0 %v2115_v30, %s6771_s5  ;;  %v8199_v30 = vld [vmem:[%s9740_s4 + $0x68] sm:$0xff] }
 0xc1e   :  { %v2068_v27 = vpop.permute.xlu1 %2067 }
 0xc1f   :  { %v2070_v43 = vmul.f32 %v2068_v27, %v2051_v20 }
 0xc21   :  { %2128 = vst.msk [vmem:[#allocation2 + $0x28] sm:$0xff] %vm345_vm2, %v2070_v43  ;;  %5741 = vmatmul.msk.f32.vlgmr.msrb.gmra.mxu1 %vm345_vm2, %v2070_v43  ;;  %5742 = vmatmul.msk.f32.vlgmr.msrb.gmra.mxu2 %vm345_vm2, %v2070_v43  ;;  %v9855_v43 = vld [vmem:[#allocation26_spill] sm:$0xff] }
 0xc22   :  { %2431 = vmatpush.msrb.mxu1 %v7878_v51  ;;  %2579 = vmatpush.msrb.mxu2 %v8124_v37 }
 0xc24   :  { %2432 = vmatpush.msrb.mxu1 %v7884_v57  ;;  %2580 = vmatpush.msrb.mxu2 %v8131_v33 }
 0xc26   :  { %2433 = vmatpush.msrb.mxu1 %v7890_v59  ;;  %2581 = vmatpush.msrb.mxu2 %v8138_v36 }
 0xc28   :  { %2434 = vmatpush.msrb.mxu1 %v7896_v29  ;;  %2582 = vmatpush.msrb.mxu2 %v8145_v55 }
 0xc2a   :  { %2435 = vmatpush.msrb.mxu1 %v7902_v1  ;;  %2583 = vmatpush.msrb.mxu2 %v8152_v23 }
 0xc2c   :  { %2436 = vmatpush.msrb.mxu1 %v7908_v50  ;;  %2584 = vmatpush.msrb.mxu2 %v8159_v39 }
 0xc2e   :  { %2437 = vmatpush.msrb.mxu1 %v7912_v56  ;;  %2585 = vmatpush.msrb.mxu2 %v8166_v48 }
 0xc30   :  { %2438 = vmatpush.msrb.mxu1 %v7916_v44  ;;  %2586 = vmatpush.msrb.mxu2 %v8173_v35 }
 0xc39   :  { %v2118_v32 = vpop.permute.xlu0 %2117 }
 0xc3a   :  { %v8177_v47 = vadd.f32 %v2118_v32, %v2110_v24  ;;  %v442_v24 = vadd.f32 %v9855_v43, %v7570_v42 }
 0xc3c   :  { %6053 = vtanh.f32 %v8177_v47 }
 0xc3d   :  { %6055 = vpow2.f32 %v5740_v45 }
 0xc42   :  { %v6054_v25 = vpop.eup %6053 }
 0xc43   :  { %2123 = vrot.lane.b32.xlu2 %v6054_v25, %s6771_s5  ;;  %v6056_v0 = vpop.eup %6055 }
 0xc44   :  { %v2078_v40 = vadd.f32 1.0, %v6056_v0 }
 0xc46   :  { %6057 = vrcp.f32 %v2078_v40  ;;  %v2105_v16 = vand.u32 2147483648, %v2078_v40  ;;  %vm2099_vm6 = vweird.f32 %v2078_v40  ;;  %v2103_v2 = vand.u32 2147483647, %v2078_v40 }
 0xc48   :  { %v2106_v62 = vor.u32 1.1754944e-38, %v2105_v16  ;;  %vm2104_vm8 = vcmp.eq.f32.partialorder %v2103_v2, 8.507059e+37 }
 0xc4c   :  { %v6058_v52 = vpop.eup %6057 }
 0xc4d   :  { %v2095_v28 = vmul.f32 %v6058_v52, %v2078_v40  ;;  %vm2100_vm5 = vweird.f32 %v6058_v52 }
 0xc4e   :  { %vm2101_vm7 = vmor %vm2099_vm6, %vm2100_vm5 }
 0xc4f   :  { %v2096_v18 = vsub.f32 1.0, %v2095_v28 }
 0xc51   :  { %v2097_v21 = vmul.f32 %v6058_v52, %v2096_v18 }
 0xc53   :  { %v2098_v61 = vadd.f32 %v6058_v52, %v2097_v21 }
 0xc55   :  { %v2102_v6 = vsel %vm2101_vm7, %v6058_v52, %v2098_v61 }
 0xc56   :  { %v2107_v31 = vsel %vm2104_vm8, %v2106_v62, %v2102_v6 }
 0xc9d   :  { %v2124_v63 = vpop.permute.xlu2 %2123 }
 0xc9e   :  { %v8182_v54 = vmul.f32 %v2124_v63, %v2107_v31  ;;  %v2158_v7 = vpop.f32.mrf.mxu1 }
 0xc9f   :  { %v2181_v32 = vadd.f32 %v2158_v7, %v442_v24 }
 0xca0   :  { %5743 = vmatmul.msk.f32.vlgmr.msra.gmra.mxu3 %vm345_vm2, %v8182_v54  ;;  %5744 = vmatmul.msk.f32.vlgmr.msra.gmra.mxu1 %vm345_vm2, %v8182_v54 }
 0xca1   :  { %2646 = vmatpush.msra.mxu1 %v7878_v51  ;;  %2599 = vmatpush.msra.mxu3 %v8192_v60  ;;  %v8206_v51 = vld [vmem:[%s9740_s4 + $0x58] sm:$0xff]  ;;  %v5745_v25 = vmul.f32 -1.442695, %v2181_v32 }
 0xca3   :  { %2647 = vmatpush.msra.mxu1 %v7884_v57  ;;  %2600 = vmatpush.msra.mxu3 %v8199_v30  ;;  %v8213_v57 = vld [vmem:[%s9740_s4 + $0x48] sm:$0xff] }
 0xca4   :  { %v2178_v13 = vpop.f32.mrf.mxu2 }
 0xca5   :  { %2648 = vmatpush.msra.mxu1 %v7890_v59  ;;  %2601 = vmatpush.msra.mxu3 %v8206_v51  ;;  %v8220_v59 = vld [vmem:[%s9740_s4 + $0x38] sm:$0xff] }
 0xca7   :  { %2649 = vmatpush.msra.mxu1 %v7896_v29  ;;  %2602 = vmatpush.msra.mxu3 %v8213_v57  ;;  %v8227_v29 = vld [vmem:[%s9740_s4 + $0x28] sm:$0xff] }
 0xca9   :  { %2650 = vmatpush.msra.mxu1 %v7902_v1  ;;  %2603 = vmatpush.msra.mxu3 %v8220_v59  ;;  %v8234_v1 = vld [vmem:[%s9740_s4 + $0x18] sm:$0xff] }
 0xcab   :  { %2651 = vmatpush.msra.mxu1 %v7908_v50  ;;  %2604 = vmatpush.msra.mxu3 %v8227_v29  ;;  %v8241_v50 = vld [vmem:[%s9740_s4 + $0x8] sm:$0xff] }
 0xcad   :  { %2652 = vmatpush.msra.mxu1 %v7912_v56  ;;  %2605 = vmatpush.msra.mxu3 %v8234_v1  ;;  %v756_v56 = vadd.f32 %v9852_v8, %v7612_v46 }
 0xcaf   :  { %2653 = vmatpush.msra.mxu1 %v7916_v44  ;;  %2606 = vmatpush.msra.mxu3 %v8241_v50  ;;  %v519_v44 = vadd.f32 %v9853_v14, %v7454_v12 }
 0xcb1   :  { %v8251_v38 = vadd.f32 %v2178_v13, %v519_v44 }
 0xd1d   :  { %v2225_v19 = vpop.f32.mrf.mxu1 }
 0xd1e   :  { %v8246_v11 = vadd.f32 %v2225_v19, %v756_v56 }
 0xd20   :  { %6059 = vtanh.f32 %v8246_v11 }
 0xd21   :  { %6061 = vtanh.f32 %v8251_v38 }
 0xd23   :  { %v2205_v10 = vpop.f32.mrf.mxu3 }
 0xd24   :  { %v2228_v20 = vadd.f32 %v2205_v10, %v679_v22 }
 0xd26   :  { %v6060_v15 = vpop.eup %6059  ;;  %v5747_v27 = vmul.f32 -1.442695, %v2228_v20 }
 0xd27   :  { %2327 = vrot.lane.b32.xlu0 %v6060_v15, %s6771_s5  ;;  %v6062_v9 = vpop.eup %6061 }
 0xd28   :  { %6063 = vpow2.f32 %v5747_v27 }
 0xd29   :  { %6065 = vpow2.f32 %v5745_v25 }
 0xd2e   :  { %v6064_v45 = vpop.eup %6063 }
 0xd2f   :  { %2271 = vrot.lane.b32.xlu0 %v6062_v9, %s6771_s5  ;;  %v2292_v0 = vadd.f32 1.0, %v6064_v45  ;;  %v6066_v40 = vpop.eup %6065 }
 0xd30   :  { %v2236_v52 = vadd.f32 1.0, %v6066_v40 }
 0xd31   :  { %6067 = vrcp.f32 %v2292_v0  ;;  %v2305_v31 = vand.u32 2147483648, %v2292_v0  ;;  %vm2299_vm10 = vweird.f32 %v2292_v0  ;;  %v2303_v63 = vand.u32 2147483647, %v2292_v0 }
 0xd32   :  { %6069 = vrcp.f32 %v2236_v52  ;;  %v2249_v15 = vand.u32 2147483648, %v2236_v52  ;;  %vm2243_vm14 = vweird.f32 %v2236_v52  ;;  %v2247_v9 = vand.u32 2147483647, %v2236_v52 }
 0xd33   :  { %v2306_v56 = vor.u32 1.1754944e-38, %v2305_v31  ;;  %vm2304_vm12 = vcmp.eq.f32.partialorder %v2303_v63, 8.507059e+37 }
 0xd34   :  { %v2250_v17 = vor.u32 1.1754944e-38, %v2249_v15  ;;  %vm2248_vm0 = vcmp.eq.f32.partialorder %v2247_v9, 8.507059e+37 }
 0xd37   :  { %v6068_v28 = vpop.eup %6067 }
 0xd38   :  { %v2295_v18 = vmul.f32 %v6068_v28, %v2292_v0  ;;  %v6070_v61 = vpop.eup %6069  ;;  %vm2300_vm9 = vweird.f32 %v6068_v28 }
 0xd39   :  { %v2239_v2 = vmul.f32 %v6070_v61, %v2236_v52  ;;  %vm2301_vm11 = vmor %vm2299_vm10, %vm2300_vm9  ;;  %vm2244_vm13 = vweird.f32 %v6070_v61 }
 0xd3a   :  { %v2296_v21 = vsub.f32 1.0, %v2295_v18  ;;  %vm2245_vm15 = vmor %vm2243_vm14, %vm2244_vm13 }
 0xd3b   :  { %v2240_v62 = vsub.f32 1.0, %v2239_v2 }
 0xd3c   :  { %v2297_v16 = vmul.f32 %v6068_v28, %v2296_v21 }
 0xd3d   :  { %v2241_v8 = vmul.f32 %v6070_v61, %v2240_v62 }
 0xd3e   :  { %v2298_v6 = vadd.f32 %v6068_v28, %v2297_v16 }
 0xd3f   :  { %v2242_v44 = vadd.f32 %v6070_v61, %v2241_v8 }
 0xd40   :  { %v2302_v7 = vsel %vm2301_vm11, %v6068_v28, %v2298_v6  ;;  %v5746_v28 = vmul.f32 -1.442695, %v8251_v38 }
 0xd41   :  { %v2307_v13 = vsel %vm2304_vm12, %v2306_v56, %v2302_v7  ;;  %v2246_v10 = vsel %vm2245_vm15, %v6070_v61, %v2242_v44 }
 0xd42   :  { %v2251_v22 = vsel %vm2248_vm0, %v2250_v17, %v2246_v10  ;;  %v2325_v43 = vmul.f32 %v2307_v13, %v8177_v47  ;;  %v5748_v47 = vmul.f32 -1.442695, %v8246_v11 }
 0xd43   :  { %v2269_v25 = vmul.f32 %v2251_v22, %v8111_v53 }
 0xd99   :  { %v2328_v19 = vpop.permute.xlu0 %2327 }
 0xd9a   :  { %v2330_v14 = vmul.f32 %v2328_v19, %v2307_v13 }
 0xd9c   :  { %2332 = vrot.lane.b32.xlu1 %v2330_v14, %s6771_s5 }
 0xda1   :  { %v2272_v20 = vpop.permute.xlu0 %2271 }
 0xda2   :  { %v2274_v27 = vmul.f32 %v2272_v20, %v2251_v22  ;;  %v8280_v22 = vld [vmem:[#allocation10 + $0x70] sm:$0xff]  ;;  %v8283_v20 = vld [vmem:[#allocation10 + $0x78] sm:$0xff] }
 0xda4   :  { %2276 = vrot.lane.b32.xlu1 %v2274_v27, %s6771_s5 }
 0xe0e   :  { %v2333_v24 = vpop.permute.xlu1 %2332 }
 0xe0f   :  { %v8263_v32 = vadd.f32 %v2333_v24, %v2325_v43  ;;  %v8286_v24 = vld [vmem:[#allocation10 + $0x60] sm:$0xff] }
 0xe11   :  { %6071 = vtanh.f32 %v8263_v32 }
 0xe16   :  { %v2277_v45 = vpop.permute.xlu1 %2276 }
 0xe17   :  { %v6072_v0 = vpop.eup %6071  ;;  %v8267_v40 = vadd.f32 %v2277_v45, %v2269_v25  ;;  %v8289_v25 = vld [vmem:[#allocation10 + $0x68] sm:$0xff] }
 0xe18   :  { %2338 = vrot.lane.b32.xlu2 %v6072_v0, %s6771_s5 }
 0xe19   :  { %6073 = vtanh.f32 %v8267_v40 }
 0xe1a   :  { %6075 = vpow2.f32 %v5748_v47  ;;  %v8295_v47 = vld [vmem:[#allocation10 + $0x58] sm:$0xff] }
 0xe1b   :  { %6077 = vpow2.f32 %v5746_v28 }
 0xe1f   :  { %v6074_v52 = vpop.eup %6073 }
 0xe20   :  { %2282 = vrot.lane.b32.xlu2 %v6074_v52, %s6771_s5  ;;  %v6076_v18 = vpop.eup %6075  ;;  %v8292_v52 = vld [vmem:[#allocation10 + $0x50] sm:$0xff] }
 0xe21   :  { %v2293_v21 = vadd.f32 1.0, %v6076_v18  ;;  %v6078_v53 = vpop.eup %6077  ;;  %v8298_v18 = vld [vmem:[#allocation10 + $0x40] sm:$0xff] }
 0xe22   :  { %v2237_v61 = vadd.f32 1.0, %v6078_v53  ;;  %v8307_v53 = vld [vmem:[#allocation10 + $0x30] sm:$0xff] }
 0xe23   :  { %6079 = vrcp.f32 %v2293_v21  ;;  %v2320_v11 = vand.u32 2147483648, %v2293_v21  ;;  %vm2314_vm3 = vweird.f32 %v2293_v21  ;;  %v2318_v56 = vand.u32 2147483647, %v2293_v21 }
 0xe24   :  { %6081 = vrcp.f32 %v2237_v61  ;;  %v2264_v10 = vand.u32 2147483648, %v2237_v61  ;;  %vm2258_vm7 = vweird.f32 %v2237_v61  ;;  %v2262_v17 = vand.u32 2147483647, %v2237_v61 }
 0xe25   :  { %v2321_v13 = vor.u32 1.1754944e-38, %v2320_v11  ;;  %vm2319_vm5 = vcmp.eq.f32.partialorder %v2318_v56, 8.507059e+37 }
 0xe26   :  { %v2265_v43 = vor.u32 1.1754944e-38, %v2264_v10  ;;  %vm2263_vm9 = vcmp.eq.f32.partialorder %v2262_v17, 8.507059e+37 }
 0xe29   :  { %v6080_v16 = vpop.eup %6079 }
 0xe2a   :  { %v2310_v2 = vmul.f32 %v6080_v16, %v2293_v21  ;;  %v6082_v62 = vpop.eup %6081  ;;  %vm2315_vm1 = vweird.f32 %v6080_v16  ;;  %v8301_v21 = vld [vmem:[#allocation10 + $0x48] sm:$0xff] }
 0xe2b   :  { %v2254_v63 = vmul.f32 %v6082_v62, %v2237_v61  ;;  %vm2316_vm4 = vmor %vm2314_vm3, %vm2315_vm1  ;;  %vm2259_vm6 = vweird.f32 %v6082_v62  ;;  %v8310_v61 = vld [vmem:[#allocation10 + $0x38] sm:$0xff] }
 0xe2c   :  { %v2311_v6 = vsub.f32 1.0, %v2310_v2  ;;  %vm2260_vm8 = vmor %vm2258_vm7, %vm2259_vm6  ;;  %v8318_v2 = vld [vmem:[#allocation10 + $0x28] sm:$0xff] }
 0xe2d   :  { %v2255_v8 = vsub.f32 1.0, %v2254_v63 }
 0xe2e   :  { %v2312_v31 = vmul.f32 %v6080_v16, %v2311_v6  ;;  %v8324_v6 = vld [vmem:[#allocation10 + $0x18] sm:$0xff] }
 0xe2f   :  { %v2256_v19 = vmul.f32 %v6082_v62, %v2255_v8  ;;  %v9858_v8 = vld [vmem:[#allocation29_spill] sm:$0xff] }
 0xe30   :  { %v2313_v7 = vadd.f32 %v6080_v16, %v2312_v31  ;;  %v522_v11 = vadd.f32 %v9858_v8, %v7454_v12 }
 0xe31   :  { %v2257_v9 = vadd.f32 %v6082_v62, %v2256_v19 }
 0xe32   :  { %v2317_v38 = vsel %vm2316_vm4, %v6080_v16, %v2313_v7  ;;  %v8315_v16 = vld [vmem:[#allocation10 + $0x20] sm:$0xff] }
 0xe33   :  { %v2322_v14 = vsel %vm2319_vm5, %v2321_v13, %v2317_v38  ;;  %v2261_v27 = vsel %vm2260_vm8, %v6082_v62, %v2257_v9  ;;  %v8330_v62 = vld [vmem:[#allocation10 + $0x8] sm:$0xff] }
 0xe34   :  { %v2266_v45 = vsel %vm2263_vm9, %v2265_v43, %v2261_v27  ;;  %v9860_v27 = vld [vmem:[#allocation28_spill] sm:$0xff] }
 0xe35   :  { %v445_v43 = vadd.f32 %v9860_v27, %v7570_v42 }
 0xe72   :  { %v2339_v44 = vpop.permute.xlu2 %2338 }
 0xe73   :  { %v8274_v15 = vmul.f32 %v2339_v44, %v2322_v14  ;;  %v9859_v14 = vld [vmem:[#allocation83_spill] sm:$0xff] }
 0xe74   :  { %v676_v44 = vadd.f32 %v9859_v14, %v7642_v4 }
 0xe75   :  { %9856 = vst [vmem:[#allocation76_spill] sm:$0xff] %v8274_v15  ;;  %5751 = vmatmul.msk.f32.vlgmr.msrb.gmra.mxu0 %vm345_vm2, %v8274_v15  ;;  %5752 = vmatmul.msk.f32.vlgmr.msrb.gmra.mxu1 %vm345_vm2, %v8274_v15 }
 0xe76   :  { %2841 = vmatpush.msrb.mxu0 %v8280_v22  ;;  %2861 = vmatpush.msrb.mxu1 %v8283_v20 }
 0xe78   :  { %2842 = vmatpush.msrb.mxu0 %v8286_v24  ;;  %2862 = vmatpush.msrb.mxu1 %v8289_v25 }
 0xe7a   :  { %v2283_v0 = vpop.permute.xlu2 %2282  ;;  %2843 = vmatpush.msrb.mxu0 %v8292_v52  ;;  %2863 = vmatpush.msrb.mxu1 %v8295_v47 }
 0xe7b   :  { %v2285_v28 = vmul.f32 %v2283_v0, %v2266_v45 }
 0xe7c   :  { %2844 = vmatpush.msrb.mxu0 %v8298_v18  ;;  %2864 = vmatpush.msrb.mxu1 %v8301_v21 }
 0xe7d   :  { %2343 = vst.msk [vmem:[#allocation2 + $0x30] sm:$0xff] %vm345_vm2, %v2285_v28  ;;  %5749 = vmatmul.msk.f32.vlgmr.msra.gmra.mxu2 %vm345_vm2, %v2285_v28  ;;  %5750 = vmatmul.msk.f32.vlgmr.msrb.gmra.mxu3 %vm345_vm2, %v2285_v28 }
 0xe7e   :  { %2845 = vmatpush.msrb.mxu0 %v8307_v53  ;;  %2865 = vmatpush.msrb.mxu1 %v8310_v61 }
 0xe7f   :  { %2794 = vmatpush.msra.mxu2 %v8124_v37  ;;  %2814 = vmatpush.msrb.mxu3 %v8192_v60 }
 0xe80   :  { %2846 = vmatpush.msrb.mxu0 %v8315_v16  ;;  %2866 = vmatpush.msrb.mxu1 %v8318_v2 }
 0xe81   :  { %2795 = vmatpush.msra.mxu2 %v8131_v33  ;;  %2815 = vmatpush.msrb.mxu3 %v8199_v30 }
 0xe82   :  { %2847 = vmatpush.msrb.mxu0 %v7986_v41  ;;  %2867 = vmatpush.msrb.mxu1 %v8324_v6  ;;  %v9857_v41 = vld [vmem:[#allocation68_spill] sm:$0xff] }
 0xe83   :  { %2796 = vmatpush.msra.mxu2 %v8138_v36  ;;  %2816 = vmatpush.msrb.mxu3 %v8206_v51 }
 0xe84   :  { %2848 = vmatpush.msrb.mxu0 %v7990_v26  ;;  %2868 = vmatpush.msrb.mxu1 %v8330_v62  ;;  %v753_v26 = vadd.f32 %v9857_v41, %v7612_v46 }
 0xe85   :  { %2797 = vmatpush.msra.mxu2 %v8145_v55  ;;  %2817 = vmatpush.msrb.mxu3 %v8213_v57 }
 0xe87   :  { %2798 = vmatpush.msra.mxu2 %v8152_v23  ;;  %2818 = vmatpush.msrb.mxu3 %v8220_v59 }
 0xe89   :  { %2799 = vmatpush.msra.mxu2 %v8159_v39  ;;  %2819 = vmatpush.msrb.mxu3 %v8227_v29 }
 0xe8b   :  { %2800 = vmatpush.msra.mxu2 %v8166_v48  ;;  %2820 = vmatpush.msrb.mxu3 %v8234_v1 }
 0xe8d   :  { %2801 = vmatpush.msra.mxu2 %v8173_v35  ;;  %2821 = vmatpush.msrb.mxu3 %v8241_v50 }
 0xef2   :  { %v2440_v31 = vpop.f32.mrf.mxu1  ;;  %v2420_v13 = vpop.f32.mrf.mxu0 }
 0xef3   :  { %v8345_v63 = vadd.f32 %v2440_v31, %v753_v26  ;;  %v2443_v9 = vadd.f32 %v2420_v13, %v676_v44 }
 0xef5   :  { %6083 = vtanh.f32 %v8345_v63  ;;  %v5755_v10 = vmul.f32 -1.442695, %v2443_v9 }
 0xefb   :  { %v6084_v7 = vpop.eup %6083 }
 0xefc   :  { %2542 = vrot.lane.b32.xlu0 %v6084_v7, %s6771_s5 }
 0xf00   :  { %v2393_v56 = vpop.f32.mrf.mxu3  ;;  %v2373_v17 = vpop.f32.mrf.mxu2 }
 0xf01   :  { %v8351_v38 = vadd.f32 %v2393_v56, %v522_v11  ;;  %v2396_v0 = vadd.f32 %v2373_v17, %v445_v43 }
 0xf03   :  { %6085 = vtanh.f32 %v8351_v38  ;;  %v5753_v41 = vmul.f32 -1.442695, %v2396_v0 }
 0xf04   :  { %6087 = vpow2.f32 %v5755_v10 }
 0xf09   :  { %v6086_v19 = vpop.eup %6085 }
 0xf0a   :  { %2486 = vrot.lane.b32.xlu0 %v6086_v19, %s6771_s5  ;;  %v6088_v45 = vpop.eup %6087 }
 0xf0b   :  { %v2507_v28 = vadd.f32 1.0, %v6088_v45 }
 0xf0d   :  { %6089 = vrcp.f32 %v2507_v28  ;;  %v2520_v14 = vand.u32 2147483648, %v2507_v28  ;;  %vm2514_vm11 = vweird.f32 %v2507_v28  ;;  %v2518_v44 = vand.u32 2147483647, %v2507_v28 }
 0xf0e   :  { %6091 = vpow2.f32 %v5753_v41 }
 0xf0f   :  { %v2521_v17 = vor.u32 1.1754944e-38, %v2520_v14  ;;  %vm2519_vm13 = vcmp.eq.f32.partialorder %v2518_v44, 8.507059e+37 }
 0xf13   :  { %v6090_v26 = vpop.eup %6089 }
 0xf14   :  { %v6092_v31 = vpop.eup %6091  ;;  %v2510_v7 = vmul.f32 %v6090_v26, %v2507_v28  ;;  %vm2515_vm10 = vweird.f32 %v6090_v26 }
 0xf15   :  { %v2451_v8 = vadd.f32 1.0, %v6092_v31  ;;  %vm2516_vm12 = vmor %vm2514_vm11, %vm2515_vm10 }
 0xf16   :  { %v2511_v11 = vsub.f32 1.0, %v2510_v7 }
 0xf17   :  { %6093 = vrcp.f32 %v2451_v8  ;;  %v2464_v7 = vand.u32 2147483648, %v2451_v8  ;;  %vm2458_vm15 = vweird.f32 %v2451_v8 }
 0xf18   :  { %v2512_v56 = vmul.f32 %v6090_v26, %v2511_v11  ;;  %v2462_v11 = vand.u32 2147483647, %v2451_v8 }
 0xf19   :  { %v2465_v28 = vor.u32 1.1754944e-38, %v2464_v7 }
 0xf1a   :  { %v2513_v13 = vadd.f32 %v6090_v26, %v2512_v56  ;;  %vm2463_vm1 = vcmp.eq.f32.partialorder %v2462_v11, 8.507059e+37 }
 0xf1c   :  { %v2517_v10 = vsel %vm2516_vm12, %v6090_v26, %v2513_v13 }
 0xf1d   :  { %v6094_v19 = vpop.eup %6093  ;;  %v2522_v45 = vsel %vm2519_vm13, %v2521_v17, %v2517_v10 }
 0xf1e   :  { %v2454_v9 = vmul.f32 %v6094_v19, %v2451_v8  ;;  %vm2459_vm14 = vweird.f32 %v6094_v19  ;;  %v2540_v14 = vmul.f32 %v2522_v45, %v8263_v32  ;;  %v5756_v32 = vmul.f32 -1.442695, %v8345_v63 }
 0xf1f   :  { %vm2460_vm0 = vmor %vm2458_vm15, %vm2459_vm14 }
 0xf20   :  { %v2455_v27 = vsub.f32 1.0, %v2454_v9 }
 0xf22   :  { %v2456_v41 = vmul.f32 %v6094_v19, %v2455_v27 }
 0xf24   :  { %v2457_v31 = vadd.f32 %v6094_v19, %v2456_v41 }
 0xf26   :  { %v2461_v56 = vsel %vm2460_vm0, %v6094_v19, %v2457_v31 }
 0xf27   :  { %v2466_v26 = vsel %vm2463_vm1, %v2465_v28, %v2461_v56 }
 0xf28   :  { %v2484_v8 = vmul.f32 %v2466_v26, %v8267_v40 }
 0xf6e   :  { %v2543_v43 = vpop.permute.xlu0 %2542 }
 0xf6f   :  { %v2545_v0 = vmul.f32 %v2543_v43, %v2522_v45  ;;  %v5754_v45 = vmul.f32 -1.442695, %v8351_v38 }
 0xf71   :  { %2547 = vrot.lane.b32.xlu1 %v2545_v0, %s6771_s5 }
 0xf7c   :  { %v2487_v3 = vpop.permute.xlu0 %2486 }
 0xf7d   :  { %v2489_v13 = vmul.f32 %v2487_v3, %v2466_v26 }
 0xf7f   :  { %2491 = vrot.lane.b32.xlu1 %v2489_v13, %s6771_s5 }
 0xfe3   :  { %v2548_v44 = vpop.permute.xlu1 %2547 }
 0xfe4   :  { %v8362_v9 = vadd.f32 %v2548_v44, %v2540_v14 }
 0xfe6   :  { %6095 = vtanh.f32 %v8362_v9 }
 0xfec   :  { %v6096_v10 = vpop.eup %6095 }
 0xfed   :  { %2553 = vrot.lane.b32.xlu2 %v6096_v10, %s6771_s5 }
 0xff1   :  { %v2492_v19 = vpop.permute.xlu1 %2491 }
 0xff2   :  { %v8367_v17 = vadd.f32 %v2492_v19, %v2484_v8 }
 0xff4   :  { %6097 = vtanh.f32 %v8367_v17 }
 0xff5   :  { %6099 = vpow2.f32 %v5756_v32 }
 0xffa   :  { %v6098_v3 = vpop.eup %6097 }
 0xffb   :  { %2497 = vrot.lane.b32.xlu2 %v6098_v3, %s6771_s5  ;;  %v6100_v27 = vpop.eup %6099 }
 0xffc   :  { %v2508_v43 = vadd.f32 1.0, %v6100_v27 }
 0xffe   :  { %6101 = vrcp.f32 %v2508_v43  ;;  %v2535_v26 = vand.u32 2147483648, %v2508_v43  ;;  %vm2529_vm4 = vweird.f32 %v2508_v43  ;;  %v2533_v63 = vand.u32 2147483647, %v2508_v43 }
 0xfff   :  { %6103 = vpow2.f32 %v5754_v45 }
0x1000   :  { %v2536_v44 = vor.u32 1.1754944e-38, %v2535_v26  ;;  %vm2534_vm6 = vcmp.eq.f32.partialorder %v2533_v63, 8.507059e+37 }
0x1004   :  { %v6102_v0 = vpop.eup %6101 }
0x1005   :  { %v6104_v41 = vpop.eup %6103  ;;  %v2525_v40 = vmul.f32 %v6102_v0, %v2508_v43  ;;  %vm2530_vm3 = vweird.f32 %v6102_v0 }
0x1006   :  { %v2452_v31 = vadd.f32 1.0, %v6104_v41  ;;  %vm2531_vm5 = vmor %vm2529_vm4, %vm2530_vm3 }
0x1007   :  { %v2526_v7 = vsub.f32 1.0, %v2525_v40 }
0x1008   :  { %6105 = vrcp.f32 %v2452_v31  ;;  %v2479_v27 = vand.u32 2147483648, %v2452_v31  ;;  %vm2473_vm8 = vweird.f32 %v2452_v31  ;;  %v2477_v43 = vand.u32 2147483647, %v2452_v31 }
0x1009   :  { %v2527_v11 = vmul.f32 %v6102_v0, %v2526_v7 }
0x100a   :  { %vm2478_vm10 = vcmp.eq.f32.partialorder %v2477_v43, 8.507059e+37 }
0x100b   :  { %v2528_v28 = vadd.f32 %v6102_v0, %v2527_v11  ;;  %v8398_v11 = vld [vmem:[#allocation10] sm:$0xff] }
0x100d   :  { %v2532_v14 = vsel %vm2531_vm5, %v6102_v0, %v2528_v28  ;;  %v2480_v0 = vor.u32 1.1754944e-38, %v2479_v27 }
0x100e   :  { %v6106_v56 = vpop.eup %6105  ;;  %v2537_v10 = vsel %vm2534_vm6, %v2536_v44, %v2532_v14  ;;  %v9862_v14 = vld [vmem:[#allocation31_spill] sm:$0xff] }
0x100f   :  { %v2469_v13 = vmul.f32 %v6106_v56, %v2452_v31  ;;  %vm2474_vm7 = vweird.f32 %v6106_v56  ;;  %v8391_v31 = vld [vmem:[#allocation10 + $0x10] sm:$0xff]  ;;  %v525_v44 = vadd.f32 %v9862_v14, %v7454_v12 }
0x1010   :  { %vm2475_vm9 = vmor %vm2473_vm8, %vm2474_vm7 }
0x1011   :  { %v2470_v38 = vsub.f32 1.0, %v2469_v13 }
0x1013   :  { %v2471_v3 = vmul.f32 %v6106_v56, %v2470_v38 }
0x1015   :  { %v2472_v32 = vadd.f32 %v6106_v56, %v2471_v3 }
0x1017   :  { %v2476_v45 = vsel %vm2475_vm9, %v6106_v56, %v2472_v32  ;;  %v9861_v56 = vld [vmem:[#allocation65_spill] sm:$0xff]  ;;  %v9863_v32 = vld [vmem:[#allocation82_spill] sm:$0xff] }
0x1018   :  { %v2481_v41 = vsel %vm2478_vm10, %v2480_v0, %v2476_v45  ;;  %v750_v28 = vadd.f32 %v9861_v56, %v7612_v46  ;;  %v673_v27 = vadd.f32 %v9863_v32, %v7642_v4 }
0x1047   :  { %v2554_v8 = vpop.permute.xlu2 %2553 }
0x1048   :  { %v8373_v19 = vmul.f32 %v2554_v8, %v2537_v10 }
0x104a   :  { %5759 = vmatmul.msk.f32.vlgmr.msra.gmra.mxu0 %vm345_vm2, %v8373_v19  ;;  %5760 = vmatmul.msk.f32.vlgmr.msra.gmra.mxu1 %vm345_vm2, %v8373_v19 }
0x104b   :  { %3056 = vmatpush.msra.mxu0 %v8280_v22  ;;  %3076 = vmatpush.msra.mxu1 %v8283_v20 }
0x104d   :  { %3057 = vmatpush.msra.mxu0 %v8286_v24  ;;  %3077 = vmatpush.msra.mxu1 %v8289_v25 }
0x104f   :  { %3058 = vmatpush.msra.mxu0 %v8292_v52  ;;  %3078 = vmatpush.msra.mxu1 %v8295_v47 }
0x1051   :  { %3059 = vmatpush.msra.mxu0 %v8298_v18  ;;  %3079 = vmatpush.msra.mxu1 %v8301_v21 }
0x1053   :  { %3060 = vmatpush.msra.mxu0 %v8307_v53  ;;  %3080 = vmatpush.msra.mxu1 %v8310_v61 }
0x1055   :  { %v2498_v40 = vpop.permute.xlu2 %2497  ;;  %3061 = vmatpush.msra.mxu0 %v8315_v16  ;;  %3081 = vmatpush.msra.mxu1 %v8318_v2 }
0x1056   :  { %v2500_v7 = vmul.f32 %v2498_v40, %v2481_v41 }
0x1057   :  { %3062 = vmatpush.msra.mxu0 %v8391_v31  ;;  %3082 = vmatpush.msra.mxu1 %v8324_v6 }
0x1058   :  { %2558 = vst.msk [vmem:[#allocation2 + $0x38] sm:$0xff] %vm345_vm2, %v2500_v7  ;;  %5757 = vmatmul.msk.f32.vlgmr.msrb.gmra.mxu2 %vm345_vm2, %v2500_v7  ;;  %5758 = vmatmul.msk.f32.vlgmr.msra.gmra.mxu3 %vm345_vm2, %v2500_v7  ;;  %v9864_v7 = vld [vmem:[#allocation30_spill] sm:$0xff] }
0x1059   :  { %3063 = vmatpush.msra.mxu0 %v8398_v11  ;;  %3083 = vmatpush.msra.mxu1 %v8330_v62  ;;  %v448_v56 = vadd.f32 %v9864_v7, %v7570_v42 }
0x105a   :  { %3009 = vmatpush.msrb.mxu2 %v8124_v37  ;;  %3029 = vmatpush.msra.mxu3 %v8192_v60 }
0x105c   :  { %3010 = vmatpush.msrb.mxu2 %v8131_v33  ;;  %3030 = vmatpush.msra.mxu3 %v8199_v30 }
0x105e   :  { %3011 = vmatpush.msrb.mxu2 %v8138_v36  ;;  %3031 = vmatpush.msra.mxu3 %v8206_v51 }
0x1060   :  { %3012 = vmatpush.msrb.mxu2 %v8145_v55  ;;  %3032 = vmatpush.msra.mxu3 %v8213_v57 }
0x1062   :  { %3013 = vmatpush.msrb.mxu2 %v8152_v23  ;;  %3033 = vmatpush.msra.mxu3 %v8220_v59 }
0x1064   :  { %3014 = vmatpush.msrb.mxu2 %v8159_v39  ;;  %3034 = vmatpush.msra.mxu3 %v8227_v29 }
0x1066   :  { %3015 = vmatpush.msrb.mxu2 %v8166_v48  ;;  %3035 = vmatpush.msra.mxu3 %v8234_v1 }
0x1068   :  { %3016 = vmatpush.msrb.mxu2 %v8173_v35  ;;  %3036 = vmatpush.msra.mxu3 %v8241_v50 }
0x10c7   :  { %v2655_v26 = vpop.f32.mrf.mxu1  ;;  %v2635_v3 = vpop.f32.mrf.mxu0 }
0x10c8   :  { %v8420_v63 = vadd.f32 %v2655_v26, %v750_v28  ;;  %v2658_v43 = vadd.f32 %v2635_v3, %v673_v27 }
0x10ca   :  { %6107 = vtanh.f32 %v8420_v63  ;;  %v5763_v45 = vmul.f32 -1.442695, %v2658_v43 }
0x10d0   :  { %v6108_v13 = vpop.eup %6107 }
0x10d1   :  { %2757 = vrot.lane.b32.xlu0 %v6108_v13, %s6771_s5 }
0x10db   :  { %v2608_v38 = vpop.f32.mrf.mxu3  ;;  %v2588_v40 = vpop.f32.mrf.mxu2 }
0x10dc   :  { %v8426_v10 = vadd.f32 %v2608_v38, %v525_v44  ;;  %v2611_v28 = vadd.f32 %v2588_v40, %v448_v56 }
0x10de   :  { %6109 = vtanh.f32 %v8426_v10  ;;  %v5761_v26 = vmul.f32 -1.442695, %v2611_v28 }
0x10df   :  { %6111 = vpow2.f32 %v5763_v45 }
0x10e4   :  { %v6110_v8 = vpop.eup %6109 }
0x10e5   :  { %2701 = vrot.lane.b32.xlu0 %v6110_v8, %s6771_s5  ;;  %v6112_v0 = vpop.eup %6111 }
0x10e6   :  { %v2722_v41 = vadd.f32 1.0, %v6112_v0 }
0x10e8   :  { %6113 = vrcp.f32 %v2722_v41  ;;  %v2735_v32 = vand.u32 2147483648, %v2722_v41  ;;  %vm2729_vm12 = vweird.f32 %v2722_v41  ;;  %v2733_v27 = vand.u32 2147483647, %v2722_v41 }
0x10e9   :  { %6115 = vpow2.f32 %v5761_v26 }
0x10ea   :  { %v2736_v0 = vor.u32 1.1754944e-38, %v2735_v32  ;;  %vm2734_vm14 = vcmp.eq.f32.partialorder %v2733_v27, 8.507059e+37 }
0x10ee   :  { %v6114_v13 = vpop.eup %6113 }
0x10ef   :  { %v2725_v14 = vmul.f32 %v6114_v13, %v2722_v41  ;;  %v6116_v44 = vpop.eup %6115  ;;  %vm2730_vm11 = vweird.f32 %v6114_v13 }
0x10f0   :  { %v2666_v8 = vadd.f32 1.0, %v6116_v44  ;;  %vm2731_vm13 = vmor %vm2729_vm12, %vm2730_vm11 }
0x10f1   :  { %v2726_v38 = vsub.f32 1.0, %v2725_v14 }
0x10f2   :  { %6117 = vrcp.f32 %v2666_v8  ;;  %vm2673_vm0 = vweird.f32 %v2666_v8 }
0x10f3   :  { %v2727_v34 = vmul.f32 %v6114_v13, %v2726_v38  ;;  %v2677_v38 = vand.u32 2147483647, %v2666_v8 }
0x10f5   :  { %v2728_v3 = vadd.f32 %v6114_v13, %v2727_v34  ;;  %v2679_v34 = vand.u32 2147483648, %v2666_v8  ;;  %vm2678_vm3 = vcmp.eq.f32.partialorder %v2677_v38, 8.507059e+37 }
0x10f7   :  { %v2732_v43 = vsel %vm2731_vm13, %v6114_v13, %v2728_v3  ;;  %v2680_v15 = vor.u32 1.1754944e-38, %v2679_v34 }
0x10f8   :  { %v6118_v45 = vpop.eup %6117  ;;  %v2737_v7 = vsel %vm2734_vm14, %v2736_v0, %v2732_v43 }
0x10f9   :  { %v2669_v28 = vmul.f32 %v6118_v45, %v2666_v8  ;;  %vm2674_vm15 = vweird.f32 %v6118_v45  ;;  %v2755_v27 = vmul.f32 %v2737_v7, %v8362_v9  ;;  %v5764_v9 = vmul.f32 -1.442695, %v8420_v63 }
0x10fa   :  { %vm2675_vm1 = vmor %vm2673_vm0, %vm2674_vm15 }
0x10fb   :  { %v2670_v26 = vsub.f32 1.0, %v2669_v28 }
0x10fd   :  { %v2671_v14 = vmul.f32 %v6118_v45, %v2670_v26  ;;  %v5762_v26 = vmul.f32 -1.442695, %v8426_v10 }
0x10ff   :  { %v2672_v44 = vadd.f32 %v6118_v45, %v2671_v14 }
0x1101   :  { %v2676_v41 = vsel %vm2675_vm1, %v6118_v45, %v2672_v44 }
0x1102   :  { %v2681_v3 = vsel %vm2678_vm3, %v2680_v15, %v2676_v41 }
0x1103   :  { %v2699_v8 = vmul.f32 %v2681_v3, %v8367_v17 }
0x1143   :  { %v2758_v40 = vpop.permute.xlu0 %2757 }
0x1144   :  { %v2760_v56 = vmul.f32 %v2758_v40, %v2737_v7 }
0x1146   :  { %2762 = vrot.lane.b32.xlu1 %v2760_v56, %s6771_s5 }
0x1157   :  { %v2702_v13 = vpop.permute.xlu0 %2701 }
0x1158   :  { %v2704_v32 = vmul.f32 %v2702_v13, %v2681_v3 }
0x115a   :  { %2706 = vrot.lane.b32.xlu1 %v2704_v32, %s6771_s5 }
0x11b8   :  { %v2763_v43 = vpop.permute.xlu1 %2762 }
0x11b9   :  { %v8437_v0 = vadd.f32 %v2763_v43, %v2755_v27 }
0x11bb   :  { %6119 = vtanh.f32 %v8437_v0 }
0x11c1   :  { %v6120_v40 = vpop.eup %6119 }
0x11c2   :  { %2768 = vrot.lane.b32.xlu2 %v6120_v40, %s6771_s5 }
0x11cc   :  { %v2707_v45 = vpop.permute.xlu1 %2706 }
0x11cd   :  { %v8442_v56 = vadd.f32 %v2707_v45, %v2699_v8 }
0x11cf   :  { %6121 = vtanh.f32 %v8442_v56 }
0x11d0   :  { %6123 = vpow2.f32 %v5764_v9 }
0x11d5   :  { %v6122_v15 = vpop.eup %6121 }
0x11d6   :  { %2712 = vrot.lane.b32.xlu2 %v6122_v15, %s6771_s5  ;;  %v6124_v7 = vpop.eup %6123 }
0x11d7   :  { %v2723_v28 = vadd.f32 1.0, %v6124_v7 }
0x11d9   :  { %6125 = vrcp.f32 %v2723_v28  ;;  %v2750_v3 = vand.u32 2147483648, %v2723_v28  ;;  %vm2744_vm5 = vweird.f32 %v2723_v28  ;;  %v2748_v32 = vand.u32 2147483647, %v2723_v28 }
0x11da   :  { %6127 = vpow2.f32 %v5762_v26 }
0x11db   :  { %v2751_v43 = vor.u32 1.1754944e-38, %v2750_v3  ;;  %vm2749_vm7 = vcmp.eq.f32.partialorder %v2748_v32, 8.507059e+37  ;;  %v9869_v3 = vld [vmem:[#allocation32_spill] sm:$0xff] }
0x11dc   :  { %v451_v32 = vadd.f32 %v9869_v3, %v7570_v42 }
0x11df   :  { %v6126_v14 = vpop.eup %6125 }
0x11e0   :  { %v2740_v44 = vmul.f32 %v6126_v14, %v2723_v28  ;;  %v6128_v17 = vpop.eup %6127  ;;  %vm2745_vm4 = vweird.f32 %v6126_v14 }
0x11e1   :  { %v2667_v38 = vadd.f32 1.0, %v6128_v17  ;;  %vm2746_vm6 = vmor %vm2744_vm5, %vm2745_vm4 }
0x11e2   :  { %v2741_v34 = vsub.f32 1.0, %v2740_v44 }
0x11e3   :  { %6129 = vrcp.f32 %v2667_v38  ;;  %v2694_v28 = vand.u32 2147483648, %v2667_v38  ;;  %vm2688_vm9 = vweird.f32 %v2667_v38  ;;  %v2692_v26 = vand.u32 2147483647, %v2667_v38 }
0x11e4   :  { %v2742_v41 = vmul.f32 %v6126_v14, %v2741_v34 }
0x11e5   :  { %v2695_v44 = vor.u32 1.1754944e-38, %v2694_v28  ;;  %vm2693_vm11 = vcmp.eq.f32.partialorder %v2692_v26, 8.507059e+37 }
0x11e6   :  { %v2743_v13 = vadd.f32 %v6126_v14, %v2742_v41 }
0x11e8   :  { %v2747_v63 = vsel %vm2746_vm6, %v6126_v14, %v2743_v13 }
0x11e9   :  { %v6130_v27 = vpop.eup %6129  ;;  %v2752_v40 = vsel %vm2749_vm7, %v2751_v43, %v2747_v63 }
0x11ea   :  { %v2684_v45 = vmul.f32 %v6130_v27, %v2667_v38  ;;  %vm2689_vm8 = vweird.f32 %v6130_v27 }
0x11eb   :  { %vm2690_vm10 = vmor %vm2688_vm9, %vm2689_vm8 }
0x11ec   :  { %v2685_v15 = vsub.f32 1.0, %v2684_v45 }
0x11ee   :  { %v2686_v9 = vmul.f32 %v6130_v27, %v2685_v15 }
0x11f0   :  { %v2687_v7 = vadd.f32 %v6130_v27, %v2686_v9 }
0x11f2   :  { %v2691_v14 = vsel %vm2690_vm10, %v6130_v27, %v2687_v7 }
0x11f3   :  { %v2696_v17 = vsel %vm2693_vm11, %v2695_v44, %v2691_v14 }
0x121c   :  { %v2769_v10 = vpop.permute.xlu2 %2768 }
0x121d   :  { %v8448_v8 = vmul.f32 %v2769_v10, %v2752_v40 }
0x121f   :  { %9865 = vst [vmem:[#allocation87_spill] sm:$0xff] %v8448_v8  ;;  %5767 = vmatmul.msk.f32.vlgmr.msrb.gmra.mxu0 %vm345_vm2, %v8448_v8  ;;  %5768 = vmatmul.msk.f32.vlgmr.msrb.gmra.mxu1 %vm345_vm2, %v8448_v8 }
0x1220   :  { %3269 = vmatpush.msrb.mxu0 %v8280_v22  ;;  %3289 = vmatpush.msrb.mxu1 %v8283_v20 }
0x1222   :  { %3270 = vmatpush.msrb.mxu0 %v8286_v24  ;;  %3290 = vmatpush.msrb.mxu1 %v8289_v25 }
0x1224   :  { %3271 = vmatpush.msrb.mxu0 %v8292_v52  ;;  %3291 = vmatpush.msrb.mxu1 %v8295_v47 }
0x1226   :  { %3272 = vmatpush.msrb.mxu0 %v8298_v18  ;;  %3292 = vmatpush.msrb.mxu1 %v8301_v21 }
0x1228   :  { %3273 = vmatpush.msrb.mxu0 %v8307_v53  ;;  %3293 = vmatpush.msrb.mxu1 %v8310_v61 }
0x122a   :  { %3274 = vmatpush.msrb.mxu0 %v8315_v16  ;;  %3294 = vmatpush.msrb.mxu1 %v8318_v2 }
0x122c   :  { %3275 = vmatpush.msrb.mxu0 %v8391_v31  ;;  %3295 = vmatpush.msrb.mxu1 %v8324_v6 }
0x122e   :  { %3276 = vmatpush.msrb.mxu0 %v8398_v11  ;;  %3296 = vmatpush.msrb.mxu1 %v8330_v62 }
0x1230   :  { %v2713_v34 = vpop.permute.xlu2 %2712 }
0x1231   :  { %v2715_v41 = vmul.f32 %v2713_v34, %v2696_v17 }
0x1233   :  { %2773 = vst.msk [vmem:[#allocation2 + $0x40] sm:$0xff] %vm345_vm2, %v2715_v41  ;;  %5765 = vmatmul.msk.f32.vlgmr.msra.gmra.mxu2 %vm345_vm2, %v2715_v41  ;;  %5766 = vmatmul.msk.f32.vlgmr.msrb.gmra.mxu3 %vm345_vm2, %v2715_v41 }
0x1234   :  { %3222 = vmatpush.msra.mxu2 %v8124_v37  ;;  %3242 = vmatpush.msrb.mxu3 %v8192_v60  ;;  %v9866_v37 = vld [vmem:[#allocation62_spill] sm:$0xff] }
0x1236   :  { %3223 = vmatpush.msra.mxu2 %v8131_v33  ;;  %3243 = vmatpush.msrb.mxu3 %v8199_v30  ;;  %v747_v33 = vadd.f32 %v9866_v37, %v7612_v46 }
0x1238   :  { %3224 = vmatpush.msra.mxu2 %v8138_v36  ;;  %3244 = vmatpush.msrb.mxu3 %v8206_v51 }
0x123a   :  { %3225 = vmatpush.msra.mxu2 %v8145_v55  ;;  %3245 = vmatpush.msrb.mxu3 %v8213_v57  ;;  %v9868_v57 = vld [vmem:[#allocation81_spill] sm:$0xff] }
0x123c   :  { %3226 = vmatpush.msra.mxu2 %v8152_v23  ;;  %3246 = vmatpush.msrb.mxu3 %v8220_v59  ;;  %v670_v59 = vadd.f32 %v9868_v57, %v7642_v4 }
0x123e   :  { %3227 = vmatpush.msra.mxu2 %v8159_v39  ;;  %3247 = vmatpush.msrb.mxu3 %v8227_v29  ;;  %v9867_v39 = vld [vmem:[#allocation63_spill] sm:$0xff] }
0x1240   :  { %3228 = vmatpush.msra.mxu2 %v8166_v48  ;;  %3248 = vmatpush.msrb.mxu3 %v8234_v1  ;;  %v528_v48 = vadd.f32 %v9867_v39, %v7454_v12 }
0x1242   :  { %3229 = vmatpush.msra.mxu2 %v8173_v35  ;;  %3249 = vmatpush.msrb.mxu3 %v8241_v50 }
0x129c   :  { %v2870_v36 = vpop.f32.mrf.mxu1  ;;  %v2850_v51 = vpop.f32.mrf.mxu0 }
0x129d   :  { %v8491_v55 = vadd.f32 %v2870_v36, %v747_v33  ;;  %v2873_v29 = vadd.f32 %v2850_v51, %v670_v59 }
0x129f   :  { %6131 = vtanh.f32 %v8491_v55  ;;  %v5771_v1 = vmul.f32 -1.442695, %v2873_v29 }
0x12a5   :  { %v6132_v23 = vpop.eup %6131 }
0x12a6   :  { %2972 = vrot.lane.b32.xlu0 %v6132_v23, %s6771_s5 }
0x12b6   :  { %v2823_v60 = vpop.f32.mrf.mxu3  ;;  %v2803_v13 = vpop.f32.mrf.mxu2 }
0x12b7   :  { %v8497_v30 = vadd.f32 %v2823_v60, %v528_v48  ;;  %v2826_v63 = vadd.f32 %v2803_v13, %v451_v32 }
0x12b9   :  { %6133 = vtanh.f32 %v8497_v30  ;;  %v5769_v43 = vmul.f32 -1.442695, %v2826_v63 }
0x12ba   :  { %6135 = vpow2.f32 %v5771_v1 }
0x12bf   :  { %v6134_v35 = vpop.eup %6133 }
0x12c0   :  { %2916 = vrot.lane.b32.xlu0 %v6134_v35, %s6771_s5  ;;  %v6136_v50 = vpop.eup %6135 }
0x12c1   :  { %v2937_v38 = vadd.f32 1.0, %v6136_v50 }
0x12c3   :  { %6137 = vrcp.f32 %v2937_v38  ;;  %v2950_v28 = vand.u32 2147483648, %v2937_v38  ;;  %vm2944_vm13 = vweird.f32 %v2937_v38  ;;  %v2948_v26 = vand.u32 2147483647, %v2937_v38 }
0x12c4   :  { %6139 = vpow2.f32 %v5769_v43 }
0x12c5   :  { %v2951_v44 = vor.u32 1.1754944e-38, %v2950_v28  ;;  %vm2949_vm15 = vcmp.eq.f32.partialorder %v2948_v26, 8.507059e+37 }
0x12c9   :  { %v6138_v27 = vpop.eup %6137 }
0x12ca   :  { %v2940_v40 = vmul.f32 %v6138_v27, %v2937_v38  ;;  %v6140_v15 = vpop.eup %6139  ;;  %vm2945_vm12 = vweird.f32 %v6138_v27 }
0x12cb   :  { %v2881_v7 = vadd.f32 1.0, %v6140_v15  ;;  %vm2946_vm14 = vmor %vm2944_vm13, %vm2945_vm12 }
0x12cc   :  { %v2941_v10 = vsub.f32 1.0, %v2940_v40 }
0x12cd   :  { %6141 = vrcp.f32 %v2881_v7  ;;  %v2894_v48 = vand.u32 2147483648, %v2881_v7  ;;  %vm2888_vm1 = vweird.f32 %v2881_v7  ;;  %v2892_v60 = vand.u32 2147483647, %v2881_v7 }
0x12ce   :  { %v2942_v45 = vmul.f32 %v6138_v27, %v2941_v10 }
0x12cf   :  { %v2895_v51 = vor.u32 1.1754944e-38, %v2894_v48  ;;  %vm2893_vm4 = vcmp.eq.f32.partialorder %v2892_v60, 8.507059e+37  ;;  %v8589_v48 = vld [vmem:[%s9740_s4 + $0x48] sm:$0xff]  ;;  %v8595_v60 = vld [vmem:[%s9740_s4 + $0x30] sm:$0xff] }
0x12d0   :  { %v2943_v9 = vadd.f32 %v6138_v27, %v2942_v45  ;;  %v5770_v45 = vmul.f32 -1.442695, %v8497_v30 }
0x12d2   :  { %v2947_v14 = vsel %vm2946_vm14, %v6138_v27, %v2943_v9 }
0x12d3   :  { %v2952_v34 = vsel %vm2949_vm15, %v2951_v44, %v2947_v14  ;;  %v6142_v37 = vpop.eup %6141 }
0x12d4   :  { %v2884_v33 = vmul.f32 %v6142_v37, %v2881_v7  ;;  %vm2889_vm0 = vweird.f32 %v6142_v37  ;;  %v2970_v1 = vmul.f32 %v2952_v34, %v8437_v0  ;;  %v5772_v0 = vmul.f32 -1.442695, %v8491_v55 }
0x12d5   :  { %vm2890_vm3 = vmor %vm2888_vm1, %vm2889_vm0 }
0x12d6   :  { %v2885_v36 = vsub.f32 1.0, %v2884_v33 }
0x12d8   :  { %v2886_v23 = vmul.f32 %v6142_v37, %v2885_v36 }
0x12da   :  { %v2887_v39 = vadd.f32 %v6142_v37, %v2886_v23  ;;  %v8577_v23 = vld [vmem:[%s9740_s4 + $0x58] sm:$0xff] }
0x12dc   :  { %v2891_v35 = vsel %vm2890_vm3, %v6142_v37, %v2887_v39  ;;  %v8583_v39 = vld [vmem:[%s9740_s4 + $0x40] sm:$0xff] }
0x12dd   :  { %v2896_v59 = vsel %vm2893_vm4, %v2895_v51, %v2891_v35  ;;  %v8601_v35 = vld [vmem:[%s9740_s4 + $0x38] sm:$0xff]  ;;  %v8607_v51 = vld [vmem:[%s9740_s4 + $0x20] sm:$0xff] }
0x12de   :  { %v2914_v3 = vmul.f32 %v2896_v59, %v8442_v56 }
0x1318   :  { %v2973_v17 = vpop.permute.xlu0 %2972 }
0x1319   :  { %v2975_v41 = vmul.f32 %v2973_v17, %v2952_v34 }
0x131b   :  { %2977 = vrot.lane.b32.xlu1 %v2975_v41, %s6771_s5 }
0x1332   :  { %v2917_v57 = vpop.permute.xlu0 %2916 }
0x1333   :  { %v2919_v29 = vmul.f32 %v2917_v57, %v2896_v59  ;;  %v8613_v57 = vld [vmem:[%s9740_s4 + $0x28] sm:$0xff]  ;;  %v8619_v59 = vld [vmem:[%s9740_s4 + $0x10] sm:$0xff] }
0x1335   :  { %2921 = vrot.lane.b32.xlu1 %v2919_v29, %s6771_s5  ;;  %v8625_v29 = vld [vmem:[%s9740_s4 + $0x18] sm:$0xff] }
0x138d   :  { %v2978_v50 = vpop.permute.xlu1 %2977 }
0x138e   :  { %v8508_v38 = vadd.f32 %v2978_v50, %v2970_v1  ;;  %v8631_v1 = vld [vmem:[%s9740_s4] sm:$0xff]  ;;  %v8637_v50 = vld [vmem:[%s9740_s4 + $0x8] sm:$0xff] }
0x1390   :  { %6143 = vtanh.f32 %v8508_v38 }
0x1396   :  { %v6144_v13 = vpop.eup %6143 }
0x1397   :  { %2983 = vrot.lane.b32.xlu2 %v6144_v13, %s6771_s5  ;;  %v9871_v13 = vld [vmem:[#allocation59_spill] sm:$0xff] }
0x13a7   :  { %v2922_v32 = vpop.permute.xlu1 %2921 }
0x13a8   :  { %v8513_v63 = vadd.f32 %v2922_v32, %v2914_v3  ;;  %v744_v3 = vadd.f32 %v9871_v13, %v7612_v46 }
0x13aa   :  { %6145 = vtanh.f32 %v8513_v63 }
0x13ab   :  { %6147 = vpow2.f32 %v5772_v0 }
0x13b0   :  { %v6146_v27 = vpop.eup %6145 }
0x13b1   :  { %2927 = vrot.lane.b32.xlu2 %v6146_v27, %s6771_s5  ;;  %v6148_v43 = vpop.eup %6147 }
0x13b2   :  { %v2938_v40 = vadd.f32 1.0, %v6148_v43  ;;  %v9872_v43 = vld [vmem:[#allocation66_spill] sm:$0xff] }
0x13b4   :  { %6149 = vrcp.f32 %v2938_v40  ;;  %v2965_v14 = vand.u32 2147483648, %v2938_v40  ;;  %vm2959_vm6 = vweird.f32 %v2938_v40  ;;  %v2963_v44 = vand.u32 2147483647, %v2938_v40 }
0x13b5   :  { %6151 = vpow2.f32 %v5770_v45 }
0x13b6   :  { %v2966_v17 = vor.u32 1.1754944e-38, %v2965_v14  ;;  %vm2964_vm8 = vcmp.eq.f32.partialorder %v2963_v44, 8.507059e+37 }
0x13ba   :  { %v6150_v10 = vpop.eup %6149 }
0x13bb   :  { %v2955_v15 = vmul.f32 %v6150_v10, %v2938_v40  ;;  %v6152_v7 = vpop.eup %6151  ;;  %vm2960_vm5 = vweird.f32 %v6150_v10  ;;  %v531_v40 = vadd.f32 %v9872_v43, %v7454_v12 }
0x13bc   :  { %v2882_v26 = vadd.f32 1.0, %v6152_v7  ;;  %vm2961_vm7 = vmor %vm2959_vm6, %vm2960_vm5 }
0x13bd   :  { %v2956_v56 = vsub.f32 1.0, %v2955_v15 }
0x13be   :  { %6153 = vrcp.f32 %v2882_v26  ;;  %vm2903_vm10 = vweird.f32 %v2882_v26 }
0x13bf   :  { %v2957_v9 = vmul.f32 %v6150_v10, %v2956_v56 }
0x13c1   :  { %v2958_v28 = vadd.f32 %v6150_v10, %v2957_v9  ;;  %v9873_v9 = vld [vmem:[#allocation80_spill] sm:$0xff] }
0x13c2   :  { %v667_v7 = vadd.f32 %v9873_v9, %v7642_v4 }
0x13c3   :  { %v2962_v55 = vsel %vm2961_vm7, %v6150_v10, %v2958_v28 }
0x13c4   :  { %v2967_v34 = vsel %vm2964_vm8, %v2966_v17, %v2962_v55  ;;  %v6154_v30 = vpop.eup %6153 }
0x13c5   :  { %v2899_v33 = vmul.f32 %v6154_v30, %v2882_v26  ;;  %vm2904_vm9 = vweird.f32 %v6154_v30 }
0x13c6   :  { %vm2905_vm11 = vmor %vm2903_vm10, %vm2904_vm9 }
0x13c7   :  { %v2900_v36 = vsub.f32 1.0, %v2899_v33 }
0x13f1   :  { %v2984_v41 = vpop.permute.xlu2 %2983 }
0x13f2   :  { %v8519_v37 = vmul.f32 %v2984_v41, %v2967_v34  ;;  %v9874_v34 = vld [vmem:[#allocation34_spill] sm:$0xff] }
0x13f3   :  { %v454_v41 = vadd.f32 %v9874_v34, %v7570_v42 }
0x13f4   :  { %9870 = vst [vmem:[#allocation23_spill] sm:$0xff] %v8519_v37  ;;  %5775 = vmatmul.msk.f32.vlgmr.msra.gmra.mxu0 %vm345_vm2, %v8519_v37  ;;  %5776 = vmatmul.msk.f32.vlgmr.msra.gmra.mxu1 %vm345_vm2, %v8519_v37 }
0x13f5   :  { %3482 = vmatpush.msra.mxu0 %v8280_v22  ;;  %3502 = vmatpush.msra.mxu1 %v8283_v20  ;;  %v2901_v22 = vmul.f32 %v6154_v30, %v2900_v36 }
0x13f7   :  { %3483 = vmatpush.msra.mxu0 %v8286_v24  ;;  %3503 = vmatpush.msra.mxu1 %v8289_v25  ;;  %v2902_v20 = vadd.f32 %v6154_v30, %v2901_v22  ;;  %v2909_v24 = vand.u32 2147483648, %v2882_v26  ;;  %v2907_v25 = vand.u32 2147483647, %v2882_v26 }
0x13f9   :  { %3484 = vmatpush.msra.mxu0 %v8292_v52  ;;  %3504 = vmatpush.msra.mxu1 %v8295_v47  ;;  %v2906_v52 = vsel %vm2905_vm11, %v6154_v30, %v2902_v20  ;;  %v2910_v47 = vor.u32 1.1754944e-38, %v2909_v24  ;;  %vm2908_vm12 = vcmp.eq.f32.partialorder %v2907_v25, 8.507059e+37 }
0x13fb   :  { %3485 = vmatpush.msra.mxu0 %v8298_v18  ;;  %3505 = vmatpush.msra.mxu1 %v8301_v21  ;;  %v2911_v18 = vsel %vm2908_vm12, %v2910_v47, %v2906_v52 }
0x13fd   :  { %3486 = vmatpush.msra.mxu0 %v8307_v53  ;;  %3506 = vmatpush.msra.mxu1 %v8310_v61  ;;  %v8547_v61 = vld [vmem:[%s9740_s4 + $0x70] sm:$0xff] }
0x13ff   :  { %3487 = vmatpush.msra.mxu0 %v8315_v16  ;;  %3507 = vmatpush.msra.mxu1 %v8318_v2  ;;  %v8553_v16 = vld [vmem:[%s9740_s4 + $0x78] sm:$0xff]  ;;  %v8559_v2 = vld [vmem:[%s9740_s4 + $0x60] sm:$0xff] }
0x1401   :  { %3488 = vmatpush.msra.mxu0 %v8391_v31  ;;  %3508 = vmatpush.msra.mxu1 %v8324_v6  ;;  %v8565_v6 = vld [vmem:[%s9740_s4 + $0x68] sm:$0xff] }
0x1403   :  { %3489 = vmatpush.msra.mxu0 %v8398_v11  ;;  %3509 = vmatpush.msra.mxu1 %v8330_v62  ;;  %v8571_v62 = vld [vmem:[%s9740_s4 + $0x50] sm:$0xff] }
0x140b   :  { %v2928_v21 = vpop.permute.xlu2 %2927 }
0x140c   :  { %v2930_v53 = vmul.f32 %v2928_v21, %v2911_v18 }
0x140e   :  { %2988 = vst.msk [vmem:[#allocation2 + $0x48] sm:$0xff] %vm345_vm2, %v2930_v53  ;;  %5773 = vmatmul.msk.f32.vlgmr.msrb.gmra.mxu2 %vm345_vm2, %v2930_v53  ;;  %5774 = vmatmul.msk.f32.vlgmr.msra.gmra.mxu3 %vm345_vm2, %v2930_v53 }
0x140f   :  { %3435 = vmatpush.msrb.mxu2 %v8547_v61  ;;  %3455 = vmatpush.msra.mxu3 %v8553_v16 }
0x1411   :  { %3436 = vmatpush.msrb.mxu2 %v8559_v2  ;;  %3456 = vmatpush.msra.mxu3 %v8565_v6 }
0x1413   :  { %3437 = vmatpush.msrb.mxu2 %v8571_v62  ;;  %3457 = vmatpush.msra.mxu3 %v8577_v23 }
0x1415   :  { %3438 = vmatpush.msrb.mxu2 %v8583_v39  ;;  %3458 = vmatpush.msra.mxu3 %v8589_v48 }
0x1417   :  { %3439 = vmatpush.msrb.mxu2 %v8595_v60  ;;  %3459 = vmatpush.msra.mxu3 %v8601_v35 }
0x1419   :  { %3440 = vmatpush.msrb.mxu2 %v8607_v51  ;;  %3460 = vmatpush.msra.mxu3 %v8613_v57 }
0x141b   :  { %3441 = vmatpush.msrb.mxu2 %v8619_v59  ;;  %3461 = vmatpush.msra.mxu3 %v8625_v29 }
0x141d   :  { %3442 = vmatpush.msrb.mxu2 %v8631_v1  ;;  %3462 = vmatpush.msra.mxu3 %v8637_v50 }
0x1471   :  { %v3085_v32 = vpop.f32.mrf.mxu1  ;;  %v3065_v56 = vpop.f32.mrf.mxu0 }
0x1472   :  { %v8642_v27 = vadd.f32 %v3085_v32, %v744_v3  ;;  %v3088_v28 = vadd.f32 %v3065_v56, %v667_v7 }
0x1474   :  { %6155 = vtanh.f32 %v8642_v27  ;;  %v5779_v26 = vmul.f32 -1.442695, %v3088_v28 }
0x147a   :  { %v6156_v0 = vpop.eup %6155 }
0x147b   :  { %3187 = vrot.lane.b32.xlu0 %v6156_v0, %s6771_s5 }
0x1491   :  { %v3038_v10 = vpop.f32.mrf.mxu3  ;;  %v3018_v17 = vpop.f32.mrf.mxu2 }
0x1492   :  { %v8648_v45 = vadd.f32 %v3038_v10, %v531_v40  ;;  %v3041_v33 = vadd.f32 %v3018_v17, %v454_v41 }
0x1494   :  { %6157 = vtanh.f32 %v8648_v45  ;;  %v5777_v22 = vmul.f32 -1.442695, %v3041_v33 }
0x1495   :  { %6159 = vpow2.f32 %v5779_v26 }
0x149a   :  { %v6158_v15 = vpop.eup %6157 }
0x149b   :  { %3131 = vrot.lane.b32.xlu0 %v6158_v15, %s6771_s5  ;;  %v6160_v14 = vpop.eup %6159 }
0x149c   :  { %v3152_v44 = vadd.f32 1.0, %v6160_v14 }
0x149e   :  { %6161 = vrcp.f32 %v3152_v44  ;;  %v3165_v25 = vand.u32 2147483648, %v3152_v44  ;;  %vm3159_vm14 = vweird.f32 %v3152_v44  ;;  %v3163_v52 = vand.u32 2147483647, %v3152_v44 }
0x149f   :  { %6163 = vpow2.f32 %v5777_v22 }
0x14a0   :  { %v3166_v21 = vor.u32 1.1754944e-38, %v3165_v25  ;;  %vm3164_vm0 = vcmp.eq.f32.partialorder %v3163_v52, 8.507059e+37 }
0x14a4   :  { %v6162_v55 = vpop.eup %6161 }
0x14a5   :  { %v3155_v30 = vmul.f32 %v6162_v55, %v3152_v44  ;;  %vm3160_vm13 = vweird.f32 %v6162_v55  ;;  %v6164_v47 = vpop.eup %6163 }
0x14a6   :  { %vm3161_vm15 = vmor %vm3159_vm14, %vm3160_vm13  ;;  %v3096_v53 = vadd.f32 1.0, %v6164_v47 }
0x14a7   :  { %v3156_v36 = vsub.f32 1.0, %v3155_v30 }
0x14a8   :  { %6165 = vrcp.f32 %v3096_v53  ;;  %v3109_v56 = vand.u32 2147483648, %v3096_v53  ;;  %vm3103_vm3 = vweird.f32 %v3096_v53  ;;  %v3107_v9 = vand.u32 2147483647, %v3096_v53 }
0x14a9   :  { %v3157_v20 = vmul.f32 %v6162_v55, %v3156_v36 }
0x14aa   :  { %v3110_v28 = vor.u32 1.1754944e-38, %v3109_v56  ;;  %vm3108_vm5 = vcmp.eq.f32.partialorder %v3107_v9, 8.507059e+37  ;;  %v8682_v56 = vld [vmem:[#allocation10 + $0x60] sm:$0xff]  ;;  %v8685_v9 = vld [vmem:[#allocation10 + $0x68] sm:$0xff] }
0x14ab   :  { %v3158_v24 = vadd.f32 %v6162_v55, %v3157_v20 }
0x14ad   :  { %v3162_v18 = vsel %vm3161_vm15, %v6162_v55, %v3158_v24 }
0x14ae   :  { %v3167_v3 = vsel %vm3164_vm0, %v3166_v21, %v3162_v18  ;;  %v6166_v0 = vpop.eup %6165  ;;  %v5778_v18 = vmul.f32 -1.442695, %v8648_v45  ;;  %v8676_v45 = vld [vmem:[#allocation10 + $0x70] sm:$0xff] }
0x14af   :  { %v3099_v43 = vmul.f32 %v6166_v0, %v3096_v53  ;;  %vm3104_vm1 = vweird.f32 %v6166_v0  ;;  %v3185_v55 = vmul.f32 %v3167_v3, %v8508_v38  ;;  %v5780_v38 = vmul.f32 -1.442695, %v8642_v27 }
0x14b0   :  { %vm3105_vm4 = vmor %vm3103_vm3, %vm3104_vm1 }
0x14b1   :  { %v3100_v40 = vsub.f32 1.0, %v3099_v43 }
0x14b3   :  { %v3101_v10 = vmul.f32 %v6166_v0, %v3100_v40 }
0x14b5   :  { %v3102_v15 = vadd.f32 %v6166_v0, %v3101_v10 }
0x14b7   :  { %v3106_v7 = vsel %vm3105_vm4, %v6166_v0, %v3102_v15  ;;  %v8679_v15 = vld [vmem:[#allocation10 + $0x78] sm:$0xff] }
0x14b8   :  { %v3111_v14 = vsel %vm3108_vm5, %v3110_v28, %v3106_v7  ;;  %v8688_v7 = vld [vmem:[#allocation10 + $0x50] sm:$0xff]  ;;  %v8691_v28 = vld [vmem:[#allocation10 + $0x58] sm:$0xff] }
0x14b9   :  { %v3129_v30 = vmul.f32 %v3111_v14, %v8513_v63 }
0x14ed   :  { %v3188_v13 = vpop.permute.xlu0 %3187 }
0x14ee   :  { %v3190_v32 = vmul.f32 %v3188_v13, %v3167_v3 }
0x14f0   :  { %3192 = vrot.lane.b32.xlu1 %v3190_v32, %s6771_s5 }
0x150d   :  { %v3132_v26 = vpop.permute.xlu0 %3131 }
0x150e   :  { %v3134_v44 = vmul.f32 %v3132_v26, %v3111_v14  ;;  %v8694_v14 = vld [vmem:[#allocation10 + $0x40] sm:$0xff] }
0x1510   :  { %3136 = vrot.lane.b32.xlu1 %v3134_v44, %s6771_s5  ;;  %v8697_v44 = vld [vmem:[#allocation10 + $0x48] sm:$0xff] }
0x1562   :  { %v3193_v17 = vpop.permute.xlu1 %3192 }
0x1563   :  { %v8659_v34 = vadd.f32 %v3193_v17, %v3185_v55  ;;  %v8700_v55 = vld [vmem:[#allocation10 + $0x30] sm:$0xff]  ;;  %v8703_v17 = vld [vmem:[#allocation10 + $0x38] sm:$0xff] }
0x1565   :  { %6167 = vtanh.f32 %v8659_v34 }
0x156b   :  { %v6168_v41 = vpop.eup %6167 }
0x156c   :  { %3198 = vrot.lane.b32.xlu2 %v6168_v41, %s6771_s5 }
0x1582   :  { %v3137_v33 = vpop.permute.xlu1 %3136 }
0x1583   :  { %v8664_v36 = vadd.f32 %v3137_v33, %v3129_v30  ;;  %v8706_v30 = vld [vmem:[#allocation10 + $0x20] sm:$0xff]  ;;  %v8709_v33 = vld [vmem:[#allocation10 + $0x28] sm:$0xff] }
0x1585   :  { %6169 = vtanh.f32 %v8664_v36 }
0x1586   :  { %6171 = vpow2.f32 %v5780_v38 }
0x158b   :  { %v6170_v22 = vpop.eup %6169 }
0x158c   :  { %3142 = vrot.lane.b32.xlu2 %v6170_v22, %s6771_s5  ;;  %v6172_v20 = vpop.eup %6171  ;;  %v8713_v22 = vld [vmem:[#allocation10 + $0x18] sm:$0xff] }
0x158d   :  { %v3153_v24 = vadd.f32 1.0, %v6172_v20  ;;  %v8717_v20 = vld [vmem:[#allocation10 + $0x8] sm:$0xff] }
0x158f   :  { %6173 = vrcp.f32 %v3153_v24  ;;  %v3180_v53 = vand.u32 2147483648, %v3153_v24  ;;  %vm3174_vm7 = vweird.f32 %v3153_v24  ;;  %v3178_v13 = vand.u32 2147483647, %v3153_v24 }
0x1590   :  { %6175 = vpow2.f32 %v5778_v18 }
0x1591   :  { %v3181_v27 = vor.u32 1.1754944e-38, %v3180_v53  ;;  %vm3179_vm9 = vcmp.eq.f32.partialorder %v3178_v13, 8.507059e+37 }
0x1595   :  { %v6174_v25 = vpop.eup %6173 }
0x1596   :  { %v3170_v52 = vmul.f32 %v6174_v25, %v3153_v24  ;;  %vm3175_vm6 = vweird.f32 %v6174_v25  ;;  %v6176_v3 = vpop.eup %6175 }
0x1597   :  { %vm3176_vm8 = vmor %vm3174_vm7, %vm3175_vm6  ;;  %v3097_v0 = vadd.f32 1.0, %v6176_v3 }
0x1598   :  { %v3171_v47 = vsub.f32 1.0, %v3170_v52 }
0x1599   :  { %6177 = vrcp.f32 %v3097_v0  ;;  %v3124_v52 = vand.u32 2147483648, %v3097_v0  ;;  %vm3118_vm11 = vweird.f32 %v3097_v0 }
0x159a   :  { %v3172_v63 = vmul.f32 %v6174_v25, %v3171_v47  ;;  %v3122_v47 = vand.u32 2147483647, %v3097_v0 }
0x159c   :  { %v3173_v21 = vadd.f32 %v6174_v25, %v3172_v63  ;;  %vm3123_vm13 = vcmp.eq.f32.partialorder %v3122_v47, 8.507059e+37 }
0x159e   :  { %v3177_v32 = vsel %vm3176_vm8, %v6174_v25, %v3173_v21 }
0x159f   :  { %v3182_v43 = vsel %vm3179_vm9, %v3181_v27, %v3177_v32  ;;  %v6178_v26 = vpop.eup %6177 }
0x15a0   :  { %v3114_v41 = vmul.f32 %v6178_v26, %v3097_v0  ;;  %vm3119_vm10 = vweird.f32 %v6178_v26  ;;  %v9877_v0 = vld [vmem:[#allocation37_spill] sm:$0xff] }
0x15a1   :  { %vm3120_vm12 = vmor %vm3118_vm11, %vm3119_vm10 }
0x15a2   :  { %v3115_v38 = vsub.f32 1.0, %v3114_v41 }
0x15a4   :  { %v3116_v24 = vmul.f32 %v6178_v26, %v3115_v38 }
0x15a6   :  { %v3117_v25 = vadd.f32 %v6178_v26, %v3116_v24  ;;  %v9878_v24 = vld [vmem:[#allocation79_spill] sm:$0xff] }
0x15a8   :  { %v3121_v18 = vsel %vm3120_vm12, %v6178_v26, %v3117_v25  ;;  %v664_v25 = vadd.f32 %v9878_v24, %v7642_v4 }
0x15c6   :  { %v3199_v40 = vpop.permute.xlu2 %3198 }
0x15c7   :  { %v8670_v10 = vmul.f32 %v3199_v40, %v3182_v43  ;;  %v534_v43 = vadd.f32 %v9877_v0, %v7454_v12 }
0x15c9   :  { %5783 = vmatmul.msk.f32.vlgmr.msrb.gmra.mxu0 %vm345_vm2, %v8670_v10  ;;  %5784 = vmatmul.msk.f32.vlgmr.msrb.gmra.mxu1 %vm345_vm2, %v8670_v10 }
0x15ca   :  { %3695 = vmatpush.msrb.mxu0 %v8676_v45  ;;  %3715 = vmatpush.msrb.mxu1 %v8679_v15 }
0x15cc   :  { %3696 = vmatpush.msrb.mxu0 %v8682_v56  ;;  %3716 = vmatpush.msrb.mxu1 %v8685_v9 }
0x15ce   :  { %3697 = vmatpush.msrb.mxu0 %v8688_v7  ;;  %3717 = vmatpush.msrb.mxu1 %v8691_v28 }
0x15d0   :  { %3698 = vmatpush.msrb.mxu0 %v8694_v14  ;;  %3718 = vmatpush.msrb.mxu1 %v8697_v44 }
0x15d2   :  { %3699 = vmatpush.msrb.mxu0 %v8700_v55  ;;  %3719 = vmatpush.msrb.mxu1 %v8703_v17 }
0x15d4   :  { %3700 = vmatpush.msrb.mxu0 %v8706_v30  ;;  %3720 = vmatpush.msrb.mxu1 %v8709_v33 }
0x15d6   :  { %3701 = vmatpush.msrb.mxu0 %v8391_v31  ;;  %3721 = vmatpush.msrb.mxu1 %v8713_v22  ;;  %v3125_v31 = vor.u32 1.1754944e-38, %v3124_v52 }
0x15d8   :  { %3702 = vmatpush.msrb.mxu0 %v8398_v11  ;;  %3722 = vmatpush.msrb.mxu1 %v8717_v20  ;;  %v3126_v63 = vsel %vm3123_vm13, %v3125_v31, %v3121_v18  ;;  %v9876_v11 = vld [vmem:[#allocation56_spill] sm:$0xff] }
0x15d9   :  { %v741_v13 = vadd.f32 %v9876_v11, %v7612_v46 }
0x15e6   :  { %v3143_v21 = vpop.permute.xlu2 %3142 }
0x15e7   :  { %v8720_v53 = vmul.f32 %v3143_v21, %v3126_v63 }
0x15e9   :  { %9875 = vst [vmem:[#allocation22_spill] sm:$0xff] %v8720_v53  ;;  %5781 = vmatmul.msk.f32.vlgmr.msra.gmra.mxu2 %vm345_vm2, %v8720_v53  ;;  %5782 = vmatmul.msk.f32.vlgmr.msrb.gmra.mxu3 %vm345_vm2, %v8720_v53 }
0x15ea   :  { %3648 = vmatpush.msra.mxu2 %v8547_v61  ;;  %3668 = vmatpush.msrb.mxu3 %v8553_v16 }
0x15ec   :  { %3649 = vmatpush.msra.mxu2 %v8559_v2  ;;  %3669 = vmatpush.msrb.mxu3 %v8565_v6 }
0x15ee   :  { %3650 = vmatpush.msra.mxu2 %v8571_v62  ;;  %3670 = vmatpush.msrb.mxu3 %v8577_v23 }
0x15f0   :  { %3651 = vmatpush.msra.mxu2 %v8583_v39  ;;  %3671 = vmatpush.msrb.mxu3 %v8589_v48 }
0x15f2   :  { %3652 = vmatpush.msra.mxu2 %v8595_v60  ;;  %3672 = vmatpush.msrb.mxu3 %v8601_v35 }
0x15f4   :  { %3653 = vmatpush.msra.mxu2 %v8607_v51  ;;  %3673 = vmatpush.msrb.mxu3 %v8613_v57 }
0x15f6   :  { %3654 = vmatpush.msra.mxu2 %v8619_v59  ;;  %3674 = vmatpush.msrb.mxu3 %v8625_v29 }
0x15f8   :  { %3655 = vmatpush.msra.mxu2 %v8631_v1  ;;  %3675 = vmatpush.msrb.mxu3 %v8637_v50 }
0x1646   :  { %v3298_v3 = vpop.f32.mrf.mxu1  ;;  %v3278_v38 = vpop.f32.mrf.mxu0 }
0x1647   :  { %v8744_v32 = vadd.f32 %v3298_v3, %v741_v13  ;;  %v3301_v52 = vadd.f32 %v3278_v38, %v664_v25  ;;  %v9879_v3 = vld [vmem:[#allocation36_spill] sm:$0xff] }
0x1649   :  { %6179 = vtanh.f32 %v8744_v32  ;;  %v5787_v47 = vmul.f32 -1.442695, %v3301_v52 }
0x164f   :  { %v6180_v27 = vpop.eup %6179 }
0x1650   :  { %3400 = vrot.lane.b32.xlu0 %v6180_v27, %s6771_s5  ;;  %v457_v27 = vadd.f32 %v9879_v3, %v7570_v42 }
0x166c   :  { %v3251_v40 = vpop.f32.mrf.mxu3  ;;  %v3231_v13 = vpop.f32.mrf.mxu2 }
0x166d   :  { %v8750_v26 = vadd.f32 %v3251_v40, %v534_v43  ;;  %v3254_v0 = vadd.f32 %v3231_v13, %v457_v27 }
0x166f   :  { %6181 = vtanh.f32 %v8750_v26  ;;  %v5785_v40 = vmul.f32 -1.442695, %v3254_v0 }
0x1670   :  { %6183 = vpow2.f32 %v5787_v47 }
0x1675   :  { %v6182_v41 = vpop.eup %6181 }
0x1676   :  { %3344 = vrot.lane.b32.xlu0 %v6182_v41, %s6771_s5  ;;  %v6184_v18 = vpop.eup %6183 }
0x1677   :  { %v3365_v31 = vadd.f32 1.0, %v6184_v18 }
0x1679   :  { %6185 = vrcp.f32 %v3365_v31  ;;  %v3378_v5 = vand.u32 2147483648, %v3365_v31  ;;  %vm3372_vm15 = vweird.f32 %v3365_v31  ;;  %v3376_v38 = vand.u32 2147483647, %v3365_v31 }
0x167a   :  { %6187 = vpow2.f32 %v5785_v40 }
0x167b   :  { %v3379_v25 = vor.u32 1.1754944e-38, %v3378_v5  ;;  %vm3377_vm1 = vcmp.eq.f32.partialorder %v3376_v38, 8.507059e+37 }
0x167f   :  { %v6186_v63 = vpop.eup %6185 }
0x1680   :  { %v3368_v21 = vmul.f32 %v6186_v63, %v3365_v31  ;;  %vm3373_vm14 = vweird.f32 %v6186_v63 }
0x1681   :  { %vm3374_vm0 = vmor %vm3372_vm15, %vm3373_vm14 }
0x1682   :  { %v3369_v11 = vsub.f32 1.0, %v3368_v21  ;;  %v6188_v21 = vpop.eup %6187 }
0x1683   :  { %v3309_v3 = vadd.f32 1.0, %v6188_v21 }
0x1684   :  { %v3370_v43 = vmul.f32 %v6186_v63, %v3369_v11 }
0x1685   :  { %6189 = vrcp.f32 %v3309_v3  ;;  %v3322_v31 = vand.u32 2147483648, %v3309_v3  ;;  %vm3316_vm4 = vweird.f32 %v3309_v3  ;;  %v3320_v40 = vand.u32 2147483647, %v3309_v3 }
0x1686   :  { %v3371_v41 = vadd.f32 %v6186_v63, %v3370_v43 }
0x1687   :  { %vm3321_vm6 = vcmp.eq.f32.partialorder %v3320_v40, 8.507059e+37 }
0x1688   :  { %v3375_v24 = vsel %vm3374_vm0, %v6186_v63, %v3371_v41  ;;  %v3323_v63 = vor.u32 1.1754944e-38, %v3322_v31 }
0x1689   :  { %v3380_v47 = vsel %vm3377_vm1, %v3379_v25, %v3375_v24 }
0x168a   :  { %v3398_v25 = vmul.f32 %v3380_v47, %v8659_v34  ;;  %v5788_v34 = vmul.f32 -1.442695, %v8744_v32 }
0x168b   :  { %v6190_v11 = vpop.eup %6189 }
0x168c   :  { %v3312_v13 = vmul.f32 %v6190_v11, %v3309_v3  ;;  %vm3317_vm3 = vweird.f32 %v6190_v11 }
0x168d   :  { %vm3318_vm5 = vmor %vm3316_vm4, %vm3317_vm3 }
0x168e   :  { %v3313_v27 = vsub.f32 1.0, %v3312_v13 }
0x1690   :  { %v3314_v0 = vmul.f32 %v6190_v11, %v3313_v27 }
0x1692   :  { %v3315_v43 = vadd.f32 %v6190_v11, %v3314_v0 }
0x1694   :  { %v3319_v5 = vsel %vm3318_vm5, %v6190_v11, %v3315_v43 }
0x1695   :  { %v3324_v38 = vsel %vm3321_vm6, %v3323_v63, %v3319_v5 }
0x1696   :  { %v3342_v3 = vmul.f32 %v3324_v38, %v8664_v36  ;;  %v5786_v36 = vmul.f32 -1.442695, %v8750_v26 }
0x16c2   :  { %v3401_v52 = vpop.permute.xlu0 %3400 }
0x16c3   :  { %v3403_v18 = vmul.f32 %v3401_v52, %v3380_v47 }
0x16c5   :  { %3405 = vrot.lane.b32.xlu1 %v3403_v18, %s6771_s5 }
0x16e8   :  { %v3345_v41 = vpop.permute.xlu0 %3344 }
0x16e9   :  { %v3347_v24 = vmul.f32 %v3345_v41, %v3324_v38 }
0x16eb   :  { %3349 = vrot.lane.b32.xlu1 %v3347_v24, %s6771_s5 }
0x1737   :  { %v3406_v52 = vpop.permute.xlu1 %3405 }
0x1738   :  { %v8761_v18 = vadd.f32 %v3406_v52, %v3398_v25 }
0x173a   :  { %6191 = vtanh.f32 %v8761_v18 }
0x1740   :  { %v6192_v21 = vpop.eup %6191 }
0x1741   :  { %3411 = vrot.lane.b32.xlu2 %v6192_v21, %s6771_s5 }
0x175d   :  { %v3350_v11 = vpop.permute.xlu1 %3349 }
0x175e   :  { %v8766_v13 = vadd.f32 %v3350_v11, %v3342_v3 }
0x1760   :  { %6193 = vtanh.f32 %v8766_v13 }
0x1761   :  { %6195 = vpow2.f32 %v5788_v34  ;;  %v8794_v34 = vld [vmem:[#allocation10] sm:$0xff] }
0x1766   :  { %v6194_v27 = vpop.eup %6193 }
0x1767   :  { %3355 = vrot.lane.b32.xlu2 %v6194_v27, %s6771_s5  ;;  %v6196_v47 = vpop.eup %6195  ;;  %v8790_v27 = vld [vmem:[#allocation10 + $0x10] sm:$0xff] }
0x1768   :  { %v3366_v0 = vadd.f32 1.0, %v6196_v47 }
0x176a   :  { %6197 = vrcp.f32 %v3366_v0  ;;  %v3393_v41 = vand.u32 2147483648, %v3366_v0  ;;  %vm3387_vm8 = vweird.f32 %v3366_v0  ;;  %v3391_v38 = vand.u32 2147483647, %v3366_v0 }
0x176b   :  { %6199 = vpow2.f32 %v5786_v36 }
0x176c   :  { %v3394_v25 = vor.u32 1.1754944e-38, %v3393_v41  ;;  %vm3392_vm10 = vcmp.eq.f32.partialorder %v3391_v38, 8.507059e+37 }
0x1770   :  { %v6198_v43 = vpop.eup %6197 }
0x1771   :  { %v3383_v31 = vmul.f32 %v6198_v43, %v3366_v0  ;;  %vm3388_vm7 = vweird.f32 %v6198_v43  ;;  %v6200_v3 = vpop.eup %6199 }
0x1772   :  { %vm3389_vm9 = vmor %vm3387_vm8, %vm3388_vm7  ;;  %v3310_v26 = vadd.f32 1.0, %v6200_v3 }
0x1773   :  { %v3384_v40 = vsub.f32 1.0, %v3383_v31 }
0x1774   :  { %6201 = vrcp.f32 %v3310_v26  ;;  %vm3331_vm12 = vweird.f32 %v3310_v26 }
0x1775   :  { %v3385_v5 = vmul.f32 %v6198_v43, %v3384_v40  ;;  %v3337_v40 = vand.u32 2147483648, %v3310_v26 }
0x1777   :  { %v3386_v63 = vadd.f32 %v6198_v43, %v3385_v5  ;;  %v3335_v5 = vand.u32 2147483647, %v3310_v26 }
0x1779   :  { %v3390_v24 = vsel %vm3389_vm9, %v6198_v43, %v3386_v63  ;;  %v3338_v63 = vor.u32 1.1754944e-38, %v3337_v40  ;;  %vm3336_vm14 = vcmp.eq.f32.partialorder %v3335_v5, 8.507059e+37  ;;  %v9884_v5 = vld [vmem:[#allocation78_spill] sm:$0xff] }
0x177a   :  { %v3395_v32 = vsel %vm3392_vm10, %v3394_v25, %v3390_v24  ;;  %v6202_v11 = vpop.eup %6201  ;;  %v9882_v25 = vld [vmem:[#allocation53_spill] sm:$0xff] }
0x177b   :  { %v3327_v47 = vmul.f32 %v6202_v11, %v3310_v26  ;;  %vm3332_vm11 = vweird.f32 %v6202_v11 }
0x177c   :  { %vm3333_vm13 = vmor %vm3331_vm12, %vm3332_vm11 }
0x177d   :  { %v3328_v0 = vsub.f32 1.0, %v3327_v47 }
0x177f   :  { %v3329_v43 = vmul.f32 %v6202_v11, %v3328_v0 }
0x1781   :  { %v3330_v31 = vadd.f32 %v6202_v11, %v3329_v43 }
0x1783   :  { %v3334_v36 = vsel %vm3333_vm13, %v6202_v11, %v3330_v31  ;;  %v9883_v11 = vld [vmem:[#allocation40_spill] sm:$0xff] }
0x1784   :  { %v3339_v41 = vsel %vm3336_vm14, %v3338_v63, %v3334_v36  ;;  %v537_v47 = vadd.f32 %v9883_v11, %v7454_v12  ;;  %v661_v36 = vadd.f32 %v9884_v5, %v7642_v4 }
0x179b   :  { %v3412_v52 = vpop.permute.xlu2 %3411 }
0x179c   :  { %v8772_v21 = vmul.f32 %v3412_v52, %v3395_v32  ;;  %v738_v32 = vadd.f32 %v9882_v25, %v7612_v46 }
0x179e   :  { %9880 = vst [vmem:[#allocation74_spill] sm:$0xff] %v8772_v21  ;;  %5791 = vmatmul.msk.f32.vlgmr.msra.gmra.mxu0 %vm345_vm2, %v8772_v21  ;;  %5792 = vmatmul.msk.f32.vlgmr.msra.gmra.mxu1 %vm345_vm2, %v8772_v21 }
0x179f   :  { %3908 = vmatpush.msra.mxu0 %v8676_v45  ;;  %3928 = vmatpush.msra.mxu1 %v8679_v15 }
0x17a1   :  { %3909 = vmatpush.msra.mxu0 %v8682_v56  ;;  %3929 = vmatpush.msra.mxu1 %v8685_v9 }
0x17a3   :  { %3910 = vmatpush.msra.mxu0 %v8688_v7  ;;  %3930 = vmatpush.msra.mxu1 %v8691_v28 }
0x17a5   :  { %3911 = vmatpush.msra.mxu0 %v8694_v14  ;;  %3931 = vmatpush.msra.mxu1 %v8697_v44 }
0x17a7   :  { %3912 = vmatpush.msra.mxu0 %v8700_v55  ;;  %3932 = vmatpush.msra.mxu1 %v8703_v17 }
0x17a9   :  { %3913 = vmatpush.msra.mxu0 %v8706_v30  ;;  %3933 = vmatpush.msra.mxu1 %v8709_v33 }
0x17ab   :  { %3914 = vmatpush.msra.mxu0 %v8790_v27  ;;  %3934 = vmatpush.msra.mxu1 %v8713_v22 }
0x17ad   :  { %3915 = vmatpush.msra.mxu0 %v8794_v34  ;;  %3935 = vmatpush.msra.mxu1 %v8717_v20 }
0x17c1   :  { %v3356_v38 = vpop.permute.xlu2 %3355 }
0x17c2   :  { %v8798_v24 = vmul.f32 %v3356_v38, %v3339_v41 }
0x17c4   :  { %9881 = vst [vmem:[#allocation86_spill] sm:$0xff] %v8798_v24  ;;  %5789 = vmatmul.msk.f32.vlgmr.msrb.gmra.mxu2 %vm345_vm2, %v8798_v24  ;;  %5790 = vmatmul.msk.f32.vlgmr.msra.gmra.mxu3 %vm345_vm2, %v8798_v24 }
0x17c5   :  { %3861 = vmatpush.msrb.mxu2 %v8547_v61  ;;  %3881 = vmatpush.msra.mxu3 %v8553_v16 }
0x17c7   :  { %3862 = vmatpush.msrb.mxu2 %v8559_v2  ;;  %3882 = vmatpush.msra.mxu3 %v8565_v6 }
0x17c9   :  { %3863 = vmatpush.msrb.mxu2 %v8571_v62  ;;  %3883 = vmatpush.msra.mxu3 %v8577_v23 }
0x17cb   :  { %3864 = vmatpush.msrb.mxu2 %v8583_v39  ;;  %3884 = vmatpush.msra.mxu3 %v8589_v48 }
0x17cd   :  { %3865 = vmatpush.msrb.mxu2 %v8595_v60  ;;  %3885 = vmatpush.msra.mxu3 %v8601_v35 }
0x17cf   :  { %3866 = vmatpush.msrb.mxu2 %v8607_v51  ;;  %3886 = vmatpush.msra.mxu3 %v8613_v57 }
0x17d1   :  { %3867 = vmatpush.msrb.mxu2 %v8619_v59  ;;  %3887 = vmatpush.msra.mxu3 %v8625_v29 }
0x17d3   :  { %3868 = vmatpush.msrb.mxu2 %v8631_v1  ;;  %3888 = vmatpush.msra.mxu3 %v8637_v50 }
0x181b   :  { %v3511_v52 = vpop.f32.mrf.mxu1  ;;  %v3491_v40 = vpop.f32.mrf.mxu0 }
0x181c   :  { %v8822_v3 = vadd.f32 %v3511_v52, %v738_v32  ;;  %v3514_v63 = vadd.f32 %v3491_v40, %v661_v36 }
0x181e   :  { %6203 = vtanh.f32 %v8822_v3  ;;  %v5795_v41 = vmul.f32 -1.442695, %v3514_v63 }
0x1824   :  { %v6204_v26 = vpop.eup %6203 }
0x1825   :  { %3613 = vrot.lane.b32.xlu0 %v6204_v26, %s6771_s5 }
0x1847   :  { %v3464_v0 = vpop.f32.mrf.mxu3 }
0x1848   :  { %v8828_v43 = vadd.f32 %v3464_v0, %v537_v47  ;;  %v3444_v47 = vpop.f32.mrf.mxu2  ;;  %v9885_v0 = vld [vmem:[#allocation39_spill] sm:$0xff] }
0x1849   :  { %v460_v24 = vadd.f32 %v9885_v0, %v7570_v42 }
0x184a   :  { %6205 = vtanh.f32 %v8828_v43 }
0x184b   :  { %6207 = vpow2.f32 %v5795_v41  ;;  %v3467_v53 = vadd.f32 %v3444_v47, %v460_v24 }
0x184d   :  { %v5793_v63 = vmul.f32 -1.442695, %v3467_v53 }
0x1850   :  { %v6206_v31 = vpop.eup %6205 }
0x1851   :  { %3557 = vrot.lane.b32.xlu0 %v6206_v31, %s6771_s5  ;;  %v6208_v38 = vpop.eup %6207 }
0x1852   :  { %v3578_v25 = vadd.f32 1.0, %v6208_v38 }
0x1854   :  { %6209 = vrcp.f32 %v3578_v25  ;;  %v3591_v31 = vand.u32 2147483648, %v3578_v25  ;;  %vm3585_vm0 = vweird.f32 %v3578_v25  ;;  %v3589_v5 = vand.u32 2147483647, %v3578_v25 }
0x1855   :  { %6211 = vpow2.f32 %v5793_v63 }
0x1856   :  { %v3592_v36 = vor.u32 1.1754944e-38, %v3591_v31  ;;  %vm3590_vm3 = vcmp.eq.f32.partialorder %v3589_v5, 8.507059e+37 }
0x185a   :  { %v6210_v32 = vpop.eup %6209 }
0x185b   :  { %v3581_v52 = vmul.f32 %v6210_v32, %v3578_v25  ;;  %vm3586_vm15 = vweird.f32 %v6210_v32 }
0x185c   :  { %vm3587_vm1 = vmor %vm3585_vm0, %vm3586_vm15 }
0x185d   :  { %v3582_v26 = vsub.f32 1.0, %v3581_v52  ;;  %v6212_v52 = vpop.eup %6211 }
0x185f   :  { %v3583_v11 = vmul.f32 %v6210_v32, %v3582_v26  ;;  %v3522_v26 = vadd.f32 1.0, %v6212_v52 }
0x1861   :  { %v3584_v8 = vadd.f32 %v6210_v32, %v3583_v11  ;;  %6213 = vrcp.f32 %v3522_v26  ;;  %v3535_v25 = vand.u32 2147483648, %v3522_v26  ;;  %vm3529_vm5 = vweird.f32 %v3522_v26 }
0x1863   :  { %v3588_v40 = vsel %vm3587_vm1, %v6210_v32, %v3584_v8  ;;  %v3533_v8 = vand.u32 2147483647, %v3522_v26  ;;  %v3536_v32 = vor.u32 1.1754944e-38, %v3535_v25 }
0x1864   :  { %v3593_v38 = vsel %vm3590_vm3, %v3592_v36, %v3588_v40 }
0x1865   :  { %vm3534_vm7 = vcmp.eq.f32.partialorder %v3533_v8, 8.507059e+37 }
0x1867   :  { %v6214_v11 = vpop.eup %6213 }
0x1868   :  { %v3525_v0 = vmul.f32 %v6214_v11, %v3522_v26  ;;  %vm3530_vm4 = vweird.f32 %v6214_v11 }
0x1869   :  { %vm3531_vm6 = vmor %vm3529_vm5, %vm3530_vm4 }
0x186a   :  { %v3526_v37 = vsub.f32 1.0, %v3525_v0 }
0x186c   :  { %v3527_v24 = vmul.f32 %v6214_v11, %v3526_v37 }
0x186e   :  { %v3528_v47 = vadd.f32 %v6214_v11, %v3527_v24 }
0x1870   :  { %v3532_v53 = vsel %vm3531_vm6, %v6214_v11, %v3528_v47 }
0x1871   :  { %v3537_v5 = vsel %vm3534_vm7, %v3536_v32, %v3532_v53 }
0x1897   :  { %v3614_v41 = vpop.permute.xlu0 %3613 }
0x1898   :  { %v3616_v21 = vmul.f32 %v3614_v41, %v3593_v38  ;;  %v3555_v41 = vmul.f32 %v3537_v5, %v8766_v13 }
0x189a   :  { %3618 = vrot.lane.b32.xlu1 %v3616_v21, %s6771_s5  ;;  %v3611_v21 = vmul.f32 %v3593_v38, %v8761_v18  ;;  %v5796_v18 = vmul.f32 -1.442695, %v8822_v3 }
0x18c3   :  { %v3558_v31 = vpop.permute.xlu0 %3557 }
0x18c4   :  { %v3560_v40 = vmul.f32 %v3558_v31, %v3537_v5 }
0x18c6   :  { %3562 = vrot.lane.b32.xlu1 %v3560_v40, %s6771_s5  ;;  %v5794_v40 = vmul.f32 -1.442695, %v8828_v43 }
0x190c   :  { %v3619_v36 = vpop.permute.xlu1 %3618 }
0x190d   :  { %v8839_v63 = vadd.f32 %v3619_v36, %v3611_v21 }
0x190f   :  { %6215 = vtanh.f32 %v8839_v63 }
0x1915   :  { %v6216_v37 = vpop.eup %6215 }
0x1916   :  { %3624 = vrot.lane.b32.xlu2 %v6216_v37, %s6771_s5 }
0x1938   :  { %v3563_v52 = vpop.permute.xlu1 %3562 }
0x1939   :  { %v8844_v26 = vadd.f32 %v3563_v52, %v3555_v41 }
0x193b   :  { %6217 = vtanh.f32 %v8844_v26 }
0x193c   :  { %6219 = vpow2.f32 %v5796_v18 }
0x1941   :  { %v6218_v11 = vpop.eup %6217 }
0x1942   :  { %3568 = vrot.lane.b32.xlu2 %v6218_v11, %s6771_s5  ;;  %v6220_v38 = vpop.eup %6219 }
0x1943   :  { %v3579_v0 = vadd.f32 1.0, %v6220_v38 }
0x1945   :  { %6221 = vrcp.f32 %v3579_v0  ;;  %v3606_v13 = vand.u32 2147483648, %v3579_v0  ;;  %vm3600_vm9 = vweird.f32 %v3579_v0  ;;  %v3604_v32 = vand.u32 2147483647, %v3579_v0 }
0x1946   :  { %6223 = vpow2.f32 %v5794_v40 }
0x1947   :  { %v3607_v5 = vor.u32 1.1754944e-38, %v3606_v13  ;;  %vm3605_vm11 = vcmp.eq.f32.partialorder %v3604_v32, 8.507059e+37 }
0x194b   :  { %v6222_v24 = vpop.eup %6221 }
0x194c   :  { %v3596_v47 = vmul.f32 %v6222_v24, %v3579_v0  ;;  %vm3601_vm8 = vweird.f32 %v6222_v24  ;;  %v6224_v43 = vpop.eup %6223 }
0x194d   :  { %vm3602_vm10 = vmor %vm3600_vm9, %vm3601_vm8  ;;  %v3523_v37 = vadd.f32 1.0, %v6224_v43 }
0x194e   :  { %v3597_v25 = vsub.f32 1.0, %v3596_v47 }
0x194f   :  { %6225 = vrcp.f32 %v3523_v37  ;;  %v3550_v0 = vand.u32 2147483648, %v3523_v37  ;;  %vm3544_vm13 = vweird.f32 %v3523_v37 }
0x1950   :  { %v3598_v8 = vmul.f32 %v6222_v24, %v3597_v25 }
0x1951   :  { %v3551_v25 = vor.u32 1.1754944e-38, %v3550_v0 }
0x1952   :  { %v3599_v53 = vadd.f32 %v6222_v24, %v3598_v8 }
0x1954   :  { %v3603_v31 = vsel %vm3602_vm10, %v6222_v24, %v3599_v53  ;;  %v3548_v24 = vand.u32 2147483647, %v3523_v37 }
0x1955   :  { %v3608_v3 = vsel %vm3605_vm11, %v3607_v5, %v3603_v31  ;;  %v6226_v41 = vpop.eup %6225 }
0x1956   :  { %v3540_v52 = vmul.f32 %v6226_v41, %v3523_v37  ;;  %vm3545_vm12 = vweird.f32 %v6226_v41  ;;  %vm3549_vm15 = vcmp.eq.f32.partialorder %v3548_v24, 8.507059e+37 }
0x1957   :  { %vm3546_vm14 = vmor %vm3544_vm13, %vm3545_vm12 }
0x1958   :  { %v3541_v11 = vsub.f32 1.0, %v3540_v52 }
0x195a   :  { %v3542_v18 = vmul.f32 %v6226_v41, %v3541_v11 }
0x195c   :  { %v3543_v38 = vadd.f32 %v6226_v41, %v3542_v18  ;;  %v9890_v18 = vld [vmem:[#allocation42_spill] sm:$0xff] }
0x195e   :  { %v3547_v47 = vsel %vm3546_vm14, %v6226_v41, %v3543_v38  ;;  %v463_v38 = vadd.f32 %v9890_v18, %v7570_v42 }
0x195f   :  { %v3552_v8 = vsel %vm3549_vm15, %v3551_v25, %v3547_v47 }
0x1970   :  { %v3625_v21 = vpop.permute.xlu2 %3624 }
0x1971   :  { %v8850_v36 = vmul.f32 %v3625_v21, %v3608_v3 }
0x1973   :  { %5799 = vmatmul.msk.f32.vlgmr.msrb.gmra.mxu0 %vm345_vm2, %v8850_v36  ;;  %5800 = vmatmul.msk.f32.vlgmr.msrb.gmra.mxu1 %vm345_vm2, %v8850_v36 }
0x1974   :  { %4121 = vmatpush.msrb.mxu0 %v8676_v45  ;;  %4141 = vmatpush.msrb.mxu1 %v8679_v15 }
0x1976   :  { %4122 = vmatpush.msrb.mxu0 %v8682_v56  ;;  %4142 = vmatpush.msrb.mxu1 %v8685_v9 }
0x1978   :  { %4123 = vmatpush.msrb.mxu0 %v8688_v7  ;;  %4143 = vmatpush.msrb.mxu1 %v8691_v28 }
0x197a   :  { %4124 = vmatpush.msrb.mxu0 %v8694_v14  ;;  %4144 = vmatpush.msrb.mxu1 %v8697_v44 }
0x197c   :  { %4125 = vmatpush.msrb.mxu0 %v8700_v55  ;;  %4145 = vmatpush.msrb.mxu1 %v8703_v17 }
0x197e   :  { %4126 = vmatpush.msrb.mxu0 %v8706_v30  ;;  %4146 = vmatpush.msrb.mxu1 %v8709_v33 }
0x1980   :  { %4127 = vmatpush.msrb.mxu0 %v8790_v27  ;;  %4147 = vmatpush.msrb.mxu1 %v8713_v22 }
0x1982   :  { %4128 = vmatpush.msrb.mxu0 %v8794_v34  ;;  %4148 = vmatpush.msrb.mxu1 %v8717_v20 }
0x199c   :  { %v3569_v53 = vpop.permute.xlu2 %3568 }
0x199d   :  { %v8872_v13 = vmul.f32 %v3569_v53, %v3552_v8 }
0x199f   :  { %9886 = vst [vmem:[#allocation25_spill] sm:$0xff] %v8872_v13  ;;  %5797 = vmatmul.msk.f32.vlgmr.msra.gmra.mxu2 %vm345_vm2, %v8872_v13  ;;  %5798 = vmatmul.msk.f32.vlgmr.msrb.gmra.mxu3 %vm345_vm2, %v8872_v13 }
0x19a0   :  { %4074 = vmatpush.msra.mxu2 %v8547_v61  ;;  %4094 = vmatpush.msrb.mxu3 %v8553_v16  ;;  %v9887_v61 = vld [vmem:[#allocation50_spill] sm:$0xff] }
0x19a1   :  { %v735_v16 = vadd.f32 %v9887_v61, %v7612_v46 }
0x19a2   :  { %4075 = vmatpush.msra.mxu2 %v8559_v2  ;;  %4095 = vmatpush.msrb.mxu3 %v8565_v6 }
0x19a4   :  { %4076 = vmatpush.msra.mxu2 %v8571_v62  ;;  %4096 = vmatpush.msrb.mxu3 %v8577_v23  ;;  %v9888_v23 = vld [vmem:[#allocation43_spill] sm:$0xff] }
0x19a6   :  { %4077 = vmatpush.msra.mxu2 %v8583_v39  ;;  %4097 = vmatpush.msrb.mxu3 %v8589_v48  ;;  %v540_v39 = vadd.f32 %v9888_v23, %v7454_v12 }
0x19a8   :  { %4078 = vmatpush.msra.mxu2 %v8595_v60  ;;  %4098 = vmatpush.msrb.mxu3 %v8601_v35 }
0x19aa   :  { %4079 = vmatpush.msra.mxu2 %v8607_v51  ;;  %4099 = vmatpush.msrb.mxu3 %v8613_v57  ;;  %v9889_v57 = vld [vmem:[#allocation77_spill] sm:$0xff] }
0x19ac   :  { %4080 = vmatpush.msra.mxu2 %v8619_v59  ;;  %4100 = vmatpush.msrb.mxu3 %v8625_v29  ;;  %v658_v59 = vadd.f32 %v9889_v57, %v7642_v4 }
0x19ae   :  { %4081 = vmatpush.msra.mxu2 %v8631_v1  ;;  %4101 = vmatpush.msrb.mxu3 %v8637_v50 }
0x19f0   :  { %v3724_v2 = vpop.f32.mrf.mxu1  ;;  %v3704_v51 = vpop.f32.mrf.mxu0 }
0x19f1   :  { %v8896_v6 = vadd.f32 %v3724_v2, %v735_v16  ;;  %v3727_v29 = vadd.f32 %v3704_v51, %v658_v59 }
0x19f3   :  { %6227 = vtanh.f32 %v8896_v6  ;;  %v5803_v1 = vmul.f32 -1.442695, %v3727_v29 }
0x19f9   :  { %v6228_v62 = vpop.eup %6227 }
0x19fa   :  { %3826 = vrot.lane.b32.xlu0 %v6228_v62, %s6771_s5 }
0x1a22   :  { %v3677_v48 = vpop.f32.mrf.mxu3  ;;  %v3657_v52 = vpop.f32.mrf.mxu2 }
0x1a23   :  { %v8902_v60 = vadd.f32 %v3677_v48, %v540_v39  ;;  %v3680_v47 = vadd.f32 %v3657_v52, %v463_v38 }
0x1a25   :  { %6229 = vtanh.f32 %v8902_v60  ;;  %v5801_v8 = vmul.f32 -1.442695, %v3680_v47 }
0x1a26   :  { %6231 = vpow2.f32 %v5803_v1 }
0x1a2b   :  { %v6230_v35 = vpop.eup %6229 }
0x1a2c   :  { %3770 = vrot.lane.b32.xlu0 %v6230_v35, %s6771_s5  ;;  %v6232_v50 = vpop.eup %6231 }
0x1a2d   :  { %v3791_v32 = vadd.f32 1.0, %v6232_v50 }
0x1a2f   :  { %6233 = vrcp.f32 %v3791_v32  ;;  %v3804_v43 = vand.u32 2147483648, %v3791_v32  ;;  %vm3798_vm1 = vweird.f32 %v3791_v32  ;;  %v3802_v37 = vand.u32 2147483647, %v3791_v32 }
0x1a30   :  { %6235 = vpow2.f32 %v5801_v8 }
0x1a31   :  { %v3805_v11 = vor.u32 1.1754944e-38, %v3804_v43  ;;  %vm3803_vm4 = vcmp.eq.f32.partialorder %v3802_v37, 8.507059e+37  ;;  %v5804_v43 = vmul.f32 -1.442695, %v8896_v6 }
0x1a35   :  { %v6234_v31 = vpop.eup %6233 }
0x1a36   :  { %v3794_v5 = vmul.f32 %v6234_v31, %v3791_v32  ;;  %vm3799_vm0 = vweird.f32 %v6234_v31  ;;  %v6236_v53 = vpop.eup %6235 }
0x1a37   :  { %vm3800_vm3 = vmor %vm3798_vm1, %vm3799_vm0  ;;  %v3735_v61 = vadd.f32 1.0, %v6236_v53 }
0x1a38   :  { %v3795_v40 = vsub.f32 1.0, %v3794_v5 }
0x1a39   :  { %6237 = vrcp.f32 %v3735_v61  ;;  %v3748_v48 = vand.u32 2147483648, %v3735_v61  ;;  %vm3742_vm6 = vweird.f32 %v3735_v61  ;;  %v3746_v35 = vand.u32 2147483647, %v3735_v61 }
0x1a3a   :  { %v3796_v3 = vmul.f32 %v6234_v31, %v3795_v40 }
0x1a3b   :  { %v3749_v57 = vor.u32 1.1754944e-38, %v3748_v48  ;;  %vm3747_vm8 = vcmp.eq.f32.partialorder %v3746_v35, 8.507059e+37  ;;  %v8991_v48 = vld [vmem:[%s9740_s4 + $0x40] sm:$0xff]  ;;  %v8997_v35 = vld [vmem:[%s9740_s4 + $0x48] sm:$0xff] }
0x1a3c   :  { %v3797_v21 = vadd.f32 %v6234_v31, %v3796_v3 }
0x1a3e   :  { %v3801_v41 = vsel %vm3800_vm3, %v6234_v31, %v3797_v21 }
0x1a3f   :  { %v3806_v24 = vsel %vm3803_vm4, %v3805_v11, %v3801_v41  ;;  %v6238_v16 = vpop.eup %6237 }
0x1a40   :  { %v3738_v2 = vmul.f32 %v6238_v16, %v3735_v61  ;;  %vm3743_vm5 = vweird.f32 %v6238_v16  ;;  %v3824_v50 = vmul.f32 %v3806_v24, %v8839_v63  ;;  %v5802_v61 = vmul.f32 -1.442695, %v8902_v60 }
0x1a41   :  { %vm3744_vm7 = vmor %vm3742_vm6, %vm3743_vm5 }
0x1a42   :  { %v3739_v62 = vsub.f32 1.0, %v3738_v2  ;;  %v8967_v2 = vld [vmem:[%s9740_s4 + $0x60] sm:$0xff] }
0x1a44   :  { %v3740_v23 = vmul.f32 %v6238_v16, %v3739_v62  ;;  %v8973_v62 = vld [vmem:[%s9740_s4 + $0x68] sm:$0xff] }
0x1a46   :  { %v3741_v39 = vadd.f32 %v6238_v16, %v3740_v23  ;;  %v8979_v23 = vld [vmem:[%s9740_s4 + $0x50] sm:$0xff] }
0x1a48   :  { %v3745_v51 = vsel %vm3744_vm7, %v6238_v16, %v3741_v39  ;;  %v8961_v16 = vld [vmem:[%s9740_s4 + $0x78] sm:$0xff] }
0x1a49   :  { %v3750_v29 = vsel %vm3747_vm8, %v3749_v57, %v3745_v51  ;;  %v8985_v39 = vld [vmem:[%s9740_s4 + $0x58] sm:$0xff]  ;;  %v9003_v51 = vld [vmem:[%s9740_s4 + $0x30] sm:$0xff] }
0x1a4a   :  { %v3768_v40 = vmul.f32 %v3750_v29, %v8844_v26  ;;  %v9009_v57 = vld [vmem:[%s9740_s4 + $0x38] sm:$0xff] }
0x1a6c   :  { %v3827_v0 = vpop.permute.xlu0 %3826 }
0x1a6d   :  { %v3829_v25 = vmul.f32 %v3827_v0, %v3806_v24 }
0x1a6f   :  { %3831 = vrot.lane.b32.xlu1 %v3829_v25, %s6771_s5 }
0x1a9e   :  { %v3771_v59 = vpop.permute.xlu0 %3770 }
0x1a9f   :  { %v3773_v1 = vmul.f32 %v3771_v59, %v3750_v29  ;;  %v9015_v59 = vld [vmem:[%s9740_s4 + $0x20] sm:$0xff]  ;;  %v9021_v29 = vld [vmem:[%s9740_s4 + $0x28] sm:$0xff] }
0x1aa1   :  { %3775 = vrot.lane.b32.xlu1 %v3773_v1, %s6771_s5  ;;  %v9027_v1 = vld [vmem:[%s9740_s4 + $0x10] sm:$0xff] }
0x1ae1   :  { %v3832_v32 = vpop.permute.xlu1 %3831 }
0x1ae2   :  { %v8913_v31 = vadd.f32 %v3832_v32, %v3824_v50  ;;  %v9033_v50 = vld [vmem:[%s9740_s4 + $0x18] sm:$0xff]  ;;  %v9039_v32 = vld [vmem:[%s9740_s4] sm:$0xff] }
0x1ae4   :  { %6239 = vtanh.f32 %v8913_v31 }
0x1aea   :  { %v6240_v5 = vpop.eup %6239 }
0x1aeb   :  { %3837 = vrot.lane.b32.xlu2 %v6240_v5, %s6771_s5  ;;  %v9045_v5 = vld [vmem:[%s9740_s4 + $0x8] sm:$0xff] }
0x1b13   :  { %v3776_v3 = vpop.permute.xlu1 %3775 }
0x1b14   :  { %v8918_v21 = vadd.f32 %v3776_v3, %v3768_v40  ;;  %v9893_v40 = vld [vmem:[#allocation47_spill] sm:$0xff] }
0x1b15   :  { %v732_v3 = vadd.f32 %v9893_v40, %v7612_v46 }
0x1b16   :  { %6241 = vtanh.f32 %v8918_v21 }
0x1b17   :  { %6243 = vpow2.f32 %v5804_v43 }
0x1b1c   :  { %v6242_v37 = vpop.eup %6241 }
0x1b1d   :  { %3781 = vrot.lane.b32.xlu2 %v6242_v37, %s6771_s5  ;;  %v6244_v63 = vpop.eup %6243 }
0x1b1e   :  { %v3792_v41 = vadd.f32 1.0, %v6244_v63 }
0x1b20   :  { %6245 = vrcp.f32 %v3792_v41  ;;  %v3819_v26 = vand.u32 2147483648, %v3792_v41  ;;  %vm3813_vm10 = vweird.f32 %v3792_v41  ;;  %v3817_v24 = vand.u32 2147483647, %v3792_v41 }
0x1b21   :  { %6247 = vpow2.f32 %v5802_v61 }
0x1b22   :  { %v3820_v25 = vor.u32 1.1754944e-38, %v3819_v26  ;;  %vm3818_vm12 = vcmp.eq.f32.partialorder %v3817_v24, 8.507059e+37  ;;  %v9895_v26 = vld [vmem:[#allocation75_spill] sm:$0xff] }
0x1b23   :  { %v655_v24 = vadd.f32 %v9895_v26, %v7642_v4 }
0x1b26   :  { %v6246_v52 = vpop.eup %6245 }
0x1b27   :  { %v3809_v11 = vmul.f32 %v6246_v52, %v3792_v41  ;;  %vm3814_vm9 = vweird.f32 %v6246_v52  ;;  %v9894_v41 = vld [vmem:[#allocation46_spill] sm:$0xff] }
0x1b28   :  { %vm3815_vm11 = vmor %vm3813_vm10, %vm3814_vm9 }
0x1b29   :  { %v3810_v18 = vsub.f32 1.0, %v3809_v11 }
0x1b2b   :  { %v3811_v38 = vmul.f32 %v6246_v52, %v3810_v18 }
0x1b2d   :  { %v3812_v0 = vadd.f32 %v6246_v52, %v3811_v38 }
0x1b2f   :  { %v3816_v47 = vsel %vm3815_vm11, %v6246_v52, %v3812_v0  ;;  %v543_v52 = vadd.f32 %v9894_v41, %v7454_v12 }
0x1b30   :  { %v3821_v6 = vsel %vm3818_vm12, %v3820_v25, %v3816_v47 }
0x1b45   :  { %v3838_v8 = vpop.permute.xlu2 %3837 }
0x1b46   :  { %v8923_v53 = vmul.f32 %v3838_v8, %v3821_v6 }
0x1b48   :  { %9891 = vst [vmem:[#allocation24_spill] sm:$0xff] %v8923_v53  ;;  %5807 = vmatmul.msk.f32.vlgmr.msra.gmra.mxu0 %vm345_vm2, %v8923_v53  ;;  %5808 = vmatmul.msk.f32.vlgmr.msra.gmra.mxu1 %vm345_vm2, %v8923_v53 }
0x1b49   :  { %4334 = vmatpush.msra.mxu0 %v8676_v45  ;;  %4354 = vmatpush.msra.mxu1 %v8679_v15  ;;  %v6248_v45 = vpop.eup %6247 }
0x1b4a   :  { %v3736_v15 = vadd.f32 1.0, %v6248_v45 }
0x1b4b   :  { %4335 = vmatpush.msra.mxu0 %v8682_v56  ;;  %4355 = vmatpush.msra.mxu1 %v8685_v9 }
0x1b4c   :  { %6249 = vrcp.f32 %v3736_v15  ;;  %vm3757_vm14 = vweird.f32 %v3736_v15 }
0x1b4d   :  { %4336 = vmatpush.msra.mxu0 %v8688_v7  ;;  %4356 = vmatpush.msra.mxu1 %v8691_v28 }
0x1b4f   :  { %4337 = vmatpush.msra.mxu0 %v8694_v14  ;;  %4357 = vmatpush.msra.mxu1 %v8697_v44  ;;  %v3763_v44 = vand.u32 2147483648, %v3736_v15 }
0x1b51   :  { %4338 = vmatpush.msra.mxu0 %v8700_v55  ;;  %4358 = vmatpush.msra.mxu1 %v8703_v17  ;;  %v3761_v55 = vand.u32 2147483647, %v3736_v15 }
0x1b52   :  { %v6250_v56 = vpop.eup %6249 }
0x1b53   :  { %4339 = vmatpush.msra.mxu0 %v8706_v30  ;;  %4359 = vmatpush.msra.mxu1 %v8709_v33  ;;  %v3753_v9 = vmul.f32 %v6250_v56, %v3736_v15  ;;  %vm3758_vm13 = vweird.f32 %v6250_v56  ;;  %v3764_v30 = vor.u32 1.1754944e-38, %v3763_v44  ;;  %vm3762_vm0 = vcmp.eq.f32.partialorder %v3761_v55, 8.507059e+37 }
0x1b54   :  { %vm3759_vm15 = vmor %vm3757_vm14, %vm3758_vm13 }
0x1b55   :  { %4340 = vmatpush.msra.mxu0 %v8790_v27  ;;  %4360 = vmatpush.msra.mxu1 %v8713_v22  ;;  %v3754_v7 = vsub.f32 1.0, %v3753_v9 }
0x1b57   :  { %4341 = vmatpush.msra.mxu0 %v8794_v34  ;;  %4361 = vmatpush.msra.mxu1 %v8717_v20  ;;  %v3755_v28 = vmul.f32 %v6250_v56, %v3754_v7  ;;  %v8955_v20 = vld [vmem:[%s9740_s4 + $0x70] sm:$0xff] }
0x1b59   :  { %v3756_v14 = vadd.f32 %v6250_v56, %v3755_v28 }
0x1b5b   :  { %v3760_v17 = vsel %vm3759_vm15, %v6250_v56, %v3756_v14 }
0x1b5c   :  { %v3765_v33 = vsel %vm3762_vm0, %v3764_v30, %v3760_v17 }
0x1b77   :  { %v3782_v22 = vpop.permute.xlu2 %3781 }
0x1b78   :  { %v8946_v60 = vmul.f32 %v3782_v22, %v3765_v33  ;;  %v9896_v22 = vld [vmem:[#allocation45_spill] sm:$0xff] }
0x1b79   :  { %v466_v40 = vadd.f32 %v9896_v22, %v7570_v42 }
0x1b7a   :  { %9892 = vst [vmem:[#allocation72_spill] sm:$0xff] %v8946_v60  ;;  %5805 = vmatmul.msk.f32.vlgmr.msrb.gmra.mxu2 %vm345_vm2, %v8946_v60  ;;  %5806 = vmatmul.msk.f32.vlgmr.msra.gmra.mxu3 %vm345_vm2, %v8946_v60 }
0x1b7b   :  { %4287 = vmatpush.msrb.mxu2 %v8955_v20  ;;  %4307 = vmatpush.msra.mxu3 %v8961_v16 }
0x1b7d   :  { %4288 = vmatpush.msrb.mxu2 %v8967_v2  ;;  %4308 = vmatpush.msra.mxu3 %v8973_v62 }
0x1b7f   :  { %4289 = vmatpush.msrb.mxu2 %v8979_v23  ;;  %4309 = vmatpush.msra.mxu3 %v8985_v39 }
0x1b81   :  { %4290 = vmatpush.msrb.mxu2 %v8991_v48  ;;  %4310 = vmatpush.msra.mxu3 %v8997_v35 }
0x1b83   :  { %4291 = vmatpush.msrb.mxu2 %v9003_v51  ;;  %4311 = vmatpush.msra.mxu3 %v9009_v57 }
0x1b85   :  { %4292 = vmatpush.msrb.mxu2 %v9015_v59  ;;  %4312 = vmatpush.msra.mxu3 %v9021_v29 }
0x1b87   :  { %4293 = vmatpush.msrb.mxu2 %v9027_v1  ;;  %4313 = vmatpush.msra.mxu3 %v9033_v50 }
0x1b89   :  { %4294 = vmatpush.msrb.mxu2 %v9039_v32  ;;  %4314 = vmatpush.msra.mxu3 %v9045_v5 }
0x1bc5   :  { %v3937_v43 = vpop.f32.mrf.mxu1  ;;  %v3917_v0 = vpop.f32.mrf.mxu0 }
0x1bc6   :  { %v9050_v37 = vadd.f32 %v3937_v43, %v732_v3  ;;  %v3940_v47 = vadd.f32 %v3917_v0, %v655_v24 }
0x1bc8   :  { %6251 = vtanh.f32 %v9050_v37  ;;  %v5811_v25 = vmul.f32 -1.442695, %v3940_v47 }
0x1bce   :  { %v6252_v63 = vpop.eup %6251 }
0x1bcf   :  { %4039 = vrot.lane.b32.xlu0 %v6252_v63, %s6771_s5 }
0x1bfd   :  { %v3890_v11 = vpop.f32.mrf.mxu3  ;;  %v3870_v33 = vpop.f32.mrf.mxu2 }
0x1bfe   :  { %v9056_v18 = vadd.f32 %v3890_v11, %v543_v52  ;;  %v3893_v3 = vadd.f32 %v3870_v33, %v466_v40 }
0x1c00   :  { %6253 = vtanh.f32 %v9056_v18  ;;  %v5809_v43 = vmul.f32 -1.442695, %v3893_v3 }
0x1c01   :  { %6255 = vpow2.f32 %v5811_v25 }
0x1c06   :  { %v6254_v38 = vpop.eup %6253 }
0x1c07   :  { %3983 = vrot.lane.b32.xlu0 %v6254_v38, %s6771_s5  ;;  %v6256_v6 = vpop.eup %6255 }
0x1c08   :  { %v4004_v8 = vadd.f32 1.0, %v6256_v6 }
0x1c0a   :  { %6257 = vrcp.f32 %v4004_v8  ;;  %v4017_v7 = vand.u32 2147483648, %v4004_v8  ;;  %vm4011_vm3 = vweird.f32 %v4004_v8  ;;  %v4015_v28 = vand.u32 2147483647, %v4004_v8 }
0x1c0b   :  { %6259 = vpow2.f32 %v5809_v43 }
0x1c0c   :  { %v4018_v44 = vor.u32 1.1754944e-38, %v4017_v7  ;;  %vm4016_vm5 = vcmp.eq.f32.partialorder %v4015_v28, 8.507059e+37  ;;  %v5812_v28 = vmul.f32 -1.442695, %v9050_v37 }
0x1c10   :  { %v6258_v61 = vpop.eup %6257 }
0x1c11   :  { %v4007_v45 = vmul.f32 %v6258_v61, %v4004_v8  ;;  %vm4012_vm1 = vweird.f32 %v6258_v61  ;;  %v6260_v63 = vpop.eup %6259 }
0x1c12   :  { %vm4013_vm4 = vmor %vm4011_vm3, %vm4012_vm1  ;;  %v3948_v41 = vadd.f32 1.0, %v6260_v63 }
0x1c13   :  { %v4008_v15 = vsub.f32 1.0, %v4007_v45 }
0x1c14   :  { %6261 = vrcp.f32 %v3948_v41  ;;  %v3961_v24 = vand.u32 2147483648, %v3948_v41  ;;  %vm3955_vm7 = vweird.f32 %v3948_v41  ;;  %v3959_v47 = vand.u32 2147483647, %v3948_v41 }
0x1c15   :  { %v4009_v56 = vmul.f32 %v6258_v61, %v4008_v15 }
0x1c16   :  { %v3962_v6 = vor.u32 1.1754944e-38, %v3961_v24  ;;  %vm3960_vm9 = vcmp.eq.f32.partialorder %v3959_v47, 8.507059e+37  ;;  %v9089_v24 = vld [vmem:[#allocation10 + $0x60] sm:$0xff]  ;;  %v9092_v47 = vld [vmem:[#allocation10 + $0x68] sm:$0xff] }
0x1c17   :  { %v4010_v9 = vadd.f32 %v6258_v61, %v4009_v56 }
0x1c19   :  { %v4014_v14 = vsel %vm4013_vm4, %v6258_v61, %v4010_v9 }
0x1c1a   :  { %v4019_v17 = vsel %vm4016_vm5, %v4018_v44, %v4014_v14  ;;  %v6262_v52 = vpop.eup %6261 }
0x1c1b   :  { %v3951_v11 = vmul.f32 %v6262_v52, %v3948_v41  ;;  %vm3956_vm6 = vweird.f32 %v6262_v52  ;;  %v4037_v15 = vmul.f32 %v4019_v17, %v8913_v31 }
0x1c1c   :  { %vm3957_vm8 = vmor %vm3955_vm7, %vm3956_vm6 }
0x1c1d   :  { %v3952_v38 = vsub.f32 1.0, %v3951_v11 }
0x1c1f   :  { %v3953_v0 = vmul.f32 %v6262_v52, %v3952_v38 }
0x1c21   :  { %v3954_v26 = vadd.f32 %v6262_v52, %v3953_v0  ;;  %v9083_v0 = vld [vmem:[#allocation10 + $0x70] sm:$0xff] }
0x1c23   :  { %v3958_v25 = vsel %vm3957_vm8, %v6262_v52, %v3954_v26  ;;  %v9086_v26 = vld [vmem:[#allocation10 + $0x78] sm:$0xff] }
0x1c24   :  { %v3963_v61 = vsel %vm3960_vm9, %v3962_v6, %v3958_v25  ;;  %v9095_v25 = vld [vmem:[#allocation10 + $0x50] sm:$0xff]  ;;  %v9098_v6 = vld [vmem:[#allocation10 + $0x58] sm:$0xff] }
0x1c25   :  { %v3981_v14 = vmul.f32 %v3963_v61, %v8918_v21 }
0x1c41   :  { %v4040_v55 = vpop.permute.xlu0 %4039 }
0x1c42   :  { %v4042_v30 = vmul.f32 %v4040_v55, %v4019_v17 }
0x1c44   :  { %4044 = vrot.lane.b32.xlu1 %v4042_v30, %s6771_s5 }
0x1c79   :  { %v3984_v8 = vpop.permute.xlu0 %3983 }
0x1c7a   :  { %v3986_v45 = vmul.f32 %v3984_v8, %v3963_v61  ;;  %v9101_v8 = vld [vmem:[#allocation10 + $0x40] sm:$0xff]  ;;  %v9104_v61 = vld [vmem:[#allocation10 + $0x48] sm:$0xff] }
0x1c7c   :  { %3988 = vrot.lane.b32.xlu1 %v3986_v45, %s6771_s5  ;;  %v5810_v45 = vmul.f32 -1.442695, %v9056_v18  ;;  %v9121_v18 = vld [vmem:[#allocation10 + $0x18] sm:$0xff] }
0x1cb6   :  { %v4045_v56 = vpop.permute.xlu1 %4044 }
0x1cb7   :  { %v9067_v9 = vadd.f32 %v4045_v56, %v4037_v15  ;;  %v9108_v15 = vld [vmem:[#allocation10 + $0x30] sm:$0xff]  ;;  %v9111_v56 = vld [vmem:[#allocation10 + $0x38] sm:$0xff] }
0x1cb9   :  { %6263 = vtanh.f32 %v9067_v9 }
0x1cba   :  { %6265 = vpow2.f32 %v5812_v28  ;;  %v9117_v28 = vld [vmem:[#allocation10 + $0x28] sm:$0xff] }
0x1cbf   :  { %v6264_v7 = vpop.eup %6263 }
0x1cc0   :  { %4050 = vrot.lane.b32.xlu2 %v6264_v7, %s6771_s5  ;;  %v6266_v30 = vpop.eup %6265  ;;  %v9114_v7 = vld [vmem:[#allocation10 + $0x20] sm:$0xff] }
0x1cc1   :  { %v4005_v17 = vadd.f32 1.0, %v6266_v30 }
0x1cc3   :  { %v4032_v37 = vand.u32 2147483648, %v4005_v17  ;;  %vm4026_vm11 = vweird.f32 %v4005_v17  ;;  %v4030_v21 = vand.u32 2147483647, %v4005_v17 }
0x1cc5   :  { %v4033_v41 = vor.u32 1.1754944e-38, %v4032_v37  ;;  %vm4031_vm13 = vcmp.eq.f32.partialorder %v4030_v21, 8.507059e+37 }
0x1cee   :  { %v3989_v44 = vpop.permute.xlu1 %3988 }
0x1cef   :  { %v9073_v55 = vadd.f32 %v3989_v44, %v3981_v14  ;;  %v9125_v14 = vld [vmem:[#allocation10 + $0x8] sm:$0xff] }
0x1cf1   :  { %6267 = vtanh.f32 %v9073_v55 }
0x1cf2   :  { %6269 = vrcp.f32 %v4005_v17 }
0x1cf3   :  { %6271 = vpow2.f32 %v5810_v45 }
0x1cf7   :  { %v6268_v31 = vpop.eup %6267 }
0x1cf8   :  { %3994 = vrot.lane.b32.xlu2 %v6268_v31, %s6771_s5  ;;  %v6270_v33 = vpop.eup %6269 }
0x1cf9   :  { %v4022_v22 = vmul.f32 %v6270_v33, %v4005_v17  ;;  %vm4027_vm10 = vweird.f32 %v6270_v33  ;;  %v6272_v44 = vpop.eup %6271 }
0x1cfa   :  { %vm4028_vm12 = vmor %vm4026_vm11, %vm4027_vm10  ;;  %v3949_v30 = vadd.f32 1.0, %v6272_v44 }
0x1cfb   :  { %v4023_v40 = vsub.f32 1.0, %v4022_v22 }
0x1cfc   :  { %6273 = vrcp.f32 %v3949_v30  ;;  %vm3970_vm15 = vweird.f32 %v3949_v30 }
0x1cfd   :  { %v4024_v3 = vmul.f32 %v6270_v33, %v4023_v40 }
0x1cff   :  { %v4025_v43 = vadd.f32 %v6270_v33, %v4024_v3  ;;  %v3974_v3 = vand.u32 2147483647, %v3949_v30 }
0x1d01   :  { %v4029_v63 = vsel %vm4028_vm12, %v6270_v33, %v4025_v43  ;;  %vm3975_vm1 = vcmp.eq.f32.partialorder %v3974_v3, 8.507059e+37 }
0x1d02   :  { %v4034_v52 = vsel %vm4031_vm13, %v4033_v41, %v4029_v63  ;;  %v6274_v31 = vpop.eup %6273  ;;  %v9899_v41 = vld [vmem:[#allocation44_spill] sm:$0xff] }
0x1d03   :  { %v3966_v17 = vmul.f32 %v6274_v31, %v3949_v30  ;;  %vm3971_vm14 = vweird.f32 %v6274_v31 }
0x1d04   :  { %vm3972_vm0 = vmor %vm3970_vm15, %vm3971_vm14 }
0x1d05   :  { %v3967_v33 = vsub.f32 1.0, %v3966_v17 }
0x1d07   :  { %v3968_v22 = vmul.f32 %v6274_v31, %v3967_v33 }
0x1d09   :  { %v3969_v40 = vadd.f32 %v6274_v31, %v3968_v22 }
0x1d0b   :  { %v3973_v43 = vsel %vm3972_vm0, %v6274_v31, %v3969_v40 }
0x1d1a   :  { %v4051_v11 = vpop.permute.xlu2 %4050 }
0x1d1b   :  { %v9077_v38 = vmul.f32 %v4051_v11, %v4034_v52  ;;  %v729_v52 = vadd.f32 %v9899_v41, %v7612_v46 }
0x1d1d   :  { %9897 = vst [vmem:[#allocation85_spill] sm:$0xff] %v9077_v38  ;;  %5815 = vmatmul.msk.f32.vlgmr.msrb.gmra.mxu0 %vm345_vm2, %v9077_v38  ;;  %5816 = vmatmul.msk.f32.vlgmr.msrb.gmra.mxu1 %vm345_vm2, %v9077_v38 }
0x1d1e   :  { %4547 = vmatpush.msrb.mxu0 %v9083_v0  ;;  %4567 = vmatpush.msrb.mxu1 %v9086_v26 }
0x1d20   :  { %4548 = vmatpush.msrb.mxu0 %v9089_v24  ;;  %4568 = vmatpush.msrb.mxu1 %v9092_v47 }
0x1d22   :  { %4549 = vmatpush.msrb.mxu0 %v9095_v25  ;;  %4569 = vmatpush.msrb.mxu1 %v9098_v6 }
0x1d24   :  { %4550 = vmatpush.msrb.mxu0 %v9101_v8  ;;  %4570 = vmatpush.msrb.mxu1 %v9104_v61 }
0x1d26   :  { %4551 = vmatpush.msrb.mxu0 %v9108_v15  ;;  %4571 = vmatpush.msrb.mxu1 %v9111_v56 }
0x1d28   :  { %4552 = vmatpush.msrb.mxu0 %v9114_v7  ;;  %4572 = vmatpush.msrb.mxu1 %v9117_v28 }
0x1d2a   :  { %4553 = vmatpush.msrb.mxu0 %v8790_v27  ;;  %4573 = vmatpush.msrb.mxu1 %v9121_v18  ;;  %v3976_v27 = vand.u32 2147483648, %v3949_v30  ;;  %v9900_v30 = vld [vmem:[#allocation49_spill] sm:$0xff] }
0x1d2b   :  { %v546_v31 = vadd.f32 %v9900_v30, %v7454_v12 }
0x1d2c   :  { %4554 = vmatpush.msrb.mxu0 %v8794_v34  ;;  %4574 = vmatpush.msrb.mxu1 %v9125_v14  ;;  %v3977_v37 = vor.u32 1.1754944e-38, %v3976_v27  ;;  %v9901_v27 = vld [vmem:[#allocation73_spill] sm:$0xff] }
0x1d2d   :  { %v652_v3 = vadd.f32 %v9901_v27, %v7642_v4 }
0x1d2e   :  { %v3978_v34 = vsel %vm3975_vm1, %v3977_v37, %v3973_v43 }
0x1d52   :  { %v3995_v21 = vpop.permute.xlu2 %3994 }
0x1d53   :  { %v9128_v63 = vmul.f32 %v3995_v21, %v3978_v34 }
0x1d55   :  { %9898 = vst [vmem:[#allocation70_spill] sm:$0xff] %v9128_v63  ;;  %5813 = vmatmul.msk.f32.vlgmr.msra.gmra.mxu2 %vm345_vm2, %v9128_v63  ;;  %5814 = vmatmul.msk.f32.vlgmr.msrb.gmra.mxu3 %vm345_vm2, %v9128_v63 }
0x1d56   :  { %4500 = vmatpush.msra.mxu2 %v8955_v20  ;;  %4520 = vmatpush.msrb.mxu3 %v8961_v16 }
0x1d58   :  { %4501 = vmatpush.msra.mxu2 %v8967_v2  ;;  %4521 = vmatpush.msrb.mxu3 %v8973_v62 }
0x1d5a   :  { %4502 = vmatpush.msra.mxu2 %v8979_v23  ;;  %4522 = vmatpush.msrb.mxu3 %v8985_v39 }
0x1d5c   :  { %4503 = vmatpush.msra.mxu2 %v8991_v48  ;;  %4523 = vmatpush.msrb.mxu3 %v8997_v35 }
0x1d5e   :  { %4504 = vmatpush.msra.mxu2 %v9003_v51  ;;  %4524 = vmatpush.msrb.mxu3 %v9009_v57 }
0x1d60   :  { %4505 = vmatpush.msra.mxu2 %v9015_v59  ;;  %4525 = vmatpush.msrb.mxu3 %v9021_v29 }
0x1d62   :  { %4506 = vmatpush.msra.mxu2 %v9027_v1  ;;  %4526 = vmatpush.msrb.mxu3 %v9033_v50 }
0x1d64   :  { %4507 = vmatpush.msra.mxu2 %v9039_v32  ;;  %4527 = vmatpush.msrb.mxu3 %v9045_v5 }
0x1d9a   :  { %v4150_v11 = vpop.f32.mrf.mxu1  ;;  %v4130_v40 = vpop.f32.mrf.mxu0 }
0x1d9b   :  { %v9152_v45 = vadd.f32 %v4150_v11, %v729_v52  ;;  %v4153_v43 = vadd.f32 %v4130_v40, %v652_v3 }
0x1d9d   :  { %6275 = vtanh.f32 %v9152_v45  ;;  %v5819_v37 = vmul.f32 -1.442695, %v4153_v43 }
0x1da3   :  { %v6276_v44 = vpop.eup %6275 }
0x1da4   :  { %4252 = vrot.lane.b32.xlu0 %v6276_v44, %s6771_s5 }
0x1dd8   :  { %v4103_v17 = vpop.f32.mrf.mxu3  ;;  %v4083_v43 = vpop.f32.mrf.mxu2 }
0x1dd9   :  { %v9158_v33 = vadd.f32 %v4103_v17, %v546_v31 }
0x1ddb   :  { %6277 = vtanh.f32 %v9158_v33 }
0x1ddc   :  { %6279 = vpow2.f32 %v5819_v37  ;;  %v9902_v37 = vld [vmem:[#allocation48_spill] sm:$0xff] }
0x1de1   :  { %v6278_v22 = vpop.eup %6277 }
0x1de2   :  { %4196 = vrot.lane.b32.xlu0 %v6278_v22, %s6771_s5  ;;  %v6280_v34 = vpop.eup %6279 }
0x1de3   :  { %v4217_v21 = vadd.f32 1.0, %v6280_v34  ;;  %v469_v34 = vadd.f32 %v9902_v37, %v7570_v42 }
0x1de5   :  { %6281 = vrcp.f32 %v4217_v21  ;;  %v4230_v31 = vand.u32 2147483648, %v4217_v21  ;;  %vm4224_vm4 = vweird.f32 %v4217_v21  ;;  %v4228_v17 = vand.u32 2147483647, %v4217_v21 }
0x1de7   :  { %v4231_v60 = vor.u32 1.1754944e-38, %v4230_v31  ;;  %vm4229_vm6 = vcmp.eq.f32.partialorder %v4228_v17, 8.507059e+37 }
0x1deb   :  { %v6282_v41 = vpop.eup %6281 }
0x1dec   :  { %v4220_v52 = vmul.f32 %v6282_v41, %v4217_v21  ;;  %vm4225_vm3 = vweird.f32 %v6282_v41 }
0x1ded   :  { %vm4226_vm5 = vmor %vm4224_vm4, %vm4225_vm3 }
0x1dee   :  { %v4221_v11 = vsub.f32 1.0, %v4220_v52  ;;  %v4106_v52 = vadd.f32 %v4083_v43, %v469_v34 }
0x1df0   :  { %v4222_v44 = vmul.f32 %v6282_v41, %v4221_v11  ;;  %v5817_v11 = vmul.f32 -1.442695, %v4106_v52 }
0x1df2   :  { %v4223_v30 = vadd.f32 %v6282_v41, %v4222_v44  ;;  %6283 = vpow2.f32 %v5817_v11 }
0x1df4   :  { %v4227_v22 = vsel %vm4226_vm5, %v6282_v41, %v4223_v30 }
0x1df5   :  { %v4232_v40 = vsel %vm4229_vm6, %v4231_v60, %v4227_v22 }
0x1df6   :  { %v4250_v34 = vmul.f32 %v4232_v40, %v9067_v9 }
0x1df8   :  { %v6284_v44 = vpop.eup %6283 }
0x1df9   :  { %v4161_v53 = vadd.f32 1.0, %v6284_v44 }
0x1dfb   :  { %6285 = vrcp.f32 %v4161_v53  ;;  %v4174_v60 = vand.u32 2147483648, %v4161_v53  ;;  %vm4168_vm8 = vweird.f32 %v4161_v53  ;;  %v4172_v17 = vand.u32 2147483647, %v4161_v53 }
0x1dfd   :  { %vm4173_vm10 = vcmp.eq.f32.partialorder %v4172_v17, 8.507059e+37 }
0x1e01   :  { %v6286_v21 = vpop.eup %6285 }
0x1e02   :  { %v4164_v63 = vmul.f32 %v6286_v21, %v4161_v53  ;;  %vm4169_vm7 = vweird.f32 %v6286_v21  ;;  %v5820_v53 = vmul.f32 -1.442695, %v9152_v45 }
0x1e03   :  { %vm4170_vm9 = vmor %vm4168_vm8, %vm4169_vm7 }
0x1e04   :  { %v4165_v41 = vsub.f32 1.0, %v4164_v63 }
0x1e06   :  { %v4166_v30 = vmul.f32 %v6286_v21, %v4165_v41 }
0x1e08   :  { %v4167_v31 = vadd.f32 %v6286_v21, %v4166_v30 }
0x1e0a   :  { %v4171_v22 = vsel %vm4170_vm9, %v6286_v21, %v4167_v31 }
0x1e16   :  { %v4253_v27 = vpop.permute.xlu0 %4252 }
0x1e17   :  { %v4255_v3 = vmul.f32 %v4253_v27, %v4232_v40  ;;  %v4175_v27 = vor.u32 1.1754944e-38, %v4174_v60 }
0x1e19   :  { %4257 = vrot.lane.b32.xlu1 %v4255_v3, %s6771_s5  ;;  %v4176_v43 = vsel %vm4173_vm10, %v4175_v27, %v4171_v22 }
0x1e1a   :  { %v4194_v44 = vmul.f32 %v4176_v43, %v9073_v55 }
0x1e54   :  { %v4197_v3 = vpop.permute.xlu0 %4196 }
0x1e55   :  { %v4199_v37 = vmul.f32 %v4197_v3, %v4176_v43 }
0x1e57   :  { %4201 = vrot.lane.b32.xlu1 %v4199_v37, %s6771_s5 }
0x1e8b   :  { %v4258_v52 = vpop.permute.xlu1 %4257 }
0x1e8c   :  { %v9169_v11 = vadd.f32 %v4258_v52, %v4250_v34 }
0x1e8e   :  { %6287 = vtanh.f32 %v9169_v11 }
0x1e8f   :  { %6289 = vpow2.f32 %v5820_v53  ;;  %v5818_v53 = vmul.f32 -1.442695, %v9158_v33 }
0x1e94   :  { %v6288_v63 = vpop.eup %6287 }
0x1e95   :  { %4263 = vrot.lane.b32.xlu2 %v6288_v63, %s6771_s5  ;;  %v6290_v30 = vpop.eup %6289  ;;  %v9197_v63 = vld [vmem:[#allocation10 + $0x10] sm:$0xff] }
0x1e96   :  { %v4218_v9 = vadd.f32 1.0, %v6290_v30 }
0x1e98   :  { %v4245_v45 = vand.u32 2147483648, %v4218_v9  ;;  %vm4239_vm12 = vweird.f32 %v4218_v9  ;;  %v4243_v55 = vand.u32 2147483647, %v4218_v9 }
0x1e9a   :  { %v4246_v43 = vor.u32 1.1754944e-38, %v4245_v45  ;;  %vm4244_vm14 = vcmp.eq.f32.partialorder %v4243_v55, 8.507059e+37 }
0x1ec9   :  { %v4202_v21 = vpop.permute.xlu1 %4201 }
0x1eca   :  { %v9175_v41 = vadd.f32 %v4202_v21, %v4194_v44  ;;  %v9202_v44 = vld [vmem:[#allocation10] sm:$0xff] }
0x1ecc   :  { %6291 = vtanh.f32 %v9175_v41 }
0x1ecd   :  { %6293 = vrcp.f32 %v4218_v9 }
0x1ece   :  { %6295 = vpow2.f32 %v5818_v53 }
0x1ed2   :  { %v6292_v40 = vpop.eup %6291 }
0x1ed3   :  { %4207 = vrot.lane.b32.xlu2 %v6292_v40, %s6771_s5  ;;  %v6294_v31 = vpop.eup %6293 }
0x1ed4   :  { %v4235_v60 = vmul.f32 %v6294_v31, %v4218_v9  ;;  %vm4240_vm11 = vweird.f32 %v6294_v31  ;;  %v6296_v21 = vpop.eup %6295 }
0x1ed5   :  { %vm4241_vm13 = vmor %vm4239_vm12, %vm4240_vm11  ;;  %v4162_v30 = vadd.f32 1.0, %v6296_v21 }
0x1ed6   :  { %v4236_v17 = vsub.f32 1.0, %v4235_v60 }
0x1ed7   :  { %6297 = vrcp.f32 %v4162_v30  ;;  %vm4183_vm0 = vweird.f32 %v4162_v30 }
0x1ed8   :  { %v4237_v22 = vmul.f32 %v6294_v31, %v4236_v17 }
0x1eda   :  { %v4238_v27 = vadd.f32 %v6294_v31, %v4237_v22  ;;  %v4189_v22 = vand.u32 2147483648, %v4162_v30 }
0x1edc   :  { %v4242_v3 = vsel %vm4241_vm13, %v6294_v31, %v4238_v27  ;;  %v4187_v27 = vand.u32 2147483647, %v4162_v30  ;;  %v4190_v45 = vor.u32 1.1754944e-38, %v4189_v22  ;;  %v9906_v22 = vld [vmem:[#allocation71_spill] sm:$0xff] }
0x1edd   :  { %v4247_v37 = vsel %vm4244_vm14, %v4246_v43, %v4242_v3  ;;  %v6298_v9 = vpop.eup %6297 }
0x1ede   :  { %v4179_v40 = vmul.f32 %v6298_v9, %v4162_v30  ;;  %vm4184_vm15 = vweird.f32 %v6298_v9  ;;  %vm4188_vm3 = vcmp.eq.f32.partialorder %v4187_v27, 8.507059e+37  ;;  %v649_v27 = vadd.f32 %v9906_v22, %v7642_v4 }
0x1edf   :  { %vm4185_vm1 = vmor %vm4183_vm0, %vm4184_vm15 }
0x1ee0   :  { %v4180_v31 = vsub.f32 1.0, %v4179_v40 }
0x1ee2   :  { %v4181_v60 = vmul.f32 %v6298_v9, %v4180_v31 }
0x1ee4   :  { %v4182_v17 = vadd.f32 %v6298_v9, %v4181_v60 }
0x1ee6   :  { %v4186_v33 = vsel %vm4185_vm1, %v6298_v9, %v4182_v17  ;;  %v9905_v9 = vld [vmem:[#allocation52_spill] sm:$0xff] }
0x1ee7   :  { %v4191_v55 = vsel %vm4188_vm3, %v4190_v45, %v4186_v33  ;;  %v549_v40 = vadd.f32 %v9905_v9, %v7454_v12 }
0x1eef   :  { %v4264_v34 = vpop.permute.xlu2 %4263 }
0x1ef0   :  { %v9179_v52 = vmul.f32 %v4264_v34, %v4247_v37  ;;  %v9904_v37 = vld [vmem:[#allocation41_spill] sm:$0xff] }
0x1ef1   :  { %v726_v34 = vadd.f32 %v9904_v37, %v7612_v46 }
0x1ef2   :  { %5823 = vmatmul.msk.f32.vlgmr.msra.gmra.mxu0 %vm345_vm2, %v9179_v52  ;;  %5824 = vmatmul.msk.f32.vlgmr.msra.gmra.mxu1 %vm345_vm2, %v9179_v52 }
0x1ef3   :  { %4760 = vmatpush.msra.mxu0 %v9083_v0  ;;  %4780 = vmatpush.msra.mxu1 %v9086_v26 }
0x1ef5   :  { %4761 = vmatpush.msra.mxu0 %v9089_v24  ;;  %4781 = vmatpush.msra.mxu1 %v9092_v47 }
0x1ef7   :  { %4762 = vmatpush.msra.mxu0 %v9095_v25  ;;  %4782 = vmatpush.msra.mxu1 %v9098_v6 }
0x1ef9   :  { %4763 = vmatpush.msra.mxu0 %v9101_v8  ;;  %4783 = vmatpush.msra.mxu1 %v9104_v61 }
0x1efb   :  { %4764 = vmatpush.msra.mxu0 %v9108_v15  ;;  %4784 = vmatpush.msra.mxu1 %v9111_v56 }
0x1efd   :  { %4765 = vmatpush.msra.mxu0 %v9114_v7  ;;  %4785 = vmatpush.msra.mxu1 %v9117_v28 }
0x1eff   :  { %4766 = vmatpush.msra.mxu0 %v9197_v63  ;;  %4786 = vmatpush.msra.mxu1 %v9121_v18 }
0x1f01   :  { %4767 = vmatpush.msra.mxu0 %v9202_v44  ;;  %4787 = vmatpush.msra.mxu1 %v9125_v14 }
0x1f2d   :  { %v4208_v3 = vpop.permute.xlu2 %4207 }
0x1f2e   :  { %v9206_v43 = vmul.f32 %v4208_v3, %v4191_v55 }
0x1f30   :  { %9903 = vst [vmem:[#allocation27_spill] sm:$0xff] %v9206_v43  ;;  %5821 = vmatmul.msk.f32.vlgmr.msrb.gmra.mxu2 %vm345_vm2, %v9206_v43  ;;  %5822 = vmatmul.msk.f32.vlgmr.msra.gmra.mxu3 %vm345_vm2, %v9206_v43 }
0x1f31   :  { %4713 = vmatpush.msrb.mxu2 %v8955_v20  ;;  %4733 = vmatpush.msra.mxu3 %v8961_v16 }
0x1f33   :  { %4714 = vmatpush.msrb.mxu2 %v8967_v2  ;;  %4734 = vmatpush.msra.mxu3 %v8973_v62 }
0x1f35   :  { %4715 = vmatpush.msrb.mxu2 %v8979_v23  ;;  %4735 = vmatpush.msra.mxu3 %v8985_v39 }
0x1f37   :  { %4716 = vmatpush.msrb.mxu2 %v8991_v48  ;;  %4736 = vmatpush.msra.mxu3 %v8997_v35 }
0x1f39   :  { %4717 = vmatpush.msrb.mxu2 %v9003_v51  ;;  %4737 = vmatpush.msra.mxu3 %v9009_v57 }
0x1f3b   :  { %4718 = vmatpush.msrb.mxu2 %v9015_v59  ;;  %4738 = vmatpush.msra.mxu3 %v9021_v29 }
0x1f3d   :  { %4719 = vmatpush.msrb.mxu2 %v9027_v1  ;;  %4739 = vmatpush.msra.mxu3 %v9033_v50 }
0x1f3f   :  { %4720 = vmatpush.msrb.mxu2 %v9039_v32  ;;  %4740 = vmatpush.msra.mxu3 %v9045_v5 }
0x1f6f   :  { %v4363_v53 = vpop.f32.mrf.mxu1  ;;  %v4343_v17 = vpop.f32.mrf.mxu0 }
0x1f70   :  { %v9230_v21 = vadd.f32 %v4363_v53, %v726_v34  ;;  %v4366_v33 = vadd.f32 %v4343_v17, %v649_v27 }
0x1f72   :  { %6299 = vtanh.f32 %v9230_v21  ;;  %v5827_v55 = vmul.f32 -1.442695, %v4366_v33 }
0x1f78   :  { %v6300_v30 = vpop.eup %6299 }
0x1f79   :  { %4465 = vrot.lane.b32.xlu0 %v6300_v30, %s6771_s5 }
0x1fb3   :  { %v4316_v31 = vpop.f32.mrf.mxu3 }
0x1fb4   :  { %v9236_v60 = vadd.f32 %v4316_v31, %v549_v40 }
0x1fb6   :  { %6301 = vtanh.f32 %v9236_v60 }
0x1fb7   :  { %6303 = vpow2.f32 %v5827_v55  ;;  %v4296_v55 = vpop.f32.mrf.mxu2 }
0x1fbc   :  { %v6302_v45 = vpop.eup %6301 }
0x1fbd   :  { %4409 = vrot.lane.b32.xlu0 %v6302_v45, %s6771_s5  ;;  %v6304_v3 = vpop.eup %6303 }
0x1fbe   :  { %v4430_v37 = vadd.f32 1.0, %v6304_v3  ;;  %v9907_v3 = vld [vmem:[#allocation51_spill] sm:$0xff] }
0x1fbf   :  { %v472_v13 = vadd.f32 %v9907_v3, %v7570_v42 }
0x1fc0   :  { %6305 = vrcp.f32 %v4430_v37  ;;  %v4443_v31 = vand.u32 2147483648, %v4430_v37  ;;  %vm4437_vm5 = vweird.f32 %v4430_v37  ;;  %v4441_v43 = vand.u32 2147483647, %v4430_v37 }
0x1fc2   :  { %v4444_v17 = vor.u32 1.1754944e-38, %v4443_v31  ;;  %vm4442_vm7 = vcmp.eq.f32.partialorder %v4441_v43, 8.507059e+37 }
0x1fc6   :  { %v6306_v34 = vpop.eup %6305 }
0x1fc7   :  { %v4433_v53 = vmul.f32 %v6306_v34, %v4430_v37  ;;  %vm4438_vm4 = vweird.f32 %v6306_v34 }
0x1fc8   :  { %vm4439_vm6 = vmor %vm4437_vm5, %vm4438_vm4 }
0x1fc9   :  { %v4434_v30 = vsub.f32 1.0, %v4433_v53  ;;  %v4319_v53 = vadd.f32 %v4296_v55, %v472_v13 }
0x1fcb   :  { %v4435_v9 = vmul.f32 %v6306_v34, %v4434_v30  ;;  %v5825_v30 = vmul.f32 -1.442695, %v4319_v53 }
0x1fcd   :  { %v4436_v40 = vadd.f32 %v6306_v34, %v4435_v9  ;;  %6307 = vpow2.f32 %v5825_v30 }
0x1fcf   :  { %v4440_v22 = vsel %vm4439_vm6, %v6306_v34, %v4436_v40 }
0x1fd0   :  { %v4445_v45 = vsel %vm4442_vm7, %v4444_v17, %v4440_v22 }
0x1fd1   :  { %v4463_v3 = vmul.f32 %v4445_v45, %v9169_v11 }
0x1fd3   :  { %v6308_v9 = vpop.eup %6307 }
0x1fd4   :  { %v4374_v38 = vadd.f32 1.0, %v6308_v9 }
0x1fd6   :  { %6309 = vrcp.f32 %v4374_v38  ;;  %v4387_v31 = vand.u32 2147483648, %v4374_v38  ;;  %vm4381_vm9 = vweird.f32 %v4374_v38  ;;  %v4385_v22 = vand.u32 2147483647, %v4374_v38 }
0x1fd8   :  { %vm4386_vm11 = vcmp.eq.f32.partialorder %v4385_v22, 8.507059e+37 }
0x1fdc   :  { %v6310_v37 = vpop.eup %6309 }
0x1fdd   :  { %v4377_v58 = vmul.f32 %v6310_v37, %v4374_v38  ;;  %vm4382_vm8 = vweird.f32 %v6310_v37  ;;  %v5828_v38 = vmul.f32 -1.442695, %v9230_v21 }
0x1fde   :  { %vm4383_vm10 = vmor %vm4381_vm9, %vm4382_vm8 }
0x1fdf   :  { %v4378_v34 = vsub.f32 1.0, %v4377_v58 }
0x1fe1   :  { %v4379_v40 = vmul.f32 %v6310_v37, %v4378_v34 }
0x1fe3   :  { %v4380_v43 = vadd.f32 %v6310_v37, %v4379_v40 }
0x1fe5   :  { %v4384_v17 = vsel %vm4383_vm10, %v6310_v37, %v4380_v43 }
0x1feb   :  { %v4466_v27 = vpop.permute.xlu0 %4465 }
0x1fec   :  { %v4468_v33 = vmul.f32 %v4466_v27, %v4445_v45  ;;  %v4388_v27 = vor.u32 1.1754944e-38, %v4387_v31 }
0x1fee   :  { %4470 = vrot.lane.b32.xlu1 %v4468_v33, %s6771_s5  ;;  %v4389_v13 = vsel %vm4386_vm11, %v4388_v27, %v4384_v17 }
0x1fef   :  { %v4407_v37 = vmul.f32 %v4389_v13, %v9175_v41 }
0x202f   :  { %v4410_v33 = vpop.permute.xlu0 %4409 }
0x2030   :  { %v4412_v55 = vmul.f32 %v4410_v33, %v4389_v13 }
0x2032   :  { %4414 = vrot.lane.b32.xlu1 %v4412_v55, %s6771_s5 }
0x2060   :  { %v4471_v53 = vpop.permute.xlu1 %4470 }
0x2061   :  { %v9247_v30 = vadd.f32 %v4471_v53, %v4463_v3 }
0x2063   :  { %6311 = vtanh.f32 %v9247_v30 }
0x2064   :  { %6313 = vpow2.f32 %v5828_v38 }
0x2069   :  { %v6312_v58 = vpop.eup %6311 }
0x206a   :  { %4476 = vrot.lane.b32.xlu2 %v6312_v58, %s6771_s5  ;;  %v6314_v9 = vpop.eup %6313 }
0x206b   :  { %v4431_v34 = vadd.f32 1.0, %v6314_v9 }
0x206d   :  { %v4458_v21 = vand.u32 2147483648, %v4431_v34  ;;  %vm4452_vm13 = vweird.f32 %v4431_v34  ;;  %v4456_v33 = vand.u32 2147483647, %v4431_v34 }
0x206f   :  { %v4459_v13 = vor.u32 1.1754944e-38, %v4458_v21  ;;  %vm4457_vm15 = vcmp.eq.f32.partialorder %v4456_v33, 8.507059e+37  ;;  %v9911_v21 = vld [vmem:[#allocation54_spill] sm:$0xff] }
0x2070   :  { %v475_v33 = vadd.f32 %v9911_v21, %v7570_v42 }
0x20a4   :  { %v4415_v40 = vpop.permute.xlu1 %4414 }
0x20a5   :  { %v9253_v43 = vadd.f32 %v4415_v40, %v4407_v37 }
0x20a7   :  { %6315 = vtanh.f32 %v9253_v43 }
0x20a8   :  { %6317 = vrcp.f32 %v4431_v34 }
0x20ad   :  { %v6316_v11 = vpop.eup %6315 }
0x20ae   :  { %v6318_v45 = vpop.eup %6317  ;;  %4420 = vrot.lane.b32.xlu2 %v6316_v11, %s6771_s5 }
0x20af   :  { %v4448_v31 = vmul.f32 %v6318_v45, %v4431_v34  ;;  %vm4453_vm12 = vweird.f32 %v6318_v45 }
0x20b0   :  { %vm4454_vm14 = vmor %vm4452_vm13, %vm4453_vm12 }
0x20b1   :  { %v4449_v22 = vsub.f32 1.0, %v4448_v31 }
0x20b3   :  { %v4450_v17 = vmul.f32 %v6318_v45, %v4449_v22 }
0x20b5   :  { %v4451_v27 = vadd.f32 %v6318_v45, %v4450_v17 }
0x20b7   :  { %v4455_v41 = vsel %vm4454_vm14, %v6318_v45, %v4451_v27 }
0x20b8   :  { %v4460_v55 = vsel %vm4457_vm15, %v4459_v13, %v4455_v41 }
0x20c4   :  { %v4477_v3 = vpop.permute.xlu2 %4476 }
0x20c5   :  { %v9257_v53 = vmul.f32 %v4477_v3, %v4460_v55 }
0x20c7   :  { %5831 = vmatmul.msk.f32.vlgmr.msrb.gmra.mxu0 %vm345_vm2, %v9257_v53  ;;  %5832 = vmatmul.msk.f32.vlgmr.msrb.gmra.mxu1 %vm345_vm2, %v9257_v53 }
0x20c8   :  { %4972 = vmatpush.msrb.mxu0 %v9083_v0  ;;  %4992 = vmatpush.msrb.mxu1 %v9086_v26  ;;  %v5826_v0 = vmul.f32 -1.442695, %v9236_v60 }
0x20ca   :  { %4973 = vmatpush.msrb.mxu0 %v9089_v24  ;;  %4993 = vmatpush.msrb.mxu1 %v9092_v47  ;;  %6319 = vpow2.f32 %v5826_v0 }
0x20cc   :  { %4974 = vmatpush.msrb.mxu0 %v9095_v25  ;;  %4994 = vmatpush.msrb.mxu1 %v9098_v6 }
0x20ce   :  { %4975 = vmatpush.msrb.mxu0 %v9101_v8  ;;  %4995 = vmatpush.msrb.mxu1 %v9104_v61 }
0x20d0   :  { %4976 = vmatpush.msrb.mxu0 %v9108_v15  ;;  %4996 = vmatpush.msrb.mxu1 %v9111_v56  ;;  %v6320_v26 = vpop.eup %6319 }
0x20d1   :  { %v4375_v24 = vadd.f32 1.0, %v6320_v26 }
0x20d2   :  { %4977 = vmatpush.msrb.mxu0 %v9114_v7  ;;  %4997 = vmatpush.msrb.mxu1 %v9117_v28 }
0x20d3   :  { %6321 = vrcp.f32 %v4375_v24  ;;  %v4402_v15 = vand.u32 2147483648, %v4375_v24  ;;  %vm4396_vm1 = vweird.f32 %v4375_v24  ;;  %v4400_v56 = vand.u32 2147483647, %v4375_v24 }
0x20d4   :  { %4978 = vmatpush.msrb.mxu0 %v9197_v63  ;;  %4998 = vmatpush.msrb.mxu1 %v9121_v18 }
0x20d5   :  { %v4403_v28 = vor.u32 1.1754944e-38, %v4402_v15  ;;  %vm4401_vm4 = vcmp.eq.f32.partialorder %v4400_v56, 8.507059e+37 }
0x20d6   :  { %4979 = vmatpush.msrb.mxu0 %v9202_v44  ;;  %4999 = vmatpush.msrb.mxu1 %v9125_v14 }
0x20d9   :  { %v6322_v47 = vpop.eup %6321 }
0x20da   :  { %v4392_v25 = vmul.f32 %v6322_v47, %v4375_v24  ;;  %vm4397_vm0 = vweird.f32 %v6322_v47 }
0x20db   :  { %vm4398_vm3 = vmor %vm4396_vm1, %vm4397_vm0 }
0x20dc   :  { %v4393_v6 = vsub.f32 1.0, %v4392_v25 }
0x20de   :  { %v4394_v8 = vmul.f32 %v6322_v47, %v4393_v6 }
0x20e0   :  { %v4395_v61 = vadd.f32 %v6322_v47, %v4394_v8 }
0x20e2   :  { %v4399_v7 = vsel %vm4398_vm3, %v6322_v47, %v4395_v61 }
0x20e3   :  { %v4404_v18 = vsel %vm4401_vm4, %v4403_v28, %v4399_v7 }
0x2108   :  { %v4421_v14 = vpop.permute.xlu2 %4420 }
0x2109   :  { %v9280_v63 = vmul.f32 %v4421_v14, %v4404_v18 }
0x210b   :  { %5829 = vmatmul.msk.f32.vlgmr.msra.gmra.mxu2 %vm345_vm2, %v9280_v63  ;;  %5830 = vmatmul.msk.f32.vlgmr.msrb.gmra.mxu3 %vm345_vm2, %v9280_v63 }
0x210c   :  { %4926 = vmatpush.msra.mxu2 %v8955_v20  ;;  %4946 = vmatpush.msrb.mxu3 %v8961_v16  ;;  %v9908_v20 = vld [vmem:[#allocation38_spill] sm:$0xff] }
0x210d   :  { %v723_v16 = vadd.f32 %v9908_v20, %v7612_v46 }
0x210e   :  { %4927 = vmatpush.msra.mxu2 %v8967_v2  ;;  %4947 = vmatpush.msrb.mxu3 %v8973_v62 }
0x2110   :  { %4928 = vmatpush.msra.mxu2 %v8979_v23  ;;  %4948 = vmatpush.msrb.mxu3 %v8985_v39 }
0x2112   :  { %4929 = vmatpush.msra.mxu2 %v8991_v48  ;;  %4949 = vmatpush.msrb.mxu3 %v8997_v35  ;;  %v9909_v48 = vld [vmem:[#allocation55_spill] sm:$0xff] }
0x2113   :  { %v552_v35 = vadd.f32 %v9909_v48, %v7454_v12 }
0x2114   :  { %4930 = vmatpush.msra.mxu2 %v9003_v51  ;;  %4950 = vmatpush.msrb.mxu3 %v9009_v57  ;;  %v9910_v51 = vld [vmem:[#allocation69_spill] sm:$0xff] }
0x2115   :  { %v646_v57 = vadd.f32 %v9910_v51, %v7642_v4 }
0x2116   :  { %4931 = vmatpush.msra.mxu2 %v9015_v59  ;;  %4951 = vmatpush.msrb.mxu3 %v9021_v29 }
0x2118   :  { %4932 = vmatpush.msra.mxu2 %v9027_v1  ;;  %4952 = vmatpush.msrb.mxu3 %v9033_v50 }
0x211a   :  { %4933 = vmatpush.msra.mxu2 %v9039_v32  ;;  %4953 = vmatpush.msrb.mxu3 %v9045_v5 }
0x2144   :  { %v4576_v2 = vpop.f32.mrf.mxu1  ;;  %v4556_v39 = vpop.f32.mrf.mxu0 }
0x2145   :  { %v9304_v62 = vadd.f32 %v4576_v2, %v723_v16  ;;  %v4579_v29 = vadd.f32 %v4556_v39, %v646_v57 }
0x2147   :  { %6323 = vtanh.f32 %v9304_v62  ;;  %v5835_v50 = vmul.f32 -1.442695, %v4579_v29  ;;  %v5836_v2 = vmul.f32 -1.442695, %v9304_v62 }
0x214d   :  { %v6324_v23 = vpop.eup %6323 }
0x214e   :  { %4678 = vrot.lane.b32.xlu0 %v6324_v23, %s6771_s5 }
0x218e   :  { %v4529_v59 = vpop.f32.mrf.mxu3  ;;  %v4509_v27 = vpop.f32.mrf.mxu2 }
0x218f   :  { %v9312_v1 = vadd.f32 %v4529_v59, %v552_v35  ;;  %v4532_v41 = vadd.f32 %v4509_v27, %v475_v33 }
0x2191   :  { %6325 = vtanh.f32 %v9312_v1  ;;  %v5833_v13 = vmul.f32 -1.442695, %v4532_v41 }
0x2192   :  { %6327 = vpow2.f32 %v5835_v50 }
0x2197   :  { %v6326_v32 = vpop.eup %6325 }
0x2198   :  { %4622 = vrot.lane.b32.xlu0 %v6326_v32, %s6771_s5  ;;  %v6328_v5 = vpop.eup %6327 }
0x2199   :  { %v4643_v44 = vadd.f32 1.0, %v6328_v5 }
0x219b   :  { %6329 = vrcp.f32 %v4643_v44  ;;  %v4656_v34 = vand.u32 2147483648, %v4643_v44  ;;  %vm4650_vm6 = vweird.f32 %v4643_v44  ;;  %v4654_v40 = vand.u32 2147483647, %v4643_v44 }
0x219c   :  { %6331 = vpow2.f32 %v5833_v13 }
0x219d   :  { %v4657_v45 = vor.u32 1.1754944e-38, %v4656_v34  ;;  %vm4655_vm8 = vcmp.eq.f32.partialorder %v4654_v40, 8.507059e+37 }
0x21a1   :  { %v6330_v60 = vpop.eup %6329 }
0x21a2   :  { %v4646_v58 = vmul.f32 %v6330_v60, %v4643_v44  ;;  %vm4651_vm5 = vweird.f32 %v6330_v60  ;;  %v6332_v55 = vpop.eup %6331 }
0x21a3   :  { %vm4652_vm7 = vmor %vm4650_vm6, %vm4651_vm5  ;;  %v4587_v3 = vadd.f32 1.0, %v6332_v55  ;;  %v9912_v55 = vld [vmem:[#allocation35_spill] sm:$0xff] }
0x21a4   :  { %v4647_v38 = vsub.f32 1.0, %v4646_v58 }
0x21a5   :  { %6333 = vrcp.f32 %v4587_v3  ;;  %v4600_v6 = vand.u32 2147483648, %v4587_v3  ;;  %vm4594_vm10 = vweird.f32 %v4587_v3  ;;  %v4598_v8 = vand.u32 2147483647, %v4587_v3 }
0x21a6   :  { %v4648_v9 = vmul.f32 %v6330_v60, %v4647_v38 }
0x21a7   :  { %v4601_v15 = vor.u32 1.1754944e-38, %v4600_v6  ;;  %vm4599_vm12 = vcmp.eq.f32.partialorder %v4598_v8, 8.507059e+37 }
0x21a8   :  { %v4649_v37 = vadd.f32 %v6330_v60, %v4648_v9  ;;  %v5834_v9 = vmul.f32 -1.442695, %v9312_v1 }
0x21aa   :  { %v4653_v11 = vsel %vm4652_vm7, %v6330_v60, %v4649_v37 }
0x21ab   :  { %v4658_v22 = vsel %vm4655_vm8, %v4657_v45, %v4653_v11  ;;  %v6334_v0 = vpop.eup %6333 }
0x21ac   :  { %v4590_v26 = vmul.f32 %v6334_v0, %v4587_v3  ;;  %vm4595_vm9 = vweird.f32 %v6334_v0  ;;  %v4676_v18 = vmul.f32 %v4658_v22, %v9247_v30  ;;  %v720_v3 = vadd.f32 %v9912_v55, %v7612_v46 }
0x21ad   :  { %vm4596_vm11 = vmor %vm4594_vm10, %vm4595_vm9 }
0x21ae   :  { %v4591_v24 = vsub.f32 1.0, %v4590_v26 }
0x21b0   :  { %v4592_v47 = vmul.f32 %v6334_v0, %v4591_v24 }
0x21b2   :  { %v4593_v25 = vadd.f32 %v6334_v0, %v4592_v47 }
0x21b4   :  { %v4597_v61 = vsel %vm4596_vm11, %v6334_v0, %v4593_v25  ;;  %v9913_v25 = vld [vmem:[#allocation67_spill] sm:$0xff] }
0x21b5   :  { %v4602_v7 = vsel %vm4599_vm12, %v4601_v15, %v4597_v61  ;;  %v643_v6 = vadd.f32 %v9913_v25, %v7642_v4 }
0x21b6   :  { %v4620_v48 = vmul.f32 %v4602_v7, %v9253_v43 }
0x21c0   :  { %v4679_v31 = vpop.permute.xlu0 %4678 }
0x21c1   :  { %v4681_v17 = vmul.f32 %v4679_v31, %v4658_v22 }
0x21c3   :  { %4683 = vrot.lane.b32.xlu1 %v4681_v17, %s6771_s5 }
0x220a   :  { %v4623_v56 = vpop.permute.xlu0 %4622 }
0x220b   :  { %v4625_v28 = vmul.f32 %v4623_v56, %v4602_v7 }
0x220d   :  { %4627 = vrot.lane.b32.xlu1 %v4625_v28, %s6771_s5 }
0x2235   :  { %v4684_v14 = vpop.permute.xlu1 %4683 }
0x2236   :  { %v9321_v20 = vadd.f32 %v4684_v14, %v4676_v18 }
0x2238   :  { %6335 = vtanh.f32 %v9321_v20 }
0x2239   :  { %6337 = vpow2.f32 %v5836_v2 }
0x223e   :  { %v6336_v16 = vpop.eup %6335 }
0x223f   :  { %4689 = vrot.lane.b32.xlu2 %v6336_v16, %s6771_s5  ;;  %v6338_v23 = vpop.eup %6337 }
0x2240   :  { %v4644_v39 = vadd.f32 1.0, %v6338_v23 }
0x2242   :  { %6339 = vrcp.f32 %v4644_v39  ;;  %v4671_v62 = vand.u32 2147483648, %v4644_v39  ;;  %vm4665_vm14 = vweird.f32 %v4644_v39  ;;  %v4669_v5 = vand.u32 2147483647, %v4644_v39 }
0x2244   :  { %v4672_v43 = vor.u32 1.1754944e-38, %v4671_v62  ;;  %vm4670_vm0 = vcmp.eq.f32.partialorder %v4669_v5, 8.507059e+37 }
0x2248   :  { %v6340_v30 = vpop.eup %6339 }
0x2249   :  { %v4661_v57 = vmul.f32 %v6340_v30, %v4644_v39  ;;  %vm4666_vm13 = vweird.f32 %v6340_v30 }
0x224a   :  { %vm4667_vm15 = vmor %vm4665_vm14, %vm4666_vm13 }
0x224b   :  { %v4662_v29 = vsub.f32 1.0, %v4661_v57 }
0x224d   :  { %v4663_v50 = vmul.f32 %v6340_v30, %v4662_v29 }
0x224f   :  { %v4664_v32 = vadd.f32 %v6340_v30, %v4663_v50 }
0x2251   :  { %v4668_v44 = vsel %vm4667_vm15, %v6340_v30, %v4664_v32 }
0x2252   :  { %v4673_v60 = vsel %vm4670_vm0, %v4672_v43, %v4668_v44  ;;  %v9915_v44 = vld [vmem:[#allocation57_spill] sm:$0xff] }
0x2253   :  { %v478_v43 = vadd.f32 %v9915_v44, %v7570_v42 }
0x227f   :  { %v4628_v35 = vpop.permute.xlu1 %4627 }
0x2280   :  { %v9327_v51 = vadd.f32 %v4628_v35, %v4620_v48 }
0x2282   :  { %6341 = vtanh.f32 %v9327_v51 }
0x2283   :  { %6343 = vpow2.f32 %v5834_v9 }
0x2288   :  { %v6342_v59 = vpop.eup %6341 }
0x2289   :  { %4633 = vrot.lane.b32.xlu0 %v6342_v59, %s6771_s5  ;;  %v6344_v37 = vpop.eup %6343  ;;  %v9914_v59 = vld [vmem:[#allocation58_spill] sm:$0xff] }
0x228a   :  { %v4588_v34 = vadd.f32 1.0, %v6344_v37  ;;  %v555_v29 = vadd.f32 %v9914_v59, %v7454_v12 }
0x228c   :  { %6345 = vrcp.f32 %v4588_v34  ;;  %v4615_v17 = vand.u32 2147483648, %v4588_v34  ;;  %vm4609_vm3 = vweird.f32 %v4588_v34  ;;  %v4613_v27 = vand.u32 2147483647, %v4588_v34 }
0x228e   :  { %v4616_v33 = vor.u32 1.1754944e-38, %v4615_v17  ;;  %vm4614_vm5 = vcmp.eq.f32.partialorder %v4613_v27, 8.507059e+37 }
0x2292   :  { %v6346_v40 = vpop.eup %6345 }
0x2293   :  { %v4605_v11 = vmul.f32 %v6346_v40, %v4588_v34  ;;  %vm4610_vm1 = vweird.f32 %v6346_v40 }
0x2294   :  { %vm4611_vm4 = vmor %vm4609_vm3, %vm4610_vm1 }
0x2295   :  { %v4606_v45 = vsub.f32 1.0, %v4605_v11 }
0x2297   :  { %v4607_v31 = vmul.f32 %v6346_v40, %v4606_v45 }
0x2299   :  { %v4690_v58 = vpop.permute.xlu2 %4689  ;;  %v4608_v22 = vadd.f32 %v6346_v40, %v4607_v31 }
0x229a   :  { %v9331_v38 = vmul.f32 %v4690_v58, %v4673_v60 }
0x229b   :  { %v4612_v21 = vsel %vm4611_vm4, %v6346_v40, %v4608_v22 }
0x229c   :  { %5839 = vmatmul.msk.f32.vlgmr.msra.gmra.mxu0 %vm345_vm2, %v9331_v38  ;;  %5840 = vmatmul.msk.f32.vlgmr.msra.gmra.mxu1 %vm345_vm2, %v9331_v38  ;;  %v4617_v41 = vsel %vm4614_vm5, %v4616_v33, %v4612_v21 }
0x22fb   :  { %v4634_v13 = vpop.permute.xlu0 %4633 }
0x22fc   :  { %v9338_v1 = vmul.f32 %v4634_v13, %v4617_v41 }
0x22fe   :  { %5837 = vmatmul.msk.f32.vlgmr.msrb.gmra.mxu2 %vm345_vm2, %v9338_v1  ;;  %5838 = vmatmul.msk.f32.vlgmr.msra.gmra.mxu3 %vm345_vm2, %v9338_v1 }
0x2319   :  { %v4789_v0 = vpop.f32.mrf.mxu1  ;;  %v4769_v47 = vpop.f32.mrf.mxu0 }
0x231a   :  { %v9346_v26 = vadd.f32 %v4789_v0, %v720_v3  ;;  %v4792_v8 = vadd.f32 %v4769_v47, %v643_v6 }
0x231c   :  { %6347 = vtanh.f32 %v9346_v26  ;;  %v5843_v61 = vmul.f32 -1.442695, %v4792_v8 }
0x231e   :  { %6349 = vpow2.f32 %v5843_v61 }
0x2322   :  { %v6348_v24 = vpop.eup %6347 }
0x2323   :  { %4891 = vrot.lane.b32.xlu2 %v6348_v24, %s6771_s5  ;;  %v5844_v24 = vmul.f32 -1.442695, %v9346_v26 }
0x2324   :  { %v6350_v15 = vpop.eup %6349 }
0x2325   :  { %v4856_v56 = vadd.f32 1.0, %v6350_v15 }
0x2327   :  { %6351 = vrcp.f32 %v4856_v56  ;;  %v4869_v2 = vand.u32 2147483648, %v4856_v56  ;;  %vm4863_vm7 = vweird.f32 %v4856_v56  ;;  %v4867_v23 = vand.u32 2147483647, %v4856_v56 }
0x2329   :  { %v4870_v48 = vor.u32 1.1754944e-38, %v4869_v2  ;;  %vm4868_vm9 = vcmp.eq.f32.partialorder %v4867_v23, 8.507059e+37 }
0x232d   :  { %v6352_v7 = vpop.eup %6351 }
0x232e   :  { %v4859_v28 = vmul.f32 %v6352_v7, %v4856_v56  ;;  %vm4864_vm6 = vweird.f32 %v6352_v7 }
0x232f   :  { %vm4865_vm8 = vmor %vm4863_vm7, %vm4864_vm6 }
0x2330   :  { %v4860_v18 = vsub.f32 1.0, %v4859_v28 }
0x2332   :  { %v4861_v14 = vmul.f32 %v6352_v7, %v4860_v18 }
0x2334   :  { %v4862_v16 = vadd.f32 %v6352_v7, %v4861_v14 }
0x2336   :  { %v4866_v39 = vsel %vm4865_vm8, %v6352_v7, %v4862_v16 }
0x2337   :  { %v4871_v30 = vsel %vm4868_vm9, %v4870_v48, %v4866_v39 }
0x2338   :  { %v4889_v45 = vmul.f32 %v4871_v30, %v9321_v20 }
0x237d   :  { %v4892_v35 = vpop.permute.xlu2 %4891 }
0x237e   :  { %v4894_v57 = vmul.f32 %v4892_v35, %v4871_v30 }
0x2380   :  { %4896 = vrot.lane.b32.xlu1 %v4894_v57, %s6771_s5 }
0x2381   :  { %v4742_v50 = vpop.f32.mrf.mxu3  ;;  %v4722_v5 = vpop.f32.mrf.mxu2 }
0x2382   :  { %v9355_v32 = vadd.f32 %v4742_v50, %v555_v29  ;;  %v4745_v60 = vadd.f32 %v4722_v5, %v478_v43  ;;  %v9916_v29 = vld [vmem:[#allocation33_spill] sm:$0xff] }
0x2383   :  { %v717_v50 = vadd.f32 %v9916_v29, %v7612_v46 }
0x2384   :  { %6353 = vtanh.f32 %v9355_v32  ;;  %v5841_v58 = vmul.f32 -1.442695, %v4745_v60  ;;  %v5842_v30 = vmul.f32 -1.442695, %v9355_v32 }
0x2386   :  { %6355 = vpow2.f32 %v5841_v58 }
0x238a   :  { %v6354_v62 = vpop.eup %6353 }
0x238b   :  { %4835 = vrot.lane.b32.xlu0 %v6354_v62, %s6771_s5 }
0x238c   :  { %v6356_v9 = vpop.eup %6355 }
0x238d   :  { %v4800_v37 = vadd.f32 1.0, %v6356_v9 }
0x238f   :  { %6357 = vrcp.f32 %v4800_v37  ;;  %v4813_v21 = vand.u32 2147483648, %v4800_v37  ;;  %vm4807_vm11 = vweird.f32 %v4800_v37  ;;  %v4811_v33 = vand.u32 2147483647, %v4800_v37 }
0x2391   :  { %v4814_v55 = vor.u32 1.1754944e-38, %v4813_v21  ;;  %vm4812_vm13 = vcmp.eq.f32.partialorder %v4811_v33, 8.507059e+37 }
0x2395   :  { %v6358_v34 = vpop.eup %6357 }
0x2396   :  { %v4803_v40 = vmul.f32 %v6358_v34, %v4800_v37  ;;  %vm4808_vm10 = vweird.f32 %v6358_v34 }
0x2397   :  { %vm4809_vm12 = vmor %vm4807_vm11, %vm4808_vm10  ;;  %vm1058_vm11 = vcmask 1048064  }
0x2398   :  { %v4804_v11 = vsub.f32 1.0, %v4803_v40 }
0x239a   :  { %v4805_v22 = vmul.f32 %v6358_v34, %v4804_v11 }
0x239c   :  { %v4806_v27 = vadd.f32 %v6358_v34, %v4805_v22  ;;  %v9917_v22 = vld [vmem:[#allocation64_spill] sm:$0xff] }
0x239e   :  { %v4810_v41 = vsel %vm4809_vm12, %v6358_v34, %v4806_v27  ;;  %v640_v27 = vadd.f32 %v9917_v22, %v7642_v4 }
0x239f   :  { %v4815_v20 = vsel %vm4812_vm13, %v4814_v55, %v4810_v41 }
0x23a0   :  { %v4833_v23 = vmul.f32 %v4815_v20, %v9327_v51 }
0x23f2   :  { %v4897_v31 = vpop.permute.xlu1 %4896 }
0x23f3   :  { %v9362_v17 = vadd.f32 %v4897_v31, %v4889_v45 }
0x23f5   :  { %6359 = vtanh.f32 %v9362_v17 }
0x23f6   :  { %6361 = vpow2.f32 %v5844_v24 }
0x23fb   :  { %v6360_v13 = vpop.eup %6359 }
0x23fc   :  { %4902 = vrot.lane.b32.xlu2 %v6360_v13, %s6771_s5  ;;  %v6362_v47 = vpop.eup %6361 }
0x23fd   :  { %v4836_v3 = vpop.permute.xlu0 %4835  ;;  %v4857_v25 = vadd.f32 1.0, %v6362_v47 }
0x23fe   :  { %v4838_v0 = vmul.f32 %v4836_v3, %v4815_v20 }
0x23ff   :  { %6363 = vrcp.f32 %v4857_v25  ;;  %v4884_v7 = vand.u32 2147483648, %v4857_v25  ;;  %vm4878_vm15 = vweird.f32 %v4857_v25  ;;  %v4882_v28 = vand.u32 2147483647, %v4857_v25 }
0x2400   :  { %4840 = vrot.lane.b32.xlu1 %v4838_v0, %s6771_s5 }
0x2401   :  { %v4885_v14 = vor.u32 1.1754944e-38, %v4884_v7  ;;  %vm4883_vm1 = vcmp.eq.f32.partialorder %v4882_v28, 8.507059e+37 }
0x2405   :  { %v6364_v6 = vpop.eup %6363 }
0x2406   :  { %v4874_v8 = vmul.f32 %v6364_v6, %v4857_v25  ;;  %vm4879_vm14 = vweird.f32 %v6364_v6 }
0x2407   :  { %vm4880_vm0 = vmor %vm4878_vm15, %vm4879_vm14 }
0x2408   :  { %v4875_v61 = vsub.f32 1.0, %v4874_v8 }
0x240a   :  { %v4876_v15 = vmul.f32 %v6364_v6, %v4875_v61 }
0x240c   :  { %v4877_v56 = vadd.f32 %v6364_v6, %v4876_v15 }
0x240e   :  { %v4881_v18 = vsel %vm4880_vm0, %v6364_v6, %v4877_v56  ;;  %v9918_v56 = vld [vmem:[#allocation88_spill] sm:$0xff] }
0x240f   :  { %v4886_v16 = vsel %vm4883_vm1, %v4885_v14, %v4881_v18 }
0x2456   :  { %v4903_v2 = vpop.permute.xlu2 %4902 }
0x2457   :  { %v4905_v26 = vmul.f32 %v4903_v2, %v4886_v16  ;;  %v9920_v16 = vld [vmem:[#allocation85_spill] sm:$0xff] }
0x2459   :  { %5847 = vmatmul.msk.f32.vlgmr.msrb.gmra.mxu0 %vm345_vm2, %v4905_v26  ;;  %5848 = vmatmul.msk.f32.vlgmr.msrb.gmra.mxu1 %vm345_vm2, %v4905_v26 }
0x2472   :  { %v4841_v39 = vpop.permute.xlu1 %4840 }
0x2473   :  { %v9371_v48 = vadd.f32 %v4841_v39, %v4833_v23  ;;  %v9922_v23 = vld [vmem:[#allocation23_spill] sm:$0xff] }
0x2475   :  { %6365 = vtanh.f32 %v9371_v48 }
0x2476   :  { %6367 = vpow2.f32 %v5842_v30 }
0x247b   :  { %v6366_v35 = vpop.eup %6365 }
0x247c   :  { %4846 = vrot.lane.b32.xlu0 %v6366_v35, %s6771_s5  ;;  %v6368_v57 = vpop.eup %6367  ;;  %v9923_v35 = vld [vmem:[#allocation70_spill] sm:$0xff] }
0x247d   :  { %v4801_v59 = vadd.f32 1.0, %v6368_v57 }
0x247f   :  { %6369 = vrcp.f32 %v4801_v59  ;;  %v4828_v9 = vand.u32 2147483648, %v4801_v59  ;;  %vm4822_vm4 = vweird.f32 %v4801_v59  ;;  %v4826_v37 = vand.u32 2147483647, %v4801_v59 }
0x2481   :  { %v4829_v46 = vor.u32 1.1754944e-38, %v4828_v9  ;;  %vm4827_vm6 = vcmp.eq.f32.partialorder %v4826_v37, 8.507059e+37 }
0x2485   :  { %v6370_v51 = vpop.eup %6369 }
0x2486   :  { %v4818_v44 = vmul.f32 %v6370_v51, %v4801_v59  ;;  %vm4823_vm3 = vweird.f32 %v6370_v51 }
0x2487   :  { %vm4824_vm5 = vmor %vm4822_vm4, %vm4823_vm3 }
0x2488   :  { %v4819_v60 = vsub.f32 1.0, %v4818_v44 }
0x248a   :  { %v4820_v58 = vmul.f32 %v6370_v51, %v4819_v60 }
0x248c   :  { %v4821_v32 = vadd.f32 %v6370_v51, %v4820_v58 }
0x248e   :  { %v4825_v34 = vsel %vm4824_vm5, %v6370_v51, %v4821_v32  ;;  %v9924_v51 = vld [vmem:[#allocation60_spill] sm:$0xff] }
0x248f   :  { %v4830_v40 = vsel %vm4827_vm6, %v4829_v46, %v4825_v34  ;;  %v481_v44 = vadd.f32 %v9924_v51, %v7570_v42 }
0x24d6   :  { %v5001_v62 = vpop.f32.mrf.mxu1  ;;  %v4981_v31 = vpop.f32.mrf.mxu0 }
0x24d7   :  { %v9378_v5 = vadd.f32 %v5001_v62, %v717_v50  ;;  %v5004_v21 = vadd.f32 %v4981_v31, %v640_v27 }
0x24d9   :  { %6371 = vtanh.f32 %v9378_v5  ;;  %v5851_v33 = vmul.f32 -1.442695, %v5004_v21  ;;  %v5852_v30 = vmul.f32 -1.442695, %v9378_v5 }
0x24db   :  { %6373 = vpow2.f32 %v5851_v33 }
0x24df   :  { %v6372_v43 = vpop.eup %6371 }
0x24e0   :  { %5103 = vrot.lane.b32.xlu2 %v6372_v43, %s6771_s5 }
0x24e1   :  { %v6374_v41 = vpop.eup %6373 }
0x24e2   :  { %v5068_v13 = vadd.f32 1.0, %v6374_v41 }
0x24e4   :  { %6375 = vrcp.f32 %v5068_v13  ;;  %v5081_v47 = vand.u32 2147483648, %v5068_v13  ;;  %vm5075_vm8 = vweird.f32 %v5068_v13  ;;  %v5079_v25 = vand.u32 2147483647, %v5068_v13 }
0x24e6   :  { %v5082_v8 = vor.u32 1.1754944e-38, %v5081_v47  ;;  %vm5080_vm10 = vcmp.eq.f32.partialorder %v5079_v25, 8.507059e+37  ;;  %v5159_v25 = vld [vmem:[#allocation11 + $0x78] sm:$0xff] }
0x24e7   :  { %5164 = vmatpush.msrb.mxu2 %v5159_v25 }
0x24ea   :  { %v6376_v55 = vpop.eup %6375 }
0x24eb   :  { %v5071_v3 = vmul.f32 %v6376_v55, %v5068_v13  ;;  %vm5076_vm7 = vweird.f32 %v6376_v55 }
0x24ec   :  { %vm5077_vm9 = vmor %vm5075_vm8, %vm5076_vm7 }
0x24ed   :  { %v5072_v20 = vsub.f32 1.0, %v5071_v3 }
0x24ee   :  { %v4847_v11 = vpop.permute.xlu0 %4846 }
0x24ef   :  { %v9382_v45 = vmul.f32 %v4847_v11, %v4830_v40  ;;  %v5073_v0 = vmul.f32 %v6376_v55, %v5072_v20 }
0x24f1   :  { %5845 = vmatmul.msk.f32.vlgmr.msra.gmra.mxu2 %vm345_vm2, %v9382_v45  ;;  %5846 = vmatmul.msk.f32.vlgmr.msrb.gmra.mxu3 %vm345_vm2, %v9382_v45  ;;  %v5074_v24 = vadd.f32 %v6376_v55, %v5073_v0 }
0x24f3   :  { %v5078_v6 = vsel %vm5077_vm9, %v6376_v55, %v5074_v24  ;;  %v9925_v24 = vld [vmem:[#allocation24_spill] sm:$0xff] }
0x24f4   :  { %v5083_v61 = vsel %vm5080_vm10, %v5082_v8, %v5078_v6  ;;  %v5158_v6 = vld [vmem:[#allocation11 + $0x70] sm:$0xff]  ;;  %vm5586_vm10 = vcmask 7168  }
0x24f5   :  { %5165 = vmatpush.msrb.mxu2 %v5158_v6 }
0x253a   :  { %v5104_v4 = vpop.permute.xlu2 %5103 }
0x253b   :  { %v5106_v15 = vmul.f32 %v5104_v4, %v5083_v61  ;;  %v5157_v4 = vld [vmem:[#allocation11 + $0x68] sm:$0xff] }
0x253c   :  { %5166 = vmatpush.msrb.mxu2 %v5157_v4 }
0x253d   :  { %5108 = vrot.lane.b32.xlu1 %v5106_v15, %s6771_s5 }
0x2545   :  { %4908 = vrot.lane.b32.xlu1 %v4905_v26, %s6771_s5 }
0x254d   :  { %4269 = vrot.lane.b32.xlu1 %v9179_v52, %s6771_s5  ;;  %v5101_v52 = vmul.f32 %v5083_v61, %v9362_v17 }
0x2555   :  { %3630 = vrot.lane.b32.xlu1 %v8850_v36, %s6771_s5 }
0x255d   :  { %3204 = vrot.lane.b32.xlu1 %v8670_v10, %s6771_s5 }
0x2565   :  { %2560 = vrot.lane.b32.xlu1 %v8373_v19, %s6771_s5 }
0x256d   :  { %2130 = vrot.lane.b32.xlu1 %v8182_v54, %s6771_s5  ;;  %v9919_v54 = vld [vmem:[#allocation61_spill] sm:$0xff] }
0x256e   :  { %v558_v17 = vadd.f32 %v9919_v54, %v7454_v12  ;;  %v9921_v12 = vld [vmem:[#allocation25_spill] sm:$0xff] }
0x256f   :  { %v5151_v54 = vld [vmem:[#allocation11 + $0x38] sm:$0xff] }
0x2574   :  { %v4935_v62 = vpop.f32.mrf.mxu2 }
0x2575   :  { %1485 = vrot.lane.b32.xlu1 %v7925_v49, %s6771_s5  ;;  %v4955_v49 = vpop.f32.mrf.mxu3  ;;  %v4958_v43 = vadd.f32 %v4935_v62, %v481_v44 }
0x2576   :  { %v9414_v18 = vadd.f32 %v4955_v49, %v558_v17  ;;  %v9927_v17 = vld [vmem:[#allocation22_spill] sm:$0xff] }
0x2577   :  { %v5849_v5 = vmul.f32 -1.442695, %v4958_v43 }
0x257d   :  { %1054 = vrot.lane.b32.xlu1 %v9918_v56, %s6771_s5 }
0x25af   :  { %v5109_v7 = vpop.permute.xlu1 %5108 }
0x25b0   :  { %v5111_v28 = vadd.f32 %v5109_v7, %v5101_v52  ;;  %v5155_v7 = vld [vmem:[#allocation11 + $0x58] sm:$0xff] }
0x25b2   :  { %6377 = vtanh.f32 %v5111_v28  ;;  %v9926_v28 = vld [vmem:[#allocation74_spill] sm:$0xff] }
0x25b3   :  { %6379 = vtanh.f32 %v9414_v18 }
0x25b4   :  { %6381 = vpow2.f32 %v5852_v30  ;;  %v5146_v30 = vld [vmem:[#allocation11 + $0x10] sm:$0xff] }
0x25b7   :  { %v4909_v36 = vpop.permute.xlu1 %4908 }
0x25b8   :  { %v6378_v10 = vpop.eup %6377  ;;  %4911 = vst.msk [vmem:[#allocation2 + $0x8] sm:$0xff] %vm1058_vm11, %v4909_v36  ;;  %v5154_v36 = vld [vmem:[#allocation11 + $0x50] sm:$0xff] }
0x25b9   :  { %5114 = vrot.lane.b32.xlu2 %v6378_v10, %s6771_s5  ;;  %v6380_v26 = vpop.eup %6379  ;;  %v5153_v10 = vld [vmem:[#allocation11 + $0x48] sm:$0xff] }
0x25ba   :  { %v6382_v29 = vpop.eup %6381 }
0x25bb   :  { %v5069_v50 = vadd.f32 1.0, %v6382_v29 }
0x25bd   :  { %6383 = vrcp.f32 %v5069_v50  ;;  %v5096_v46 = vand.u32 2147483648, %v5069_v50  ;;  %vm5090_vm13 = vweird.f32 %v5069_v50  ;;  %v5094_v40 = vand.u32 2147483647, %v5069_v50 }
0x25be   :  { %6385 = vpow2.f32 %v5849_v5 }
0x25bf   :  { %v4270_v19 = vpop.permute.xlu1 %4269  ;;  %v5097_v31 = vor.u32 1.1754944e-38, %v5096_v46  ;;  %vm5095_vm15 = vcmp.eq.f32.partialorder %v5094_v40, 8.507059e+37  ;;  %v9934_v40 = vld [vmem:[#allocation86_spill] sm:$0xff] }
0x25c0   :  { %4272 = vst.msk [vmem:[#allocation2 + $0x20] sm:$0xff] %vm1058_vm11, %v4270_v19  ;;  %v5152_v19 = vld [vmem:[#allocation11 + $0x40] sm:$0xff] }
0x25c1   :  { %4695 = vrot.lane.b32.xlu2 %v9331_v38, %s6771_s5 }
0x25c3   :  { %v6384_v60 = vpop.eup %6383 }
0x25c4   :  { %v5086_v58 = vmul.f32 %v6384_v60, %v5069_v50  ;;  %v6386_v9 = vpop.eup %6385  ;;  %vm5091_vm12 = vweird.f32 %v6384_v60 }
0x25c5   :  { %vm5092_vm14 = vmor %vm5090_vm13, %vm5091_vm12 }
0x25c6   :  { %v5087_v32 = vsub.f32 1.0, %v5086_v58 }
0x25c7   :  { %v3631_v14 = vpop.permute.xlu1 %3630 }
0x25c8   :  { %3633 = vst.msk [vmem:[#allocation2 + $0x38] sm:$0xff] %vm1058_vm11, %v3631_v14  ;;  %v5088_v37 = vmul.f32 %v6384_v60, %v5087_v32  ;;  %v9928_v14 = vld [vmem:[#allocation87_spill] sm:$0xff] }
0x25c9   :  { %4056 = vrot.lane.b32.xlu2 %v9920_v16, %s6771_s5  ;;  %v9929_v16 = vld [vmem:[#allocation20_spill] sm:$0xff] }
0x25ca   :  { %v5089_v34 = vadd.f32 %v6384_v60, %v5088_v37 }
0x25cc   :  { %v5093_v11 = vsel %vm5092_vm14, %v6384_v60, %v5089_v34 }
0x25cd   :  { %v5098_v42 = vsel %vm5095_vm15, %v5097_v31, %v5093_v11  ;;  %v9487_v31 = vld [vmem:[#allocation2 + $0x20] sm:$0xff] }
0x25cf   :  { %v3205_v2 = vpop.permute.xlu1 %3204 }
0x25d0   :  { %3207 = vst.msk [vmem:[#allocation2 + $0x48] sm:$0xff] %vm1058_vm11, %v3205_v2  ;;  %v5150_v2 = vld [vmem:[#allocation11 + $0x30] sm:$0xff] }
0x25d1   :  { %5047 = vrot.lane.b32.xlu2 %v6380_v26, %s6771_s5  ;;  %v5149_v26 = vld [vmem:[#allocation11 + $0x28] sm:$0xff] }
0x25d7   :  { %v2561_v38 = vpop.permute.xlu1 %2560 }
0x25d8   :  { %2564 = vst.msk [vmem:[#allocation2 + $0x60] sm:$0xff] %vm1058_vm11, %v2561_v38  ;;  %v5148_v38 = vld [vmem:[#allocation11 + $0x20] sm:$0xff] }
0x25d9   :  { %3628 = vst.msk [vmem:[#allocation2 + $0x60] sm:$0xff] %vm345_vm2, %v9921_v12  ;;  %2990 = vrot.lane.b32.xlu2 %v9922_v23, %s6771_s5  ;;  %v9930_v12 = vld [vmem:[#allocation76_spill] sm:$0xff]  ;;  %v9931_v23 = vld [vmem:[#allocation89_spill] sm:$0xff] }
0x25df   :  { %v2131_v39 = vpop.permute.xlu1 %2130 }
0x25e0   :  { %2134 = vst.msk [vmem:[#allocation2 + $0x70] sm:$0xff] %vm1058_vm11, %v2131_v39  ;;  %v9932_v39 = vld [vmem:[#allocation21_spill] sm:$0xff] }
0x25e1   :  { %4054 = vst.msk [vmem:[#allocation2 + $0x70] sm:$0xff] %vm345_vm2, %v9923_v35  ;;  %v5147_v35 = vld [vmem:[#allocation11 + $0x18] sm:$0xff] }
0x25e7   :  { %v1486_v57 = vpop.permute.xlu1 %1485 }
0x25e8   :  { %1489 = vst.msk [vmem:[#allocation2 + $0x88] sm:$0xff] %vm1058_vm11, %v1486_v57  ;;  %v5145_v57 = vld [vmem:[#allocation11 + $0x8] sm:$0xff] }
0x25e9   :  { %4693 = vst.msk [vmem:[#allocation2 + $0x88] sm:$0xff] %vm345_vm2, %v9338_v1  ;;  %v5012_v1 = vadd.f32 1.0, %v6386_v9  ;;  %v9470_v9 = vld [vmem:[#allocation2 + $0x8] sm:$0xff] }
0x25eb   :  { %6387 = vrcp.f32 %v5012_v1  ;;  %v5025_v0 = vand.u32 2147483648, %v5012_v1  ;;  %vm5019_vm1 = vweird.f32 %v5012_v1  ;;  %v5023_v47 = vand.u32 2147483647, %v5012_v1 }
0x25ed   :  { %v5026_v61 = vor.u32 1.1754944e-38, %v5025_v0  ;;  %vm5024_vm4 = vcmp.eq.f32.partialorder %v5023_v47, 8.507059e+37 }
0x25ef   :  { %v1055_v59 = vpop.permute.xlu1 %1054 }
0x25f0   :  { %1059 = vst.msk [vmem:[#allocation2 + $0x98] sm:$0xff] %vm1058_vm11, %v1055_v59  ;;  %v5144_v59 = vld [vmem:[#allocation11] sm:$0xff] }
0x25f1   :  { %v6388_v21 = vpop.eup %6387 }
0x25f2   :  { %v5015_v33 = vmul.f32 %v6388_v21, %v5012_v1  ;;  %vm5020_vm0 = vweird.f32 %v6388_v21 }
0x25f3   :  { %vm5021_vm3 = vmor %vm5019_vm1, %vm5020_vm0 }
0x25f4   :  { %v5016_v13 = vsub.f32 1.0, %v5015_v33 }
0x25f6   :  { %v5017_v55 = vmul.f32 %v6388_v21, %v5016_v13  ;;  %v9509_v13 = vld [vmem:[#allocation2 + $0x48] sm:$0xff] }
0x25f8   :  { %v5018_v20 = vadd.f32 %v6388_v21, %v5017_v55 }
0x25fa   :  { %v5022_v8 = vsel %vm5021_vm3, %v6388_v21, %v5018_v20  ;;  %v9502_v21 = vld [vmem:[#allocation2 + $0x38] sm:$0xff] }
0x25fb   :  { %v5027_v15 = vsel %vm5024_vm4, %v5026_v61, %v5022_v8 }
0x25fc   :  { %v5045_v29 = vmul.f32 %v5027_v15, %v9371_v48  ;;  %v9933_v48 = vld [vmem:[#allocation27_spill] sm:$0xff] }
0x2613   :  { %v5115_v22 = vpop.permute.xlu2 %5114 }
0x2614   :  { %v5117_v27 = vmul.f32 %v5115_v22, %v5098_v42 }
0x2616   :  { %5120 = vrot.lane.b32.xlu0 %v5117_v27, %s6771_s5 }
0x261b   :  { %v4696_v41 = vpop.permute.xlu2 %4695 }
0x261c   :  { %4698 = vst.msk [vmem:[#allocation2 + $0x10] sm:$0xff] %vm1058_vm11, %v4696_v41  ;;  %v5850_v41 = vmul.f32 -1.442695, %v9414_v18 }
0x261e   :  { %4482 = vrot.lane.b32.xlu0 %v9257_v53, %s6771_s5  ;;  %v5156_v53 = vld [vmem:[#allocation11 + $0x60] sm:$0xff] }
0x261f   :  { %5167 = vmatpush.msrb.mxu2 %v5156_v53  ;;  %v9524_v53 = vld [vmem:[#allocation2 + $0x70] sm:$0xff] }
0x2621   :  { %5168 = vmatpush.msrb.mxu2 %v5155_v7 }
0x2623   :  { %v4057_v3 = vpop.permute.xlu2 %4056  ;;  %5169 = vmatpush.msrb.mxu2 %v5154_v36  ;;  %v9477_v1 = vld [vmem:[#allocation2 + $0x10] sm:$0xff] }
0x2624   :  { %4059 = vst.msk [vmem:[#allocation2 + $0x28] sm:$0xff] %vm1058_vm11, %v4057_v3 }
0x2625   :  { %5170 = vmatpush.msrb.mxu2 %v5153_v10 }
0x2626   :  { %3843 = vrot.lane.b32.xlu0 %v9925_v24, %s6771_s5  ;;  %v9518_v24 = vld [vmem:[#allocation2 + $0x60] sm:$0xff] }
0x2627   :  { %5171 = vmatpush.msrb.mxu2 %v5152_v19  ;;  %v9534_v19 = vld [vmem:[#allocation13] ss:$0 sm:$0xff] }
0x2629   :  { %5172 = vmatpush.msrb.mxu2 %v5151_v54 }
0x262b   :  { %v5048_v56 = vpop.permute.xlu2 %5047  ;;  %5173 = vmatpush.msrb.mxu2 %v5150_v2  ;;  %v9493_v22 = vld [vmem:[#allocation2 + $0x28] sm:$0xff] }
0x262c   :  { %v5050_v52 = vmul.f32 %v5048_v56, %v5027_v15 }
0x262d   :  { %5174 = vmatpush.msrb.mxu2 %v5149_v26 }
0x262e   :  { %3417 = vrot.lane.b32.xlu0 %v9926_v28, %s6771_s5  ;;  %5052 = vrot.lane.b32.xlu2 %v5050_v52, %s6771_s5 }
0x262f   :  { %5175 = vmatpush.msrb.mxu2 %v5148_v38 }
0x2631   :  { %5176 = vmatpush.msrb.mxu2 %v5147_v35 }
0x2633   :  { %v2991_v49 = vpop.permute.xlu2 %2990  ;;  %5177 = vmatpush.msrb.mxu2 %v5146_v30 }
0x2634   :  { %2994 = vst.msk [vmem:[#allocation2 + $0x50] sm:$0xff] %vm1058_vm11, %v2991_v49 }
0x2635   :  { %3202 = vst.msk [vmem:[#allocation2 + $0x50] sm:$0xff] %vm345_vm2, %v9927_v17  ;;  %5178 = vmatpush.msrb.mxu2 %v5145_v57  ;;  %v9537_v17 = vld [vmem:[#allocation2 + $0x88] sm:$0xff] }
0x2636   :  { %2775 = vrot.lane.b32.xlu0 %v9928_v14, %s6771_s5  ;;  %1915 = vrot.lane.b32.xlu2 %v9929_v16, %s6771_s5 }
0x2637   :  { %5179 = vmatpush.msrb.mxu2 %v5144_v59 }
0x263e   :  { %2345 = vrot.lane.b32.xlu0 %v9930_v12, %s6771_s5  ;;  %1270 = vrot.lane.b32.xlu2 %v9931_v23, %s6771_s5 }
0x2646   :  { %1700 = vrot.lane.b32.xlu0 %v9932_v39, %s6771_s5 }
0x2688   :  { %v5121_v50 = vpop.permute.xlu0 %5120  ;;  %v5053_v62 = vpop.permute.xlu2 %5052 }
0x2689   :  { %5123 = vst.msk [vmem:[#allocation2] sm:$0xff] %vm1058_vm11, %v5121_v50  ;;  %v5055_v51 = vadd.f32 %v5053_v62, %v5045_v29 }
0x268b   :  { %6389 = vtanh.f32 %v5055_v51 }
0x268c   :  { %6391 = vpow2.f32 %v5850_v41 }
0x2690   :  { %v4483_v44 = vpop.permute.xlu0 %4482  ;;  %v1916_v43 = vpop.permute.xlu2 %1915  ;;  %v9462_v60 = vld [vmem:[#allocation2] sm:$0xff] }
0x2691   :  { %v6390_v5 = vpop.eup %6389  ;;  %4485 = vst.msk [vmem:[#allocation2 + $0x18] sm:$0xff] %vm1058_vm11, %v4483_v44  ;;  %5180 = vmatmul.f32.vlgmr.msrb.gmra.mxu2 %v9462_v60 }
0x2692   :  { %1919 = vst.msk [vmem:[#allocation2 + $0x78] sm:$0xff] %vm1058_vm11, %v1916_v43  ;;  %5058 = vrot.lane.b32.xlu0 %v6390_v5, %s6771_s5  ;;  %v6392_v55 = vpop.eup %6391 }
0x2693   :  { %4267 = vst.msk [vmem:[#allocation2 + $0x78] sm:$0xff] %vm345_vm2, %v9933_v48  ;;  %v5013_v3 = vadd.f32 1.0, %v6392_v55 }
0x2695   :  { %6393 = vrcp.f32 %v5013_v3  ;;  %v5040_v4 = vand.u32 2147483648, %v5013_v3  ;;  %vm5034_vm6 = vweird.f32 %v5013_v3  ;;  %v5038_v61 = vand.u32 2147483647, %v5013_v3 }
0x2697   :  { %v5041_v56 = vor.u32 1.1754944e-38, %v5040_v4  ;;  %vm5039_vm8 = vcmp.eq.f32.partialorder %v5038_v61, 8.507059e+37 }
0x2698   :  { %v3844_v58 = vpop.permute.xlu0 %3843  ;;  %v1271_v32 = vpop.permute.xlu2 %1270  ;;  %v9481_v46 = vld [vmem:[#allocation2 + $0x18] sm:$0xff] }
0x2699   :  { %3846 = vst.msk [vmem:[#allocation2 + $0x30] sm:$0xff] %vm1058_vm11, %v3844_v58  ;;  %5183 = vmatmul.f32.gmra.mxu2 %v9470_v9 }
0x269a   :  { %1274 = vst.msk [vmem:[#allocation2 + $0x90] sm:$0xff] %vm1058_vm11, %v1271_v32  ;;  %v9528_v36 = vld [vmem:[#allocation2 + $0x78] sm:$0xff] }
0x269b   :  { %4906 = vst.msk [vmem:[#allocation2 + $0x90] sm:$0xff] %vm345_vm2, %v9382_v45  ;;  %v9935_v45 = vld [vmem:[#allocation72_spill] sm:$0xff]  ;;  %v6394_v0 = vpop.eup %6393 }
0x269c   :  { %v5030_v18 = vmul.f32 %v6394_v0, %v5013_v3  ;;  %vm5035_vm5 = vweird.f32 %v6394_v0 }
0x269d   :  { %vm5036_vm7 = vmor %vm5034_vm6, %vm5035_vm5 }
0x269e   :  { %v5031_v47 = vsub.f32 1.0, %v5030_v18 }
0x26a0   :  { %v3418_v37 = vpop.permute.xlu0 %3417  ;;  %v9499_v27 = vld [vmem:[#allocation2 + $0x30] sm:$0xff]  ;;  %v5032_v6 = vmul.f32 %v6394_v0, %v5031_v47 }
0x26a1   :  { %3420 = vst.msk [vmem:[#allocation2 + $0x40] sm:$0xff] %vm1058_vm11, %v3418_v37  ;;  %5186 = vmatmul.f32.gmra.mxu2 %v9477_v1 }
0x26a2   :  { %v5033_v8 = vadd.f32 %v6394_v0, %v5032_v6  ;;  %v9541_v2 = vld [vmem:[#allocation2 + $0x90] sm:$0xff] }
0x26a4   :  { %v5037_v15 = vsel %vm5036_vm7, %v6394_v0, %v5033_v8 }
0x26a5   :  { %v5042_v52 = vsel %vm5039_vm8, %v5041_v56, %v5037_v15 }
0x26a8   :  { %v2776_v34 = vpop.permute.xlu0 %2775  ;;  %v9505_v33 = vld [vmem:[#allocation2 + $0x40] sm:$0xff] }
0x26a9   :  { %2779 = vst.msk [vmem:[#allocation2 + $0x58] sm:$0xff] %vm1058_vm11, %v2776_v34  ;;  %5189 = vmatmul.f32.gmra.mxu2 %v9481_v46 }
0x26aa   :  { %3415 = vst.msk [vmem:[#allocation2 + $0x58] sm:$0xff] %vm345_vm2, %v9934_v40 }
0x26b0   :  { %v2346_v11 = vpop.permute.xlu0 %2345 }
0x26b1   :  { %2349 = vst.msk [vmem:[#allocation2 + $0x68] sm:$0xff] %vm1058_vm11, %v2346_v11  ;;  %5192 = vmatmul.f32.gmra.mxu2 %v9487_v31  ;;  %v9515_v20 = vld [vmem:[#allocation2 + $0x58] sm:$0xff] }
0x26b2   :  { %3841 = vst.msk [vmem:[#allocation2 + $0x68] sm:$0xff] %vm345_vm2, %v9935_v45 }
0x26b8   :  { %v1701_v42 = vpop.permute.xlu0 %1700 }
0x26b9   :  { %1704 = vst.msk [vmem:[#allocation2 + $0x80] sm:$0xff] %vm1058_vm11, %v1701_v42  ;;  %5195 = vmatmul.f32.gmra.mxu2 %v9493_v22  ;;  %v9521_v25 = vld [vmem:[#allocation2 + $0x68] sm:$0xff] }
0x26ba   :  { %4480 = vst.msk [vmem:[#allocation2 + $0x80] sm:$0xff] %vm345_vm2, %v9280_v63  ;;  %v9512_v63 = vld [vmem:[#allocation2 + $0x50] sm:$0xff] }
0x26c1   :  { %5198 = vmatmul.f32.gmra.mxu2 %v9499_v27  ;;  %v9531_v10 = vld [vmem:[#allocation2 + $0x80] sm:$0xff] }
0x26c9   :  { %5201 = vmatmul.f32.gmra.mxu2 %v9502_v21 }
0x26d1   :  { %5204 = vmatmul.f32.gmra.mxu2 %v9505_v33 }
0x26d9   :  { %5207 = vmatmul.f32.gmra.mxu2 %v9509_v13 }
0x26e1   :  { %5210 = vmatmul.f32.gmra.mxu2 %v9512_v63 }
0x26e9   :  { %5213 = vmatmul.f32.gmra.mxu2 %v9515_v20 }
0x26f1   :  { %5216 = vmatmul.f32.gmra.mxu2 %v9518_v24 }
0x26f9   :  { %5219 = vmatmul.f32.gmra.mxu2 %v9521_v25 }
0x2701   :  { %5222 = vmatmul.f32.gmra.mxu2 %v9524_v53 }
0x2704   :  { %v5059_v7 = vpop.permute.xlu0 %5058 }
0x2705   :  { %v5061_v28 = vmul.f32 %v5059_v7, %v5042_v52 }
0x2707   :  { %5118 = vst.msk [vmem:[#allocation2 + $0x98] sm:$0xff] %vm345_vm2, %v5061_v28 }
0x2709   :  { %5225 = vmatmul.f32.gmra.mxu2 %v9528_v36 }
0x270e   :  { %v9548_v12 = vld [vmem:[#allocation2 + $0x98] sm:$0xff] }
0x2711   :  { %5228 = vmatmul.f32.gmra.mxu2 %v9531_v10 }
0x2714   :  { %v5181_v49 = vpop.f32.mrf.mxu2 }
0x2715   :  { %v5182_v54 = vadd.f32 %v9534_v19, %v5181_v49 }
0x2717   :  { %5241 = vmax.xlane.f32.xlu2 %v5182_v54 }
0x2719   :  { %5231 = vmatmul.f32.gmra.mxu2 %v9537_v17 }
0x271c   :  { %v5184_v14 = vpop.f32.mrf.mxu2 }
0x271d   :  { %v5185_v16 = vadd.f32 %v9534_v19, %v5184_v14 }
0x271f   :  { %5243 = vmax.xlane.f32.xlu0 %v5185_v16 }
0x2721   :  { %5234 = vmatmul.f32.gmra.mxu2 %v9541_v2 }
0x2724   :  { %v5187_v26 = vpop.f32.mrf.mxu2 }
0x2725   :  { %v9545_v38 = vadd.f32 %v9534_v19, %v5187_v26 }
0x2727   :  { %5245 = vmax.xlane.f32.xlu1 %v9545_v38 }
0x2729   :  { %5237 = vmatmul.f32.gmra.mxu2 %v9548_v12 }
0x272c   :  { %v5190_v23 = vpop.f32.mrf.mxu2 }
0x272d   :  { %v5191_v39 = vadd.f32 %v9534_v19, %v5190_v23 }
0x272f   :  { %5247 = vmax.xlane.f32.xlu2 %v5191_v39 }
0x2734   :  { %v5193_v35 = vpop.f32.mrf.mxu2 }
0x2735   :  { %v9553_v30 = vadd.f32 %v9534_v19, %v5193_v35 }
0x2737   :  { %5249 = vmax.xlane.f32.xlu2 %v9553_v30 }
0x273c   :  { %v5196_v57 = vpop.f32.mrf.mxu2 }
0x273d   :  { %v9557_v59 = vadd.f32 %v9534_v19, %v5196_v57 }
0x273f   :  { %5251 = vmax.xlane.f32.xlu0 %v9557_v59 }
0x2744   :  { %v5199_v29 = vpop.f32.mrf.mxu2 }
0x2745   :  { %v9561_v50 = vadd.f32 %v9534_v19, %v5199_v29 }
0x2747   :  { %5253 = vmax.xlane.f32.xlu1 %v9561_v50 }
0x274c   :  { %v5202_v62 = vpop.f32.mrf.mxu2 }
0x274d   :  { %v9565_v51 = vadd.f32 %v9534_v19, %v5202_v62 }
0x274f   :  { %5255 = vmax.xlane.f32.xlu2 %v9565_v51 }
0x2754   :  { %v5205_v44 = vpop.f32.mrf.mxu2 }
0x2755   :  { %v9569_v43 = vadd.f32 %v9534_v19, %v5205_v44 }
0x2757   :  { %5257 = vmax.xlane.f32.xlu0 %v9569_v43 }
0x275c   :  { %v5208_v5 = vpop.f32.mrf.mxu2 }
0x275d   :  { %v9573_v48 = vadd.f32 %v9534_v19, %v5208_v5 }
0x275f   :  { %5259 = vmax.xlane.f32.xlu1 %v9573_v48 }
0x2764   :  { %v5211_v58 = vpop.f32.mrf.mxu2 }
0x2765   :  { %v9577_v32 = vadd.f32 %v9534_v19, %v5211_v58 }
0x2767   :  { %5261 = vmax.xlane.f32.xlu2 %v9577_v32 }
0x276c   :  { %v5214_v37 = vpop.f32.mrf.mxu2 }
0x276d   :  { %v9581_v34 = vadd.f32 %v9534_v19, %v5214_v37 }
0x276f   :  { %5263 = vmax.xlane.f32.xlu0 %v9581_v34 }
0x2774   :  { %v5217_v40 = vpop.f32.mrf.mxu2 }
0x2775   :  { %v9585_v11 = vadd.f32 %v9534_v19, %v5217_v40 }
0x2777   :  { %5265 = vmax.xlane.f32.xlu1 %v9585_v11 }
0x277c   :  { %v5220_v45 = vpop.f32.mrf.mxu2 }
0x277d   :  { %v9589_v42 = vadd.f32 %v9534_v19, %v5220_v45 }
0x277f   :  { %5267 = vmax.xlane.f32.xlu2 %v9589_v42 }
0x2784   :  { %v5223_v41 = vpop.f32.mrf.mxu2 }
0x2785   :  { %v9593_v55 = vadd.f32 %v9534_v19, %v5223_v41 }
0x2787   :  { %5269 = vmax.xlane.f32.xlu0 %v9593_v55 }
0x278a   :  { %v5242_v47 = vpop.xlane.xlu2 %5241 }
0x278b   :  { %v5281_v8 = vsub.f32 %v5182_v54, %v5242_v47 }
0x278c   :  { %v5226_v3 = vpop.f32.mrf.mxu2 }
0x278d   :  { %v9597_v0 = vadd.f32 %v9534_v19, %v5226_v3  ;;  %v5301_v4 = vmul.f32 1.442695, %v5281_v8 }
0x278f   :  { %5271 = vmax.xlane.f32.xlu1 %v9597_v0  ;;  %6395 = vpow2.f32 %v5301_v4 }
0x2792   :  { %v5244_v15 = vpop.xlane.xlu0 %5243 }
0x2793   :  { %v5282_v52 = vsub.f32 %v5185_v16, %v5244_v15 }
0x2794   :  { %v5229_v18 = vpop.f32.mrf.mxu2 }
0x2795   :  { %v9601_v6 = vadd.f32 %v9534_v19, %v5229_v18  ;;  %v5303_v49 = vmul.f32 1.442695, %v5282_v52  ;;  %v9611_v54 = vpop.eup %6395 }
0x2797   :  { %5273 = vmax.xlane.f32.xlu2 %v9601_v6 }
0x279a   :  { %v5246_v26 = vpop.xlane.xlu1 %5245 }
0x279b   :  { %v5283_v57 = vsub.f32 %v9545_v38, %v5246_v26 }
0x279c   :  { %v5232_v61 = vpop.f32.mrf.mxu2 }
0x279d   :  { %v9605_v56 = vadd.f32 %v9534_v19, %v5232_v61  ;;  %v5305_v29 = vmul.f32 1.442695, %v5283_v57 }
0x279f   :  { %5275 = vmax.xlane.f32.xlu0 %v9605_v56 }
0x27a2   :  { %v5248_v7 = vpop.xlane.xlu2 %5247 }
0x27a3   :  { %v5284_v28 = vsub.f32 %v5191_v39, %v5248_v7 }
0x27a4   :  { %v5235_v14 = vpop.f32.mrf.mxu2 }
0x27a5   :  { %v5307_v23 = vmul.f32 1.442695, %v5284_v28  ;;  %v9609_v35 = vadd.f32 %v9534_v19, %v5235_v14 }
0x27a7   :  { %6397 = vpow2.f32 %v5307_v23  ;;  %5277 = vmax.xlane.f32.xlu1 %v9609_v35  ;;  %5341 = vadd.xlane.f32.xlu0 %v9611_v54 }
0x27a8   :  { %6399 = vpow2.f32 %v5303_v49 }
0x27aa   :  { %v5250_v16 = vpop.xlane.xlu2 %5249 }
0x27ab   :  { %v5285_v39 = vsub.f32 %v9553_v30, %v5250_v16 }
0x27ac   :  { %v5238_v62 = vpop.f32.mrf.mxu2 }
0x27ad   :  { %v9617_v44 = vpop.eup %6397  ;;  %v5309_v5 = vmul.f32 1.442695, %v5285_v39  ;;  %v9620_v58 = vadd.f32 %v9534_v19, %v5238_v62 }
0x27ae   :  { %v9622_v37 = vpop.eup %6399 }
0x27af   :  { %6401 = vpow2.f32 %v5309_v5  ;;  %5279 = vmax.xlane.f32.xlu2 %v9620_v58  ;;  %5343 = vadd.xlane.f32.xlu1 %v9622_v37 }
0x27b0   :  { %6403 = vpow2.f32 %v5305_v29  ;;  %5347 = vadd.xlane.f32.xlu0 %v9617_v44 }
0x27b2   :  { %v5252_v38 = vpop.xlane.xlu0 %5251 }
0x27b3   :  { %v5286_v30 = vsub.f32 %v9557_v59, %v5252_v38 }
0x27b5   :  { %v9628_v40 = vpop.eup %6401  ;;  %v5311_v45 = vmul.f32 1.442695, %v5286_v30 }
0x27b6   :  { %v9630_v41 = vpop.eup %6403 }
0x27b7   :  { %6405 = vpow2.f32 %v5311_v45  ;;  %5345 = vadd.xlane.f32.xlu2 %v9630_v41  ;;  %5349 = vadd.xlane.f32.xlu1 %v9628_v40 }
0x27ba   :  { %v5254_v19 = vpop.xlane.xlu1 %5253 }
0x27bb   :  { %v5287_v3 = vsub.f32 %v9561_v50, %v5254_v19 }
0x27bd   :  { %v9635_v18 = vpop.eup %6405  ;;  %v5313_v47 = vmul.f32 1.442695, %v5287_v3 }
0x27bf   :  { %6407 = vpow2.f32 %v5313_v47  ;;  %5351 = vadd.xlane.f32.xlu2 %v9635_v18 }
0x27c2   :  { %v5256_v59 = vpop.xlane.xlu2 %5255 }
0x27c3   :  { %v5288_v8 = vsub.f32 %v9565_v51, %v5256_v59 }
0x27c5   :  { %v9639_v4 = vpop.eup %6407  ;;  %v5315_v61 = vmul.f32 1.442695, %v5288_v8 }
0x27c6   :  { %5353 = vadd.xlane.f32.xlu0 %v9639_v4 }
0x27c7   :  { %6409 = vpow2.f32 %v5315_v61 }
0x27ca   :  { %v5258_v15 = vpop.xlane.xlu0 %5257 }
0x27cb   :  { %v5289_v52 = vsub.f32 %v9569_v43, %v5258_v15 }
0x27cd   :  { %v9643_v7 = vpop.eup %6409  ;;  %v5317_v50 = vmul.f32 1.442695, %v5289_v52 }
0x27ce   :  { %5355 = vadd.xlane.f32.xlu1 %v9643_v7 }
0x27cf   :  { %6411 = vpow2.f32 %v5317_v50 }
0x27d2   :  { %v5260_v28 = vpop.xlane.xlu1 %5259 }
0x27d3   :  { %v5290_v49 = vsub.f32 %v9573_v48, %v5260_v28 }
0x27d5   :  { %v9647_v14 = vpop.eup %6411  ;;  %v5319_v51 = vmul.f32 1.442695, %v5290_v49 }
0x27d6   :  { %5357 = vadd.xlane.f32.xlu2 %v9647_v14 }
0x27d7   :  { %6413 = vpow2.f32 %v5319_v51 }
0x27da   :  { %v5262_v26 = vpop.xlane.xlu2 %5261 }
0x27db   :  { %v5291_v23 = vsub.f32 %v9577_v32, %v5262_v26 }
0x27dd   :  { %v9651_v57 = vpop.eup %6413  ;;  %v5321_v43 = vmul.f32 1.442695, %v5291_v23 }
0x27de   :  { %5359 = vadd.xlane.f32.xlu0 %v9651_v57 }
0x27df   :  { %6415 = vpow2.f32 %v5321_v43 }
0x27e2   :  { %v5264_v16 = vpop.xlane.xlu0 %5263 }
0x27e3   :  { %v5292_v39 = vsub.f32 %v9581_v34, %v5264_v16 }
0x27e5   :  { %v9655_v29 = vpop.eup %6415  ;;  %v5323_v48 = vmul.f32 1.442695, %v5292_v39 }
0x27e6   :  { %5361 = vadd.xlane.f32.xlu1 %v9655_v29 }
0x27e7   :  { %6417 = vpow2.f32 %v5323_v48 }
0x27ea   :  { %v5266_v62 = vpop.xlane.xlu1 %5265 }
0x27eb   :  { %v5293_v5 = vsub.f32 %v9585_v11, %v5266_v62 }
0x27ed   :  { %v9659_v38 = vpop.eup %6417  ;;  %v5325_v32 = vmul.f32 1.442695, %v5293_v5 }
0x27ee   :  { %5363 = vadd.xlane.f32.xlu2 %v9659_v38 }
0x27ef   :  { %6419 = vpow2.f32 %v5325_v32 }
0x27f2   :  { %v5268_v30 = vpop.xlane.xlu2 %5267 }
0x27f3   :  { %v5294_v45 = vsub.f32 %v9589_v42, %v5268_v30 }
0x27f5   :  { %v9663_v19 = vpop.eup %6419  ;;  %v5327_v34 = vmul.f32 1.442695, %v5294_v45 }
0x27f6   :  { %5365 = vadd.xlane.f32.xlu0 %v9663_v19 }
0x27f7   :  { %6421 = vpow2.f32 %v5327_v34 }
0x27fa   :  { %v5270_v3 = vpop.xlane.xlu0 %5269 }
0x27fb   :  { %v5295_v47 = vsub.f32 %v9593_v55, %v5270_v3 }
0x27fd   :  { %v9667_v59 = vpop.eup %6421  ;;  %v5329_v11 = vmul.f32 1.442695, %v5295_v47 }
0x27fe   :  { %5367 = vadd.xlane.f32.xlu1 %v9667_v59 }
0x27ff   :  { %6423 = vpow2.f32 %v5329_v11 }
0x2802   :  { %v5272_v8 = vpop.xlane.xlu1 %5271 }
0x2803   :  { %v5296_v61 = vsub.f32 %v9597_v0, %v5272_v8 }
0x2805   :  { %v9671_v15 = vpop.eup %6423  ;;  %v5331_v42 = vmul.f32 1.442695, %v5296_v61 }
0x2806   :  { %5369 = vadd.xlane.f32.xlu2 %v9671_v15 }
0x2807   :  { %6425 = vpow2.f32 %v5331_v42 }
0x280a   :  { %v5274_v52 = vpop.xlane.xlu2 %5273 }
0x280b   :  { %v5297_v50 = vsub.f32 %v9601_v6, %v5274_v52 }
0x280d   :  { %v9675_v28 = vpop.eup %6425  ;;  %v5333_v55 = vmul.f32 1.442695, %v5297_v50 }
0x280e   :  { %5371 = vadd.xlane.f32.xlu0 %v9675_v28 }
0x280f   :  { %6427 = vpow2.f32 %v5333_v55 }
0x2812   :  { %v5276_v49 = vpop.xlane.xlu0 %5275 }
0x2813   :  { %v5298_v51 = vsub.f32 %v9605_v56, %v5276_v49  ;;  %v5895_v49 = vld [vmem:[#allocation14 + $0x1] ss:$0 sm:$0xff] }
0x2815   :  { %v9679_v26 = vpop.eup %6427  ;;  %v5335_v0 = vmul.f32 1.442695, %v5298_v51 }
0x2816   :  { %5373 = vadd.xlane.f32.xlu1 %v9679_v26 }
0x2817   :  { %6429 = vpow2.f32 %v5335_v0 }
0x281a   :  { %v5278_v23 = vpop.xlane.xlu1 %5277 }
0x281b   :  { %v5299_v43 = vsub.f32 %v9609_v35, %v5278_v23  ;;  %v5342_v35 = vpop.xlane.xlu0 %5341 }
0x281d   :  { %v9683_v16 = vpop.eup %6429  ;;  %v5337_v6 = vmul.f32 1.442695, %v5299_v43  ;;  %v5894_v43 = vld [vmem:[#allocation14] ss:$0 sm:$0xff] }
0x281e   :  { %5375 = vadd.xlane.f32.xlu2 %v9683_v16 }
0x281f   :  { %6431 = vpow2.f32 %v5337_v6 }
0x2822   :  { %v5280_v39 = vpop.xlane.xlu2 %5279  ;;  %v5344_v32 = vpop.xlane.xlu1 %5343 }
0x2823   :  { %v5300_v48 = vsub.f32 %v9620_v58, %v5280_v39  ;;  %v5348_v45 = vpop.xlane.xlu0 %5347  ;;  %v5898_v39 = vld [vmem:[#allocation14 + $0x2] ss:$0 sm:$0xff] }
0x2825   :  { %v9687_v62 = vpop.eup %6431  ;;  %v5339_v56 = vmul.f32 1.442695, %v5300_v48 }
0x2826   :  { %5377 = vadd.xlane.f32.xlu0 %v9687_v62 }
0x2827   :  { %6433 = vpow2.f32 %v5339_v56 }
0x2828   :  { %6435 = vrcp.f32 %v5344_v32 }
0x2829   :  { %6437 = vrcp.f32 %v5342_v35 }
0x282a   :  { %v5346_v30 = vpop.xlane.xlu2 %5345  ;;  %v5350_v34 = vpop.xlane.xlu1 %5349 }
0x282b   :  { %6439 = vrcp.f32 %v5346_v30 }
0x282c   :  { %6441 = vrcp.f32 %v5348_v45 }
0x282d   :  { %v9690_v5 = vpop.eup %6433  ;;  %6443 = vrcp.f32 %v5350_v34 }
0x282e   :  { %5379 = vadd.xlane.f32.xlu1 %v9690_v5  ;;  %v6436_v47 = vpop.eup %6435 }
0x282f   :  { %v6438_v11 = vpop.eup %6437  ;;  %v5402_v42 = vmul.f32 %v6436_v47, %v9622_v37 }
0x2830   :  { %v5401_v50 = vmul.f32 %v6438_v11, %v9611_v54 }
0x2831   :  { %v6440_v61 = vpop.eup %6439  ;;  %v5422_v51 = vmul.f32 %v5402_v42, %v9470_v9 }
0x2832   :  { %v5352_v3 = vpop.xlane.xlu2 %5351  ;;  %v5403_v55 = vmul.f32 %v6440_v61, %v9630_v41  ;;  %v6442_v23 = vpop.eup %6441  ;;  %v5421_v6 = vmul.f32 %v5401_v50, %v9462_v60  ;;  %v5897_v50 = vld [vmem:[#allocation14 + $0x4] ss:$0 sm:$0xff] }
0x2833   :  { %6445 = vrcp.f32 %v5352_v3  ;;  %v6444_v56 = vpop.eup %6443  ;;  %v5522_v54 = vmul.f32 %v5895_v49, %v5422_v51  ;;  %v5404_v35 = vmul.f32 %v6442_v23, %v9617_v44  ;;  %v5896_v3 = vld [vmem:[#allocation14 + $0x3] ss:$0 sm:$0xff]  ;;  %v5899_v49 = vld [vmem:[#allocation14 + $0x5] ss:$0 sm:$0xff]  ;;  %v5900_v23 = vld [vmem:[#allocation14 + $0x6] ss:$0 sm:$0xff] }
0x2834   :  { %v5423_v48 = vmul.f32 %v5403_v55, %v9477_v1  ;;  %v5521_v30 = vmul.f32 %v5894_v43, %v5421_v6 }
0x2835   :  { %v5424_v60 = vmul.f32 %v5404_v35, %v9481_v46 }
0x2836   :  { %v5523_v9 = vmul.f32 %v5898_v39, %v5423_v48  ;;  %v5541_v34 = vadd.f32 %v5522_v54, %v5521_v30 }
0x2839   :  { %v5354_v58 = vpop.xlane.xlu0 %5353  ;;  %v6446_v32 = vpop.eup %6445 }
0x283a   :  { %6447 = vrcp.f32 %v5354_v58  ;;  %v5405_v58 = vmul.f32 %v6444_v56, %v9628_v40  ;;  %v5406_v1 = vmul.f32 %v6446_v32, %v9635_v18 }
0x283c   :  { %v5425_v55 = vmul.f32 %v5405_v58, %v9487_v31  ;;  %v5426_v46 = vmul.f32 %v5406_v1, %v9493_v22 }
0x283e   :  { %v5525_v39 = vmul.f32 %v5897_v50, %v5425_v55  ;;  %v5526_v48 = vmul.f32 %v5899_v49, %v5426_v46  ;;  %v5906_v55 = vld [vmem:[#allocation14 + $0xc] ss:$0 sm:$0xff] }
0x2840   :  { %v6448_v45 = vpop.eup %6447 }
0x2841   :  { %v5356_v8 = vpop.xlane.xlu1 %5355  ;;  %v5407_v44 = vmul.f32 %v6448_v45, %v9639_v4 }
0x2842   :  { %6449 = vrcp.f32 %v5356_v8  ;;  %v5542_v8 = vadd.f32 %v5541_v34, %v5523_v9  ;;  %v5903_v34 = vld [vmem:[#allocation14 + $0x9] ss:$0 sm:$0xff] }
0x2843   :  { %v5427_v43 = vmul.f32 %v5407_v44, %v9499_v27 }
0x2845   :  { %v5527_v35 = vmul.f32 %v5900_v23, %v5427_v43 }
0x2848   :  { %v6450_v11 = vpop.eup %6449 }
0x2849   :  { %v5358_v52 = vpop.xlane.xlu2 %5357  ;;  %v5408_v40 = vmul.f32 %v6450_v11, %v9643_v7 }
0x284a   :  { %6451 = vrcp.f32 %v5358_v52  ;;  %v5524_v52 = vmul.f32 %v5896_v3, %v5424_v60 }
0x284b   :  { %v5428_v31 = vmul.f32 %v5408_v40, %v9502_v21 }
0x2850   :  { %v6452_v42 = vpop.eup %6451 }
0x2851   :  { %v5360_v0 = vpop.xlane.xlu0 %5359  ;;  %v5409_v4 = vmul.f32 %v6452_v42, %v9647_v14 }
0x2852   :  { %6453 = vrcp.f32 %v5360_v0  ;;  %v5543_v0 = vadd.f32 %v5542_v8, %v5524_v52 }
0x2853   :  { %v5429_v32 = vmul.f32 %v5409_v4, %v9505_v33  ;;  %v5908_v4 = vld [vmem:[#allocation14 + $0xe] ss:$0 sm:$0xff] }
0x2854   :  { %v5544_v54 = vadd.f32 %v5543_v0, %v5525_v39 }
0x2856   :  { %v5545_v9 = vadd.f32 %v5544_v54, %v5526_v48  ;;  %v5909_v48 = vld [vmem:[#allocation14 + $0xf] ss:$0 sm:$0xff] }
0x2858   :  { %v6454_v18 = vpop.eup %6453  ;;  %v5546_v58 = vadd.f32 %v5545_v9, %v5527_v35 }
0x2859   :  { %v5362_v37 = vpop.xlane.xlu1 %5361  ;;  %v5410_v22 = vmul.f32 %v6454_v18, %v9651_v57  ;;  %v5907_v18 = vld [vmem:[#allocation14 + $0xd] ss:$0 sm:$0xff] }
0x285a   :  { %6455 = vrcp.f32 %v5362_v37  ;;  %v5901_v37 = vld [vmem:[#allocation14 + $0x7] ss:$0 sm:$0xff] }
0x285b   :  { %v5528_v45 = vmul.f32 %v5901_v37, %v5428_v31  ;;  %v5430_v21 = vmul.f32 %v5410_v22, %v9509_v13 }
0x285d   :  { %v5547_v8 = vadd.f32 %v5546_v58, %v5528_v45  ;;  %v5530_v44 = vmul.f32 %v5903_v34, %v5430_v21 }
0x2860   :  { %v6456_v6 = vpop.eup %6455 }
0x2861   :  { %v5364_v41 = vpop.xlane.xlu2 %5363  ;;  %v5411_v27 = vmul.f32 %v6456_v6, %v9655_v29 }
0x2862   :  { %6457 = vrcp.f32 %v5364_v41  ;;  %v5902_v41 = vld [vmem:[#allocation14 + $0x8] ss:$0 sm:$0xff] }
0x2863   :  { %v5529_v1 = vmul.f32 %v5902_v41, %v5429_v32  ;;  %v5431_v33 = vmul.f32 %v5411_v27, %v9512_v63  ;;  %v5911_v32 = vld [vmem:[#allocation14 + $0x11] ss:$0 sm:$0xff] }
0x2865   :  { %v5548_v52 = vadd.f32 %v5547_v8, %v5529_v1  ;;  %v5914_v1 = vld [vmem:[#allocation5] ss:$0 sm:$0xff] }
0x2868   :  { %v6458_v7 = vpop.eup %6457 }
0x2869   :  { %v5366_v47 = vpop.xlane.xlu0 %5365  ;;  %v5412_v57 = vmul.f32 %v6458_v7, %v9659_v38  ;;  %v5910_v7 = vld [vmem:[#allocation14 + $0x10] ss:$0 sm:$0xff] }
0x286a   :  { %6459 = vrcp.f32 %v5366_v47  ;;  %v5904_v47 = vld [vmem:[#allocation14 + $0xa] ss:$0 sm:$0xff] }
0x286b   :  { %v5432_v42 = vmul.f32 %v5412_v57, %v9515_v20  ;;  %v5531_v50 = vmul.f32 %v5904_v47, %v5431_v33 }
0x2870   :  { %v6460_v30 = vpop.eup %6459 }
0x2871   :  { %v5368_v61 = vpop.xlane.xlu1 %5367  ;;  %v5413_v29 = vmul.f32 %v6460_v30, %v9663_v19  ;;  %v5549_v19 = vadd.f32 %v5548_v52, %v5530_v44 }
0x2872   :  { %6461 = vrcp.f32 %v5368_v61  ;;  %v5905_v61 = vld [vmem:[#allocation14 + $0xb] ss:$0 sm:$0xff] }
0x2873   :  { %v5433_v49 = vmul.f32 %v5413_v29, %v9518_v24 }
0x2875   :  { %v5533_v43 = vmul.f32 %v5906_v55, %v5433_v49 }
0x2878   :  { %v6462_v60 = vpop.eup %6461 }
0x2879   :  { %v5370_v51 = vpop.xlane.xlu2 %5369  ;;  %v5414_v13 = vmul.f32 %v6462_v60, %v9667_v59  ;;  %v5550_v59 = vadd.f32 %v5549_v19, %v5531_v50 }
0x287a   :  { %6463 = vrcp.f32 %v5370_v51  ;;  %v5532_v51 = vmul.f32 %v5905_v61, %v5432_v42 }
0x287b   :  { %v5434_v0 = vmul.f32 %v5414_v13, %v9521_v25 }
0x287c   :  { %v5551_v39 = vadd.f32 %v5550_v59, %v5532_v51 }
0x2880   :  { %v6464_v11 = vpop.eup %6463 }
0x2881   :  { %v5372_v56 = vpop.xlane.xlu0 %5371  ;;  %v5415_v46 = vmul.f32 %v6464_v11, %v9671_v15  ;;  %v5534_v15 = vmul.f32 %v5907_v18, %v5434_v0 }
0x2882   :  { %6465 = vrcp.f32 %v5372_v56  ;;  %v5552_v56 = vadd.f32 %v5551_v39, %v5533_v43 }
0x2883   :  { %v5435_v6 = vmul.f32 %v5415_v46, %v9524_v53 }
0x2884   :  { %v5553_v53 = vadd.f32 %v5552_v56, %v5534_v15 }
0x2885   :  { %v5535_v25 = vmul.f32 %v5908_v4, %v5435_v6 }
0x2887   :  { %v5554_v27 = vadd.f32 %v5553_v53, %v5535_v25 }
0x2888   :  { %v6466_v38 = vpop.eup %6465 }
0x2889   :  { %v5374_v14 = vpop.xlane.xlu1 %5373  ;;  %v5416_v20 = vmul.f32 %v6466_v38, %v9675_v28 }
0x288a   :  { %6467 = vrcp.f32 %v5374_v14 }
0x288b   :  { %v5436_v37 = vmul.f32 %v5416_v20, %v9528_v36 }
0x288d   :  { %v5536_v41 = vmul.f32 %v5909_v48, %v5436_v37 }
0x288f   :  { %v5555_v9 = vadd.f32 %v5554_v27, %v5536_v41 }
0x2890   :  { %v6468_v40 = vpop.eup %6467 }
0x2891   :  { %v5376_v3 = vpop.xlane.xlu2 %5375  ;;  %v5417_v24 = vmul.f32 %v6468_v40, %v9679_v26 }
0x2892   :  { %6469 = vrcp.f32 %v5376_v3 }
0x2893   :  { %v5437_v28 = vmul.f32 %v5417_v24, %v9531_v10  ;;  %v5913_v10 = vld [vmem:[#allocation14 + $0x13] ss:$0 sm:$0xff] }
0x2895   :  { %v5537_v14 = vmul.f32 %v5910_v7, %v5437_v28 }
0x2898   :  { %v6470_v23 = vpop.eup %6469 }
0x2899   :  { %v5378_v63 = vpop.xlane.xlu0 %5377  ;;  %v5418_v31 = vmul.f32 %v6470_v23, %v9683_v16  ;;  %v5912_v16 = vld [vmem:[#allocation14 + $0x12] ss:$0 sm:$0xff] }
0x289a   :  { %6471 = vrcp.f32 %v5378_v63 }
0x289b   :  { %v5438_v26 = vmul.f32 %v5418_v31, %v9537_v17 }
0x289d   :  { %v5538_v30 = vmul.f32 %v5911_v32, %v5438_v26 }
0x28a0   :  { %v6472_v22 = vpop.eup %6471 }
0x28a1   :  { %v5419_v54 = vmul.f32 %v6472_v22, %v9687_v62  ;;  %v5380_v35 = vpop.xlane.xlu1 %5379  ;;  %v5556_v62 = vadd.f32 %v5555_v9, %v5537_v14 }
0x28a2   :  { %6473 = vrcp.f32 %v5380_v35 }
0x28a3   :  { %v5439_v36 = vmul.f32 %v5419_v54, %v9541_v2  ;;  %v5557_v3 = vadd.f32 %v5556_v62, %v5538_v30 }
0x28a5   :  { %v5539_v21 = vmul.f32 %v5912_v16, %v5439_v36 }
0x28a7   :  { %v5558_v58 = vadd.f32 %v5557_v3, %v5539_v21 }
0x28a8   :  { %v6474_v45 = vpop.eup %6473 }
0x28a9   :  { %v5420_v34 = vmul.f32 %v6474_v45, %v9690_v5 }
0x28ab   :  { %v5440_v57 = vmul.f32 %v5420_v34, %v9548_v12 }
0x28ad   :  { %v5540_v60 = vmul.f32 %v5913_v10, %v5440_v57 }
0x28af   :  { %v5559_v17 = vadd.f32 %v5558_v58, %v5540_v60 }
0x28b1   :  { %5560 = vadd.xlane.f32.xlu2 %v5559_v17 }
0x2924   :  { %v5561_v47 = vpop.xlane.xlu2 %5560 }
0x2925   :  { %v5566_v33 = vadd.f32 %v5914_v1, %v5561_v47 }
0x2927   :  { %v5853_v2 = vmul.f32 -1.442695, %v5566_v33 }
0x2929   :  { %6475 = vpow2.f32 %v5853_v2 }
0x292f   :  { %v6476_v29 = vpop.eup %6475 }
0x2930   :  { %v5570_v11 = vadd.f32 1.0, %v6476_v29 }
0x2932   :  { %6477 = vrcp.f32 %v5570_v11  ;;  %v5582_v61 = vand.u32 2147483648, %v5570_v11  ;;  %v5580_v12 = vand.u32 2147483647, %v5570_v11  ;;  %vm5576_vm9 = vweird.f32 %v5570_v11 }
0x2934   :  { %v5583_v38 = vor.u32 1.1754944e-38, %v5582_v61  ;;  %vm5581_vm12 = vcmp.eq.f32.partialorder %v5580_v12, 8.507059e+37 }
0x2938   :  { %v6478_v8 = vpop.eup %6477 }
0x2939   :  { %v5572_v5 = vmul.f32 %v6478_v8, %v5570_v11  ;;  %vm5577_vm2 = vweird.f32 %v6478_v8 }
0x293a   :  { %vm5578_vm11 = vmor %vm5576_vm9, %vm5577_vm2 }
0x293b   :  { %v5573_v44 = vsub.f32 1.0, %v5572_v5 }
0x293d   :  { %v5574_v42 = vmul.f32 %v6478_v8, %v5573_v44 }
0x293f   :  { %v5575_v13 = vadd.f32 %v6478_v8, %v5574_v42 }
0x2941   :  { %v5579_v52 = vsel %vm5578_vm11, %v6478_v8, %v5575_v13 }
0x2942   :  { %v5584_v50 = vsel %vm5581_vm12, %v5583_v38, %v5579_v52 }
0x2943   :  { %5587 = vst.msk [vmem:[%s9749_s13] sm:$0xff] %vm5586_vm10, %v5584_v50 }
0x2944   :  { %5592 = vsyncpa [#allocation7], 1 }
0x2945   :  { %5593 = vsyncpa [#allocation9], 1 }
0x2946   :  { %5594 = vsyncpa [#allocation12], 1 }
0x2947   :  { %5595 = vsyncpa [#allocation15], 1 }

</bundles_post_ra>
